<compile_context>
chip_gen: v7x
topology: tpu7x:2x2x1
jax: 0.10.0
libtpu: 0.0.40
codegen_flags: <defaults>
</compile_context>

<pallas_src>
import jax
import jax.numpy as jnp
from jax.experimental import pallas as pl
from jax.experimental.pallas import tpu as pltpu

EPS = 1e-5
LANE = 128


def _round_up(x, m):
    return (x + m - 1) // m * m


def _make_encoder_block_kernel(N, H, W, CP, compute_dtype):
    M = N * H * W                 # rows of the conv matmuls, order (n, h, w)
    inv_m = 1.0 / float(M)

    def _im2col(xp):
        """xp: (N, H+2, W+2, CP) value -> (M, 9*CP) patch matrix.

        kh is a leading-dim slice (free), kw is a small sublane-offset slice,
        CP = 128 keeps every lane access tile-aligned and full width, so the
        9-way concat is plain lane-tile placement (no lane relayout) and the
        (N,H,W,CP)->(M,CP) reshape is layout-preserving (W % 8 == 0).
        """
        taps = []
        for kh in range(3):
            for kw in range(3):
                taps.append(xp[:, kh:kh + H, kw:kw + W, :].reshape(M, CP))
        return jnp.concatenate(taps, axis=-1)             # (M, 9*CP)

    def _bn(acc, g, b):
        """Train-mode BN, two-pass (mean-centred) stats on the lane-dense f32 acc."""
        mean = jnp.sum(acc, axis=0, keepdims=True) * inv_m          # (1, CP)
        d = acc - mean
        var = jnp.sum(d * d, axis=0, keepdims=True) * inv_m         # (1, CP)
        a = g * jax.lax.rsqrt(var + EPS)                             # EUP
        return d * a + b

    def kernel(xp_ref, w1_ref, g1_ref, b1_ref, w2_ref, g2_ref, b2_ref, id_ref,
               out_ref, h1pad_ref):
        # ---- conv1: single im2col matmul, K = 9*CP, f32 accumulation ----
        col1 = _im2col(xp_ref[...])                        # already compute_dtype
        acc1 = jnp.dot(col1, w1_ref[...], preferred_element_type=jnp.float32)

        # ---- bn1 + relu (fused) ----
        h1 = jnp.maximum(_bn(acc1, g1_ref[...], b1_ref[...]), 0.0)

        # ---- padded hidden (1-element halo) in compute dtype (bf16 default) ----
        h1pad_ref[...] = jnp.zeros((N, H + 2, W + 2, CP), compute_dtype)
        h1pad_ref[:, 1:1 + H, 1:1 + W, :] = (
            h1.astype(compute_dtype).reshape(N, H, W, CP))

        # ---- conv2: single im2col matmul ----
        col2 = _im2col(h1pad_ref[...])
        acc2 = jnp.dot(col2, w2_ref[...], preferred_element_type=jnp.float32)

        # ---- bn2 + residual add (exact f32) + relu; lane-dense full-width store ----
        h2 = _bn(acc2, g2_ref[...], b2_ref[...])
        out_ref[...] = jnp.maximum(h2 + id_ref[...], 0.0)

    return kernel


def encoder_block_pallas(x_nchw, w1_hwio, g1, b1, w2_hwio, g2, b2,
                         compute_dtype=jnp.bfloat16):
    """x_nchw: (N, C, H, W) f32; w*_hwio: (3, 3, Cin, Cout) f32; g*, b*: (C,) f32."""
    N, Cin, H, W = x_nchw.shape
    C = w1_hwio.shape[-1]
    assert Cin == C, "identity add requires inplanes == planes (downsample=None)"
    # TODO(synk): stride>1 / downsample branch of the general EncoderBlock is not implemented.

    CP = _round_up(C, LANE)       # channel dim padded to the 128-lane tile
    M = N * H * W

    # ---- JAX glue: layout transpose + halo/channel pad + lane-dense views ----
    x_nhwc = jnp.transpose(x_nchw, (0, 2, 3, 1)).astype(jnp.float32)
    xpad = jnp.pad(x_nhwc, ((0, 0), (1, 1), (1, 1), (0, CP - Cin)))
    xpad = xpad.astype(compute_dtype)                        # cast ONCE, pre-im2col
    ident = jnp.pad(x_nhwc, ((0, 0), (0, 0), (0, 0), (0, CP - Cin)))
    ident = ident.reshape(M, CP)                             # f32 lane-dense identity

    def prep_w(w):                                           # (3,3,Cin,C) -> (9*CP, CP)
        wp = jnp.pad(w, ((0, 0), (0, 0), (0, CP - Cin), (0, CP - C)))
        return wp.reshape(9 * CP, CP).astype(compute_dtype)

    def prep_v(v):                                           # (C,) -> (1, CP), zero-padded
        return jnp.pad(v, (0, CP - C)).reshape(1, CP).astype(jnp.float32)

    w1p, w2p = prep_w(w1_hwio), prep_w(w2_hwio)
    g1p, b1p, g2p, b2p = prep_v(g1), prep_v(b1), prep_v(g2), prep_v(b2)

    itemsize = jnp.dtype(compute_dtype).itemsize
    flops = 2 * (2 * M * (9 * CP) * CP)
    bytes_accessed = int((xpad.size + w1p.size + w2p.size) * itemsize
                         + 4 * (ident.size + 4 * CP + M * CP))

    kernel = _make_encoder_block_kernel(N, H, W, CP, compute_dtype)

    out2d = pl.pallas_call(
        kernel,
        out_shape=jax.ShapeDtypeStruct((M, CP), jnp.float32),
        grid=(1,),
        in_specs=[
            pl.BlockSpec((N, H + 2, W + 2, CP), lambda i: (0, 0, 0, 0)),
            pl.BlockSpec((9 * CP, CP), lambda i: (0, 0)),
            pl.BlockSpec((1, CP), lambda i: (0, 0)),
            pl.BlockSpec((1, CP), lambda i: (0, 0)),
            pl.BlockSpec((9 * CP, CP), lambda i: (0, 0)),
            pl.BlockSpec((1, CP), lambda i: (0, 0)),
            pl.BlockSpec((1, CP), lambda i: (0, 0)),
            pl.BlockSpec((M, CP), lambda i: (0, 0)),
        ],
        out_specs=pl.BlockSpec((M, CP), lambda i: (0, 0)),
        scratch_shapes=[pltpu.VMEM((N, H + 2, W + 2, CP), compute_dtype)],
        compiler_params=pltpu.CompilerParams(
            dimension_semantics=("arbitrary",),
            vmem_limit_bytes=32 * 1024 * 1024),
        cost_estimate=pl.CostEstimate(
            flops=flops, transcendentals=2 * CP, bytes_accessed=bytes_accessed),
    )(xpad, w1p, g1p, b1p, w2p, g2p, b2p, ident)

    out = out2d.reshape(N, H, W, CP)[..., :C]                # drop channel padding
    return jnp.transpose(out, (0, 3, 1, 2))                  # back to NCHW


def encoder_block_ref(x, w1_hwio, g1, b1, w2_hwio, g2, b2):
    """Pure-JAX f32 reference matching PyTorch EncoderBlock.forward (train-mode BN)."""
    dn = ("NCHW", "HWIO", "NCHW")

    def bn(o, g, b):
        mean = o.mean(axis=(0, 2, 3), keepdims=True)
        var = ((o - mean) ** 2).mean(axis=(0, 2, 3), keepdims=True)
        return (o - mean) / jnp.sqrt(var + EPS) * g.reshape(1, -1, 1, 1) \
               + b.reshape(1, -1, 1, 1)

    out = jax.lax.conv_general_dilated(x, w1_hwio, (1, 1), "SAME",
                                       dimension_numbers=dn)
    out = jax.nn.relu(bn(out, g1, b1))
    out = jax.lax.conv_general_dilated(out, w2_hwio, (1, 1), "SAME",
                                       dimension_numbers=dn)
    out = bn(out, g2, b2)
    return jax.nn.relu(out + x)


if __name__ == "__main__":
    N, C, H, W = 2, 8, 16, 16   # inplanes = planes = 8, stride = 1
    key = jax.random.PRNGKey(0)
    kx, kw1, kw2, kg1, kb1, kg2, kb2 = jax.random.split(key, 7)

    x = jax.random.normal(kx, (N, C, H, W), jnp.float32)
    w1 = 0.1 * jax.random.normal(kw1, (3, 3, C, C), jnp.float32)    # conv1, HWIO
    w2 = 0.1 * jax.random.normal(kw2, (3, 3, C, C), jnp.float32)    # conv2, HWIO
    g1 = 1.0 + 0.1 * jax.random.normal(kg1, (C,), jnp.float32)      # bn1 weight
    b1 = 0.1 * jax.random.normal(kb1, (C,), jnp.float32)            # bn1 bias
    g2 = 1.0 + 0.1 * jax.random.normal(kg2, (C,), jnp.float32)      # bn2 weight
    b2 = 0.1 * jax.random.normal(kb2, (C,), jnp.float32)            # bn2 bias

    ref = encoder_block_ref(x, w1, g1, b1, w2, g2, b2)

    # 1) f32-operand variant: validates layout / indexing / BN at tight tolerance
    #    (typical max abs err ~1e-5; threshold leaves headroom for matmul passes).
    out_f32 = jax.block_until_ready(
        encoder_block_pallas(x, w1, g1, b1, w2, g2, b2, compute_dtype=jnp.float32))
    assert out_f32.shape == ref.shape == (N, C, H, W)
    err_f32 = float(jnp.max(jnp.abs(out_f32 - ref)))
    assert bool(jnp.allclose(out_f32, ref, rtol=5e-3, atol=5e-3)), \
        f"f32-operand max abs err = {err_f32}"

    # 2) bf16 fast path (f32 accumulation / BN / residual); tolerance covers
    #    only bf16 operand rounding.
    out = jax.block_until_ready(encoder_block_pallas(x, w1, g1, b1, w2, g2, b2))
    assert out.shape == ref.shape == (N, C, H, W)
    err_bf16 = float(jnp.max(jnp.abs(out - ref)))
    assert bool(jnp.allclose(out, ref, rtol=2e-2, atol=2e-2)), \
        f"bf16 max abs err = {err_bf16}"

    print("KERNEL_OK")
</pallas_src>

<mosaic_0001>
module attributes {stable_mosaic.version = 11 : i64} {
  func.func @kernel(%arg0: i32, %arg1: memref<2x18x18x128xf32, #tpu.memory_space<vmem>>, %arg2: memref<1152x128xf32, #tpu.memory_space<vmem>>, %arg3: memref<1x128xf32, #tpu.memory_space<vmem>>, %arg4: memref<1x128xf32, #tpu.memory_space<vmem>>, %arg5: memref<1152x128xf32, #tpu.memory_space<vmem>>, %arg6: memref<1x128xf32, #tpu.memory_space<vmem>>, %arg7: memref<1x128xf32, #tpu.memory_space<vmem>>, %arg8: memref<512x128xf32, #tpu.memory_space<vmem>>, %arg9: memref<512x128xf32, #tpu.memory_space<vmem>>, %arg10: memref<2x18x18x128xf32, #tpu.memory_space<vmem>>) attributes {dimension_semantics = [#tpu.dimension_semantics<arbitrary>], iteration_bounds = array<i64: 1>, scalar_prefetch = 0 : i64, scratch_operands = 1 : i64, tpu.core_type = #tpu.core_type<tc>, window_params = [{pipeline_mode = #tpu.pipeline_mode<synchronous>, transform_indices = @transform_0, window_bounds = array<i64: 2, 18, 18, 128>}, {pipeline_mode = #tpu.pipeline_mode<synchronous>, transform_indices = @transform_1, window_bounds = array<i64: 1152, 128>}, {pipeline_mode = #tpu.pipeline_mode<synchronous>, transform_indices = @transform_2, window_bounds = array<i64: 1, 128>}, {pipeline_mode = #tpu.pipeline_mode<synchronous>, transform_indices = @transform_3, window_bounds = array<i64: 1, 128>}, {pipeline_mode = #tpu.pipeline_mode<synchronous>, transform_indices = @transform_4, window_bounds = array<i64: 1152, 128>}, {pipeline_mode = #tpu.pipeline_mode<synchronous>, transform_indices = @transform_5, window_bounds = array<i64: 1, 128>}, {pipeline_mode = #tpu.pipeline_mode<synchronous>, transform_indices = @transform_6, window_bounds = array<i64: 1, 128>}, {pipeline_mode = #tpu.pipeline_mode<synchronous>, transform_indices = @transform_7, window_bounds = array<i64: 512, 128>}, {pipeline_mode = #tpu.pipeline_mode<synchronous>, transform_indices = @transform_8, window_bounds = array<i64: 512, 128>}]} {
    %c0 = arith.constant 0 : index
    %c0_0 = arith.constant 0 : index
    %c0_1 = arith.constant 0 : index
    %c0_2 = arith.constant 0 : index
    %0 = vector.load %arg1[%c0, %c0_0, %c0_1, %c0_2] : memref<2x18x18x128xf32, #tpu.memory_space<vmem>>, vector<2x18x18x128xf32>
    %1 = vector.extract_strided_slice %0 {offsets = [0, 0, 0, 0], sizes = [2, 16, 16, 128], strides = [1, 1, 1, 1]} : vector<2x18x18x128xf32> to vector<2x16x16x128xf32>
    %2 = vector.shape_cast %1 : vector<2x16x16x128xf32> to vector<512x128xf32>
    %3 = vector.extract_strided_slice %0 {offsets = [0, 0, 1, 0], sizes = [2, 16, 16, 128], strides = [1, 1, 1, 1]} : vector<2x18x18x128xf32> to vector<2x16x16x128xf32>
    %4 = vector.shape_cast %3 : vector<2x16x16x128xf32> to vector<512x128xf32>
    %5 = vector.extract_strided_slice %0 {offsets = [0, 0, 2, 0], sizes = [2, 16, 16, 128], strides = [1, 1, 1, 1]} : vector<2x18x18x128xf32> to vector<2x16x16x128xf32>
    %6 = vector.shape_cast %5 : vector<2x16x16x128xf32> to vector<512x128xf32>
    %7 = vector.extract_strided_slice %0 {offsets = [0, 1, 0, 0], sizes = [2, 16, 16, 128], strides = [1, 1, 1, 1]} : vector<2x18x18x128xf32> to vector<2x16x16x128xf32>
    %8 = vector.shape_cast %7 : vector<2x16x16x128xf32> to vector<512x128xf32>
    %9 = vector.extract_strided_slice %0 {offsets = [0, 1, 1, 0], sizes = [2, 16, 16, 128], strides = [1, 1, 1, 1]} : vector<2x18x18x128xf32> to vector<2x16x16x128xf32>
    %10 = vector.shape_cast %9 : vector<2x16x16x128xf32> to vector<512x128xf32>
    %11 = vector.extract_strided_slice %0 {offsets = [0, 1, 2, 0], sizes = [2, 16, 16, 128], strides = [1, 1, 1, 1]} : vector<2x18x18x128xf32> to vector<2x16x16x128xf32>
    %12 = vector.shape_cast %11 : vector<2x16x16x128xf32> to vector<512x128xf32>
    %13 = vector.extract_strided_slice %0 {offsets = [0, 2, 0, 0], sizes = [2, 16, 16, 128], strides = [1, 1, 1, 1]} : vector<2x18x18x128xf32> to vector<2x16x16x128xf32>
    %14 = vector.shape_cast %13 : vector<2x16x16x128xf32> to vector<512x128xf32>
    %15 = vector.extract_strided_slice %0 {offsets = [0, 2, 1, 0], sizes = [2, 16, 16, 128], strides = [1, 1, 1, 1]} : vector<2x18x18x128xf32> to vector<2x16x16x128xf32>
    %16 = vector.shape_cast %15 : vector<2x16x16x128xf32> to vector<512x128xf32>
    %17 = vector.extract_strided_slice %0 {offsets = [0, 2, 2, 0], sizes = [2, 16, 16, 128], strides = [1, 1, 1, 1]} : vector<2x18x18x128xf32> to vector<2x16x16x128xf32>
    %18 = vector.shape_cast %17 : vector<2x16x16x128xf32> to vector<512x128xf32>
    %19 = tpu.concatenate %2, %4, %6, %8, %10, %12, %14, %16, %18 in 1 : vector<512x128xf32>, vector<512x128xf32>, vector<512x128xf32>, vector<512x128xf32>, vector<512x128xf32>, vector<512x128xf32>, vector<512x128xf32>, vector<512x128xf32>, vector<512x128xf32> -> vector<512x1152xf32>
    %c0_3 = arith.constant 0 : index
    %c0_4 = arith.constant 0 : index
    %20 = vector.load %arg2[%c0_3, %c0_4] : memref<1152x128xf32, #tpu.memory_space<vmem>>, vector<1152x128xf32>
    %cst = arith.constant dense<0.000000e+00> : vector<512x128xf32>
    %21 = tpu.matmul %19, %20, %cst {dimension_numbers = #tpu.dot_dimension_numbers<[1], [0], [0], [1], [0, 0, 1, 1], [], []>} : vector<512x1152xf32>, vector<1152x128xf32>, vector<512x128xf32> -> vector<512x128xf32>
    %c0_5 = arith.constant 0 : index
    %c0_6 = arith.constant 0 : index
    %22 = vector.load %arg3[%c0_5, %c0_6] : memref<1x128xf32, #tpu.memory_space<vmem>>, vector<1x128xf32>
    %c0_7 = arith.constant 0 : index
    %c0_8 = arith.constant 0 : index
    %23 = vector.load %arg4[%c0_7, %c0_8] : memref<1x128xf32, #tpu.memory_space<vmem>>, vector<1x128xf32>
    %cst_9 = arith.constant dense<0.000000e+00> : vector<128xf32>
    %24 = vector.multi_reduction <add>, %21, %cst_9 [0] : vector<512x128xf32> to vector<128xf32>
    %25 = vector.shape_cast %24 : vector<128xf32> to vector<1x128xf32>
    %cst_10 = arith.constant 0.001953125 : f32
    %26 = vector.broadcast %cst_10 : f32 to vector<1x128xf32>
    %27 = arith.mulf %25, %26 : vector<1x128xf32>
    %28 = vector.broadcast %27 : vector<1x128xf32> to vector<512x128xf32>
    %29 = arith.subf %21, %28 : vector<512x128xf32>
    %30 = arith.mulf %29, %29 : vector<512x128xf32>
    %cst_11 = arith.constant dense<0.000000e+00> : vector<128xf32>
    %31 = vector.multi_reduction <add>, %30, %cst_11 [0] : vector<512x128xf32> to vector<128xf32>
    %32 = vector.shape_cast %31 : vector<128xf32> to vector<1x128xf32>
    %cst_12 = arith.constant 0.001953125 : f32
    %33 = vector.broadcast %cst_12 : f32 to vector<1x128xf32>
    %34 = arith.mulf %32, %33 : vector<1x128xf32>
    %cst_13 = arith.constant 9.99999974E-6 : f32
    %35 = vector.broadcast %cst_13 : f32 to vector<1x128xf32>
    %36 = arith.addf %34, %35 : vector<1x128xf32>
    %37 = math.rsqrt %36 : vector<1x128xf32>
    %38 = arith.mulf %22, %37 : vector<1x128xf32>
    %39 = vector.broadcast %38 : vector<1x128xf32> to vector<512x128xf32>
    %40 = arith.mulf %29, %39 : vector<512x128xf32>
    %41 = vector.broadcast %23 : vector<1x128xf32> to vector<512x128xf32>
    %42 = arith.addf %40, %41 : vector<512x128xf32>
    %cst_14 = arith.constant 0.000000e+00 : f32
    %43 = vector.broadcast %cst_14 : f32 to vector<512x128xf32>
    %44 = arith.maximumf %42, %43 : vector<512x128xf32>
    %cst_15 = arith.constant 0.000000e+00 : f32
    %45 = vector.broadcast %cst_15 : f32 to vector<2x18x18x128xf32>
    %c0_16 = arith.constant 0 : index
    %c0_17 = arith.constant 0 : index
    %c0_18 = arith.constant 0 : index
    %c0_19 = arith.constant 0 : index
    %46 = vector.load %arg10[%c0_16, %c0_17, %c0_18, %c0_19] : memref<2x18x18x128xf32, #tpu.memory_space<vmem>>, vector<2x18x18x128xf32>
    tpu.vector_store %arg10[%c0_16, %c0_17, %c0_18, %c0_19], %45 {strides = array<i32>} : memref<2x18x18x128xf32, #tpu.memory_space<vmem>>, vector<2x18x18x128xf32>,
    %47 = vector.shape_cast %44 : vector<512x128xf32> to vector<2x16x16x128xf32>
    %c0_20 = arith.constant 0 : index
    %c1 = arith.constant 1 : index
    %c1_21 = arith.constant 1 : index
    %c0_22 = arith.constant 0 : index
    %48 = vector.load %arg10[%c0_20, %c1, %c1_21, %c0_22] : memref<2x18x18x128xf32, #tpu.memory_space<vmem>>, vector<2x16x16x128xf32>
    tpu.vector_store %arg10[%c0_20, %c1, %c1_21, %c0_22], %47 {strides = array<i32>} : memref<2x18x18x128xf32, #tpu.memory_space<vmem>>, vector<2x16x16x128xf32>,
    %c0_23 = arith.constant 0 : index
    %c0_24 = arith.constant 0 : index
    %c0_25 = arith.constant 0 : index
    %c0_26 = arith.constant 0 : index
    %49 = vector.load %arg10[%c0_23, %c0_24, %c0_25, %c0_26] : memref<2x18x18x128xf32, #tpu.memory_space<vmem>>, vector<2x18x18x128xf32>
    %50 = vector.extract_strided_slice %49 {offsets = [0, 0, 0, 0], sizes = [2, 16, 16, 128], strides = [1, 1, 1, 1]} : vector<2x18x18x128xf32> to vector<2x16x16x128xf32>
    %51 = vector.shape_cast %50 : vector<2x16x16x128xf32> to vector<512x128xf32>
    %52 = vector.extract_strided_slice %49 {offsets = [0, 0, 1, 0], sizes = [2, 16, 16, 128], strides = [1, 1, 1, 1]} : vector<2x18x18x128xf32> to vector<2x16x16x128xf32>
    %53 = vector.shape_cast %52 : vector<2x16x16x128xf32> to vector<512x128xf32>
    %54 = vector.extract_strided_slice %49 {offsets = [0, 0, 2, 0], sizes = [2, 16, 16, 128], strides = [1, 1, 1, 1]} : vector<2x18x18x128xf32> to vector<2x16x16x128xf32>
    %55 = vector.shape_cast %54 : vector<2x16x16x128xf32> to vector<512x128xf32>
    %56 = vector.extract_strided_slice %49 {offsets = [0, 1, 0, 0], sizes = [2, 16, 16, 128], strides = [1, 1, 1, 1]} : vector<2x18x18x128xf32> to vector<2x16x16x128xf32>
    %57 = vector.shape_cast %56 : vector<2x16x16x128xf32> to vector<512x128xf32>
    %58 = vector.extract_strided_slice %49 {offsets = [0, 1, 1, 0], sizes = [2, 16, 16, 128], strides = [1, 1, 1, 1]} : vector<2x18x18x128xf32> to vector<2x16x16x128xf32>
    %59 = vector.shape_cast %58 : vector<2x16x16x128xf32> to vector<512x128xf32>
    %60 = vector.extract_strided_slice %49 {offsets = [0, 1, 2, 0], sizes = [2, 16, 16, 128], strides = [1, 1, 1, 1]} : vector<2x18x18x128xf32> to vector<2x16x16x128xf32>
    %61 = vector.shape_cast %60 : vector<2x16x16x128xf32> to vector<512x128xf32>
    %62 = vector.extract_strided_slice %49 {offsets = [0, 2, 0, 0], sizes = [2, 16, 16, 128], strides = [1, 1, 1, 1]} : vector<2x18x18x128xf32> to vector<2x16x16x128xf32>
    %63 = vector.shape_cast %62 : vector<2x16x16x128xf32> to vector<512x128xf32>
    %64 = vector.extract_strided_slice %49 {offsets = [0, 2, 1, 0], sizes = [2, 16, 16, 128], strides = [1, 1, 1, 1]} : vector<2x18x18x128xf32> to vector<2x16x16x128xf32>
    %65 = vector.shape_cast %64 : vector<2x16x16x128xf32> to vector<512x128xf32>
    %66 = vector.extract_strided_slice %49 {offsets = [0, 2, 2, 0], sizes = [2, 16, 16, 128], strides = [1, 1, 1, 1]} : vector<2x18x18x128xf32> to vector<2x16x16x128xf32>
    %67 = vector.shape_cast %66 : vector<2x16x16x128xf32> to vector<512x128xf32>
    %68 = tpu.concatenate %51, %53, %55, %57, %59, %61, %63, %65, %67 in 1 : vector<512x128xf32>, vector<512x128xf32>, vector<512x128xf32>, vector<512x128xf32>, vector<512x128xf32>, vector<512x128xf32>, vector<512x128xf32>, vector<512x128xf32>, vector<512x128xf32> -> vector<512x1152xf32>
    %c0_27 = arith.constant 0 : index
    %c0_28 = arith.constant 0 : index
    %69 = vector.load %arg5[%c0_27, %c0_28] : memref<1152x128xf32, #tpu.memory_space<vmem>>, vector<1152x128xf32>
    %cst_29 = arith.constant dense<0.000000e+00> : vector<512x128xf32>
    %70 = tpu.matmul %68, %69, %cst_29 {dimension_numbers = #tpu.dot_dimension_numbers<[1], [0], [0], [1], [0, 0, 1, 1], [], []>} : vector<512x1152xf32>, vector<1152x128xf32>, vector<512x128xf32> -> vector<512x128xf32>
    %c0_30 = arith.constant 0 : index
    %c0_31 = arith.constant 0 : index
    %71 = vector.load %arg6[%c0_30, %c0_31] : memref<1x128xf32, #tpu.memory_space<vmem>>, vector<1x128xf32>
    %c0_32 = arith.constant 0 : index
    %c0_33 = arith.constant 0 : index
    %72 = vector.load %arg7[%c0_32, %c0_33] : memref<1x128xf32, #tpu.memory_space<vmem>>, vector<1x128xf32>
    %cst_34 = arith.constant dense<0.000000e+00> : vector<128xf32>
    %73 = vector.multi_reduction <add>, %70, %cst_34 [0] : vector<512x128xf32> to vector<128xf32>
    %74 = vector.shape_cast %73 : vector<128xf32> to vector<1x128xf32>
    %cst_35 = arith.constant 0.001953125 : f32
    %75 = vector.broadcast %cst_35 : f32 to vector<1x128xf32>
    %76 = arith.mulf %74, %75 : vector<1x128xf32>
    %77 = vector.broadcast %76 : vector<1x128xf32> to vector<512x128xf32>
    %78 = arith.subf %70, %77 : vector<512x128xf32>
    %79 = arith.mulf %78, %78 : vector<512x128xf32>
    %cst_36 = arith.constant dense<0.000000e+00> : vector<128xf32>
    %80 = vector.multi_reduction <add>, %79, %cst_36 [0] : vector<512x128xf32> to vector<128xf32>
    %81 = vector.shape_cast %80 : vector<128xf32> to vector<1x128xf32>
    %cst_37 = arith.constant 0.001953125 : f32
    %82 = vector.broadcast %cst_37 : f32 to vector<1x128xf32>
    %83 = arith.mulf %81, %82 : vector<1x128xf32>
    %cst_38 = arith.constant 9.99999974E-6 : f32
    %84 = vector.broadcast %cst_38 : f32 to vector<1x128xf32>
    %85 = arith.addf %83, %84 : vector<1x128xf32>
    %86 = math.rsqrt %85 : vector<1x128xf32>
    %87 = arith.mulf %71, %86 : vector<1x128xf32>
    %88 = vector.broadcast %87 : vector<1x128xf32> to vector<512x128xf32>
    %89 = arith.mulf %78, %88 : vector<512x128xf32>
    %90 = vector.broadcast %72 : vector<1x128xf32> to vector<512x128xf32>
    %91 = arith.addf %89, %90 : vector<512x128xf32>
    %c0_39 = arith.constant 0 : index
    %c0_40 = arith.constant 0 : index
    %92 = vector.load %arg8[%c0_39, %c0_40] : memref<512x128xf32, #tpu.memory_space<vmem>>, vector<512x128xf32>
    %93 = arith.addf %91, %92 : vector<512x128xf32>
    %cst_41 = arith.constant 0.000000e+00 : f32
    %94 = vector.broadcast %cst_41 : f32 to vector<512x128xf32>
    %95 = arith.maximumf %93, %94 : vector<512x128xf32>
    %c0_42 = arith.constant 0 : index
    %c0_43 = arith.constant 0 : index
    %96 = vector.load %arg9[%c0_42, %c0_43] : memref<512x128xf32, #tpu.memory_space<vmem>>, vector<512x128xf32>
    tpu.vector_store %arg9[%c0_42, %c0_43], %95 {strides = array<i32>} : memref<512x128xf32, #tpu.memory_space<vmem>>, vector<512x128xf32>,
    return
  }
  func.func @transform_0(%arg0: i32) -> (i32, i32, i32, i32) {
    %c0_i32 = arith.constant 0 : i32
    %c0_i32_0 = arith.constant 0 : i32
    %c0_i32_1 = arith.constant 0 : i32
    %c0_i32_2 = arith.constant 0 : i32
    %c0_i32_3 = arith.constant 0 : i32
    return %c0_i32, %c0_i32_0, %c0_i32_1, %c0_i32_2 : i32, i32, i32, i32
  }
  func.func @transform_1(%arg0: i32) -> (i32, i32) {
    %c0_i32 = arith.constant 0 : i32
    %c0_i32_0 = arith.constant 0 : i32
    %c0_i32_1 = arith.constant 0 : i32
    return %c0_i32, %c0_i32_0 : i32, i32
  }
  func.func @transform_2(%arg0: i32) -> (i32, i32) {
    %c0_i32 = arith.constant 0 : i32
    %c0_i32_0 = arith.constant 0 : i32
    %c0_i32_1 = arith.constant 0 : i32
    return %c0_i32, %c0_i32_0 : i32, i32
  }
  func.func @transform_3(%arg0: i32) -> (i32, i32) {
    %c0_i32 = arith.constant 0 : i32
    %c0_i32_0 = arith.constant 0 : i32
    %c0_i32_1 = arith.constant 0 : i32
    return %c0_i32, %c0_i32_0 : i32, i32
  }
  func.func @transform_4(%arg0: i32) -> (i32, i32) {
    %c0_i32 = arith.constant 0 : i32
    %c0_i32_0 = arith.constant 0 : i32
    %c0_i32_1 = arith.constant 0 : i32
    return %c0_i32, %c0_i32_0 : i32, i32
  }
  func.func @transform_5(%arg0: i32) -> (i32, i32) {
    %c0_i32 = arith.constant 0 : i32
    %c0_i32_0 = arith.constant 0 : i32
    %c0_i32_1 = arith.constant 0 : i32
    return %c0_i32, %c0_i32_0 : i32, i32
  }
  func.func @transform_6(%arg0: i32) -> (i32, i32) {
    %c0_i32 = arith.constant 0 : i32
    %c0_i32_0 = arith.constant 0 : i32
    %c0_i32_1 = arith.constant 0 : i32
    return %c0_i32, %c0_i32_0 : i32, i32
  }
  func.func @transform_7(%arg0: i32) -> (i32, i32) {
    %c0_i32 = arith.constant 0 : i32
    %c0_i32_0 = arith.constant 0 : i32
    %c0_i32_1 = arith.constant 0 : i32
    return %c0_i32, %c0_i32_0 : i32, i32
  }
  func.func @transform_8(%arg0: i32) -> (i32, i32) {
    %c0_i32 = arith.constant 0 : i32
    %c0_i32_0 = arith.constant 0 : i32
    %c0_i32_1 = arith.constant 0 : i32
    return %c0_i32, %c0_i32_0 : i32, i32
  }
}

</mosaic_0001>

<bundles_post_ra>
// kernel: tpu_custom_call.1
= control target key start
LH: loop header
LB: loop body
LE: loop exit
PB: predicated region body
PF: predicated region fallthrough
CT: control target
= control target key end

     0   :  { %13 = vsyncpa [#allocation4], 0  ;;  %s15709_s0 = inlined_call_operand.vmem [shape: f32[2,18,18,128], index: 0, kind: input, shape index: {}]   ;;  %s15710_s1 = inlined_call_operand.vmem [shape: f32[1152,128], index: 1, kind: input, shape index: {}]   ;;  %s15711_s2 = inlined_call_operand.vmem [shape: f32[1,128], index: 2, kind: input, shape index: {}]   ;;  %s15712_s3 = inlined_call_operand.vmem [shape: f32[1,128], index: 3, kind: input, shape index: {}]   ;;  %s15713_s4 = inlined_call_operand.hbm [shape: f32[1152,128], index: 4, kind: input, shape index: {}]   ;;  %s15714_s5 = inlined_call_operand.vmem [shape: f32[1,128], index: 5, kind: input, shape index: {}]   ;;  %s15715_s6 = inlined_call_operand.vmem [shape: f32[1,128], index: 6, kind: input, shape index: {}]   ;;  %s15716_s7 = inlined_call_operand.hbm [shape: f32[512,128], index: 7, kind: input, shape index: {}]   ;;  %s15717_s8 = inlined_call_operand.hbm [shape: f32[512,128], index: 8, kind: output, shape index: {}]  }
   0x1   :  { %14 = vsyncpa [#allocation7], 0 }
   0x2   :  { %15 = vsyncpa [#allocation5], 0  ;;  %s8835_s27 = smov [#allocation3]   ;;  %s8763_s9 = scalar_lea.hbm %s15713_s4, 18432 }
   0x3   :  { %s29_s28 = sshll.u32 %s8835_s27, 4  ;;  %p8764_p0 = scmp.ne.s32.totalorder %s15713_s4, %s8763_s9  ;;  %s30_s28 = int_to_ptr.vmem [resolvable:$true] %s29_s28 }
   0x4   :  { %p8767_p1 = scmp.lt.u32.totalorder %s8763_s9, %s15713_s4 }
   0x6   :  { %p8769_p2 = pnand %p8767_p1, %p8764_p0 }
   0x8   :  { %8772 = shalt.err (!%p8769_p2)
}
   0x9   :  { %s8773_s14 = scalar_lea.vmem %s30_s28, 18432  ;;  %p8778_p4 = scmp.lt.s32.totalorder %s30_s28, %s30_s28 }
   0xa   :  { %p8774_p3 = scmp.ne.s32.totalorder %s30_s28, %s8773_s14  ;;  %p8779_p5 = scmp.lt.s32.totalorder %s8773_s14, %s8773_s14 }
   0xc   :  { %p8780_p6 = por %p8779_p5, %p8778_p4 }
   0xe   :  { %p8781_p7 = pnand %p8780_p6, %p8774_p3 }
  0x10   :  { %8784 = shalt.err (!%p8781_p7)
}
  0x11   :  { %s8836_s15 = smov 128   ;;  %s8837_s16 = smov 8  }
  0x12   :  { %35 = dma.hbm_to_vmem [thread:$0]  %s15713_s4, 18432, %s30_s28, [#allocation4], %s8836_s15, %s8836_s15, %s8837_s16  }
  0x13   :  { %s8838_s19 = smov [#allocation6]   ;;  %s8785_s23 = scalar_lea.hbm %s15716_s7, 8192 }
  0x14   :  { %s45_s20 = sshll.u32 %s8838_s19, 4  ;;  %p8786_p8 = scmp.ne.s32.totalorder %s15716_s7, %s8785_s23  ;;  %s46_s20 = int_to_ptr.vmem [resolvable:$true] %s45_s20 }
  0x15   :  { %p8789_p9 = scmp.lt.u32.totalorder %s8785_s23, %s15716_s7 }
  0x17   :  { %p8791_p10 = pnand %p8789_p9, %p8786_p8 }
  0x19   :  { %8794 = shalt.err (!%p8791_p10)
}
  0x1a   :  { %s8795_s29 = scalar_lea.vmem %s46_s20, 8192  ;;  %p8800_p12 = scmp.lt.s32.totalorder %s46_s20, %s46_s20 }
  0x1b   :  { %p8796_p11 = scmp.ne.s32.totalorder %s46_s20, %s8795_s29  ;;  %p8801_p13 = scmp.lt.s32.totalorder %s8795_s29, %s8795_s29 }
  0x1d   :  { %p8802_p0 = por %p8801_p13, %p8800_p12 }
  0x1f   :  { %p8803_p1 = pnand %p8802_p0, %p8796_p11 }
  0x21   :  { %8806 = shalt.err (!%p8803_p1)
}
  0x22   :  { %51 = dma.hbm_to_vmem [thread:$0]  %s15716_s7, 8192, %s46_s20, [#allocation7], %s8836_s15, %s8836_s15, %s8837_s16  }
  0x23   :  { %8829 = dma.done.wait [#allocation4], 18432  }
  0x24   :  { %8830 = vsyncadd [#allocation4], 4294948864 }
  0x25   :  { %8831 = dma.done.wait [#allocation7], 8192  }
  0x26   :  { %8832 = vsyncadd [#allocation7], 4294959104  ;;  %v15718_v0 = vmov 0.0|0.0   ;;  %v780_v1 = vld [vmem:[%s15710_s1] sm:$0xff]  ;;  %v781_v2 = vld [vmem:[%s15710_s1 + $0x8] sm:$0xff]  ;;  %vm262_vm0 = vcmask 1046528  }
  0x27   :  { %7393 = vmatprep.subr.bf16.mxu0 %v15718_v0  ;;  %v782_v3 = vld [vmem:[%s15710_s1 + $0x10] sm:$0xff]  ;;  %v7394_v4 = vpack.c.bf16 %v781_v2, %v780_v1  ;;  %v783_v5 = vld [vmem:[%s15710_s1 + $0x18] sm:$0xff]  ;;  %v784_v7 = vld [vmem:[%s15710_s1 + $0x20] sm:$0xff]  ;;  %vm487_vm1 = vcmask 1045504  }
  0x28   :  { %v7397_v6 = vpack.c.bf16 %v783_v5, %v782_v3  ;;  %v785_v8 = vld [vmem:[%s15710_s1 + $0x28] sm:$0xff]  ;;  %v786_v10 = vld [vmem:[%s15710_s1 + $0x30] sm:$0xff]  ;;  %v787_v11 = vld [vmem:[%s15710_s1 + $0x38] sm:$0xff] }
  0x29   :  { %7395 = vmatpush1.bf16.msra.mxu0 %v7394_v4  ;;  %v7400_v9 = vpack.c.bf16 %v785_v8, %v784_v7  ;;  %v8947_v12 = vld [vmem:[%s15709_s0] sm:$0xff]  ;;  %v7403_v13 = vpack.c.bf16 %v787_v11, %v786_v10  ;;  %v8952_v14 = vld [vmem:[%s15709_s0 + $0x8] sm:$0xff]  ;;  %v790_v21 = vld [vmem:[%s15710_s1 + $0x50] sm:$0xff] }
  0x2a   :  { %7396 = vmatprep.subr.bf16.mxu0 %v15718_v0  ;;  %v263_v15 = vrot.slane %v8947_v12, 1  ;;  %v788_v16 = vld [vmem:[%s15710_s1 + $0x40] sm:$0xff]  ;;  %v789_v17 = vld [vmem:[%s15710_s1 + $0x48] sm:$0xff]  ;;  %v264_v18 = vrot.slane %v8952_v14, 1  ;;  %v791_v22 = vld [vmem:[%s15710_s1 + $0x58] sm:$0xff] }
  0x2b   :  { %v7406_v20 = vpack.c.bf16 %v789_v17, %v788_v16  ;;  %v7409_v23 = vpack.c.bf16 %v791_v22, %v790_v21  ;;  %v792_v24 = vld [vmem:[%s15710_s1 + $0x60] sm:$0xff]  ;;  %v793_v25 = vld [vmem:[%s15710_s1 + $0x68] sm:$0xff]  ;;  %v794_v27 = vld [vmem:[%s15710_s1 + $0x70] sm:$0xff] }
  0x2c   :  { %v265_v19 = vsel %vm262_vm0, %v263_v15, %v264_v18  ;;  %v7412_v26 = vpack.c.bf16 %v793_v25, %v792_v24  ;;  %v795_v28 = vld [vmem:[%s15710_s1 + $0x78] sm:$0xff]  ;;  %v796_v30 = vld [vmem:[%s15710_s1 + $0x80] sm:$0xff]  ;;  %v797_v31 = vld [vmem:[%s15710_s1 + $0x88] sm:$0xff] }
  0x2d   :  { %7398 = vmatpush1.bf16.msra.mxu0 %v7397_v6  ;;  %988 = vmatprep.mubr.f32.mxu0 %v265_v19  ;;  %v7415_v29 = vpack.c.bf16 %v795_v28, %v794_v27  ;;  %v7418_v32 = vpack.c.bf16 %v797_v31, %v796_v30  ;;  %v798_v33 = vld [vmem:[%s15710_s1 + $0x90] sm:$0xff]  ;;  %v799_v34 = vld [vmem:[%s15710_s1 + $0x98] sm:$0xff]  ;;  %v800_v36 = vld [vmem:[%s15710_s1 + $0xa0] sm:$0xff] }
  0x2e   :  { %7399 = vmatprep.subr.bf16.mxu0 %v15718_v0  ;;  %v7421_v35 = vpack.c.bf16 %v799_v34, %v798_v33  ;;  %v801_v37 = vld [vmem:[%s15710_s1 + $0xa8] sm:$0xff]  ;;  %v802_v39 = vld [vmem:[%s15710_s1 + $0xb0] sm:$0xff]  ;;  %v803_v40 = vld [vmem:[%s15710_s1 + $0xb8] sm:$0xff] }
  0x2f   :  { %v7424_v38 = vpack.c.bf16 %v801_v37, %v800_v36  ;;  %v7427_v41 = vpack.c.bf16 %v803_v40, %v802_v39  ;;  %v804_v42 = vld [vmem:[%s15710_s1 + $0xc0] sm:$0xff]  ;;  %v805_v43 = vld [vmem:[%s15710_s1 + $0xc8] sm:$0xff]  ;;  %v806_v45 = vld [vmem:[%s15710_s1 + $0xd0] sm:$0xff] }
  0x30   :  { %v7430_v44 = vpack.c.bf16 %v805_v43, %v804_v42  ;;  %v807_v46 = vld [vmem:[%s15710_s1 + $0xd8] sm:$0xff]  ;;  %v808_v48 = vld [vmem:[%s15710_s1 + $0xe0] sm:$0xff]  ;;  %v809_v49 = vld [vmem:[%s15710_s1 + $0xe8] sm:$0xff] }
  0x31   :  { %7401 = vmatpush1.bf16.msra.mxu0 %v7400_v9  ;;  %v7433_v47 = vpack.c.bf16 %v807_v46, %v806_v45  ;;  %v7436_v50 = vpack.c.bf16 %v809_v49, %v808_v48  ;;  %v810_v51 = vld [vmem:[%s15710_s1 + $0xf0] sm:$0xff]  ;;  %v811_v52 = vld [vmem:[%s15710_s1 + $0xf8] sm:$0xff]  ;;  %v812_v55 = vld [vmem:[%s15710_s1 + $0x100] sm:$0xff] }
  0x32   :  { %7402 = vmatprep.subr.bf16.mxu0 %v15718_v0  ;;  %v9046_v53 = vld [vmem:[%s15709_s0 + $0x10] sm:$0x3]  ;;  %v7439_v54 = vpack.c.bf16 %v811_v52, %v810_v51  ;;  %v813_v56 = vld [vmem:[%s15710_s1 + $0x108] sm:$0xff]  ;;  %v9059_v58 = vld [vmem:[%s15709_s0 + $0x18] sm:$0xff] }
  0x33   :  { %v266_v57 = vrot.slane %v9046_v53, 1  ;;  %v9064_v59 = vld [vmem:[%s15709_s0 + $0x20] sm:$0xff]  ;;  %v7442_v60 = vpack.c.bf16 %v813_v56, %v812_v55  ;;  %v268_v62 = vrot.slane %v9059_v58, 1  ;;  %v814_v1 = vld [vmem:[%s15710_s1 + $0x110] sm:$0xff]  ;;  %v815_v2 = vld [vmem:[%s15710_s1 + $0x118] sm:$0xff] }
  0x34   :  { %v269_v63 = vrot.slane %v9064_v59, 1  ;;  %v9081_v3 = vld [vmem:[%s15709_s0 + $0x28] sm:$0x3]  ;;  %v7445_v4 = vpack.c.bf16 %v815_v2, %v814_v1  ;;  %v816_v7 = vld [vmem:[%s15710_s1 + $0x120] sm:$0xff]  ;;  %v9098_v9 = vld [vmem:[%s15709_s0 + $0x30] sm:$0xff] }
  0x35   :  { %7404 = vmatpush1.bf16.msra.mxu0 %v7403_v13  ;;  %v267_v61 = vsel %vm262_vm0, %v264_v18, %v266_v57  ;;  %v271_v6 = vrot.slane %v9081_v3, 1  ;;  %v817_v8 = vld [vmem:[%s15710_s1 + $0x128] sm:$0xff]  ;;  %v9103_v10 = vld [vmem:[%s15709_s0 + $0x38] sm:$0xff]  ;;  %v273_v15 = vrot.slane %v9098_v9, 1  ;;  %v818_v17 = vld [vmem:[%s15710_s1 + $0x130] sm:$0xff] }
  0x36   :  { %7405 = vmatprep.subr.bf16.mxu0 %v15718_v0  ;;  %v9085_v5 = vsel %vm262_vm0, %v268_v62, %v269_v63  ;;  %v7448_v11 = vpack.c.bf16 %v817_v8, %v816_v7  ;;  %v274_v16 = vrot.slane %v9103_v10, 1  ;;  %v819_v18 = vld [vmem:[%s15710_s1 + $0x138] sm:$0xff]  ;;  %v9122_v19 = vld [vmem:[%s15709_s0 + $0x40] sm:$0x3]  ;;  %v821_v24 = vld [vmem:[%s15710_s1 + $0x148] sm:$0xff] }
  0x37   :  { %16295 = vst [vmem:[#allocation12_spill] sm:$0xff] %v9085_v5  ;;  %v9108_v13 = vsel %vm262_vm0, %v269_v63, %v271_v6  ;;  %v276_v22 = vrot.slane %v9122_v19, 1  ;;  %v9140_v25 = vld [vmem:[%s15709_s0 + $0x48] sm:$0xff]  ;;  %v822_v31 = vld [vmem:[%s15710_s1 + $0x150] sm:$0xff]  ;;  %v9164_v33 = vld [vmem:[%s15709_s0 + $0x58] sm:$0x3] }
  0x38   :  { %16296 = vst [vmem:[#allocation13_spill] sm:$0xff] %v9108_v13  ;;  %v9127_v21 = vsel %vm262_vm0, %v273_v15, %v274_v16  ;;  %v281_v36 = vrot.slane %v9164_v33, 1  ;;  %v824_v37 = vld [vmem:[%s15710_s1 + $0x160] sm:$0xff]  ;;  %v9187_v40 = vld [vmem:[%s15709_s0 + $0x68] sm:$0xff]  ;;  %v826_v45 = vld [vmem:[%s15710_s1 + $0x170] sm:$0xff] }
  0x39   :  { %7407 = vmatpush1.bf16.msra.mxu0 %v7406_v20  ;;  %v7451_v20 = vpack.c.bf16 %v819_v18, %v818_v17  ;;  %16297 = vst [vmem:[#allocation14_spill] sm:$0xff] %v9127_v21  ;;  %v9150_v28 = vsel %vm262_vm0, %v274_v16, %v276_v22  ;;  %v9182_v39 = vld [vmem:[%s15709_s0 + $0x60] sm:$0xff]  ;;  %v827_v46 = vld [vmem:[%s15710_s1 + $0x178] sm:$0xff]  ;;  %v829_v52 = vld [vmem:[%s15710_s1 + $0x188] sm:$0xff] }
  0x3a   :  { %7408 = vmatprep.subr.bf16.mxu0 %v15718_v0  ;;  %16298 = vst [vmem:[#allocation15_spill] sm:$0xff] %v9150_v28  ;;  %v283_v43 = vrot.slane %v9182_v39, 1  ;;  %v7463_v48 = vpack.c.bf16 %v827_v46, %v826_v45  ;;  %v828_v51 = vld [vmem:[%s15710_s1 + $0x180] sm:$0xff]  ;;  %v830_v62 = vld [vmem:[%s15710_s1 + $0x190] sm:$0xff]  ;;  %v831_v63 = vld [vmem:[%s15710_s1 + $0x198] sm:$0xff] }
  0x3b   :  { %v9229_v55 = vld [vmem:[%s15709_s0 + $0x80] sm:$0xff]  ;;  %v7466_v56 = vpack.c.bf16 %v829_v52, %v828_v51  ;;  %v9248_v1 = vld [vmem:[%s15709_s0 + $0x88] sm:$0x3]  ;;  %v7469_v2 = vpack.c.bf16 %v831_v63, %v830_v62  ;;  %v9271_v15 = vld [vmem:[%s15709_s0 + $0x98] sm:$0xff] }
  0x3c   :  { %v291_v6 = vrot.slane %v9248_v1, 1  ;;  %v832_v7 = vld [vmem:[%s15710_s1 + $0x1a0] sm:$0xff]  ;;  %v833_v8 = vld [vmem:[%s15710_s1 + $0x1a8] sm:$0xff]  ;;  %v9348_v51 = vld [vmem:[%s15709_s0 + $0xd0] sm:$0x3] }
  0x3d   :  { %7410 = vmatpush1.bf16.msra.mxu0 %v7409_v23  ;;  %v820_v23 = vld [vmem:[%s15710_s1 + $0x140] sm:$0xff]  ;;  %v7472_v16 = vpack.c.bf16 %v833_v8, %v832_v7  ;;  %v9335_v45 = vld [vmem:[%s15709_s0 + $0xc8] sm:$0xff] }
  0x3e   :  { %7411 = vmatprep.subr.bf16.mxu0 %v15718_v0  ;;  %v7454_v27 = vpack.c.bf16 %v821_v24, %v820_v23  ;;  %v9284_v22 = vld [vmem:[%s15709_s0 + $0xa0] sm:$0x3]  ;;  %v837_v8 = vld [vmem:[%s15710_s1 + $0x1c8] sm:$0xff] }
  0x3f   :  { %v296_v24 = vrot.slane %v9284_v22, 1  ;;  %v836_v7 = vld [vmem:[%s15710_s1 + $0x1c0] sm:$0xff] }
  0x41   :  { %7413 = vmatpush1.bf16.msra.mxu0 %v7412_v26  ;;  %v9145_v26 = vld [vmem:[%s15709_s0 + $0x50] sm:$0xff] }
  0x42   :  { %7414 = vmatprep.subr.bf16.mxu0 %v15718_v0  ;;  %v279_v30 = vrot.slane %v9145_v26, 1 }
  0x44   :  { %v9192_v42 = vsel %vm262_vm0, %v279_v30, %v281_v36  ;;  %v834_v36 = vld [vmem:[%s15710_s1 + $0x1b0] sm:$0xff] }
  0x45   :  { %7416 = vmatpush1.bf16.msra.mxu0 %v7415_v29  ;;  %v278_v29 = vrot.slane %v9140_v25, 1  ;;  %16300 = vst [vmem:[#allocation17_spill] sm:$0xff] %v9192_v42 }
  0x46   :  { %7417 = vmatprep.subr.bf16.mxu0 %v15718_v0 }
  0x49   :  { %7419 = vmatpush1.bf16.msra.mxu0 %v7418_v32  ;;  %v823_v32 = vld [vmem:[%s15710_s1 + $0x158] sm:$0xff] }
  0x4a   :  { %7420 = vmatprep.subr.bf16.mxu0 %v15718_v0  ;;  %v7457_v34 = vpack.c.bf16 %v823_v32, %v822_v31 }
  0x4d   :  { %7422 = vmatpush1.bf16.msra.mxu0 %v7421_v35  ;;  %v9169_v35 = vsel %vm262_vm0, %v278_v29, %v279_v30  ;;  %v9301_v29 = vld [vmem:[%s15709_s0 + $0xb0] sm:$0xff] }
  0x4e   :  { %7423 = vmatprep.subr.bf16.mxu0 %v15718_v0  ;;  %16299 = vst [vmem:[#allocation16_spill] sm:$0xff] %v9169_v35  ;;  %v299_v32 = vrot.slane %v9301_v29, 1 }
  0x51   :  { %7425 = vmatpush1.bf16.msra.mxu0 %v7424_v38  ;;  %v825_v38 = vld [vmem:[%s15710_s1 + $0x168] sm:$0xff] }
  0x52   :  { %7426 = vmatprep.subr.bf16.mxu0 %v15718_v0 }
  0x55   :  { %7428 = vmatpush1.bf16.msra.mxu0 %v7427_v41  ;;  %v7460_v41 = vpack.c.bf16 %v825_v38, %v824_v37  ;;  %v835_v37 = vld [vmem:[%s15710_s1 + $0x1b8] sm:$0xff] }
  0x56   :  { %7429 = vmatprep.subr.bf16.mxu0 %v15718_v0  ;;  %v7475_v38 = vpack.c.bf16 %v835_v37, %v834_v36 }
  0x59   :  { %7431 = vmatpush1.bf16.msra.mxu0 %v7430_v44  ;;  %v284_v44 = vrot.slane %v9187_v40, 1 }
  0x5a   :  { %7432 = vmatprep.subr.bf16.mxu0 %v15718_v0 }
  0x5b   :  { %v9211_v49 = vsel %vm262_vm0, %v283_v43, %v284_v44 }
  0x5c   :  { %16301 = vst [vmem:[#allocation18_spill] sm:$0xff] %v9211_v49 }
  0x5d   :  { %7434 = vmatpush1.bf16.msra.mxu0 %v7433_v47  ;;  %v9206_v47 = vld [vmem:[%s15709_s0 + $0x70] sm:$0x3] }
  0x5e   :  { %7435 = vmatprep.subr.bf16.mxu0 %v15718_v0 }
  0x61   :  { %7437 = vmatpush1.bf16.msra.mxu0 %v7436_v50  ;;  %v286_v50 = vrot.slane %v9206_v47, 1 }
  0x62   :  { %7438 = vmatprep.subr.bf16.mxu0 %v15718_v0 }
  0x63   :  { %v9234_v57 = vsel %vm262_vm0, %v284_v44, %v286_v50  ;;  %v9330_v44 = vld [vmem:[%s15709_s0 + $0xc0] sm:$0xff]  ;;  %v304_v50 = vrot.slane %v9335_v45, 1 }
  0x64   :  { %16302 = vst [vmem:[#allocation19_spill] sm:$0xff] %v9234_v57 }
  0x65   :  { %7440 = vmatpush1.bf16.msra.mxu0 %v7439_v54  ;;  %v9224_v54 = vld [vmem:[%s15709_s0 + $0x78] sm:$0xff] }
  0x66   :  { %7441 = vmatprep.subr.bf16.mxu0 %v15718_v0 }
  0x68   :  { %989 = vmatmul.mubr.f32.vlgmr.msra.gmra.mrb[0].mxu0 %v8947_v12 }
  0x69   :  { %7443 = vmatpush1.bf16.msra.mxu0 %v7442_v60  ;;  %993 = vmatprep.mubr.f32.mxu0 %v267_v61  ;;  %v288_v60 = vrot.slane %v9224_v54, 1  ;;  %v289_v61 = vrot.slane %v9229_v55, 1 }
  0x6a   :  { %7444 = vmatprep.subr.bf16.mxu0 %v15718_v0 }
  0x6b   :  { %v9276_v17 = vsel %vm262_vm0, %v289_v61, %v291_v6  ;;  %v9376_v6 = vld [vmem:[%s15709_s0 + $0xe8] sm:$0x3] }
  0x6c   :  { %994 = vmatmul.mubr.f32.gmra.mrb[2].mxu0 %v8952_v14  ;;  %16304 = vst [vmem:[#allocation21_spill] sm:$0xff] %v9276_v17 }
  0x6d   :  { %998 = vmatprep.mubr.f32.mxu0 %v9085_v5  ;;  %7446 = vmatpush1.bf16.msra.mxu0 %v7445_v4  ;;  %v9253_v4 = vsel %vm262_vm0, %v288_v60, %v289_v61  ;;  %v9359_v60 = vld [vmem:[%s15709_s0 + $0xd8] sm:$0xff]  ;;  %v9364_v61 = vld [vmem:[%s15709_s0 + $0xe0] sm:$0xff]  ;;  %v9657_v5 = vld [vmem:[%s15709_s0 + $0x1f0] sm:$0x3] }
  0x6e   :  { %7447 = vmatprep.subr.bf16.mxu0 %v15718_v0  ;;  %16303 = vst [vmem:[#allocation20_spill] sm:$0xff] %v9253_v4  ;;  %v308_v63 = vrot.slane %v9359_v60, 1  ;;  %16335 = vst [vmem:[#allocation50_spill] sm:$0xff] %v9657_v5 }
  0x70   :  { %999 = vmatmul.mubr.f32.gmra.mrb[4].mxu0 %v9059_v58 }
  0x71   :  { %1003 = vmatprep.mubr.f32.mxu0 %v9108_v13  ;;  %7449 = vmatpush1.bf16.msra.mxu0 %v7448_v11  ;;  %v9266_v11 = vld [vmem:[%s15709_s0 + $0x90] sm:$0xff]  ;;  %v9630_v13 = vld [vmem:[%s15709_s0 + $0x1d8] sm:$0x3] }
  0x72   :  { %7450 = vmatprep.subr.bf16.mxu0 %v15718_v0  ;;  %v293_v18 = vrot.slane %v9266_v11, 1  ;;  %16331 = vst [vmem:[#allocation46_spill] sm:$0xff] %v9630_v13 }
  0x74   :  { %1004 = vmatmul.mubr.f32.gmra.mrb[6].mxu0 %v9064_v59 }
  0x75   :  { %1008 = vmatprep.mubr.f32.mxu0 %v9127_v21  ;;  %7452 = vmatpush1.bf16.msra.mxu0 %v7451_v20  ;;  %v294_v20 = vrot.slane %v9271_v15, 1 }
  0x76   :  { %7453 = vmatprep.subr.bf16.mxu0 %v15718_v0 }
  0x77   :  { %v9289_v23 = vsel %vm262_vm0, %v293_v18, %v294_v20  ;;  %v9306_v30 = vsel %vm262_vm0, %v294_v20, %v296_v24  ;;  %v311_v20 = vrot.slane %v9376_v6, 1  ;;  %v9393_v24 = vld [vmem:[%s15709_s0 + $0xf0] sm:$0xff] }
  0x78   :  { %1009 = vmatmul.mubr.f32.gmra.mrb[8].mxu0 %v9098_v9  ;;  %16305 = vst [vmem:[#allocation22_spill] sm:$0xff] %v9289_v23  ;;  %16306 = vst [vmem:[#allocation23_spill] sm:$0xff] %v9306_v30  ;;  %v313_v36 = vrot.slane %v9393_v24, 1 }
  0x79   :  { %1013 = vmatprep.mubr.f32.mxu0 %v9150_v28  ;;  %7455 = vmatpush1.bf16.msra.mxu0 %v7454_v27  ;;  %v9296_v27 = vld [vmem:[%s15709_s0 + $0xa8] sm:$0xff]  ;;  %v9616_v28 = vld [vmem:[%s15709_s0 + $0x1d0] sm:$0xff] }
  0x7a   :  { %7456 = vmatprep.subr.bf16.mxu0 %v15718_v0  ;;  %v298_v31 = vrot.slane %v9296_v27, 1  ;;  %16329 = vst [vmem:[#allocation45_spill] sm:$0xff] %v9616_v28 }
  0x7c   :  { %1014 = vmatmul.mubr.f32.gmra.mrb[10].mxu0 %v9103_v10 }
  0x7d   :  { %1018 = vmatprep.mubr.f32.mxu0 %v9169_v35  ;;  %7458 = vmatpush1.bf16.msra.mxu0 %v7457_v34  ;;  %v9313_v34 = vld [vmem:[%s15709_s0 + $0xb8] sm:$0x3]  ;;  %v9611_v35 = vld [vmem:[%s15709_s0 + $0x1c8] sm:$0xff] }
  0x7e   :  { %7459 = vmatprep.subr.bf16.mxu0 %v15718_v0  ;;  %v301_v43 = vrot.slane %v9313_v34, 1  ;;  %16328 = vst [vmem:[#allocation44_spill] sm:$0xff] %v9611_v35 }
  0x80   :  { %1019 = vmatmul.mubr.f32.gmra.mrb[12].mxu0 %v9140_v25  ;;  %v9341_v46 = vsel %vm262_vm0, %v299_v32, %v301_v43 }
  0x81   :  { %1023 = vmatprep.mubr.f32.mxu0 %v9192_v42  ;;  %7461 = vmatpush1.bf16.msra.mxu0 %v7460_v41  ;;  %v9324_v41 = vsel %vm262_vm0, %v298_v31, %v299_v32  ;;  %16308 = vst [vmem:[#allocation25_spill] sm:$0xff] %v9341_v46  ;;  %v9398_v31 = vld [vmem:[%s15709_s0 + $0xf8] sm:$0xff] }
  0x82   :  { %7462 = vmatprep.subr.bf16.mxu0 %v15718_v0  ;;  %16307 = vst [vmem:[#allocation24_spill] sm:$0xff] %v9324_v41  ;;  %v314_v37 = vrot.slane %v9398_v31, 1  ;;  %v9587_v42 = vld [vmem:[%s15709_s0 + $0x1b8] sm:$0xff] }
  0x83   :  { %16325 = vst [vmem:[#allocation41_spill] sm:$0xff] %v9587_v42 }
  0x84   :  { %1024 = vmatmul.mubr.f32.gmra.mrb[14].mxu0 %v9145_v26  ;;  %v9416_v43 = vsel %vm262_vm0, %v313_v36, %v314_v37 }
  0x85   :  { %1028 = vmatprep.mubr.f32.mxu0 %v9211_v49  ;;  %7464 = vmatpush1.bf16.msra.mxu0 %v7463_v48  ;;  %v303_v48 = vrot.slane %v9330_v44, 1  ;;  %16313 = vst [vmem:[#allocation30_spill] sm:$0xff] %v9416_v43  ;;  %v9582_v49 = vld [vmem:[%s15709_s0 + $0x1b0] sm:$0xff] }
  0x86   :  { %7465 = vmatprep.subr.bf16.mxu0 %v15718_v0 }
  0x87   :  { %v9353_v52 = vsel %vm262_vm0, %v303_v48, %v304_v50 }
  0x88   :  { %1029 = vmatmul.mubr.f32.gmra.mrb[16].mxu0 %v9182_v39  ;;  %16309 = vst [vmem:[#allocation26_spill] sm:$0xff] %v9353_v52 }
  0x89   :  { %1033 = vmatprep.mubr.f32.mxu0 %v9234_v57  ;;  %7467 = vmatpush1.bf16.msra.mxu0 %v7466_v56  ;;  %v306_v56 = vrot.slane %v9348_v51, 1 }
  0x8a   :  { %7468 = vmatprep.subr.bf16.mxu0 %v15718_v0 }
  0x8b   :  { %v9369_v62 = vsel %vm262_vm0, %v304_v50, %v306_v56  ;;  %v9422_v50 = vld [vmem:[%s15709_s0 + $0x108] sm:$0xff]  ;;  %v9427_v56 = vld [vmem:[%s15709_s0 + $0x110] sm:$0xff] }
  0x8c   :  { %1034 = vmatmul.mubr.f32.gmra.mrb[18].mxu0 %v9187_v40  ;;  %16310 = vst [vmem:[#allocation27_spill] sm:$0xff] %v9369_v62 }
  0x8d   :  { %1038 = vmatprep.mubr.f32.mxu0 %v9253_v4  ;;  %7470 = vmatpush1.bf16.msra.mxu0 %v7469_v2  ;;  %v309_v2 = vrot.slane %v9364_v61, 1  ;;  %v842_v4 = vld [vmem:[%s15710_s1 + $0x1f0] sm:$0xff] }
  0x8e   :  { %7471 = vmatprep.subr.bf16.mxu0 %v15718_v0 }
  0x8f   :  { %v9387_v18 = vsel %vm262_vm0, %v308_v63, %v309_v2  ;;  %v9404_v32 = vsel %vm262_vm0, %v309_v2, %v311_v20  ;;  %v318_v2 = vrot.slane %v9422_v50, 1  ;;  %v839_v20 = vld [vmem:[%s15710_s1 + $0x1d8] sm:$0xff] }
  0x90   :  { %1039 = vmatmul.mubr.f32.gmra.mrb[20].mxu0 %v9224_v54  ;;  %16311 = vst [vmem:[#allocation28_spill] sm:$0xff] %v9387_v18  ;;  %16312 = vst [vmem:[#allocation29_spill] sm:$0xff] %v9404_v32 }
  0x91   :  { %1043 = vmatprep.mubr.f32.mxu0 %v9276_v17  ;;  %7473 = vmatpush1.bf16.msra.mxu0 %v7472_v16  ;;  %v7478_v16 = vpack.c.bf16 %v837_v8, %v836_v7  ;;  %v319_v7 = vrot.slane %v9427_v56, 1  ;;  %v9439_v8 = vld [vmem:[%s15709_s0 + $0x118] sm:$0x3] }
  0x92   :  { %7474 = vmatprep.subr.bf16.mxu0 %v15718_v0  ;;  %v9565_v17 = vld [vmem:[%s15709_s0 + $0x178] sm:$0x3] }
  0x93   :  { %v341_v57 = vrot.slane %v9565_v17, 1 }
  0x94   :  { %1044 = vmatmul.mubr.f32.gmra.mrb[22].mxu0 %v9229_v55 }
  0x95   :  { %1048 = vmatprep.mubr.f32.mxu0 %v9289_v23  ;;  %7476 = vmatpush1.bf16.msra.mxu0 %v7475_v38  ;;  %v9411_v38 = vld [vmem:[%s15709_s0 + $0x100] sm:$0x3] }
  0x96   :  { %7477 = vmatprep.subr.bf16.mxu0 %v15718_v0  ;;  %v316_v48 = vrot.slane %v9411_v38, 1 }
  0x98   :  { %1049 = vmatmul.mubr.f32.gmra.mrb[24].mxu0 %v9266_v11  ;;  %v9432_v63 = vsel %vm262_vm0, %v314_v37, %v316_v48  ;;  %v9450_v37 = vsel %vm262_vm0, %v318_v2, %v319_v7  ;;  %v321_v48 = vrot.slane %v9439_v8, 1 }
  0x99   :  { %1053 = vmatprep.mubr.f32.mxu0 %v9306_v30  ;;  %7479 = vmatpush1.bf16.msra.mxu0 %v7478_v16  ;;  %16314 = vst [vmem:[#allocation31_spill] sm:$0xff] %v9432_v63  ;;  %v838_v16 = vld [vmem:[%s15710_s1 + $0x1d0] sm:$0xff]  ;;  %16315 = vst [vmem:[#allocation32_spill] sm:$0xff] %v9450_v37  ;;  %v9524_v30 = vld [vmem:[%s15709_s0 + $0x158] sm:$0xff] }
  0x9a   :  { %7480 = vmatprep.subr.bf16.mxu0 %v15718_v0  ;;  %v7481_v36 = vpack.c.bf16 %v839_v20, %v838_v16  ;;  %v9456_v0 = vld [vmem:[%s15709_s0 + $0x120] sm:$0xff]  ;;  %v9467_v2 = vsel %vm262_vm0, %v319_v7, %v321_v48  ;;  %v9485_v7 = vld [vmem:[%s15709_s0 + $0x138] sm:$0xff] }
  0x9b   :  { %16317 = vst [vmem:[#allocation33_spill] sm:$0xff] %v9467_v2  ;;  %v323_v16 = vrot.slane %v9456_v0, 1  ;;  %v9490_v48 = vld [vmem:[%s15709_s0 + $0x140] sm:$0xff] }
  0x9c   :  { %1054 = vmatmul.mubr.f32.gmra.mrb[26].mxu0 %v9271_v15 }
  0x9d   :  { %1058 = vmatprep.mubr.f32.mxu0 %v9324_v41  ;;  %7482 = vmatpush1.bf16.msra.mxu0 %v7481_v36  ;;  %v9519_v41 = vld [vmem:[%s15709_s0 + $0x150] sm:$0xff] }
  0xa0   :  { %1059 = vmatmul.mubr.f32.gmra.mrb[28].mxu0 %v9296_v27 }
  0xa1   :  { %1063 = vmatprep.mubr.f32.mxu0 %v9341_v46 }
  0xa4   :  { %1064 = vmatmul.mubr.f32.gmra.mrb[30].mxu0 %v9301_v29 }
  0xa5   :  { %1068 = vmatprep.mubr.f32.mxu0 %v9353_v52  ;;  %v840_v52 = vld [vmem:[%s15710_s1 + $0x1e0] sm:$0xff] }
  0xa8   :  { %1069 = vmatmul.mubr.f32.gmra.mrb[32].mxu0 %v9330_v44 }
  0xa9   :  { %1073 = vmatprep.mubr.f32.mxu0 %v9369_v62  ;;  %v9502_v62 = vld [vmem:[%s15709_s0 + $0x148] sm:$0x3] }
  0xaa   :  { %v331_v46 = vrot.slane %v9502_v62, 1 }
  0xac   :  { %1074 = vmatmul.mubr.f32.gmra.mrb[34].mxu0 %v9335_v45 }
  0xad   :  { %1078 = vmatprep.mubr.f32.mxu0 %v9387_v18  ;;  %v329_v18 = vrot.slane %v9490_v48, 1 }
  0xb0   :  { %1079 = vmatmul.mubr.f32.gmra.mrb[36].mxu0 %v9359_v60 }
  0xb1   :  { %1083 = vmatprep.mubr.f32.mxu0 %v9404_v32  ;;  %v9474_v32 = vld [vmem:[%s15709_s0 + $0x130] sm:$0x3] }
  0xb4   :  { %1084 = vmatmul.mubr.f32.gmra.mrb[38].mxu0 %v9364_v61 }
  0xb5   :  { %1088 = vmatprep.mubr.f32.mxu0 %v9416_v43  ;;  %v9461_v43 = vld [vmem:[%s15709_s0 + $0x128] sm:$0xff] }
  0xb6   :  { %v324_v20 = vrot.slane %v9461_v43, 1 }
  0xb8   :  { %1089 = vmatmul.mubr.f32.gmra.mrb[40].mxu0 %v9393_v24  ;;  %v9479_v36 = vsel %vm262_vm0, %v323_v16, %v324_v20  ;;  %v328_v16 = vrot.slane %v9485_v7, 1 }
  0xb9   :  { %1093 = vmatprep.mubr.f32.mxu0 %v9432_v63  ;;  %v16316_v63 = vmov 0.0|0.0   ;;  %16318 = vst [vmem:[#allocation34_spill] sm:$0xff] %v9479_v36 }
  0xba   :  { %7483 = vmatprep.subr.bf16.mxu0 %v16316_v63 }
  0xbc   :  { %1094 = vmatmul.mubr.f32.gmra.mrb[42].mxu0 %v9398_v31 }
  0xbd   :  { %1098 = vmatprep.mubr.f32.mxu0 %v9450_v37  ;;  %v326_v37 = vrot.slane %v9474_v32, 1 }
  0xc0   :  { %1099 = vmatmul.mubr.f32.gmra.mrb[44].mxu0 %v9422_v50 }
  0xc1   :  { %1103 = vmatprep.mubr.f32.mxu0 %v9467_v2  ;;  %v9495_v2 = vsel %vm262_vm0, %v324_v20, %v326_v37  ;;  %v841_v37 = vld [vmem:[%s15710_s1 + $0x1e8] sm:$0xff] }
  0xc2   :  { %16319 = vst [vmem:[#allocation35_spill] sm:$0xff] %v9495_v2  ;;  %v7484_v20 = vpack.c.bf16 %v841_v37, %v840_v52  ;;  %v9530_v52 = vsel %vm262_vm0, %v329_v18, %v331_v46  ;;  %v334_v37 = vrot.slane %v9524_v30, 1  ;;  %v9548_v46 = vld [vmem:[%s15709_s0 + $0x168] sm:$0xff] }
  0xc3   :  { %16321 = vst [vmem:[#allocation37_spill] sm:$0xff] %v9530_v52 }
  0xc4   :  { %1104 = vmatmul.mubr.f32.gmra.mrb[46].mxu0 %v9427_v56 }
  0xc5   :  { %1108 = vmatprep.mubr.f32.mxu0 %v9479_v36  ;;  %v9513_v36 = vsel %vm262_vm0, %v328_v16, %v329_v18  ;;  %7485 = vmatpush1.bf16.msra.mxu0 %v7484_v20  ;;  %v333_v16 = vrot.slane %v9519_v41, 1  ;;  %v9553_v18 = vld [vmem:[%s15709_s0 + $0x170] sm:$0xff] }
  0xc6   :  { %16320 = vst [vmem:[#allocation36_spill] sm:$0xff] %v9513_v36  ;;  %7486 = vmatprep.subr.bf16.mxu0 %v16316_v63  ;;  %v339_v23 = vrot.slane %v9553_v18, 1 }
  0xc7   :  { %v9542_v20 = vsel %vm262_vm0, %v333_v16, %v334_v37  ;;  %v338_v16 = vrot.slane %v9548_v46, 1 }
  0xc8   :  { %1109 = vmatmul.mubr.f32.gmra.mrb[48].mxu0 %v9456_v0  ;;  %16322 = vst [vmem:[#allocation38_spill] sm:$0xff] %v9542_v20 }
  0xc9   :  { %1113 = vmatprep.mubr.f32.mxu0 %v9495_v2  ;;  %v9537_v2 = vld [vmem:[%s15709_s0 + $0x160] sm:$0x3] }
  0xcc   :  { %1114 = vmatmul.mubr.f32.gmra.mrb[50].mxu0 %v9461_v43 }
  0xcd   :  { %1118 = vmatprep.mubr.f32.mxu0 %v9513_v36  ;;  %v336_v36 = vrot.slane %v9537_v2, 1 }
  0xd0   :  { %1119 = vmatmul.mubr.f32.gmra.mrb[52].mxu0 %v9485_v7 }
  0xd1   :  { %1123 = vmatprep.mubr.f32.mxu0 %v9530_v52  ;;  %v9558_v52 = vsel %vm262_vm0, %v334_v37, %v336_v36  ;;  %v843_v36 = vld [vmem:[%s15710_s1 + $0x1f8] sm:$0xff] }
  0xd2   :  { %16323 = vst [vmem:[#allocation39_spill] sm:$0xff] %v9558_v52  ;;  %v7487_v37 = vpack.c.bf16 %v843_v36, %v842_v4  ;;  %v9593_v4 = vsel %vm262_vm0, %v339_v23, %v341_v57  ;;  %v344_v36 = vrot.slane %v9587_v42, 1 }
  0xd3   :  { %16326 = vst [vmem:[#allocation42_spill] sm:$0xff] %v9593_v4 }
  0xd4   :  { %1124 = vmatmul.mubr.f32.gmra.mrb[54].mxu0 %v9490_v48 }
  0xd5   :  { %1128 = vmatprep.mubr.f32.mxu0 %v9542_v20  ;;  %v9576_v20 = vsel %vm262_vm0, %v338_v16, %v339_v23  ;;  %7488 = vmatpush1.bf16.msra.mxu0 %v7487_v37  ;;  %v343_v16 = vrot.slane %v9582_v49, 1  ;;  %v488_v37 = vrot.slane %v8947_v12, 2 }
  0xd6   :  { %16324 = vst [vmem:[#allocation40_spill] sm:$0xff] %v9576_v20  ;;  %7489 = vmatprep.subr.bf16.mxu0 %v16316_v63 }
  0xd7   :  { %v345_v57 = vsel %vm262_vm0, %v343_v16, %v344_v36  ;;  %v348_v16 = vrot.slane %v9611_v35, 1 }
  0xd8   :  { %1129 = vmatmul.mubr.f32.gmra.mrb[56].mxu0 %v9519_v41 }
  0xd9   :  { %1133 = vmatprep.mubr.f32.mxu0 %v9558_v52  ;;  %v9600_v52 = vld [vmem:[%s15709_s0 + $0x1c0] sm:$0x3] }
  0xda   :  { %16327 = vst [vmem:[#allocation43_spill] sm:$0xff] %v9600_v52  ;;  %v346_v23 = vrot.slane %v9600_v52, 1 }
  0xdc   :  { %1134 = vmatmul.mubr.f32.gmra.mrb[58].mxu0 %v9524_v30  ;;  %v347_v12 = vsel %vm262_vm0, %v344_v36, %v346_v23  ;;  %v351_v36 = vrot.slane %v9630_v13, 1  ;;  %v9640_v23 = vld [vmem:[%s15709_s0 + $0x1e0] sm:$0xff] }
  0xdd   :  { %1138 = vmatprep.mubr.f32.mxu0 %v9576_v20  ;;  %v349_v20 = vrot.slane %v9616_v28, 1 }
  0xe0   :  { %1139 = vmatmul.mubr.f32.gmra.mrb[60].mxu0 %v9548_v46 }
  0xe1   :  { %1143 = vmatprep.mubr.f32.mxu0 %v9593_v4  ;;  %v16330_v4 = vrot.slane %v8952_v14, 2 }
  0xe3   :  { %v9625_v21 = vsel %vm487_vm1, %v488_v37, %v16330_v4  ;;  %v9645_v4 = vld [vmem:[%s15709_s0 + $0x1e8] sm:$0xff]  ;;  %v9650_v37 = vsel %vm262_vm0, %v349_v20, %v351_v36  ;;  %v9673_v36 = vld [vmem:[%s15709_s0 + $0x200] sm:$0xff] }
  0xe4   :  { %1144 = vmatmul.mubr.f32.gmra.mrb[62].mxu0 %v9553_v18  ;;  %16333 = vst [vmem:[#allocation48_spill] sm:$0xff] %v9645_v4  ;;  %16334 = vst [vmem:[#allocation49_spill] sm:$0xff] %v9650_v37 }
  0xe5   :  { %1148 = vmatprep.mubr.f32.mxu0 %v345_v57  ;;  %v9634_v57 = vsel %vm262_vm0, %v348_v16, %v349_v20  ;;  %v354_v16 = vrot.slane %v9645_v4, 1  ;;  %v9668_v20 = vld [vmem:[%s15709_s0 + $0x1f8] sm:$0xff]  ;;  %16338 = vst [vmem:[#allocation53_spill] sm:$0xff] %v9673_v36 }
  0xe6   :  { %16332 = vst [vmem:[#allocation47_spill] sm:$0xff] %v9634_v57  ;;  %16337 = vst [vmem:[#allocation52_spill] sm:$0xff] %v9668_v20  ;;  %v358_v52 = vrot.slane %v9668_v20, 1 }
  0xe8   :  { %1149 = vmatmul.mubr.f32.gmra.mrb[64].mxu0 %v9582_v49 }
  0xe9   :  { %1153 = vmatprep.mubr.f32.mxu0 %v347_v12  ;;  %v353_v12 = vrot.slane %v9640_v23, 1 }
  0xeb   :  { %v9662_v13 = vsel %vm262_vm0, %v353_v12, %v354_v16  ;;  %v15790_v12 = vrot.slane %v9103_v10, 2 }
  0xec   :  { %1154 = vmatmul.mubr.f32.gmra.mrb[66].mxu0 %v9587_v42  ;;  %16336 = vst [vmem:[#allocation51_spill] sm:$0xff] %v9662_v13  ;;  %v9687_v42 = vld [vmem:[%s15709_s0 + $0x208] sm:$0x3] }
  0xed   :  { %1158 = vmatprep.mubr.f32.mxu0 %v9634_v57  ;;  %v356_v57 = vrot.slane %v9657_v5, 1  ;;  %16340 = vst [vmem:[#allocation55_spill] sm:$0xff] %v9687_v42 }
  0xef   :  { %v9680_v5 = vsel %vm262_vm0, %v354_v16, %v356_v57  ;;  %v361_v16 = vrot.slane %v9687_v42, 1  ;;  %v9721_v42 = vld [vmem:[%s15709_s0 + $0x220] sm:$0x3] }
  0xf0   :  { %1159 = vmatmul.mubr.f32.gmra.mrb[68].mxu0 %v9611_v35  ;;  %16339 = vst [vmem:[#allocation54_spill] sm:$0xff] %v9680_v5  ;;  %v359_v35 = vrot.slane %v9673_v36, 1  ;;  %16345 = vst [vmem:[#allocation60_spill] sm:$0xff] %v9721_v42 }
  0xf1   :  { %1163 = vmatprep.mubr.f32.mxu0 %v9650_v37  ;;  %v498_v37 = vrot.slane %v9098_v9, 2 }
  0xf2   :  { %v9698_v57 = vsel %vm262_vm0, %v358_v52, %v359_v35 }
  0xf3   :  { %16341 = vst [vmem:[#allocation56_spill] sm:$0xff] %v9698_v57 }
  0xf4   :  { %1164 = vmatmul.mubr.f32.gmra.mrb[70].mxu0 %v9616_v28  ;;  %v9704_v28 = vld [vmem:[%s15709_s0 + $0x210] sm:$0xff] }
  0xf5   :  { %1168 = vmatprep.mubr.f32.mxu0 %v9662_v13  ;;  %v9692_v13 = vsel %vm487_vm1, %v498_v37, %v15790_v12  ;;  %16342 = vst [vmem:[#allocation57_spill] sm:$0xff] %v9704_v28  ;;  %v9709_v37 = vld [vmem:[%s15709_s0 + $0x218] sm:$0xff]  ;;  %v9714_v12 = vsel %vm262_vm0, %v359_v35, %v361_v16  ;;  %v363_v52 = vrot.slane %v9704_v28, 1  ;;  %v9732_v35 = vld [vmem:[%s15709_s0 + $0x228] sm:$0xff]  ;;  %v9737_v16 = vld [vmem:[%s15709_s0 + $0x230] sm:$0xff] }
  0xf6   :  { %7169 = vmatprep.mubr.f32.mxu1 %v9692_v13  ;;  %16343 = vst [vmem:[#allocation58_spill] sm:$0xff] %v9709_v37  ;;  %16344 = vst [vmem:[#allocation59_spill] sm:$0xff] %v9714_v12 }
  0xf7   :  { %16347 = vst [vmem:[#allocation62_spill] sm:$0xff] %v9732_v35  ;;  %16348 = vst [vmem:[#allocation63_spill] sm:$0xff] %v9737_v16 }
  0xf8   :  { %1169 = vmatmul.mubr.f32.gmra.mrb[72].mxu0 %v9640_v23 }
  0xf9   :  { %1173 = vmatprep.mubr.f32.mxu0 %v9680_v5  ;;  %v364_v5 = vrot.slane %v9709_v37, 1 }
  0xfc   :  { %1174 = vmatmul.mubr.f32.gmra.mrb[74].mxu0 %v9645_v4  ;;  %v9726_v4 = vsel %vm262_vm0, %v363_v52, %v364_v5  ;;  %v368_v52 = vrot.slane %v9732_v35, 1 }
  0xfd   :  { %1178 = vmatprep.mubr.f32.mxu0 %v9698_v57  ;;  %16346 = vst [vmem:[#allocation61_spill] sm:$0xff] %v9726_v4  ;;  %v366_v57 = vrot.slane %v9721_v42, 1  ;;  %v369_v42 = vrot.slane %v9737_v16, 1 }
 0x100   :  { %1179 = vmatmul.mubr.f32.gmra.mrb[76].mxu0 %v9668_v20  ;;  %v9749_v20 = vld [vmem:[%s15709_s0 + $0x238] sm:$0x3] }
 0x101   :  { %1183 = vmatprep.mubr.f32.mxu0 %v9714_v12  ;;  %v9742_v12 = vsel %vm262_vm0, %v364_v5, %v366_v57  ;;  %16350 = vst [vmem:[#allocation65_spill] sm:$0xff] %v9749_v20  ;;  %v9760_v5 = vld [vmem:[%s15709_s0 + $0x240] sm:$0xff]  ;;  %v9765_v57 = vld [vmem:[%s15709_s0 + $0x248] sm:$0xff] }
 0x102   :  { %16349 = vst [vmem:[#allocation64_spill] sm:$0xff] %v9742_v12  ;;  %16352 = vst [vmem:[#allocation67_spill] sm:$0xff] %v9760_v5 }
 0x103   :  { %16353 = vst [vmem:[#allocation68_spill] sm:$0xff] %v9765_v57 }
 0x104   :  { %1184 = vmatmul.mubr.f32.gmra.mrb[78].mxu0 %v9673_v36  ;;  %v9754_v36 = vsel %vm262_vm0, %v368_v52, %v369_v42  ;;  %v373_v52 = vrot.slane %v9760_v5, 1 }
 0x105   :  { %1188 = vmatprep.mubr.f32.mxu0 %v9726_v4  ;;  %16351 = vst [vmem:[#allocation66_spill] sm:$0xff] %v9754_v36  ;;  %v371_v4 = vrot.slane %v9749_v20, 1  ;;  %v374_v20 = vrot.slane %v9765_v57, 1 }
 0x108   :  { %1189 = vmatmul.mubr.f32.gmra.mrb[80].mxu0 %v9704_v28  ;;  %v9777_v28 = vld [vmem:[%s15709_s0 + $0x250] sm:$0x3] }
 0x109   :  { %1193 = vmatprep.mubr.f32.mxu0 %v9742_v12  ;;  %v9770_v12 = vsel %vm262_vm0, %v369_v42, %v371_v4  ;;  %16355 = vst [vmem:[#allocation70_spill] sm:$0xff] %v9777_v28  ;;  %v9788_v42 = vld [vmem:[%s15709_s0 + $0x258] sm:$0xff]  ;;  %v9793_v4 = vld [vmem:[%s15709_s0 + $0x260] sm:$0xff] }
 0x10a   :  { %16354 = vst [vmem:[#allocation69_spill] sm:$0xff] %v9770_v12  ;;  %16357 = vst [vmem:[#allocation72_spill] sm:$0xff] %v9788_v42 }
 0x10b   :  { %16358 = vst [vmem:[#allocation73_spill] sm:$0xff] %v9793_v4 }
 0x10c   :  { %1194 = vmatmul.mubr.f32.gmra.mrb[82].mxu0 %v9709_v37  ;;  %v9782_v37 = vsel %vm262_vm0, %v373_v52, %v374_v20  ;;  %v378_v52 = vrot.slane %v9788_v42, 1 }
 0x10d   :  { %1198 = vmatprep.mubr.f32.mxu0 %v9754_v36  ;;  %16356 = vst [vmem:[#allocation71_spill] sm:$0xff] %v9782_v37  ;;  %v376_v36 = vrot.slane %v9777_v28, 1  ;;  %v379_v28 = vrot.slane %v9793_v4, 1 }
 0x110   :  { %1199 = vmatmul.mubr.f32.gmra.mrb[84].mxu0 %v9732_v35  ;;  %v9805_v35 = vld [vmem:[%s15709_s0 + $0x268] sm:$0x3] }
 0x111   :  { %1203 = vmatprep.mubr.f32.mxu0 %v9770_v12  ;;  %v9798_v12 = vsel %vm262_vm0, %v374_v20, %v376_v36  ;;  %16360 = vst [vmem:[#allocation75_spill] sm:$0xff] %v9805_v35  ;;  %v9816_v20 = vld [vmem:[%s15709_s0 + $0x270] sm:$0xff]  ;;  %v9821_v36 = vld [vmem:[%s15709_s0 + $0x278] sm:$0xff] }
 0x112   :  { %16359 = vst [vmem:[#allocation74_spill] sm:$0xff] %v9798_v12  ;;  %16362 = vst [vmem:[#allocation77_spill] sm:$0xff] %v9816_v20 }
 0x113   :  { %16363 = vst [vmem:[#allocation78_spill] sm:$0xff] %v9821_v36 }
 0x114   :  { %1204 = vmatmul.mubr.f32.gmra.mrb[86].mxu0 %v9737_v16  ;;  %v9810_v16 = vsel %vm262_vm0, %v378_v52, %v379_v28  ;;  %v383_v52 = vrot.slane %v9816_v20, 1 }
 0x115   :  { %1208 = vmatprep.mubr.f32.mxu0 %v9782_v37  ;;  %16361 = vst [vmem:[#allocation76_spill] sm:$0xff] %v9810_v16  ;;  %v381_v37 = vrot.slane %v9805_v35, 1  ;;  %v384_v35 = vrot.slane %v9821_v36, 1 }
 0x118   :  { %1209 = vmatmul.mubr.f32.gmra.mrb[88].mxu0 %v9760_v5  ;;  %v9833_v5 = vld [vmem:[%s15709_s0 + $0x280] sm:$0x3] }
 0x119   :  { %1213 = vmatprep.mubr.f32.mxu0 %v9798_v12  ;;  %v9826_v12 = vsel %vm262_vm0, %v379_v28, %v381_v37  ;;  %16365 = vst [vmem:[#allocation80_spill] sm:$0xff] %v9833_v5  ;;  %v9844_v28 = vld [vmem:[%s15709_s0 + $0x288] sm:$0xff]  ;;  %v9849_v37 = vld [vmem:[%s15709_s0 + $0x290] sm:$0xff] }
 0x11a   :  { %16364 = vst [vmem:[#allocation79_spill] sm:$0xff] %v9826_v12  ;;  %16367 = vst [vmem:[#allocation82_spill] sm:$0xff] %v9844_v28 }
 0x11b   :  { %16368 = vst [vmem:[#allocation83_spill] sm:$0xff] %v9849_v37 }
 0x11c   :  { %1214 = vmatmul.mubr.f32.gmra.mrb[90].mxu0 %v9765_v57  ;;  %v9838_v57 = vsel %vm262_vm0, %v383_v52, %v384_v35  ;;  %v388_v52 = vrot.slane %v9844_v28, 1 }
 0x11d   :  { %1218 = vmatprep.mubr.f32.mxu0 %v9810_v16  ;;  %16366 = vst [vmem:[#allocation81_spill] sm:$0xff] %v9838_v57  ;;  %v386_v16 = vrot.slane %v9833_v5, 1  ;;  %v389_v5 = vrot.slane %v9849_v37, 1 }
 0x120   :  { %1219 = vmatmul.mubr.f32.gmra.mrb[92].mxu0 %v9788_v42  ;;  %v9861_v42 = vld [vmem:[%s15709_s0 + $0x298] sm:$0x3] }
 0x121   :  { %1223 = vmatprep.mubr.f32.mxu0 %v9826_v12  ;;  %v9854_v12 = vsel %vm262_vm0, %v384_v35, %v386_v16  ;;  %16370 = vst [vmem:[#allocation85_spill] sm:$0xff] %v9861_v42  ;;  %v9872_v35 = vld [vmem:[%s15709_s0 + $0x2a0] sm:$0xff]  ;;  %v9877_v16 = vld [vmem:[%s15709_s0 + $0x2a8] sm:$0xff] }
 0x122   :  { %16369 = vst [vmem:[#allocation84_spill] sm:$0xff] %v9854_v12  ;;  %16372 = vst [vmem:[#allocation87_spill] sm:$0xff] %v9872_v35 }
 0x123   :  { %16373 = vst [vmem:[#allocation88_spill] sm:$0xff] %v9877_v16 }
 0x124   :  { %1224 = vmatmul.mubr.f32.gmra.mrb[94].mxu0 %v9793_v4  ;;  %v9866_v4 = vsel %vm262_vm0, %v388_v52, %v389_v5  ;;  %v393_v52 = vrot.slane %v9872_v35, 1 }
 0x125   :  { %1228 = vmatprep.mubr.f32.mxu0 %v9838_v57  ;;  %16371 = vst [vmem:[#allocation86_spill] sm:$0xff] %v9866_v4  ;;  %v391_v57 = vrot.slane %v9861_v42, 1  ;;  %v394_v42 = vrot.slane %v9877_v16, 1 }
 0x128   :  { %1229 = vmatmul.mubr.f32.gmra.mrb[96].mxu0 %v9816_v20  ;;  %v9889_v20 = vld [vmem:[%s15709_s0 + $0x2b0] sm:$0x3] }
 0x129   :  { %1233 = vmatprep.mubr.f32.mxu0 %v9854_v12  ;;  %v9882_v12 = vsel %vm262_vm0, %v389_v5, %v391_v57  ;;  %16375 = vst [vmem:[#allocation90_spill] sm:$0xff] %v9889_v20  ;;  %v9900_v5 = vld [vmem:[%s15709_s0 + $0x2b8] sm:$0xff]  ;;  %v9905_v57 = vld [vmem:[%s15709_s0 + $0x2c0] sm:$0xff] }
 0x12a   :  { %16374 = vst [vmem:[#allocation89_spill] sm:$0xff] %v9882_v12  ;;  %16377 = vst [vmem:[#allocation92_spill] sm:$0xff] %v9900_v5 }
 0x12b   :  { %16378 = vst [vmem:[#allocation93_spill] sm:$0xff] %v9905_v57 }
 0x12c   :  { %1234 = vmatmul.mubr.f32.gmra.mrb[98].mxu0 %v9821_v36  ;;  %v9894_v36 = vsel %vm262_vm0, %v393_v52, %v394_v42  ;;  %v398_v52 = vrot.slane %v9900_v5, 1 }
 0x12d   :  { %1238 = vmatprep.mubr.f32.mxu0 %v9866_v4  ;;  %16376 = vst [vmem:[#allocation91_spill] sm:$0xff] %v9894_v36  ;;  %v396_v4 = vrot.slane %v9889_v20, 1  ;;  %v399_v20 = vrot.slane %v9905_v57, 1 }
 0x130   :  { %1239 = vmatmul.mubr.f32.gmra.mrb[100].mxu0 %v9844_v28  ;;  %v9917_v28 = vld [vmem:[%s15709_s0 + $0x2c8] sm:$0x3] }
 0x131   :  { %1243 = vmatprep.mubr.f32.mxu0 %v9882_v12  ;;  %v9910_v12 = vsel %vm262_vm0, %v394_v42, %v396_v4  ;;  %16380 = vst [vmem:[#allocation95_spill] sm:$0xff] %v9917_v28  ;;  %v9928_v42 = vld [vmem:[%s15709_s0 + $0x2d0] sm:$0xff]  ;;  %v9933_v4 = vld [vmem:[%s15709_s0 + $0x2d8] sm:$0xff] }
 0x132   :  { %16379 = vst [vmem:[#allocation94_spill] sm:$0xff] %v9910_v12  ;;  %16382 = vst [vmem:[#allocation97_spill] sm:$0xff] %v9928_v42 }
 0x133   :  { %16383 = vst [vmem:[#allocation98_spill] sm:$0xff] %v9933_v4 }
 0x134   :  { %1244 = vmatmul.mubr.f32.gmra.mrb[102].mxu0 %v9849_v37  ;;  %v9922_v37 = vsel %vm262_vm0, %v398_v52, %v399_v20  ;;  %v403_v52 = vrot.slane %v9928_v42, 1 }
 0x135   :  { %1248 = vmatprep.mubr.f32.mxu0 %v9894_v36  ;;  %16381 = vst [vmem:[#allocation96_spill] sm:$0xff] %v9922_v37  ;;  %v401_v36 = vrot.slane %v9917_v28, 1  ;;  %v404_v28 = vrot.slane %v9933_v4, 1 }
 0x138   :  { %1249 = vmatmul.mubr.f32.gmra.mrb[104].mxu0 %v9872_v35  ;;  %v9945_v35 = vld [vmem:[%s15709_s0 + $0x2e0] sm:$0x3] }
 0x139   :  { %1253 = vmatprep.mubr.f32.mxu0 %v9910_v12  ;;  %v9938_v12 = vsel %vm262_vm0, %v399_v20, %v401_v36  ;;  %16385 = vst [vmem:[#allocation100_spill] sm:$0xff] %v9945_v35  ;;  %v9956_v20 = vld [vmem:[%s15709_s0 + $0x2e8] sm:$0xff]  ;;  %v9961_v36 = vld [vmem:[%s15709_s0 + $0x2f0] sm:$0xff] }
 0x13a   :  { %16384 = vst [vmem:[#allocation99_spill] sm:$0xff] %v9938_v12  ;;  %16387 = vst [vmem:[#allocation102_spill] sm:$0xff] %v9956_v20 }
 0x13b   :  { %16388 = vst [vmem:[#allocation103_spill] sm:$0xff] %v9961_v36 }
 0x13c   :  { %1254 = vmatmul.mubr.f32.gmra.mrb[106].mxu0 %v9877_v16  ;;  %v9950_v16 = vsel %vm262_vm0, %v403_v52, %v404_v28  ;;  %v408_v52 = vrot.slane %v9956_v20, 1 }
 0x13d   :  { %1258 = vmatprep.mubr.f32.mxu0 %v9922_v37  ;;  %16386 = vst [vmem:[#allocation101_spill] sm:$0xff] %v9950_v16  ;;  %v406_v37 = vrot.slane %v9945_v35, 1  ;;  %v409_v35 = vrot.slane %v9961_v36, 1 }
 0x140   :  { %1259 = vmatmul.mubr.f32.gmra.mrb[108].mxu0 %v9900_v5  ;;  %v9973_v5 = vld [vmem:[%s15709_s0 + $0x2f8] sm:$0x3] }
 0x141   :  { %1263 = vmatprep.mubr.f32.mxu0 %v9938_v12  ;;  %v9966_v12 = vsel %vm262_vm0, %v404_v28, %v406_v37  ;;  %16390 = vst [vmem:[#allocation105_spill] sm:$0xff] %v9973_v5  ;;  %v9984_v28 = vld [vmem:[%s15709_s0 + $0x300] sm:$0xff]  ;;  %v9989_v37 = vld [vmem:[%s15709_s0 + $0x308] sm:$0xff] }
 0x142   :  { %16389 = vst [vmem:[#allocation104_spill] sm:$0xff] %v9966_v12 }
 0x144   :  { %1264 = vmatmul.mubr.f32.gmra.mrb[110].mxu0 %v9905_v57  ;;  %v9978_v57 = vsel %vm262_vm0, %v408_v52, %v409_v35  ;;  %v413_v52 = vrot.slane %v9984_v28, 1 }
 0x145   :  { %1268 = vmatprep.mubr.f32.mxu0 %v9950_v16  ;;  %16391 = vst [vmem:[#allocation106_spill] sm:$0xff] %v9978_v57  ;;  %v411_v16 = vrot.slane %v9973_v5, 1  ;;  %v414_v5 = vrot.slane %v9989_v37, 1 }
 0x148   :  { %1269 = vmatmul.mubr.f32.gmra.mrb[112].mxu0 %v9928_v42  ;;  %v10001_v42 = vld [vmem:[%s15709_s0 + $0x310] sm:$0x3] }
 0x149   :  { %1273 = vmatprep.mubr.f32.mxu0 %v9966_v12  ;;  %v9994_v12 = vsel %vm262_vm0, %v409_v35, %v411_v16  ;;  %16393 = vst [vmem:[#allocation108_spill] sm:$0xff] %v10001_v42  ;;  %v10012_v35 = vld [vmem:[%s15709_s0 + $0x318] sm:$0xff]  ;;  %v10017_v16 = vld [vmem:[%s15709_s0 + $0x320] sm:$0xff] }
 0x14a   :  { %16392 = vst [vmem:[#allocation107_spill] sm:$0xff] %v9994_v12  ;;  %16395 = vst [vmem:[#allocation110_spill] sm:$0xff] %v10017_v16 }
 0x14c   :  { %1274 = vmatmul.mubr.f32.gmra.mrb[114].mxu0 %v9933_v4  ;;  %v10006_v4 = vsel %vm262_vm0, %v413_v52, %v414_v5  ;;  %v418_v52 = vrot.slane %v10012_v35, 1 }
 0x14d   :  { %1278 = vmatprep.mubr.f32.mxu0 %v9978_v57  ;;  %16394 = vst [vmem:[#allocation109_spill] sm:$0xff] %v10006_v4  ;;  %v416_v57 = vrot.slane %v10001_v42, 1  ;;  %v419_v42 = vrot.slane %v10017_v16, 1 }
 0x150   :  { %1279 = vmatmul.mubr.f32.gmra.mrb[116].mxu0 %v9956_v20  ;;  %v10029_v20 = vld [vmem:[%s15709_s0 + $0x328] sm:$0x3] }
 0x151   :  { %1283 = vmatprep.mubr.f32.mxu0 %v9994_v12  ;;  %v10022_v12 = vsel %vm262_vm0, %v414_v5, %v416_v57  ;;  %16397 = vst [vmem:[#allocation112_spill] sm:$0xff] %v10029_v20  ;;  %v844_v57 = vld [vmem:[%s15710_s1 + $0x200] sm:$0xff] }
 0x152   :  { %16396 = vst [vmem:[#allocation111_spill] sm:$0xff] %v10022_v12 }
 0x154   :  { %1284 = vmatmul.mubr.f32.gmra.mrb[118].mxu0 %v9961_v36  ;;  %v10034_v36 = vsel %vm262_vm0, %v418_v52, %v419_v42  ;;  %v845_v52 = vld [vmem:[%s15710_s1 + $0x208] sm:$0xff] }
 0x155   :  { %1288 = vmatprep.mubr.f32.mxu0 %v10006_v4  ;;  %16398 = vst [vmem:[#allocation113_spill] sm:$0xff] %v10034_v36  ;;  %v421_v4 = vrot.slane %v10029_v20, 1 }
 0x157   :  { %v10040_v5 = vsel %vm262_vm0, %v419_v42, %v421_v4  ;;  %v491_v42 = vrot.slane %v9046_v53, 2  ;;  %v846_v4 = vld [vmem:[%s15710_s1 + $0x210] sm:$0xff]  ;;  %v494_v53 = vrot.slane %v9064_v59, 2 }
 0x158   :  { %1289 = vmatmul.mubr.f32.gmra.mrb[120].mxu0 %v9984_v28  ;;  %16399 = vst [vmem:[#allocation114_spill] sm:$0xff] %v10040_v5 }
 0x159   :  { %1293 = vmatprep.mubr.f32.mxu0 %v10022_v12  ;;  %v16400_v12 = vrot.slane %v8952_v14, 2 }
 0x15b   :  { %v492_v20 = vsel %vm487_vm1, %v16400_v12, %v491_v42  ;;  %v850_v12 = vld [vmem:[%s15710_s1 + $0x230] sm:$0xff] }
 0x15c   :  { %1294 = vmatmul.mubr.f32.gmra.mrb[122].mxu0 %v9989_v37 }
 0x15d   :  { %1298 = vmatprep.mubr.f32.mxu0 %v10034_v36  ;;  %v7490_v36 = vpack.c.bf16 %v845_v52, %v844_v57  ;;  %v493_v57 = vrot.slane %v9059_v58, 2 }
 0x15f   :  { %v10075_v14 = vsel %vm487_vm1, %v493_v57, %v494_v53  ;;  %v855_v57 = vld [vmem:[%s15710_s1 + $0x258] sm:$0xff] }
 0x160   :  { %1299 = vmatmul.mubr.f32.gmra.mrb[124].mxu0 %v10012_v35 }
 0x161   :  { %1303 = vmatprep.mubr.f32.mxu0 %v10040_v5  ;;  %v847_v5 = vld [vmem:[%s15710_s1 + $0x218] sm:$0xff] }
 0x162   :  { %v7493_v52 = vpack.c.bf16 %v847_v5, %v846_v4  ;;  %v501_v5 = vrot.slane %v9122_v19, 2  ;;  %v854_v4 = vld [vmem:[%s15710_s1 + $0x250] sm:$0xff] }
 0x164   :  { %1304 = vmatmul.mubr.f32.gmra.mrb[126].mxu0 %v10017_v16  ;;  %v848_v16 = vld [vmem:[%s15710_s1 + $0x220] sm:$0xff] }
 0x165   :  { %1373 = vmatprep.mubr.f32.mxu0 %v9059_v58  ;;  %v496_v58 = vrot.slane %v9081_v3, 2 }
 0x168   :  { %1374 = vmatmul.mubr.f32.vlgmr.msra.gmra.mrb[0].mxu0 %v9625_v21  ;;  %v849_v21 = vld [vmem:[%s15710_s1 + $0x228] sm:$0xff] }
 0x169   :  { %7491 = vmatpush1.bf16.msra.mxu0 %v7490_v36  ;;  %1378 = vmatprep.mubr.f32.mxu0 %v9064_v59  ;;  %v7496_v59 = vpack.c.bf16 %v849_v21, %v848_v16  ;;  %v851_v36 = vld [vmem:[%s15710_s1 + $0x238] sm:$0xff]  ;;  %v853_v16 = vld [vmem:[%s15710_s1 + $0x248] sm:$0xff]  ;;  %v504_v21 = vrot.slane %v9145_v26, 2 }
 0x16a   :  { %7492 = vmatprep.subr.bf16.mxu0 %v16316_v63  ;;  %v7499_v3 = vpack.c.bf16 %v851_v36, %v850_v12  ;;  %v857_v12 = vld [vmem:[%s15710_s1 + $0x268] sm:$0xff]  ;;  %v858_v36 = vld [vmem:[%s15710_s1 + $0x270] sm:$0xff] }
 0x16c   :  { %1379 = vmatmul.mubr.f32.gmra.mrb[2].mxu0 %v492_v20  ;;  %v852_v20 = vld [vmem:[%s15710_s1 + $0x240] sm:$0xff] }
 0x16d   :  { %1383 = vmatprep.mubr.f32.mxu0 %v9098_v9  ;;  %7494 = vmatpush1.bf16.msra.mxu0 %v7493_v52  ;;  %v10088_v9 = vsel %vm487_vm1, %v494_v53, %v496_v58  ;;  %v7502_v42 = vpack.c.bf16 %v853_v16, %v852_v20  ;;  %v16401_v53 = vrot.slane %v9103_v10, 2  ;;  %v503_v52 = vrot.slane %v9140_v25, 2 }
 0x16e   :  { %7495 = vmatprep.subr.bf16.mxu0 %v16316_v63  ;;  %v7505_v58 = vpack.c.bf16 %v855_v57, %v854_v4  ;;  %v509_v16 = vrot.slane %v9187_v40, 2  ;;  %v861_v4 = vld [vmem:[%s15710_s1 + $0x288] sm:$0xff] }
 0x16f   :  { %v10112_v19 = vsel %vm487_vm1, %v16401_v53, %v501_v5  ;;  %v862_v53 = vld [vmem:[%s15710_s1 + $0x290] sm:$0xff] }
 0x170   :  { %1384 = vmatmul.mubr.f32.gmra.mrb[4].mxu0 %v10075_v14 }
 0x171   :  { %1388 = vmatprep.mubr.f32.mxu0 %v9103_v10  ;;  %7497 = vmatpush1.bf16.msra.mxu0 %v7496_v59  ;;  %v856_v59 = vld [vmem:[%s15710_s1 + $0x260] sm:$0xff]  ;;  %v10126_v10 = vsel %vm487_vm1, %v503_v52, %v504_v21  ;;  %v863_v52 = vld [vmem:[%s15710_s1 + $0x298] sm:$0xff] }
 0x172   :  { %7498 = vmatprep.subr.bf16.mxu0 %v16316_v63 }
 0x174   :  { %1389 = vmatmul.mubr.f32.gmra.mrb[6].mxu0 %v10088_v9 }
 0x175   :  { %1393 = vmatprep.mubr.f32.mxu0 %v9140_v25  ;;  %7500 = vmatpush1.bf16.msra.mxu0 %v7499_v3  ;;  %v506_v25 = vrot.slane %v9164_v33, 2  ;;  %v859_v3 = vld [vmem:[%s15710_s1 + $0x278] sm:$0xff]  ;;  %v508_v33 = vrot.slane %v9182_v39, 2 }
 0x176   :  { %7501 = vmatprep.subr.bf16.mxu0 %v16316_v63  ;;  %v7511_v5 = vpack.c.bf16 %v859_v3, %v858_v36  ;;  %v518_v3 = vrot.slane %v9266_v11, 2 }
 0x177   :  { %v10139_v20 = vsel %vm487_vm1, %v504_v21, %v506_v25  ;;  %v865_v25 = vld [vmem:[%s15710_s1 + $0x2a8] sm:$0xff] }
 0x178   :  { %1394 = vmatmul.mubr.f32.gmra.mrb[8].mxu0 %v9692_v13 }
 0x179   :  { %1398 = vmatprep.mubr.f32.mxu0 %v9145_v26  ;;  %7503 = vmatpush1.bf16.msra.mxu0 %v7502_v42  ;;  %v7508_v26 = vpack.c.bf16 %v857_v12, %v856_v59  ;;  %v860_v42 = vld [vmem:[%s15710_s1 + $0x280] sm:$0xff]  ;;  %v7517_v59 = vpack.c.bf16 %v863_v52, %v862_v53  ;;  %v529_v53 = vrot.slane %v9335_v45, 2 }
 0x17a   :  { %7504 = vmatprep.subr.bf16.mxu0 %v16316_v63  ;;  %v7514_v57 = vpack.c.bf16 %v861_v4, %v860_v42  ;;  %v864_v12 = vld [vmem:[%s15710_s1 + $0x2a0] sm:$0xff]  ;;  %v523_v42 = vrot.slane %v9296_v27, 2  ;;  %v524_v4 = vrot.slane %v9301_v29, 2 }
 0x17c   :  { %1399 = vmatmul.mubr.f32.gmra.mrb[10].mxu0 %v10112_v19 }
 0x17d   :  { %1403 = vmatprep.mubr.f32.mxu0 %v9182_v39  ;;  %7506 = vmatpush1.bf16.msra.mxu0 %v7505_v58  ;;  %v10153_v39 = vsel %vm487_vm1, %v508_v33, %v509_v16  ;;  %v514_v58 = vrot.slane %v9229_v55, 2  ;;  %v519_v33 = vrot.slane %v9271_v15, 2 }
 0x17e   :  { %7507 = vmatprep.subr.bf16.mxu0 %v16316_v63 }
 0x180   :  { %1404 = vmatmul.mubr.f32.gmra.mrb[12].mxu0 %v10126_v10 }
 0x181   :  { %1408 = vmatprep.mubr.f32.mxu0 %v9187_v40  ;;  %7509 = vmatpush1.bf16.msra.mxu0 %v7508_v26  ;;  %v511_v40 = vrot.slane %v9206_v47, 2  ;;  %v513_v47 = vrot.slane %v9224_v54, 2  ;;  %v7520_v26 = vpack.c.bf16 %v865_v25, %v864_v12  ;;  %v536_v25 = vrot.slane %v9376_v6, 2 }
 0x182   :  { %7510 = vmatprep.subr.bf16.mxu0 %v16316_v63  ;;  %v541_v6 = vrot.slane %v9411_v38, 2 }
 0x183   :  { %v10166_v21 = vsel %vm487_vm1, %v509_v16, %v511_v40  ;;  %v521_v16 = vrot.slane %v9284_v22, 2  ;;  %v10215_v40 = vsel %vm487_vm1, %v523_v42, %v524_v4  ;;  %v549_v42 = vrot.slane %v9461_v43, 2 }
 0x184   :  { %1409 = vmatmul.mubr.f32.gmra.mrb[14].mxu0 %v10139_v20 }
 0x185   :  { %1413 = vmatprep.mubr.f32.mxu0 %v9224_v54  ;;  %7512 = vmatpush1.bf16.msra.mxu0 %v7511_v5  ;;  %v10180_v54 = vsel %vm487_vm1, %v513_v47, %v514_v58  ;;  %v10207_v5 = vsel %vm487_vm1, %v519_v33, %v521_v16  ;;  %v868_v47 = vld [vmem:[%s15710_s1 + $0x2c0] sm:$0xff]  ;;  %v544_v16 = vrot.slane %v9427_v56, 2 }
 0x186   :  { %7513 = vmatprep.subr.bf16.mxu0 %v16316_v63 }
 0x188   :  { %1414 = vmatmul.mubr.f32.gmra.mrb[16].mxu0 %v10153_v39 }
 0x189   :  { %1418 = vmatprep.mubr.f32.mxu0 %v9229_v55  ;;  %7515 = vmatpush1.bf16.msra.mxu0 %v7514_v57  ;;  %v516_v55 = vrot.slane %v9248_v1, 2  ;;  %v10195_v1 = vsel %vm487_vm1, %v518_v3, %v519_v33  ;;  %v526_v57 = vrot.slane %v9313_v34, 2  ;;  %v531_v34 = vrot.slane %v9348_v51, 2  ;;  %v870_v3 = vld [vmem:[%s15710_s1 + $0x2d0] sm:$0xff] }
 0x18a   :  { %7516 = vmatprep.subr.bf16.mxu0 %v16316_v63  ;;  %v543_v33 = vrot.slane %v9422_v50, 2 }
 0x18b   :  { %v10187_v36 = vsel %vm487_vm1, %v514_v58, %v516_v55  ;;  %v533_v58 = vrot.slane %v9359_v60, 2  ;;  %v539_v55 = vrot.slane %v9398_v31, 2 }
 0x18c   :  { %1419 = vmatmul.mubr.f32.gmra.mrb[18].mxu0 %v10166_v21 }
 0x18d   :  { %1423 = vmatprep.mubr.f32.mxu0 %v9266_v11  ;;  %7518 = vmatpush1.bf16.msra.mxu0 %v7517_v59  ;;  %v866_v11 = vld [vmem:[%s15710_s1 + $0x2b0] sm:$0xff]  ;;  %v534_v59 = vrot.slane %v9364_v61, 2 }
 0x18e   :  { %7519 = vmatprep.subr.bf16.mxu0 %v16316_v63 }
 0x18f   :  { %v10248_v12 = vsel %vm487_vm1, %v533_v58, %v534_v59  ;;  %v874_v58 = vld [vmem:[%s15710_s1 + $0x2f0] sm:$0xff] }
 0x190   :  { %1424 = vmatmul.mubr.f32.gmra.mrb[20].mxu0 %v10180_v54 }
 0x191   :  { %1428 = vmatprep.mubr.f32.mxu0 %v9271_v15  ;;  %7521 = vmatpush1.bf16.msra.mxu0 %v7520_v26  ;;  %v867_v15 = vld [vmem:[%s15710_s1 + $0x2b8] sm:$0xff] }
 0x192   :  { %7522 = vmatprep.subr.bf16.mxu0 %v16316_v63  ;;  %v7523_v22 = vpack.c.bf16 %v867_v15, %v866_v11  ;;  %v10281_v11 = vsel %vm487_vm1, %v543_v33, %v544_v16  ;;  %v546_v15 = vrot.slane %v9439_v8, 2  ;;  %v551_v8 = vrot.slane %v9474_v32, 2  ;;  %v16403_v33 = vld [vmem:[#allocation44_spill] sm:$0xff] }
 0x194   :  { %1429 = vmatmul.mubr.f32.gmra.mrb[22].mxu0 %v10187_v36 }
 0x195   :  { %1433 = vmatprep.mubr.f32.mxu0 %v9296_v27  ;;  %7524 = vmatpush1.bf16.msra.mxu0 %v7523_v22  ;;  %v10221_v27 = vsel %vm487_vm1, %v524_v4, %v526_v57  ;;  %v872_v22 = vld [vmem:[%s15710_s1 + $0x2e0] sm:$0xff]  ;;  %v553_v57 = vrot.slane %v9485_v7, 2 }
 0x196   :  { %7525 = vmatprep.subr.bf16.mxu0 %v16316_v63 }
 0x198   :  { %1434 = vmatmul.mubr.f32.gmra.mrb[24].mxu0 %v10195_v1 }
 0x199   :  { %1438 = vmatprep.mubr.f32.mxu0 %v9301_v29  ;;  %v528_v29 = vrot.slane %v9330_v44, 2 }
 0x19b   :  { %v10228_v52 = vsel %vm487_vm1, %v528_v29, %v529_v53  ;;  %v554_v29 = vrot.slane %v9490_v48, 2 }
 0x19c   :  { %1439 = vmatmul.mubr.f32.gmra.mrb[26].mxu0 %v10207_v5 }
 0x19d   :  { %1443 = vmatprep.mubr.f32.mxu0 %v9330_v44  ;;  %v869_v44 = vld [vmem:[%s15710_s1 + $0x2c8] sm:$0xff] }
 0x19e   :  { %v7526_v51 = vpack.c.bf16 %v869_v44, %v868_v47  ;;  %v559_v47 = vrot.slane %v9524_v30, 2 }
 0x1a0   :  { %1444 = vmatmul.mubr.f32.gmra.mrb[28].mxu0 %v10215_v40 }
 0x1a1   :  { %1448 = vmatprep.mubr.f32.mxu0 %v9335_v45  ;;  %v10240_v45 = vsel %vm487_vm1, %v529_v53, %v531_v34  ;;  %7527 = vmatpush1.bf16.msra.mxu0 %v7526_v51  ;;  %v10314_v53 = vsel %vm487_vm1, %v553_v57, %v554_v29  ;;  %v556_v34 = vrot.slane %v9502_v62, 2  ;;  %v561_v62 = vrot.slane %v9537_v2, 2  ;;  %v16407_v57 = vld [vmem:[#allocation48_spill] sm:$0xff] }
 0x1a2   :  { %7528 = vmatprep.subr.bf16.mxu0 %v16316_v63  ;;  %v564_v51 = vrot.slane %v9553_v18, 2 }
 0x1a4   :  { %1449 = vmatmul.mubr.f32.gmra.mrb[30].mxu0 %v10221_v27 }
 0x1a5   :  { %1453 = vmatprep.mubr.f32.mxu0 %v9359_v60  ;;  %v10254_v60 = vsel %vm487_vm1, %v534_v59, %v536_v25  ;;  %v563_v59 = vrot.slane %v9548_v46, 2  ;;  %v10346_v25 = vld [vmem:[%s15709_s0 + $0x180] sm:$0xff] }
 0x1a8   :  { %1454 = vmatmul.mubr.f32.gmra.mrb[32].mxu0 %v10228_v52 }
 0x1a9   :  { %1458 = vmatprep.mubr.f32.mxu0 %v9364_v61  ;;  %v538_v61 = vrot.slane %v9393_v24, 2 }
 0x1ab   :  { %v10261_v26 = vsel %vm487_vm1, %v538_v61, %v539_v55  ;;  %v10352_v61 = vsel %vm487_vm1, %v563_v59, %v564_v51 }
 0x1ac   :  { %1459 = vmatmul.mubr.f32.gmra.mrb[34].mxu0 %v10240_v45 }
 0x1ad   :  { %1463 = vmatprep.mubr.f32.mxu0 %v9393_v24  ;;  %v871_v24 = vld [vmem:[%s15710_s1 + $0x2d8] sm:$0xff] }
 0x1ae   :  { %v7529_v38 = vpack.c.bf16 %v871_v24, %v870_v3  ;;  %v16402_v3 = vld [vmem:[#allocation41_spill] sm:$0xff] }
 0x1af   :  { %v569_v24 = vrot.slane %v16402_v3, 2 }
 0x1b0   :  { %1464 = vmatmul.mubr.f32.gmra.mrb[36].mxu0 %v10248_v12 }
 0x1b1   :  { %1468 = vmatprep.mubr.f32.mxu0 %v9398_v31  ;;  %v10273_v31 = vsel %vm487_vm1, %v539_v55, %v541_v6  ;;  %7530 = vmatpush1.bf16.msra.mxu0 %v7529_v38  ;;  %v568_v6 = vrot.slane %v9582_v49, 2 }
 0x1b2   :  { %7531 = vmatprep.subr.bf16.mxu0 %v16316_v63 }
 0x1b4   :  { %1469 = vmatmul.mubr.f32.gmra.mrb[38].mxu0 %v10254_v60 }
 0x1b5   :  { %1473 = vmatprep.mubr.f32.mxu0 %v9422_v50  ;;  %v10287_v50 = vsel %vm487_vm1, %v544_v16, %v546_v15  ;;  %v16404_v16 = vld [vmem:[#allocation43_spill] sm:$0xff]  ;;  %v16405_v15 = vld [vmem:[#allocation45_spill] sm:$0xff] }
 0x1b6   :  { %v571_v38 = vrot.slane %v16404_v16, 2 }
 0x1b8   :  { %1474 = vmatmul.mubr.f32.gmra.mrb[40].mxu0 %v10261_v26 }
 0x1b9   :  { %1478 = vmatprep.mubr.f32.mxu0 %v9427_v56  ;;  %v548_v56 = vrot.slane %v9456_v0, 2 }
 0x1bb   :  { %v10294_v4 = vsel %vm487_vm1, %v548_v56, %v549_v42  ;;  %v572_v56 = vsel %vm487_vm1, %v569_v24, %v571_v38  ;;  %v16414_v38 = vld [vmem:[#allocation62_spill] sm:$0xff] }
 0x1bc   :  { %1479 = vmatmul.mubr.f32.gmra.mrb[42].mxu0 %v10273_v31 }
 0x1bd   :  { %1483 = vmatprep.mubr.f32.mxu0 %v9456_v0  ;;  %v873_v0 = vld [vmem:[%s15710_s1 + $0x2e8] sm:$0xff] }
 0x1be   :  { %v7532_v32 = vpack.c.bf16 %v873_v0, %v872_v22  ;;  %v16406_v22 = vld [vmem:[#allocation46_spill] sm:$0xff] }
 0x1bf   :  { %v576_v0 = vrot.slane %v16406_v22, 2 }
 0x1c0   :  { %1484 = vmatmul.mubr.f32.gmra.mrb[44].mxu0 %v10281_v11 }
 0x1c1   :  { %1488 = vmatprep.mubr.f32.mxu0 %v9461_v43  ;;  %v10306_v43 = vsel %vm487_vm1, %v549_v42, %v551_v8  ;;  %7533 = vmatpush1.bf16.msra.mxu0 %v7532_v32  ;;  %v573_v42 = vrot.slane %v16403_v33, 2  ;;  %v574_v8 = vrot.slane %v16405_v15, 2  ;;  %v578_v32 = vrot.slane %v9640_v23, 2 }
 0x1c2   :  { %7534 = vmatprep.subr.bf16.mxu0 %v16316_v63 }
 0x1c3   :  { %v10377_v49 = vsel %vm487_vm1, %v573_v42, %v574_v8 }
 0x1c4   :  { %1489 = vmatmul.mubr.f32.gmra.mrb[46].mxu0 %v10287_v50 }
 0x1c5   :  { %1493 = vmatprep.mubr.f32.mxu0 %v9485_v7  ;;  %v10320_v7 = vsel %vm487_vm1, %v554_v29, %v556_v34  ;;  %v10383_v29 = vsel %vm487_vm1, %v574_v8, %v576_v0  ;;  %v579_v34 = vrot.slane %v16407_v57, 2  ;;  %v16416_v8 = vld [vmem:[#allocation63_spill] sm:$0xff]  ;;  %v593_v0 = vrot.slane %v16414_v38, 2 }
 0x1c8   :  { %1494 = vmatmul.mubr.f32.gmra.mrb[48].mxu0 %v10294_v4 }
 0x1c9   :  { %1498 = vmatprep.mubr.f32.mxu0 %v9490_v48  ;;  %v558_v48 = vrot.slane %v9519_v41, 2 }
 0x1cb   :  { %v10327_v44 = vsel %vm487_vm1, %v558_v48, %v559_v47  ;;  %v16408_v48 = vld [vmem:[#allocation52_spill] sm:$0xff] }
 0x1cc   :  { %1499 = vmatmul.mubr.f32.gmra.mrb[50].mxu0 %v10306_v43 }
 0x1cd   :  { %1503 = vmatprep.mubr.f32.mxu0 %v9519_v41  ;;  %v875_v41 = vld [vmem:[%s15710_s1 + $0x2f8] sm:$0xff] }
 0x1ce   :  { %v7535_v2 = vpack.c.bf16 %v875_v41, %v874_v58  ;;  %v16410_v41 = vld [vmem:[#allocation53_spill] sm:$0xff] }
 0x1d0   :  { %1504 = vmatmul.mubr.f32.gmra.mrb[52].mxu0 %v10314_v53 }
 0x1d1   :  { %1508 = vmatprep.mubr.f32.mxu0 %v9524_v30  ;;  %v10339_v30 = vsel %vm487_vm1, %v559_v47, %v561_v62  ;;  %7536 = vmatpush1.bf16.msra.mxu0 %v7535_v2  ;;  %v10390_v47 = vsel %vm487_vm1, %v578_v32, %v579_v34  ;;  %v16409_v62 = vld [vmem:[#allocation50_spill] sm:$0xff]  ;;  %v16411_v2 = vld [vmem:[#allocation57_spill] sm:$0xff]  ;;  %v16417_v32 = vld [vmem:[#allocation67_spill] sm:$0xff] }
 0x1d2   :  { %7537 = vmatprep.subr.bf16.mxu0 %v16316_v63  ;;  %v581_v58 = vrot.slane %v16409_v62, 2 }
 0x1d4   :  { %1509 = vmatmul.mubr.f32.gmra.mrb[54].mxu0 %v10320_v7  ;;  %v10396_v59 = vsel %vm487_vm1, %v579_v34, %v581_v58  ;;  %v16419_v58 = vld [vmem:[#allocation68_spill] sm:$0xff] }
 0x1d5   :  { %1513 = vmatprep.mubr.f32.mxu0 %v9548_v46  ;;  %v566_v46 = vrot.slane %v9565_v17, 2  ;;  %v570_v17 = vsel %vm487_vm1, %v568_v6, %v569_v24  ;;  %v16412_v6 = vld [vmem:[#allocation55_spill] sm:$0xff]  ;;  %v16413_v24 = vld [vmem:[#allocation58_spill] sm:$0xff] }
 0x1d6   :  { %v586_v3 = vrot.slane %v16412_v6, 2  ;;  %v589_v16 = vrot.slane %v16413_v24, 2 }
 0x1d7   :  { %v10363_v55 = vsel %vm487_vm1, %v564_v51, %v566_v46  ;;  %v584_v51 = vrot.slane %v16410_v41, 2 }
 0x1d8   :  { %1514 = vmatmul.mubr.f32.gmra.mrb[56].mxu0 %v10327_v44 }
 0x1d9   :  { %1518 = vmatprep.mubr.f32.mxu0 %v9553_v18  ;;  %v10358_v18 = vld [vmem:[%s15709_s0 + $0x188] sm:$0xff] }
 0x1dc   :  { %1519 = vmatmul.mubr.f32.gmra.mrb[58].mxu0 %v10339_v30 }
 0x1dd   :  { %1523 = vmatprep.mubr.f32.mxu0 %v10346_v25 }
 0x1e0   :  { %1524 = vmatmul.mubr.f32.gmra.mrb[60].mxu0 %v10352_v61 }
 0x1e1   :  { %1528 = vmatprep.mubr.f32.mxu0 %v10358_v18 }
 0x1e4   :  { %1529 = vmatmul.mubr.f32.gmra.mrb[62].mxu0 %v10363_v55 }
 0x1e5   :  { %1533 = vmatprep.mubr.f32.mxu0 %v16403_v33  ;;  %v10409_v33 = vsel %vm487_vm1, %v584_v51, %v586_v3  ;;  %v16421_v3 = vld [vmem:[#allocation70_spill] sm:$0xff] }
 0x1e8   :  { %1534 = vmatmul.mubr.f32.gmra.mrb[64].mxu0 %v570_v17  ;;  %v588_v17 = vrot.slane %v16411_v2, 2 }
 0x1e9   :  { %1538 = vmatprep.mubr.f32.mxu0 %v16405_v15 }
 0x1ea   :  { %v10416_v15 = vsel %vm487_vm1, %v588_v17, %v589_v16  ;;  %v16422_v17 = vld [vmem:[#allocation73_spill] sm:$0xff] }
 0x1ec   :  { %1539 = vmatmul.mubr.f32.gmra.mrb[66].mxu0 %v572_v56  ;;  %v16415_v56 = vld [vmem:[#allocation60_spill] sm:$0xff] }
 0x1ed   :  { %1543 = vmatprep.mubr.f32.mxu0 %v9640_v23  ;;  %v583_v23 = vrot.slane %v16408_v48, 2  ;;  %v591_v42 = vrot.slane %v16415_v56, 2  ;;  %v604_v56 = vrot.slane %v16422_v17, 2 }
 0x1ef   :  { %v10403_v46 = vsel %vm487_vm1, %v583_v23, %v584_v51  ;;  %v10422_v22 = vsel %vm487_vm1, %v589_v16, %v591_v42  ;;  %v598_v23 = vrot.slane %v16417_v32, 2  ;;  %v599_v51 = vrot.slane %v16419_v58, 2  ;;  %v16423_v42 = vld [vmem:[#allocation77_spill] sm:$0xff] }
 0x1f0   :  { %1544 = vmatmul.mubr.f32.gmra.mrb[68].mxu0 %v10377_v49 }
 0x1f1   :  { %1548 = vmatprep.mubr.f32.mxu0 %v16407_v57  ;;  %v594_v57 = vrot.slane %v16416_v8, 2  ;;  %v10442_v6 = vsel %vm487_vm1, %v598_v23, %v599_v51  ;;  %v16426_v23 = vld [vmem:[#allocation82_spill] sm:$0xff] }
 0x1f3   :  { %v10429_v34 = vsel %vm487_vm1, %v593_v0, %v594_v57  ;;  %v16424_v0 = vld [vmem:[#allocation75_spill] sm:$0xff] }
 0x1f4   :  { %1549 = vmatmul.mubr.f32.gmra.mrb[70].mxu0 %v10383_v29 }
 0x1f5   :  { %1553 = vmatprep.mubr.f32.mxu0 %v16408_v48  ;;  %v16418_v48 = vld [vmem:[#allocation65_spill] sm:$0xff] }
 0x1f6   :  { %v596_v62 = vrot.slane %v16418_v48, 2 }
 0x1f8   :  { %1554 = vmatmul.mubr.f32.gmra.mrb[72].mxu0 %v10390_v47 }
 0x1f9   :  { %1558 = vmatprep.mubr.f32.mxu0 %v16410_v41  ;;  %v10435_v41 = vsel %vm487_vm1, %v594_v57, %v596_v62  ;;  %v606_v57 = vrot.slane %v16424_v0, 2  ;;  %v608_v62 = vrot.slane %v16423_v42, 2 }
 0x1fb   :  { %v10461_v48 = vsel %vm487_vm1, %v604_v56, %v606_v57  ;;  %v16431_v57 = vld [vmem:[#allocation85_spill] sm:$0xff] }
 0x1fc   :  { %1559 = vmatmul.mubr.f32.gmra.mrb[74].mxu0 %v10396_v59 }
 0x1fd   :  { %1563 = vmatprep.mubr.f32.mxu0 %v16411_v2  ;;  %v16420_v2 = vld [vmem:[#allocation72_spill] sm:$0xff] }
 0x200   :  { %1564 = vmatmul.mubr.f32.gmra.mrb[76].mxu0 %v10403_v46 }
 0x201   :  { %1568 = vmatprep.mubr.f32.mxu0 %v16413_v24  ;;  %v601_v24 = vrot.slane %v16421_v3, 2 }
 0x203   :  { %v10448_v16 = vsel %vm487_vm1, %v599_v51, %v601_v24  ;;  %v16428_v24 = vld [vmem:[#allocation83_spill] sm:$0xff] }
 0x204   :  { %1569 = vmatmul.mubr.f32.gmra.mrb[78].mxu0 %v10409_v33 }
 0x205   :  { %1573 = vmatprep.mubr.f32.mxu0 %v16414_v38  ;;  %v603_v38 = vrot.slane %v16420_v2, 2 }
 0x208   :  { %1574 = vmatmul.mubr.f32.gmra.mrb[80].mxu0 %v10416_v15 }
 0x209   :  { %1578 = vmatprep.mubr.f32.mxu0 %v16416_v8  ;;  %v10455_v8 = vsel %vm487_vm1, %v603_v38, %v604_v56  ;;  %v613_v38 = vrot.slane %v16426_v23, 2  ;;  %v614_v56 = vrot.slane %v16428_v24, 2 }
 0x20b   :  { %v10481_v0 = vsel %vm487_vm1, %v613_v38, %v614_v56  ;;  %v16436_v38 = vld [vmem:[#allocation90_spill] sm:$0xff] }
 0x20c   :  { %1579 = vmatmul.mubr.f32.gmra.mrb[82].mxu0 %v10422_v22  ;;  %16430 = vst [vmem:[#allocation41_spill] sm:$0xff] %v10481_v0 }
 0x20d   :  { %1583 = vmatprep.mubr.f32.mxu0 %v16417_v32  ;;  %v16425_v32 = vld [vmem:[#allocation78_spill] sm:$0xff] }
 0x210   :  { %1584 = vmatmul.mubr.f32.gmra.mrb[84].mxu0 %v10429_v34 }
 0x211   :  { %1588 = vmatprep.mubr.f32.mxu0 %v16419_v58  ;;  %v609_v58 = vrot.slane %v16425_v32, 2 }
 0x213   :  { %v10468_v51 = vsel %vm487_vm1, %v608_v62, %v609_v58  ;;  %v16432_v62 = vld [vmem:[#allocation88_spill] sm:$0xff] }
 0x214   :  { %1589 = vmatmul.mubr.f32.gmra.mrb[86].mxu0 %v10435_v41 }
 0x215   :  { %1593 = vmatprep.mubr.f32.mxu0 %v16420_v2  ;;  %v16427_v2 = vld [vmem:[#allocation80_spill] sm:$0xff] }
 0x216   :  { %v611_v3 = vrot.slane %v16427_v2, 2  ;;  %v619_v2 = vrot.slane %v16432_v62, 2 }
 0x218   :  { %1594 = vmatmul.mubr.f32.gmra.mrb[88].mxu0 %v10442_v6 }
 0x219   :  { %1598 = vmatprep.mubr.f32.mxu0 %v16422_v17  ;;  %v10474_v17 = vsel %vm487_vm1, %v609_v58, %v611_v3  ;;  %v16434_v3 = vld [vmem:[#allocation92_spill] sm:$0xff] }
 0x21c   :  { %1599 = vmatmul.mubr.f32.gmra.mrb[90].mxu0 %v10448_v16 }
 0x21d   :  { %1603 = vmatprep.mubr.f32.mxu0 %v16423_v42  ;;  %v16429_v42 = vld [vmem:[#allocation87_spill] sm:$0xff] }
 0x220   :  { %1604 = vmatmul.mubr.f32.gmra.mrb[92].mxu0 %v10455_v8 }
 0x221   :  { %1608 = vmatprep.mubr.f32.mxu0 %v16425_v32  ;;  %v616_v32 = vrot.slane %v16431_v57, 2  ;;  %v621_v57 = vrot.slane %v16436_v38, 2 }
 0x223   :  { %v10487_v58 = vsel %vm487_vm1, %v614_v56, %v616_v32  ;;  %v10500_v56 = vsel %vm487_vm1, %v619_v2, %v621_v57  ;;  %v16443_v57 = vld [vmem:[#allocation102_spill] sm:$0xff] }
 0x224   :  { %1609 = vmatmul.mubr.f32.gmra.mrb[94].mxu0 %v10461_v48  ;;  %16433 = vst [vmem:[#allocation44_spill] sm:$0xff] %v10487_v58  ;;  %16438 = vst [vmem:[#allocation45_spill] sm:$0xff] %v10500_v56 }
 0x225   :  { %1613 = vmatprep.mubr.f32.mxu0 %v16426_v23  ;;  %v618_v23 = vrot.slane %v16429_v42, 2 }
 0x228   :  { %1614 = vmatmul.mubr.f32.gmra.mrb[96].mxu0 %v10468_v51 }
 0x229   :  { %1618 = vmatprep.mubr.f32.mxu0 %v16428_v24  ;;  %v10494_v24 = vsel %vm487_vm1, %v618_v23, %v619_v2 }
 0x22a   :  { %16435 = vst [vmem:[#allocation43_spill] sm:$0xff] %v10494_v24 }
 0x22c   :  { %1619 = vmatmul.mubr.f32.gmra.mrb[98].mxu0 %v10474_v17 }
 0x22d   :  { %1623 = vmatprep.mubr.f32.mxu0 %v16429_v42  ;;  %v623_v42 = vrot.slane %v16434_v3, 2 }
 0x230   :  { %1624 = vmatmul.mubr.f32.gmra.mrb[100].mxu0 %v10481_v0  ;;  %v16437_v0 = vld [vmem:[#allocation93_spill] sm:$0xff] }
 0x231   :  { %1628 = vmatprep.mubr.f32.mxu0 %v16432_v62  ;;  %v624_v32 = vrot.slane %v16437_v0, 2  ;;  %v16439_v62 = vld [vmem:[#allocation97_spill] sm:$0xff] }
 0x233   :  { %v10507_v23 = vsel %vm487_vm1, %v623_v42, %v624_v32 }
 0x234   :  { %1629 = vmatmul.mubr.f32.gmra.mrb[102].mxu0 %v10487_v58  ;;  %16440 = vst [vmem:[#allocation46_spill] sm:$0xff] %v10507_v23  ;;  %v16441_v58 = vld [vmem:[#allocation95_spill] sm:$0xff] }
 0x235   :  { %1633 = vmatprep.mubr.f32.mxu0 %v16434_v3  ;;  %v626_v38 = vrot.slane %v16441_v58, 2  ;;  %v628_v3 = vrot.slane %v16439_v62, 2 }
 0x237   :  { %v10513_v2 = vsel %vm487_vm1, %v624_v32, %v626_v38 }
 0x238   :  { %1634 = vmatmul.mubr.f32.gmra.mrb[104].mxu0 %v10494_v24  ;;  %v16442_v24 = vld [vmem:[#allocation98_spill] sm:$0xff] }
 0x239   :  { %1638 = vmatprep.mubr.f32.mxu0 %v16437_v0  ;;  %v629_v0 = vrot.slane %v16442_v24, 2 }
 0x23b   :  { %v10520_v42 = vsel %vm487_vm1, %v628_v3, %v629_v0  ;;  %v16447_v3 = vld [vmem:[#allocation105_spill] sm:$0xff] }
 0x23c   :  { %1639 = vmatmul.mubr.f32.gmra.mrb[106].mxu0 %v10500_v56  ;;  %v16444_v56 = vld [vmem:[#allocation100_spill] sm:$0xff] }
 0x23d   :  { %1643 = vmatprep.mubr.f32.mxu0 %v16439_v62  ;;  %v631_v58 = vrot.slane %v16444_v56, 2  ;;  %v633_v62 = vrot.slane %v16443_v57, 2  ;;  %v636_v56 = vrot.slane %v16447_v3, 2 }
 0x23f   :  { %v10526_v32 = vsel %vm487_vm1, %v629_v0, %v631_v58 }
 0x240   :  { %1644 = vmatmul.mubr.f32.gmra.mrb[108].mxu0 %v10507_v23  ;;  %v16445_v23 = vld [vmem:[#allocation103_spill] sm:$0xff] }
 0x241   :  { %1648 = vmatprep.mubr.f32.mxu0 %v16442_v24  ;;  %v634_v24 = vrot.slane %v16445_v23, 2 }
 0x243   :  { %v10533_v38 = vsel %vm487_vm1, %v633_v62, %v634_v24  ;;  %v10539_v0 = vsel %vm487_vm1, %v634_v24, %v636_v56  ;;  %v16450_v62 = vld [vmem:[#allocation108_spill] sm:$0xff]  ;;  %v10559_v56 = vld [vmem:[%s15709_s0 + $0x330] sm:$0xff] }
 0x244   :  { %1649 = vmatmul.mubr.f32.gmra.mrb[110].mxu0 %v10513_v2  ;;  %16446 = vst [vmem:[#allocation48_spill] sm:$0xff] %v10533_v38  ;;  %16448 = vst [vmem:[#allocation52_spill] sm:$0xff] %v10539_v0  ;;  %v641_v3 = vrot.slane %v16450_v62, 2  ;;  %v16455_v62 = vld [vmem:[#allocation112_spill] sm:$0xff] }
 0x245   :  { %1653 = vmatprep.mubr.f32.mxu0 %v16443_v57  ;;  %v638_v57 = vrot.slane %v9984_v28, 2  ;;  %16453 = vst [vmem:[#allocation57_spill] sm:$0xff] %v10559_v56 }
 0x248   :  { %1654 = vmatmul.mubr.f32.gmra.mrb[112].mxu0 %v10520_v42 }
 0x249   :  { %1658 = vmatprep.mubr.f32.mxu0 %v16445_v23  ;;  %v639_v23 = vrot.slane %v9989_v37, 2 }
 0x24b   :  { %v10546_v58 = vsel %vm487_vm1, %v638_v57, %v639_v23  ;;  %v10552_v24 = vsel %vm487_vm1, %v639_v23, %v641_v3  ;;  %v876_v23 = vld [vmem:[%s15710_s1 + $0x300] sm:$0xff]  ;;  %v877_v3 = vld [vmem:[%s15710_s1 + $0x308] sm:$0xff] }
 0x24c   :  { %1659 = vmatmul.mubr.f32.gmra.mrb[114].mxu0 %v10526_v32  ;;  %16449 = vst [vmem:[#allocation50_spill] sm:$0xff] %v10546_v58  ;;  %16452 = vst [vmem:[#allocation53_spill] sm:$0xff] %v10552_v24 }
 0x24d   :  { %1663 = vmatprep.mubr.f32.mxu0 %v9984_v28  ;;  %v643_v28 = vrot.slane %v10012_v35, 2 }
 0x250   :  { %1664 = vmatmul.mubr.f32.gmra.mrb[116].mxu0 %v10533_v38  ;;  %v16451_v38 = vld [vmem:[#allocation110_spill] sm:$0xff] }
 0x251   :  { %1668 = vmatprep.mubr.f32.mxu0 %v9989_v37  ;;  %v644_v37 = vrot.slane %v16451_v38, 2 }
 0x253   :  { %v10564_v57 = vsel %vm487_vm1, %v643_v28, %v644_v37  ;;  %v7538_v28 = vpack.c.bf16 %v877_v3, %v876_v23  ;;  %v881_v23 = vld [vmem:[%s15710_s1 + $0x328] sm:$0xff] }
 0x254   :  { %1669 = vmatmul.mubr.f32.gmra.mrb[118].mxu0 %v10539_v0  ;;  %16454 = vst [vmem:[#allocation55_spill] sm:$0xff] %v10564_v57  ;;  %v16459_v3 = vld [vmem:[#allocation13_spill] sm:$0xff]  ;;  %v16487_v0 = vld [vmem:[#allocation42_spill] sm:$0xff] }
 0x255   :  { %1673 = vmatprep.mubr.f32.mxu0 %v10012_v35  ;;  %v10570_v35 = vld [vmem:[%s15709_s0 + $0x338] sm:$0xff] }
 0x256   :  { %16456 = vst [vmem:[#allocation58_spill] sm:$0xff] %v10570_v35 }
 0x258   :  { %1674 = vmatmul.mubr.f32.gmra.mrb[120].mxu0 %v10546_v58  ;;  %v646_v58 = vrot.slane %v16455_v62, 2  ;;  %v878_v62 = vld [vmem:[%s15710_s1 + $0x310] sm:$0xff] }
 0x259   :  { %1678 = vmatprep.mubr.f32.mxu0 %v16451_v38 }
 0x25a   :  { %v10575_v38 = vsel %vm487_vm1, %v644_v37, %v646_v58  ;;  %v879_v58 = vld [vmem:[%s15710_s1 + $0x318] sm:$0xff]  ;;  %v16458_v37 = vld [vmem:[#allocation12_spill] sm:$0xff] }
 0x25b   :  { %16457 = vst [vmem:[#allocation62_spill] sm:$0xff] %v10575_v38 }
 0x25c   :  { %1679 = vmatmul.mubr.f32.gmra.mrb[122].mxu0 %v10552_v24 }
 0x25d   :  { %1683 = vmatprep.mubr.f32.mxu0 %v10559_v56 }
 0x260   :  { %1684 = vmatmul.mubr.f32.gmra.mrb[124].mxu0 %v10564_v57 }
 0x261   :  { %1688 = vmatprep.mubr.f32.mxu0 %v10570_v35  ;;  %v7541_v35 = vpack.c.bf16 %v879_v58, %v878_v62  ;;  %v16460_v62 = vld [vmem:[#allocation14_spill] sm:$0xff] }
 0x264   :  { %1689 = vmatmul.mubr.f32.gmra.mrb[126].mxu0 %v10575_v38  ;;  %v919_v38 = vld [vmem:[%s15710_s1 + $0x458] sm:$0xff] }
 0x265   :  { %1758 = vmatprep.mubr.f32.mxu0 %v10075_v14  ;;  %v880_v14 = vld [vmem:[%s15710_s1 + $0x320] sm:$0xff] }
 0x268   :  { %1759 = vmatmul.mubr.f32.vlgmr.msra.gmra.mrb[0].mxu0 %v16458_v37  ;;  %v7544_v37 = vpack.c.bf16 %v881_v23, %v880_v14  ;;  %v16461_v14 = vld [vmem:[#allocation15_spill] sm:$0xff] }
 0x269   :  { %7539 = vmatpush1.bf16.msra.mxu0 %v7538_v28  ;;  %1763 = vmatprep.mubr.f32.mxu0 %v10088_v9  ;;  %v882_v9 = vld [vmem:[%s15710_s1 + $0x330] sm:$0xff]  ;;  %v883_v28 = vld [vmem:[%s15710_s1 + $0x338] sm:$0xff] }
 0x26a   :  { %7540 = vmatprep.subr.bf16.mxu0 %v16316_v63  ;;  %v7547_v58 = vpack.c.bf16 %v883_v28, %v882_v9  ;;  %v16462_v9 = vld [vmem:[#allocation16_spill] sm:$0xff] }
 0x26c   :  { %1764 = vmatmul.mubr.f32.gmra.mrb[2].mxu0 %v16459_v3  ;;  %v886_v3 = vld [vmem:[%s15710_s1 + $0x350] sm:$0xff] }
 0x26d   :  { %1768 = vmatprep.mubr.f32.mxu0 %v9692_v13  ;;  %7542 = vmatpush1.bf16.msra.mxu0 %v7541_v35  ;;  %v884_v13 = vld [vmem:[%s15710_s1 + $0x340] sm:$0xff]  ;;  %v885_v35 = vld [vmem:[%s15710_s1 + $0x348] sm:$0xff] }
 0x26e   :  { %7543 = vmatprep.subr.bf16.mxu0 %v16316_v63  ;;  %v7550_v23 = vpack.c.bf16 %v885_v35, %v884_v13  ;;  %v889_v13 = vld [vmem:[%s15710_s1 + $0x368] sm:$0xff] }
 0x26f   :  { %v16463_v35 = vld [vmem:[#allocation17_spill] sm:$0xff] }
 0x270   :  { %1769 = vmatmul.mubr.f32.gmra.mrb[4].mxu0 %v16460_v62  ;;  %v719_v62 = vrot.slane %v10358_v18, 1 }
 0x271   :  { %1773 = vmatprep.mubr.f32.mxu0 %v10112_v19  ;;  %7545 = vmatpush1.bf16.msra.mxu0 %v7544_v37  ;;  %v887_v37 = vld [vmem:[%s15710_s1 + $0x358] sm:$0xff] }
 0x272   :  { %7546 = vmatprep.subr.bf16.mxu0 %v16316_v63  ;;  %v7553_v28 = vpack.c.bf16 %v887_v37, %v886_v3  ;;  %v891_v3 = vld [vmem:[%s15710_s1 + $0x378] sm:$0xff]  ;;  %v16464_v37 = vld [vmem:[#allocation18_spill] sm:$0xff] }
 0x274   :  { %1774 = vmatmul.mubr.f32.gmra.mrb[6].mxu0 %v16461_v14  ;;  %v913_v14 = vld [vmem:[%s15710_s1 + $0x428] sm:$0xff] }
 0x275   :  { %1778 = vmatprep.mubr.f32.mxu0 %v10126_v10  ;;  %7548 = vmatpush1.bf16.msra.mxu0 %v7547_v58  ;;  %v888_v58 = vld [vmem:[%s15710_s1 + $0x360] sm:$0xff] }
 0x276   :  { %7549 = vmatprep.subr.bf16.mxu0 %v16316_v63 }
 0x278   :  { %1779 = vmatmul.mubr.f32.gmra.mrb[8].mxu0 %v16462_v9  ;;  %v7556_v9 = vpack.c.bf16 %v889_v13, %v888_v58  ;;  %v893_v58 = vld [vmem:[%s15710_s1 + $0x388] sm:$0xff]  ;;  %v16465_v13 = vld [vmem:[#allocation19_spill] sm:$0xff] }
 0x279   :  { %1783 = vmatprep.mubr.f32.mxu0 %v10139_v20  ;;  %7551 = vmatpush1.bf16.msra.mxu0 %v7550_v23  ;;  %v890_v23 = vld [vmem:[%s15710_s1 + $0x370] sm:$0xff] }
 0x27a   :  { %7552 = vmatprep.subr.bf16.mxu0 %v16316_v63 }
 0x27c   :  { %1784 = vmatmul.mubr.f32.gmra.mrb[10].mxu0 %v16463_v35  ;;  %v7559_v35 = vpack.c.bf16 %v891_v3, %v890_v23  ;;  %v895_v23 = vld [vmem:[%s15710_s1 + $0x398] sm:$0xff]  ;;  %v16466_v3 = vld [vmem:[#allocation20_spill] sm:$0xff] }
 0x27d   :  { %1788 = vmatprep.mubr.f32.mxu0 %v10153_v39  ;;  %7554 = vmatpush1.bf16.msra.mxu0 %v7553_v28  ;;  %v892_v28 = vld [vmem:[%s15710_s1 + $0x380] sm:$0xff] }
 0x27e   :  { %7555 = vmatprep.subr.bf16.mxu0 %v16316_v63 }
 0x280   :  { %1789 = vmatmul.mubr.f32.gmra.mrb[12].mxu0 %v16464_v37  ;;  %v7562_v37 = vpack.c.bf16 %v893_v58, %v892_v28  ;;  %v897_v28 = vld [vmem:[%s15710_s1 + $0x3a8] sm:$0xff] }
 0x281   :  { %1793 = vmatprep.mubr.f32.mxu0 %v10166_v21  ;;  %7557 = vmatpush1.bf16.msra.mxu0 %v7556_v9  ;;  %v894_v9 = vld [vmem:[%s15710_s1 + $0x390] sm:$0xff]  ;;  %v16467_v58 = vld [vmem:[#allocation21_spill] sm:$0xff] }
 0x282   :  { %7558 = vmatprep.subr.bf16.mxu0 %v16316_v63 }
 0x284   :  { %1794 = vmatmul.mubr.f32.gmra.mrb[14].mxu0 %v16465_v13  ;;  %v7565_v13 = vpack.c.bf16 %v895_v23, %v894_v9  ;;  %v16469_v9 = vld [vmem:[#allocation23_spill] sm:$0xff]  ;;  %v16470_v23 = vld [vmem:[#allocation24_spill] sm:$0xff] }
 0x285   :  { %1798 = vmatprep.mubr.f32.mxu0 %v10180_v54  ;;  %7560 = vmatpush1.bf16.msra.mxu0 %v7559_v35  ;;  %v896_v35 = vld [vmem:[%s15710_s1 + $0x3a0] sm:$0xff] }
 0x286   :  { %7561 = vmatprep.subr.bf16.mxu0 %v16316_v63 }
 0x288   :  { %1799 = vmatmul.mubr.f32.gmra.mrb[16].mxu0 %v16466_v3  ;;  %v7568_v3 = vpack.c.bf16 %v897_v28, %v896_v35  ;;  %v899_v35 = vld [vmem:[%s15710_s1 + $0x3b8] sm:$0xff] }
 0x289   :  { %1803 = vmatprep.mubr.f32.mxu0 %v10187_v36  ;;  %7563 = vmatpush1.bf16.msra.mxu0 %v7562_v37  ;;  %v16468_v37 = vld [vmem:[#allocation22_spill] sm:$0xff] }
 0x28a   :  { %7564 = vmatprep.subr.bf16.mxu0 %v16316_v63 }
 0x28c   :  { %1804 = vmatmul.mubr.f32.gmra.mrb[18].mxu0 %v16467_v58 }
 0x28d   :  { %1808 = vmatprep.mubr.f32.mxu0 %v10195_v1  ;;  %7566 = vmatpush1.bf16.msra.mxu0 %v7565_v13  ;;  %v898_v13 = vld [vmem:[%s15710_s1 + $0x3b0] sm:$0xff] }
 0x28e   :  { %7567 = vmatprep.subr.bf16.mxu0 %v16316_v63  ;;  %v7571_v28 = vpack.c.bf16 %v899_v35, %v898_v13  ;;  %v900_v13 = vld [vmem:[%s15710_s1 + $0x3c0] sm:$0xff]  ;;  %v901_v35 = vld [vmem:[%s15710_s1 + $0x3c8] sm:$0xff] }
 0x290   :  { %1809 = vmatmul.mubr.f32.gmra.mrb[20].mxu0 %v16468_v37  ;;  %v16474_v37 = vld [vmem:[#allocation28_spill] sm:$0xff] }
 0x291   :  { %1813 = vmatprep.mubr.f32.mxu0 %v10207_v5  ;;  %7569 = vmatpush1.bf16.msra.mxu0 %v7568_v3  ;;  %v16471_v3 = vld [vmem:[#allocation25_spill] sm:$0xff] }
 0x292   :  { %7570 = vmatprep.subr.bf16.mxu0 %v16316_v63 }
 0x294   :  { %1814 = vmatmul.mubr.f32.gmra.mrb[22].mxu0 %v16469_v9  ;;  %v16472_v9 = vld [vmem:[#allocation26_spill] sm:$0xff] }
 0x295   :  { %1818 = vmatprep.mubr.f32.mxu0 %v10215_v40  ;;  %7572 = vmatpush1.bf16.msra.mxu0 %v7571_v28  ;;  %v7574_v28 = vpack.c.bf16 %v901_v35, %v900_v13  ;;  %v902_v13 = vld [vmem:[%s15710_s1 + $0x3d0] sm:$0xff]  ;;  %v903_v35 = vld [vmem:[%s15710_s1 + $0x3d8] sm:$0xff] }
 0x296   :  { %7573 = vmatprep.subr.bf16.mxu0 %v16316_v63 }
 0x298   :  { %1819 = vmatmul.mubr.f32.gmra.mrb[24].mxu0 %v16470_v23  ;;  %v16473_v23 = vld [vmem:[#allocation27_spill] sm:$0xff] }
 0x299   :  { %1823 = vmatprep.mubr.f32.mxu0 %v10221_v27  ;;  %7575 = vmatpush1.bf16.msra.mxu0 %v7574_v28  ;;  %v7577_v28 = vpack.c.bf16 %v903_v35, %v902_v13  ;;  %v909_v13 = vld [vmem:[%s15710_s1 + $0x408] sm:$0xff] }
 0x29a   :  { %7576 = vmatprep.subr.bf16.mxu0 %v16316_v63 }
 0x29c   :  { %1824 = vmatmul.mubr.f32.gmra.mrb[26].mxu0 %v16471_v3  ;;  %v16478_v3 = vld [vmem:[#allocation32_spill] sm:$0xff] }
 0x29d   :  { %1828 = vmatprep.mubr.f32.mxu0 %v10228_v52  ;;  %7578 = vmatpush1.bf16.msra.mxu0 %v7577_v28  ;;  %v16482_v28 = vld [vmem:[#allocation36_spill] sm:$0xff] }
 0x29e   :  { %7579 = vmatprep.subr.bf16.mxu0 %v16316_v63 }
 0x2a0   :  { %1829 = vmatmul.mubr.f32.gmra.mrb[28].mxu0 %v16472_v9  ;;  %v16475_v9 = vld [vmem:[#allocation29_spill] sm:$0xff] }
 0x2a1   :  { %1833 = vmatprep.mubr.f32.mxu0 %v10240_v45 }
 0x2a4   :  { %1834 = vmatmul.mubr.f32.gmra.mrb[30].mxu0 %v16473_v23  ;;  %v16476_v23 = vld [vmem:[#allocation30_spill] sm:$0xff] }
 0x2a5   :  { %1838 = vmatprep.mubr.f32.mxu0 %v10248_v12 }
 0x2a8   :  { %1839 = vmatmul.mubr.f32.gmra.mrb[32].mxu0 %v16474_v37  ;;  %v16477_v37 = vld [vmem:[#allocation31_spill] sm:$0xff] }
 0x2a9   :  { %1843 = vmatprep.mubr.f32.mxu0 %v10254_v60 }
 0x2ac   :  { %1844 = vmatmul.mubr.f32.gmra.mrb[34].mxu0 %v16475_v9  ;;  %v908_v9 = vld [vmem:[%s15710_s1 + $0x400] sm:$0xff] }
 0x2ad   :  { %1848 = vmatprep.mubr.f32.mxu0 %v10261_v26  ;;  %v7585_v35 = vpack.c.bf16 %v909_v13, %v908_v9  ;;  %v911_v9 = vld [vmem:[%s15710_s1 + $0x418] sm:$0xff] }
 0x2af   :  { %7586 = vmatprep.subr.bf16.mxu1 %v7585_v35 }
 0x2b0   :  { %1849 = vmatmul.mubr.f32.gmra.mrb[36].mxu0 %v16476_v23  ;;  %v16479_v23 = vld [vmem:[#allocation33_spill] sm:$0xff]  ;;  %7588 = vmatpush3.bf16.msra.mxu1 %v7585_v35 }
 0x2b1   :  { %1853 = vmatprep.mubr.f32.mxu0 %v10273_v31  ;;  %v16483_v35 = vld [vmem:[#allocation37_spill] sm:$0xff] }
 0x2b4   :  { %1854 = vmatmul.mubr.f32.gmra.mrb[38].mxu0 %v16477_v37  ;;  %v16480_v37 = vld [vmem:[#allocation34_spill] sm:$0xff] }
 0x2b5   :  { %1858 = vmatprep.mubr.f32.mxu0 %v10281_v11 }
 0x2b8   :  { %1859 = vmatmul.mubr.f32.gmra.mrb[40].mxu0 %v16478_v3  ;;  %v16481_v3 = vld [vmem:[#allocation35_spill] sm:$0xff] }
 0x2b9   :  { %1863 = vmatprep.mubr.f32.mxu0 %v10287_v50 }
 0x2bc   :  { %1864 = vmatmul.mubr.f32.gmra.mrb[42].mxu0 %v16479_v23  ;;  %v910_v23 = vld [vmem:[%s15710_s1 + $0x410] sm:$0xff] }
 0x2bd   :  { %1868 = vmatprep.mubr.f32.mxu0 %v10294_v4  ;;  %v7589_v13 = vpack.c.bf16 %v911_v9, %v910_v23  ;;  %v16484_v23 = vld [vmem:[#allocation38_spill] sm:$0xff] }
 0x2bf   :  { %7590 = vmatprep.subr.bf16.mxu1 %v7589_v13 }
 0x2c0   :  { %1869 = vmatmul.mubr.f32.gmra.mrb[44].mxu0 %v16480_v37  ;;  %v904_v37 = vld [vmem:[%s15710_s1 + $0x3e0] sm:$0xff]  ;;  %7592 = vmatpush3.bf16.msra.mxu1 %v7589_v13  ;;  %v16485_v13 = vld [vmem:[#allocation39_spill] sm:$0xff] }
 0x2c1   :  { %1873 = vmatprep.mubr.f32.mxu0 %v10306_v43 }
 0x2c4   :  { %1874 = vmatmul.mubr.f32.gmra.mrb[46].mxu0 %v16481_v3  ;;  %v905_v3 = vld [vmem:[%s15710_s1 + $0x3e8] sm:$0xff] }
 0x2c5   :  { %1878 = vmatprep.mubr.f32.mxu0 %v10314_v53  ;;  %v7580_v58 = vpack.c.bf16 %v905_v3, %v904_v37  ;;  %v915_v3 = vld [vmem:[%s15710_s1 + $0x438] sm:$0xff] }
 0x2c7   :  { %7581 = vmatpush1.bf16.msra.mxu0 %v7580_v58  ;;  %v914_v58 = vld [vmem:[%s15710_s1 + $0x430] sm:$0xff] }
 0x2c8   :  { %1879 = vmatmul.mubr.f32.gmra.mrb[48].mxu0 %v16482_v28  ;;  %v912_v28 = vld [vmem:[%s15710_s1 + $0x420] sm:$0xff]  ;;  %7582 = vmatprep.subr.bf16.mxu0 %v16316_v63  ;;  %v7597_v9 = vpack.c.bf16 %v915_v3, %v914_v58  ;;  %v108_v58 = vld [vmem:[%s15709_s0 + $0x190] sm:$0x3] }
 0x2c9   :  { %1883 = vmatprep.mubr.f32.mxu0 %v10320_v7  ;;  %v7593_v37 = vpack.c.bf16 %v913_v14, %v912_v28  ;;  %v916_v14 = vld [vmem:[%s15710_s1 + $0x440] sm:$0xff]  ;;  %v917_v28 = vld [vmem:[%s15710_s1 + $0x448] sm:$0xff]  ;;  %v735_v57 = vrot.slane %v108_v58, 2 }
 0x2ca   :  { %v16486_v3 = vld [vmem:[#allocation40_spill] sm:$0xff] }
 0x2cb   :  { %7594 = vmatprep.subr.bf16.mxu1 %v7593_v37 }
 0x2cc   :  { %1884 = vmatmul.mubr.f32.gmra.mrb[50].mxu0 %v16483_v35  ;;  %7596 = vmatpush3.bf16.msra.mxu1 %v7593_v37  ;;  %v732_v35 = vrot.slane %v10346_v25, 2  ;;  %v733_v37 = vrot.slane %v10358_v18, 2  ;;  %v921_v18 = vld [vmem:[%s15710_s1 + $0x468] sm:$0xff] }
 0x2cd   :  { %1888 = vmatprep.mubr.f32.mxu0 %v10327_v44  ;;  %7598 = vmatprep.subr.bf16.mxu1 %v7597_v9 }
 0x2ce   :  { %v10792_v56 = vsel %vm487_vm1, %v732_v35, %v733_v37  ;;  %v721_v35 = vrot.slane %v108_v58, 1 }
 0x2d0   :  { %1889 = vmatmul.mubr.f32.gmra.mrb[52].mxu0 %v16484_v23  ;;  %7600 = vmatpush3.bf16.msra.mxu1 %v7597_v9  ;;  %v7601_v23 = vpack.c.bf16 %v917_v28, %v916_v14  ;;  %v907_v9 = vld [vmem:[%s15710_s1 + $0x3f8] sm:$0xff]  ;;  %v918_v14 = vld [vmem:[%s15710_s1 + $0x450] sm:$0xff]  ;;  %v718_v28 = vrot.slane %v10346_v25, 1  ;;  %v920_v25 = vld [vmem:[%s15710_s1 + $0x460] sm:$0xff]  ;;  %v10817_v58 = vsel %vm262_vm0, %v719_v62, %v721_v35 }
 0x2d1   :  { %1893 = vmatprep.mubr.f32.mxu0 %v10339_v30  ;;  %v7605_v24 = vpack.c.bf16 %v919_v38, %v918_v14  ;;  %v7609_v38 = vpack.c.bf16 %v921_v18, %v920_v25  ;;  %v16521_v14 = vld [vmem:[#allocation50_spill] sm:$0xff]  ;;  %v16523_v25 = vld [vmem:[#allocation53_spill] sm:$0xff]  ;;  %v16524_v18 = vld [vmem:[#allocation111_spill] sm:$0xff] }
 0x2d2   :  { %7602 = vmatprep.subr.bf16.mxu1 %v7601_v23  ;;  %v16525_v35 = vld [vmem:[#allocation55_spill] sm:$0xff] }
 0x2d4   :  { %1894 = vmatmul.mubr.f32.gmra.mrb[54].mxu0 %v16485_v13  ;;  %v906_v13 = vld [vmem:[%s15710_s1 + $0x3f0] sm:$0xff]  ;;  %7604 = vmatpush3.bf16.msra.mxu1 %v7601_v23  ;;  %v10803_v23 = vsel %vm262_vm0, %v718_v28, %v719_v62  ;;  %v16489_v62 = vld [vmem:[#allocation49_spill] sm:$0xff] }
 0x2d5   :  { %1898 = vmatprep.mubr.f32.mxu0 %v10352_v61  ;;  %7606 = vmatprep.subr.bf16.mxu1 %v7605_v24  ;;  %v16522_v28 = vld [vmem:[#allocation109_spill] sm:$0xff] }
 0x2d8   :  { %1899 = vmatmul.mubr.f32.gmra.mrb[56].mxu0 %v16486_v3  ;;  %v7583_v3 = vpack.c.bf16 %v907_v9, %v906_v13  ;;  %7608 = vmatpush3.bf16.msra.mxu1 %v7605_v24  ;;  %v10806_v13 = vsel %vm487_vm1, %v733_v37, %v735_v57  ;;  %v923_v9 = vld [vmem:[%s15710_s1 + $0x478] sm:$0xff] }
 0x2d9   :  { %1903 = vmatprep.mubr.f32.mxu0 %v10363_v55  ;;  %7610 = vmatprep.subr.bf16.mxu1 %v7609_v38  ;;  %v16488_v57 = vld [vmem:[#allocation47_spill] sm:$0xff] }
 0x2da   :  { %7584 = vmatpush1.bf16.msra.mxu0 %v7583_v3  ;;  %v922_v3 = vld [vmem:[%s15710_s1 + $0x470] sm:$0xff]  ;;  %v16520_v37 = vld [vmem:[#allocation107_spill] sm:$0xff] }
 0x2db   :  { %v7613_v24 = vpack.c.bf16 %v923_v9, %v922_v3  ;;  %v16527_v3 = vld [vmem:[#allocation58_spill] sm:$0xff] }
 0x2dc   :  { %1904 = vmatmul.mubr.f32.gmra.mrb[58].mxu0 %v16487_v0  ;;  %7612 = vmatpush3.bf16.msra.mxu1 %v7609_v38  ;;  %v16526_v38 = vld [vmem:[#allocation57_spill] sm:$0xff]  ;;  %v738_v9 = vrot.slane %v16527_v3, 2 }
 0x2dd   :  { %1908 = vmatprep.mubr.f32.mxu0 %v10792_v56  ;;  %7614 = vmatprep.subr.bf16.mxu1 %v7613_v24 }
 0x2e0   :  { %1909 = vmatmul.mubr.f32.gmra.mrb[60].mxu0 %v10803_v23  ;;  %7616 = vmatpush3.bf16.msra.mxu1 %v7613_v24  ;;  %v162_v24 = vld [vmem:[%s15709_s0 + $0x340] sm:$0x3] }
 0x2e1   :  { %1913 = vmatprep.mubr.f32.mxu0 %v10806_v13  ;;  %7617 = vmatprep.subr.bf16.mxu1 %v16316_v63  ;;  %v723_v63 = vrot.slane %v16526_v38, 1 }
 0x2e3   :  { %7170 = vmatmul.mubr.f32.vlgmr.msra.gmra.mrb[0].mxu1 %v10112_v19  ;;  %v16491_v19 = vld [vmem:[#allocation54_spill] sm:$0xff] }
 0x2e4   :  { %1914 = vmatmul.mubr.f32.gmra.mrb[62].mxu0 %v10817_v58  ;;  %7172 = vmatprep.mubr.f32.mxu1 %v10126_v10  ;;  %v16492_v10 = vld [vmem:[#allocation56_spill] sm:$0xff] }
 0x2e5   :  { %1918 = vmatprep.mubr.f32.mxu0 %v10377_v49  ;;  %v16490_v49 = vld [vmem:[#allocation51_spill] sm:$0xff] }
 0x2e7   :  { %7173 = vmatmul.mubr.f32.gmra.mrb[2].mxu1 %v10139_v20  ;;  %v16493_v20 = vld [vmem:[#allocation59_spill] sm:$0xff] }
 0x2e8   :  { %1919 = vmatmul.mubr.f32.gmra.mrb[64].mxu0 %v16488_v57  ;;  %7175 = vmatprep.mubr.f32.mxu1 %v10153_v39  ;;  %v16494_v39 = vld [vmem:[#allocation61_spill] sm:$0xff] }
 0x2e9   :  { %1923 = vmatprep.mubr.f32.mxu0 %v10383_v29  ;;  %v16518_v29 = vld [vmem:[#allocation106_spill] sm:$0xff]  ;;  %v16528_v57 = vld [vmem:[#allocation113_spill] sm:$0xff] }
 0x2eb   :  { %7176 = vmatmul.mubr.f32.gmra.mrb[4].mxu1 %v10166_v21  ;;  %v16495_v21 = vld [vmem:[#allocation64_spill] sm:$0xff] }
 0x2ec   :  { %1924 = vmatmul.mubr.f32.gmra.mrb[66].mxu0 %v16489_v62  ;;  %7178 = vmatprep.mubr.f32.mxu1 %v10180_v54  ;;  %v16496_v54 = vld [vmem:[#allocation66_spill] sm:$0xff] }
 0x2ed   :  { %1928 = vmatprep.mubr.f32.mxu0 %v10390_v47  ;;  %v16529_v62 = vld [vmem:[#allocation62_spill] sm:$0xff] }
 0x2ef   :  { %7179 = vmatmul.mubr.f32.gmra.mrb[6].mxu1 %v10187_v36  ;;  %v16497_v36 = vld [vmem:[#allocation69_spill] sm:$0xff] }
 0x2f0   :  { %1929 = vmatmul.mubr.f32.gmra.mrb[68].mxu0 %v16490_v49  ;;  %7181 = vmatprep.mubr.f32.mxu1 %v10195_v1  ;;  %v16498_v1 = vld [vmem:[#allocation71_spill] sm:$0xff] }
 0x2f1   :  { %1933 = vmatprep.mubr.f32.mxu0 %v10396_v59 }
 0x2f3   :  { %7182 = vmatmul.mubr.f32.gmra.mrb[8].mxu1 %v10207_v5  ;;  %v16499_v5 = vld [vmem:[#allocation74_spill] sm:$0xff] }
 0x2f4   :  { %1934 = vmatmul.mubr.f32.gmra.mrb[70].mxu0 %v16491_v19  ;;  %7184 = vmatprep.mubr.f32.mxu1 %v10215_v40  ;;  %v16500_v40 = vld [vmem:[#allocation76_spill] sm:$0xff] }
 0x2f5   :  { %1938 = vmatprep.mubr.f32.mxu0 %v10403_v46 }
 0x2f7   :  { %7185 = vmatmul.mubr.f32.gmra.mrb[10].mxu1 %v10221_v27  ;;  %v16501_v27 = vld [vmem:[#allocation79_spill] sm:$0xff] }
 0x2f8   :  { %1939 = vmatmul.mubr.f32.gmra.mrb[72].mxu0 %v16492_v10  ;;  %7187 = vmatprep.mubr.f32.mxu1 %v10228_v52  ;;  %v16502_v52 = vld [vmem:[#allocation81_spill] sm:$0xff] }
 0x2f9   :  { %1943 = vmatprep.mubr.f32.mxu0 %v10409_v33 }
 0x2fb   :  { %7188 = vmatmul.mubr.f32.gmra.mrb[12].mxu1 %v10240_v45  ;;  %v16503_v45 = vld [vmem:[#allocation84_spill] sm:$0xff] }
 0x2fc   :  { %1944 = vmatmul.mubr.f32.gmra.mrb[74].mxu0 %v16493_v20  ;;  %7190 = vmatprep.mubr.f32.mxu1 %v10248_v12  ;;  %v16504_v12 = vld [vmem:[#allocation41_spill] sm:$0xff] }
 0x2fd   :  { %1948 = vmatprep.mubr.f32.mxu0 %v10416_v15 }
 0x2ff   :  { %7191 = vmatmul.mubr.f32.gmra.mrb[14].mxu1 %v10254_v60  ;;  %v16505_v60 = vld [vmem:[#allocation86_spill] sm:$0xff] }
 0x300   :  { %1949 = vmatmul.mubr.f32.gmra.mrb[76].mxu0 %v16494_v39  ;;  %7193 = vmatprep.mubr.f32.mxu1 %v10261_v26  ;;  %v16506_v26 = vld [vmem:[#allocation44_spill] sm:$0xff] }
 0x301   :  { %1953 = vmatprep.mubr.f32.mxu0 %v10422_v22 }
 0x303   :  { %7194 = vmatmul.mubr.f32.gmra.mrb[16].mxu1 %v10273_v31  ;;  %v16507_v31 = vld [vmem:[#allocation89_spill] sm:$0xff] }
 0x304   :  { %1954 = vmatmul.mubr.f32.gmra.mrb[78].mxu0 %v16495_v21  ;;  %7196 = vmatprep.mubr.f32.mxu1 %v10281_v11  ;;  %v16508_v11 = vld [vmem:[#allocation43_spill] sm:$0xff] }
 0x305   :  { %1958 = vmatprep.mubr.f32.mxu0 %v10429_v34 }
 0x307   :  { %7197 = vmatmul.mubr.f32.gmra.mrb[18].mxu1 %v10287_v50  ;;  %v16509_v50 = vld [vmem:[#allocation91_spill] sm:$0xff] }
 0x308   :  { %1959 = vmatmul.mubr.f32.gmra.mrb[80].mxu0 %v16496_v54  ;;  %7199 = vmatprep.mubr.f32.mxu1 %v10294_v4  ;;  %v16510_v4 = vld [vmem:[#allocation45_spill] sm:$0xff] }
 0x309   :  { %1963 = vmatprep.mubr.f32.mxu0 %v10435_v41 }
 0x30b   :  { %7200 = vmatmul.mubr.f32.gmra.mrb[20].mxu1 %v10306_v43  ;;  %v16511_v43 = vld [vmem:[#allocation94_spill] sm:$0xff] }
 0x30c   :  { %1964 = vmatmul.mubr.f32.gmra.mrb[82].mxu0 %v16497_v36  ;;  %7202 = vmatprep.mubr.f32.mxu1 %v10314_v53  ;;  %v16512_v53 = vld [vmem:[#allocation46_spill] sm:$0xff] }
 0x30d   :  { %1968 = vmatprep.mubr.f32.mxu0 %v10442_v6 }
 0x30f   :  { %7203 = vmatmul.mubr.f32.gmra.mrb[22].mxu1 %v10320_v7  ;;  %v16513_v7 = vld [vmem:[#allocation96_spill] sm:$0xff] }
 0x310   :  { %1969 = vmatmul.mubr.f32.gmra.mrb[84].mxu0 %v16498_v1  ;;  %7205 = vmatprep.mubr.f32.mxu1 %v10327_v44  ;;  %v16514_v44 = vld [vmem:[#allocation99_spill] sm:$0xff] }
 0x311   :  { %1973 = vmatprep.mubr.f32.mxu0 %v10448_v16 }
 0x313   :  { %7206 = vmatmul.mubr.f32.gmra.mrb[24].mxu1 %v10339_v30  ;;  %v16515_v30 = vld [vmem:[#allocation101_spill] sm:$0xff] }
 0x314   :  { %1974 = vmatmul.mubr.f32.gmra.mrb[86].mxu0 %v16499_v5  ;;  %7208 = vmatprep.mubr.f32.mxu1 %v10352_v61  ;;  %v16516_v61 = vld [vmem:[#allocation104_spill] sm:$0xff] }
 0x315   :  { %1978 = vmatprep.mubr.f32.mxu0 %v10455_v8 }
 0x317   :  { %7209 = vmatmul.mubr.f32.gmra.mrb[26].mxu1 %v10363_v55  ;;  %v16517_v55 = vld [vmem:[#allocation48_spill] sm:$0xff] }
 0x318   :  { %1979 = vmatmul.mubr.f32.gmra.mrb[88].mxu0 %v16500_v40  ;;  %7211 = vmatprep.mubr.f32.mxu1 %v10792_v56  ;;  %v16519_v56 = vld [vmem:[#allocation52_spill] sm:$0xff] }
 0x319   :  { %1983 = vmatprep.mubr.f32.mxu0 %v10461_v48 }
 0x31b   :  { %7212 = vmatmul.mubr.f32.gmra.mrb[28].mxu1 %v10806_v13  ;;  %v737_v13 = vrot.slane %v16526_v38, 2 }
 0x31c   :  { %1984 = vmatmul.mubr.f32.gmra.mrb[90].mxu0 %v16501_v27 }
 0x31d   :  { %1988 = vmatprep.mubr.f32.mxu0 %v10468_v51 }
 0x320   :  { %1989 = vmatmul.mubr.f32.gmra.mrb[92].mxu0 %v16502_v52 }
 0x321   :  { %1993 = vmatprep.mubr.f32.mxu0 %v10474_v17 }
 0x324   :  { %1994 = vmatmul.mubr.f32.gmra.mrb[94].mxu0 %v16503_v45 }
 0x325   :  { %1998 = vmatprep.mubr.f32.mxu0 %v16504_v12 }
 0x328   :  { %1999 = vmatmul.mubr.f32.gmra.mrb[96].mxu0 %v16505_v60 }
 0x329   :  { %2003 = vmatprep.mubr.f32.mxu0 %v16506_v26 }
 0x32c   :  { %2004 = vmatmul.mubr.f32.gmra.mrb[98].mxu0 %v16507_v31 }
 0x32d   :  { %2008 = vmatprep.mubr.f32.mxu0 %v16508_v11 }
 0x330   :  { %2009 = vmatmul.mubr.f32.gmra.mrb[100].mxu0 %v16509_v50 }
 0x331   :  { %2013 = vmatprep.mubr.f32.mxu0 %v16510_v4 }
 0x334   :  { %2014 = vmatmul.mubr.f32.gmra.mrb[102].mxu0 %v16511_v43 }
 0x335   :  { %2018 = vmatprep.mubr.f32.mxu0 %v16512_v53 }
 0x338   :  { %2019 = vmatmul.mubr.f32.gmra.mrb[104].mxu0 %v16513_v7  ;;  %v726_v7 = vrot.slane %v162_v24, 1 }
 0x339   :  { %2023 = vmatprep.mubr.f32.mxu0 %v10513_v2 }
 0x33c   :  { %2024 = vmatmul.mubr.f32.gmra.mrb[106].mxu0 %v16514_v44 }
 0x33d   :  { %2028 = vmatprep.mubr.f32.mxu0 %v10520_v42 }
 0x340   :  { %2029 = vmatmul.mubr.f32.gmra.mrb[108].mxu0 %v16515_v30 }
 0x341   :  { %2033 = vmatprep.mubr.f32.mxu0 %v10526_v32 }
 0x344   :  { %2034 = vmatmul.mubr.f32.gmra.mrb[110].mxu0 %v16516_v61  ;;  %v10927_v61 = vld [vmem:[%s15709_s0 + $0x1a0] sm:$0xff] }
 0x345   :  { %2038 = vmatprep.mubr.f32.mxu0 %v16517_v55  ;;  %v767_v38 = vrot.slane %v10927_v61, 2 }
 0x348   :  { %2039 = vmatmul.mubr.f32.gmra.mrb[112].mxu0 %v16518_v29  ;;  %v10922_v29 = vld [vmem:[%s15709_s0 + $0x198] sm:$0xff] }
 0x349   :  { %2043 = vmatprep.mubr.f32.mxu0 %v16519_v56 }
 0x34c   :  { %2044 = vmatmul.mubr.f32.gmra.mrb[114].mxu0 %v16520_v37  ;;  %v740_v37 = vrot.slane %v162_v24, 2  ;;  %v8654_v24 = vld [vmem:[%s15709_s0 + $0x108] sm:$0xff] }
 0x34d   :  { %2048 = vmatprep.mubr.f32.mxu0 %v16521_v14 }
 0x34e   :  { %v10944_v50 = vsel %vm487_vm1, %v738_v9, %v740_v37  ;;  %v8650_v37 = vld [vmem:[%s15709_s0 + $0xd8] sm:$0xff] }
 0x350   :  { %2049 = vmatmul.mubr.f32.gmra.mrb[116].mxu0 %v16522_v28  ;;  %v724_v28 = vrot.slane %v16527_v3, 1  ;;  %v16530_v3 = vld [vmem:[#allocation114_spill] sm:$0xff] }
 0x351   :  { %2053 = vmatprep.mubr.f32.mxu0 %v16523_v25 }
 0x352   :  { %v10940_v44 = vsel %vm262_vm0, %v723_v63, %v724_v28  ;;  %v16531_v63 = vld [vmem:[#allocation14_spill] sm:$0xff] }
 0x354   :  { %2054 = vmatmul.mubr.f32.gmra.mrb[118].mxu0 %v16524_v18  ;;  %v10917_v18 = vsel %vm487_vm1, %v737_v13, %v738_v9  ;;  %v10934_v13 = vld [vmem:[%s15709_s0 + $0x1a8] sm:$0x3]  ;;  %v16549_v9 = vld [vmem:[#allocation32_spill] sm:$0xff] }
 0x355   :  { %2058 = vmatprep.mubr.f32.mxu0 %v16525_v35  ;;  %v769_v30 = vrot.slane %v10934_v13, 2 }
 0x357   :  { %v770_v31 = vsel %vm487_vm1, %v767_v38, %v769_v30  ;;  %v16544_v30 = vld [vmem:[#allocation27_spill] sm:$0xff] }
 0x358   :  { %2059 = vmatmul.mubr.f32.gmra.mrb[120].mxu0 %v16528_v57  ;;  %v766_v57 = vrot.slane %v10922_v29, 2 }
 0x359   :  { %2063 = vmatprep.mubr.f32.mxu0 %v16529_v62 }
 0x35a   :  { %v768_v43 = vsel %vm487_vm1, %v766_v57, %v767_v38  ;;  %v16550_v57 = vld [vmem:[#allocation33_spill] sm:$0xff]  ;;  %v16551_v38 = vld [vmem:[#allocation34_spill] sm:$0xff] }
 0x35b   :  { %7214 = vmatprep.mubr.f32.mxu1 %v768_v43  ;;  %v16541_v43 = vld [vmem:[#allocation24_spill] sm:$0xff] }
 0x35c   :  { %2064 = vmatmul.mubr.f32.gmra.mrb[122].mxu0 %v16530_v3  ;;  %7215 = vmatmul.mubr.f32.gmra.mrb[30].mxu1 %v770_v31  ;;  %v10951_v3 = vsel %vm262_vm0, %v724_v28, %v726_v7  ;;  %v8636_v31 = vld [vmem:[%s15709_s0 + $0x30] sm:$0xff]  ;;  %v8648_v7 = vld [vmem:[%s15709_s0 + $0xc0] sm:$0xff] }
 0x35d   :  { %2068 = vmatprep.mubr.f32.mxu0 %v10917_v18  ;;  %7217 = vmatprep.mubr.f32.mxu1 %v10390_v47  ;;  %v16532_v47 = vld [vmem:[#allocation15_spill] sm:$0xff]  ;;  %v8651_v28 = vld [vmem:[%s15709_s0 + $0xe0] sm:$0xff] }
 0x360   :  { %2069 = vmatmul.mubr.f32.gmra.mrb[124].mxu0 %v10940_v44  ;;  %7218 = vmatmul.mubr.f32.gmra.mrb[32].mxu1 %v10396_v59  ;;  %v8637_v59 = vld [vmem:[%s15709_s0 + $0x38] sm:$0xff] }
 0x361   :  { %2073 = vmatprep.mubr.f32.mxu0 %v10944_v50  ;;  %7220 = vmatprep.mubr.f32.mxu1 %v10403_v46  ;;  %v16533_v46 = vld [vmem:[#allocation16_spill] sm:$0xff] }
 0x364   :  { %2074 = vmatmul.mubr.f32.gmra.mrb[126].mxu0 %v10951_v3  ;;  %7221 = vmatmul.mubr.f32.gmra.mrb[34].mxu1 %v10409_v33  ;;  %v8638_v33 = vld [vmem:[%s15709_s0 + $0x48] sm:$0xff] }
 0x365   :  { %2143 = vmatprep.mubr.f32.mxu0 %v16531_v63  ;;  %7223 = vmatprep.mubr.f32.mxu1 %v10416_v15  ;;  %v16534_v15 = vld [vmem:[#allocation17_spill] sm:$0xff]  ;;  %v8656_v63 = vld [vmem:[%s15709_s0 + $0x120] sm:$0xff] }
 0x368   :  { %2144 = vmatmul.mubr.f32.vlgmr.msra.gmra.mrb[0].mxu0 %v8636_v31  ;;  %7224 = vmatmul.mubr.f32.gmra.mrb[36].mxu1 %v10422_v22  ;;  %v8639_v22 = vld [vmem:[%s15709_s0 + $0x50] sm:$0xff]  ;;  %v16552_v31 = vld [vmem:[#allocation35_spill] sm:$0xff] }
 0x369   :  { %2148 = vmatprep.mubr.f32.mxu0 %v16532_v47  ;;  %7226 = vmatprep.mubr.f32.mxu1 %v10429_v34  ;;  %v16535_v34 = vld [vmem:[#allocation18_spill] sm:$0xff] }
 0x36c   :  { %2149 = vmatmul.mubr.f32.gmra.mrb[2].mxu0 %v8637_v59  ;;  %7227 = vmatmul.mubr.f32.gmra.mrb[38].mxu1 %v10435_v41  ;;  %v8640_v41 = vld [vmem:[%s15709_s0 + $0x60] sm:$0xff]  ;;  %v8657_v59 = vld [vmem:[%s15709_s0 + $0x128] sm:$0xff] }
 0x36d   :  { %2153 = vmatprep.mubr.f32.mxu0 %v16533_v46  ;;  %7229 = vmatprep.mubr.f32.mxu1 %v10442_v6  ;;  %v16536_v6 = vld [vmem:[#allocation19_spill] sm:$0xff] }
 0x370   :  { %2154 = vmatmul.mubr.f32.gmra.mrb[4].mxu0 %v8638_v33  ;;  %7230 = vmatmul.mubr.f32.gmra.mrb[40].mxu1 %v10448_v16  ;;  %v8641_v16 = vld [vmem:[%s15709_s0 + $0x68] sm:$0xff]  ;;  %v16553_v33 = vld [vmem:[#allocation36_spill] sm:$0xff] }
 0x371   :  { %2158 = vmatprep.mubr.f32.mxu0 %v16534_v15  ;;  %7232 = vmatprep.mubr.f32.mxu1 %v10455_v8  ;;  %v16537_v8 = vld [vmem:[#allocation20_spill] sm:$0xff]  ;;  %v8840_v15 = vmov 0.0  }
 0x372   :  { %3329 = vst [vmem:[#allocation2 + $0x18] sm:$0xff] %v8840_v15  ;;  %3330 = vst [vmem:[#allocation2 + $0x20] sm:$0xff] %v8840_v15 }
 0x373   :  { %3326 = vst [vmem:[#allocation2] sm:$0xff] %v8840_v15  ;;  %3328 = vst [vmem:[#allocation2 + $0x10] sm:$0x3] %v8840_v15 }
 0x374   :  { %2159 = vmatmul.mubr.f32.gmra.mrb[6].mxu0 %v8639_v22  ;;  %7233 = vmatmul.mubr.f32.gmra.mrb[42].mxu1 %v10461_v48  ;;  %v8642_v48 = vld [vmem:[%s15709_s0 + $0x78] sm:$0xff]  ;;  %3331 = vst [vmem:[#allocation2 + $0x28] sm:$0x3] %v8840_v15  ;;  %3332 = vst [vmem:[#allocation2 + $0x30] sm:$0xff] %v8840_v15 }
 0x375   :  { %2163 = vmatprep.mubr.f32.mxu0 %v16535_v34  ;;  %7235 = vmatprep.mubr.f32.mxu1 %v10468_v51  ;;  %v16538_v51 = vld [vmem:[#allocation21_spill] sm:$0xff]  ;;  %3333 = vst [vmem:[#allocation2 + $0x38] sm:$0xff] %v8840_v15  ;;  %3334 = vst [vmem:[#allocation2 + $0x40] sm:$0x3] %v8840_v15  ;;  %v8658_v22 = vld [vmem:[%s15709_s0 + $0x138] sm:$0xff] }
 0x376   :  { %3335 = vst [vmem:[#allocation2 + $0x48] sm:$0xff] %v8840_v15  ;;  %3336 = vst [vmem:[#allocation2 + $0x50] sm:$0xff] %v8840_v15  ;;  %v16554_v34 = vld [vmem:[#allocation37_spill] sm:$0xff] }
 0x377   :  { %3337 = vst [vmem:[#allocation2 + $0x58] sm:$0x3] %v8840_v15  ;;  %3338 = vst [vmem:[#allocation2 + $0x60] sm:$0xff] %v8840_v15 }
 0x378   :  { %2164 = vmatmul.mubr.f32.gmra.mrb[8].mxu0 %v8640_v41  ;;  %7236 = vmatmul.mubr.f32.gmra.mrb[44].mxu1 %v10474_v17  ;;  %v8643_v17 = vld [vmem:[%s15709_s0 + $0x80] sm:$0xff]  ;;  %3339 = vst [vmem:[#allocation2 + $0x68] sm:$0xff] %v8840_v15  ;;  %3340 = vst [vmem:[#allocation2 + $0x70] sm:$0x3] %v8840_v15 }
 0x379   :  { %2168 = vmatprep.mubr.f32.mxu0 %v16536_v6  ;;  %7238 = vmatprep.mubr.f32.mxu1 %v16504_v12  ;;  %v16539_v12 = vld [vmem:[#allocation22_spill] sm:$0xff]  ;;  %3341 = vst [vmem:[#allocation2 + $0x78] sm:$0xff] %v8840_v15  ;;  %3342 = vst [vmem:[#allocation2 + $0x80] sm:$0xff] %v8840_v15 }
 0x37a   :  { %3343 = vst [vmem:[#allocation2 + $0x88] sm:$0x3] %v8840_v15  ;;  %3344 = vst [vmem:[#allocation2 + $0x90] sm:$0xff] %v8840_v15 }
 0x37b   :  { %3345 = vst [vmem:[#allocation2 + $0x98] sm:$0xff] %v8840_v15  ;;  %3346 = vst [vmem:[#allocation2 + $0xa0] sm:$0x3] %v8840_v15 }
 0x37c   :  { %2169 = vmatmul.mubr.f32.gmra.mrb[10].mxu0 %v8641_v16  ;;  %7239 = vmatmul.mubr.f32.gmra.mrb[46].mxu1 %v16506_v26  ;;  %v8644_v26 = vld [vmem:[%s15709_s0 + $0x90] sm:$0xff]  ;;  %3347 = vst [vmem:[#allocation2 + $0xa8] sm:$0xff] %v8840_v15  ;;  %3348 = vst [vmem:[#allocation2 + $0xb0] sm:$0xff] %v8840_v15  ;;  %v8659_v16 = vld [vmem:[%s15709_s0 + $0x140] sm:$0xff] }
 0x37d   :  { %2173 = vmatprep.mubr.f32.mxu0 %v16537_v8  ;;  %7241 = vmatprep.mubr.f32.mxu1 %v16508_v11  ;;  %v16540_v11 = vld [vmem:[#allocation23_spill] sm:$0xff]  ;;  %3349 = vst [vmem:[#allocation2 + $0xb8] sm:$0x3] %v8840_v15  ;;  %3350 = vst [vmem:[#allocation2 + $0xc0] sm:$0xff] %v8840_v15  ;;  %v16555_v8 = vld [vmem:[#allocation38_spill] sm:$0xff] }
 0x37e   :  { %3351 = vst [vmem:[#allocation2 + $0xc8] sm:$0xff] %v8840_v15  ;;  %3352 = vst [vmem:[#allocation2 + $0xd0] sm:$0x3] %v8840_v15 }
 0x37f   :  { %3353 = vst [vmem:[#allocation2 + $0xd8] sm:$0xff] %v8840_v15  ;;  %3354 = vst [vmem:[#allocation2 + $0xe0] sm:$0xff] %v8840_v15 }
 0x380   :  { %2174 = vmatmul.mubr.f32.gmra.mrb[12].mxu0 %v8642_v48  ;;  %7242 = vmatmul.mubr.f32.gmra.mrb[48].mxu1 %v16510_v4  ;;  %v8645_v4 = vld [vmem:[%s15709_s0 + $0x98] sm:$0xff]  ;;  %3355 = vst [vmem:[#allocation2 + $0xe8] sm:$0x3] %v8840_v15  ;;  %3356 = vst [vmem:[#allocation2 + $0xf0] sm:$0xff] %v8840_v15  ;;  %v8660_v48 = vld [vmem:[%s15709_s0 + $0x150] sm:$0xff] }
 0x381   :  { %2178 = vmatprep.mubr.f32.mxu0 %v16538_v51  ;;  %7244 = vmatprep.mubr.f32.mxu1 %v16512_v53  ;;  %v16543_v53 = vld [vmem:[#allocation26_spill] sm:$0xff]  ;;  %3357 = vst [vmem:[#allocation2 + $0xf8] sm:$0xff] %v8840_v15  ;;  %3358 = vst [vmem:[#allocation2 + $0x100] sm:$0x3] %v8840_v15  ;;  %v16556_v51 = vld [vmem:[#allocation39_spill] sm:$0xff] }
 0x382   :  { %3359 = vst [vmem:[#allocation2 + $0x108] sm:$0xff] %v8840_v15  ;;  %3360 = vst [vmem:[#allocation2 + $0x110] sm:$0xff] %v8840_v15 }
 0x383   :  { %3361 = vst [vmem:[#allocation2 + $0x118] sm:$0x3] %v8840_v15  ;;  %3362 = vst [vmem:[#allocation2 + $0x120] sm:$0xff] %v8840_v15 }
 0x384   :  { %2179 = vmatmul.mubr.f32.gmra.mrb[14].mxu0 %v8643_v17  ;;  %7245 = vmatmul.mubr.f32.gmra.mrb[50].mxu1 %v10513_v2  ;;  %v8646_v2 = vld [vmem:[%s15709_s0 + $0xa8] sm:$0xff]  ;;  %3363 = vst [vmem:[#allocation2 + $0x128] sm:$0xff] %v8840_v15  ;;  %3364 = vst [vmem:[#allocation2 + $0x130] sm:$0x3] %v8840_v15 }
 0x385   :  { %2183 = vmatprep.mubr.f32.mxu0 %v16539_v12  ;;  %7247 = vmatprep.mubr.f32.mxu1 %v10520_v42  ;;  %v16542_v42 = vld [vmem:[#allocation25_spill] sm:$0xff]  ;;  %3365 = vst [vmem:[#allocation2 + $0x138] sm:$0xff] %v8840_v15  ;;  %3366 = vst [vmem:[#allocation2 + $0x140] sm:$0xff] %v8840_v15 }
 0x386   :  { %3367 = vst [vmem:[#allocation2 + $0x148] sm:$0x3] %v8840_v15  ;;  %3368 = vst [vmem:[#allocation2 + $0x150] sm:$0xff] %v8840_v15 }
 0x387   :  { %3369 = vst [vmem:[#allocation2 + $0x158] sm:$0xff] %v8840_v15  ;;  %3370 = vst [vmem:[#allocation2 + $0x160] sm:$0x3] %v8840_v15 }
 0x388   :  { %2184 = vmatmul.mubr.f32.gmra.mrb[16].mxu0 %v8644_v26  ;;  %7248 = vmatmul.mubr.f32.gmra.mrb[52].mxu1 %v10526_v32  ;;  %v8647_v32 = vld [vmem:[%s15709_s0 + $0xb0] sm:$0xff]  ;;  %3371 = vst [vmem:[#allocation2 + $0x168] sm:$0xff] %v8840_v15  ;;  %3372 = vst [vmem:[#allocation2 + $0x170] sm:$0xff] %v8840_v15  ;;  %v8661_v26 = vld [vmem:[%s15709_s0 + $0x158] sm:$0xff] }
 0x389   :  { %2188 = vmatprep.mubr.f32.mxu0 %v16540_v11  ;;  %7250 = vmatprep.mubr.f32.mxu1 %v16517_v55  ;;  %v8649_v55 = vld [vmem:[%s15709_s0 + $0xc8] sm:$0xff]  ;;  %3373 = vst [vmem:[#allocation2 + $0x178] sm:$0x3] %v8840_v15  ;;  %3374 = vst [vmem:[#allocation2 + $0x180] sm:$0xff] %v8840_v15  ;;  %v16557_v11 = vld [vmem:[#allocation40_spill] sm:$0xff] }
 0x38a   :  { %3375 = vst [vmem:[#allocation2 + $0x188] sm:$0xff] %v8840_v15  ;;  %3376 = vst [vmem:[#allocation2 + $0x190] sm:$0x3] %v8840_v15 }
 0x38b   :  { %3379 = vst [vmem:[#allocation2 + $0x1a8] sm:$0x3] %v8840_v15  ;;  %3382 = vst [vmem:[#allocation2 + $0x1c0] sm:$0x3] %v8840_v15 }
 0x38c   :  { %2189 = vmatmul.mubr.f32.gmra.mrb[18].mxu0 %v8645_v4  ;;  %7251 = vmatmul.mubr.f32.gmra.mrb[54].mxu1 %v16519_v56  ;;  %v16545_v56 = vld [vmem:[#allocation28_spill] sm:$0xff]  ;;  %3383 = vst [vmem:[#allocation2 + $0x1c8] sm:$0xff] %v8840_v15  ;;  %3384 = vst [vmem:[#allocation2 + $0x1d0] sm:$0xff] %v8840_v15  ;;  %v8662_v4 = vld [vmem:[%s15709_s0 + $0x168] sm:$0xff] }
 0x38d   :  { %2193 = vmatprep.mubr.f32.mxu0 %v16541_v43  ;;  %7253 = vmatprep.mubr.f32.mxu1 %v16521_v14  ;;  %v16546_v14 = vld [vmem:[#allocation29_spill] sm:$0xff]  ;;  %3385 = vst [vmem:[#allocation2 + $0x1d8] sm:$0x3] %v8840_v15  ;;  %3386 = vst [vmem:[#allocation2 + $0x1e0] sm:$0xff] %v8840_v15 }
 0x38e   :  { %3387 = vst [vmem:[#allocation2 + $0x1e8] sm:$0xff] %v8840_v15  ;;  %3388 = vst [vmem:[#allocation2 + $0x1f0] sm:$0x3] %v8840_v15 }
 0x38f   :  { %3389 = vst [vmem:[#allocation2 + $0x1f8] sm:$0xff] %v8840_v15  ;;  %3390 = vst [vmem:[#allocation2 + $0x200] sm:$0xff] %v8840_v15 }
 0x390   :  { %2194 = vmatmul.mubr.f32.gmra.mrb[20].mxu0 %v8646_v2  ;;  %7254 = vmatmul.mubr.f32.gmra.mrb[56].mxu1 %v16523_v25  ;;  %v8652_v25 = vld [vmem:[%s15709_s0 + $0xf0] sm:$0xff]  ;;  %3391 = vst [vmem:[#allocation2 + $0x208] sm:$0x3] %v8840_v15  ;;  %3392 = vst [vmem:[#allocation2 + $0x210] sm:$0xff] %v8840_v15 }
 0x391   :  { %2198 = vmatprep.mubr.f32.mxu0 %v16542_v42  ;;  %7256 = vmatprep.mubr.f32.mxu1 %v16525_v35  ;;  %v8653_v35 = vld [vmem:[%s15709_s0 + $0xf8] sm:$0xff]  ;;  %3393 = vst [vmem:[#allocation2 + $0x218] sm:$0xff] %v8840_v15  ;;  %3394 = vst [vmem:[#allocation2 + $0x220] sm:$0x3] %v8840_v15  ;;  %v8663_v42 = vld [vmem:[%s15709_s0 + $0x170] sm:$0xff] }
 0x392   :  { %3395 = vst [vmem:[#allocation2 + $0x228] sm:$0xff] %v8840_v15  ;;  %3396 = vst [vmem:[#allocation2 + $0x230] sm:$0xff] %v8840_v15 }
 0x393   :  { %3397 = vst [vmem:[#allocation2 + $0x238] sm:$0x3] %v8840_v15  ;;  %3398 = vst [vmem:[#allocation2 + $0x240] sm:$0xff] %v8840_v15 }
 0x394   :  { %2199 = vmatmul.mubr.f32.gmra.mrb[22].mxu0 %v8647_v32  ;;  %7257 = vmatmul.mubr.f32.gmra.mrb[58].mxu1 %v16529_v62  ;;  %v8655_v62 = vld [vmem:[%s15709_s0 + $0x110] sm:$0xff]  ;;  %3399 = vst [vmem:[#allocation2 + $0x248] sm:$0xff] %v8840_v15  ;;  %3400 = vst [vmem:[#allocation2 + $0x250] sm:$0x3] %v8840_v15  ;;  %v752_v32 = vrot.slane %v10922_v29, 1 }
 0x395   :  { %2203 = vmatprep.mubr.f32.mxu0 %v16543_v53  ;;  %7259 = vmatprep.mubr.f32.mxu1 %v10917_v18  ;;  %v16548_v18 = vld [vmem:[#allocation31_spill] sm:$0xff]  ;;  %3401 = vst [vmem:[#allocation2 + $0x258] sm:$0xff] %v8840_v15  ;;  %3402 = vst [vmem:[#allocation2 + $0x260] sm:$0xff] %v8840_v15  ;;  %v753_v53 = vrot.slane %v10927_v61, 1 }
 0x396   :  { %3403 = vst [vmem:[#allocation2 + $0x268] sm:$0x3] %v8840_v15  ;;  %3404 = vst [vmem:[#allocation2 + $0x270] sm:$0xff] %v8840_v15 }
 0x397   :  { %3405 = vst [vmem:[#allocation2 + $0x278] sm:$0xff] %v8840_v15  ;;  %3406 = vst [vmem:[#allocation2 + $0x280] sm:$0x3] %v8840_v15 }
 0x398   :  { %2204 = vmatmul.mubr.f32.gmra.mrb[24].mxu0 %v8648_v7  ;;  %7260 = vmatmul.mubr.f32.gmra.mrb[60].mxu1 %v10944_v50  ;;  %v16547_v50 = vld [vmem:[#allocation30_spill] sm:$0xff]  ;;  %3407 = vst [vmem:[#allocation2 + $0x288] sm:$0xff] %v8840_v15  ;;  %3408 = vst [vmem:[#allocation2 + $0x290] sm:$0xff] %v8840_v15  ;;  %v8664_v7 = vld [vmem:[%s15709_s0 + $0x180] sm:$0xff] }
 0x399   :  { %2208 = vmatprep.mubr.f32.mxu0 %v16544_v30  ;;  %3409 = vst [vmem:[#allocation2 + $0x298] sm:$0x3] %v8840_v15  ;;  %3410 = vst [vmem:[#allocation2 + $0x2a0] sm:$0xff] %v8840_v15  ;;  %v755_v30 = vrot.slane %v10934_v13, 1  ;;  %v11240_v13 = vld [vmem:[%s15709_s0 + $0x358] sm:$0x3] }
 0x39a   :  { %3411 = vst [vmem:[#allocation2 + $0x2a8] sm:$0xff] %v8840_v15  ;;  %3412 = vst [vmem:[#allocation2 + $0x2b0] sm:$0x3] %v8840_v15 }
 0x39b   :  { %3413 = vst [vmem:[#allocation2 + $0x2b8] sm:$0xff] %v8840_v15  ;;  %3414 = vst [vmem:[#allocation2 + $0x2c0] sm:$0xff] %v8840_v15 }
 0x39c   :  { %2209 = vmatmul.mubr.f32.gmra.mrb[26].mxu0 %v8649_v55  ;;  %3415 = vst [vmem:[#allocation2 + $0x2c8] sm:$0x3] %v8840_v15  ;;  %3416 = vst [vmem:[#allocation2 + $0x2d0] sm:$0xff] %v8840_v15 }
 0x39d   :  { %2213 = vmatprep.mubr.f32.mxu0 %v16545_v56  ;;  %3417 = vst [vmem:[#allocation2 + $0x2d8] sm:$0xff] %v8840_v15  ;;  %3418 = vst [vmem:[#allocation2 + $0x2e0] sm:$0x3] %v8840_v15  ;;  %v11231_v56 = vld [vmem:[%s15709_s0 + $0x350] sm:$0xff] }
 0x39e   :  { %3419 = vst [vmem:[#allocation2 + $0x2e8] sm:$0xff] %v8840_v15  ;;  %3420 = vst [vmem:[#allocation2 + $0x2f0] sm:$0xff] %v8840_v15 }
 0x39f   :  { %3421 = vst [vmem:[#allocation2 + $0x2f8] sm:$0x3] %v8840_v15  ;;  %3422 = vst [vmem:[#allocation2 + $0x300] sm:$0xff] %v8840_v15 }
 0x3a0   :  { %2214 = vmatmul.mubr.f32.gmra.mrb[28].mxu0 %v8650_v37  ;;  %3423 = vst [vmem:[#allocation2 + $0x308] sm:$0xff] %v8840_v15  ;;  %3424 = vst [vmem:[#allocation2 + $0x310] sm:$0x3] %v8840_v15 }
 0x3a1   :  { %2218 = vmatprep.mubr.f32.mxu0 %v16546_v14  ;;  %3425 = vst [vmem:[#allocation2 + $0x318] sm:$0xff] %v8840_v15  ;;  %3426 = vst [vmem:[#allocation2 + $0x320] sm:$0xff] %v8840_v15  ;;  %v772_v14 = vrot.slane %v11231_v56, 2 }
 0x3a2   :  { %3427 = vst [vmem:[#allocation2 + $0x328] sm:$0x3] %v8840_v15  ;;  %3428 = vst [vmem:[#allocation2 + $0x330] sm:$0xff] %v8840_v15 }
 0x3a3   :  { %3429 = vst [vmem:[#allocation2 + $0x338] sm:$0xff] %v8840_v15  ;;  %3430 = vst [vmem:[#allocation2 + $0x340] sm:$0x3] %v8840_v15 }
 0x3a4   :  { %2219 = vmatmul.mubr.f32.gmra.mrb[30].mxu0 %v8651_v28  ;;  %3433 = vst [vmem:[#allocation2 + $0x358] sm:$0x3] %v8840_v15  ;;  %v8665_v28 = vld [vmem:[%s15709_s0 + $0x188] sm:$0xff]  ;;  %v8673_v15 = vld [vmem:[%s15709_s0 + $0x230] sm:$0xff] }
 0x3a5   :  { %2223 = vmatprep.mubr.f32.mxu0 %v16547_v50  ;;  %v774_v50 = vrot.slane %v11240_v13, 2 }
 0x3a8   :  { %2224 = vmatmul.mubr.f32.gmra.mrb[32].mxu0 %v8652_v25 }
 0x3a9   :  { %2228 = vmatprep.mubr.f32.mxu0 %v16548_v18  ;;  %v756_v18 = vsel %vm262_vm0, %v753_v53, %v755_v30  ;;  %v16561_v30 = vld [vmem:[#allocation96_spill] sm:$0xff] }
 0x3ac   :  { %2229 = vmatmul.mubr.f32.gmra.mrb[34].mxu0 %v8653_v35  ;;  %v775_v35 = vsel %vm487_vm1, %v772_v14, %v774_v50 }
 0x3ad   :  { %2233 = vmatprep.mubr.f32.mxu0 %v16549_v9 }
 0x3b0   :  { %2234 = vmatmul.mubr.f32.gmra.mrb[36].mxu0 %v8654_v24 }
 0x3b1   :  { %2238 = vmatprep.mubr.f32.mxu0 %v16550_v57  ;;  %v8666_v57 = vld [vmem:[%s15709_s0 + $0x1e0] sm:$0xff] }
 0x3b4   :  { %2239 = vmatmul.mubr.f32.gmra.mrb[38].mxu0 %v8655_v62 }
 0x3b5   :  { %2243 = vmatprep.mubr.f32.mxu0 %v16551_v38 }
 0x3b6   :  { %v11068_v47 = vpop.f32.mrb[0].mxu1 }
 0x3b7   :  { %v11073_v46 = vpop.f32.mrb[1].mxu1 }
 0x3b8   :  { %2244 = vmatmul.mubr.f32.gmra.mrb[40].mxu0 %v8656_v63  ;;  %v8669_v63 = vld [vmem:[%s15709_s0 + $0x200] sm:$0xff] }
 0x3b9   :  { %2248 = vmatprep.mubr.f32.mxu0 %v16552_v31 }
 0x3ba   :  { %v11181_v41 = vpop.f32.mrb[2].mxu1 }
 0x3bb   :  { %v11183_v6 = vpop.f32.mrb[3].mxu1 }
 0x3bc   :  { %2249 = vmatmul.mubr.f32.gmra.mrb[42].mxu0 %v8657_v59  ;;  %v8671_v59 = vld [vmem:[%s15709_s0 + $0x218] sm:$0xff] }
 0x3bd   :  { %2253 = vmatprep.mubr.f32.mxu0 %v16553_v33 }
 0x3be   :  { %v11193_v17 = vpop.f32.mrb[4].mxu1 }
 0x3bf   :  { %v11195_v12 = vpop.f32.mrb[5].mxu1 }
 0x3c0   :  { %2254 = vmatmul.mubr.f32.gmra.mrb[44].mxu0 %v8658_v22 }
 0x3c1   :  { %2258 = vmatprep.mubr.f32.mxu0 %v16554_v34  ;;  %v8675_v34 = vld [vmem:[%s15709_s0 + $0x248] sm:$0xff] }
 0x3c2   :  { %v11205_v43 = vpop.f32.mrb[6].mxu1 }
 0x3c3   :  { %v11207_v2 = vpop.f32.mrb[7].mxu1 }
 0x3c4   :  { %2259 = vmatmul.mubr.f32.gmra.mrb[46].mxu0 %v8659_v16 }
 0x3c5   :  { %2263 = vmatprep.mubr.f32.mxu0 %v16555_v8  ;;  %v8677_v8 = vld [vmem:[%s15709_s0 + $0x260] sm:$0xff] }
 0x3c6   :  { %v11221_v55 = vpop.f32.mrb[8].mxu1 }
 0x3c7   :  { %v11233_v37 = vpop.f32.mrb[9].mxu1 }
 0x3c8   :  { %2264 = vmatmul.mubr.f32.gmra.mrb[48].mxu0 %v8660_v48 }
 0x3c9   :  { %2268 = vmatprep.mubr.f32.mxu0 %v16556_v51  ;;  %v8679_v51 = vld [vmem:[%s15709_s0 + $0x278] sm:$0xff] }
 0x3ca   :  { %v11250_v9 = vpop.f32.mrb[10].mxu1 }
 0x3cb   :  { %v11252_v24 = vpop.f32.mrb[11].mxu1 }
 0x3cc   :  { %2269 = vmatmul.mubr.f32.gmra.mrb[50].mxu0 %v8661_v26  ;;  %v16558_v26 = vld [vmem:[#allocation89_spill] sm:$0xff] }
 0x3cd   :  { %2273 = vmatprep.mubr.f32.mxu0 %v16557_v11 }
 0x3ce   :  { %v11260_v62 = vpop.f32.mrb[12].mxu1 }
 0x3cf   :  { %v11262_v38 = vpop.f32.mrb[13].mxu1 }
 0x3d0   :  { %2274 = vmatmul.mubr.f32.gmra.mrb[52].mxu0 %v8662_v4  ;;  %v8681_v4 = vld [vmem:[%s15709_s0 + $0x290] sm:$0xff] }
 0x3d1   :  { %2278 = vmatprep.mubr.f32.mxu0 %v16487_v0  ;;  %v754_v0 = vsel %vm262_vm0, %v752_v32, %v753_v53  ;;  %v16560_v32 = vld [vmem:[#allocation94_spill] sm:$0xff] }
 0x3d4   :  { %2279 = vmatmul.mubr.f32.gmra.mrb[54].mxu0 %v8663_v42  ;;  %v16559_v42 = vld [vmem:[#allocation91_spill] sm:$0xff] }
 0x3d5   :  { %2283 = vmatprep.mubr.f32.mxu0 %v10803_v23  ;;  %v11226_v23 = vld [vmem:[%s15709_s0 + $0x348] sm:$0xff] }
 0x3d8   :  { %2284 = vmatmul.mubr.f32.gmra.mrb[56].mxu0 %v8664_v7 }
 0x3d9   :  { %2288 = vmatprep.mubr.f32.mxu0 %v10817_v58  ;;  %v771_v58 = vrot.slane %v11226_v23, 2 }
 0x3db   :  { %v773_v25 = vsel %vm487_vm1, %v771_v58, %v772_v14  ;;  %v8684_v58 = vld [vmem:[%s15709_s0 + $0x2b8] sm:$0xff] }
 0x3dc   :  { %2289 = vmatmul.mubr.f32.gmra.mrb[58].mxu0 %v8665_v28  ;;  %7262 = vmatprep.mubr.f32.mxu1 %v773_v25  ;;  %v16562_v14 = vld [vmem:[#allocation99_spill] sm:$0xff]  ;;  %v8685_v25 = vld [vmem:[%s15709_s0 + $0x2c0] sm:$0xff] }
 0x3dd   :  { %2293 = vmatprep.mubr.f32.mxu0 %v754_v0  ;;  %7263 = vmatmul.mubr.f32.gmra.mrb[62].mxu1 %v775_v35  ;;  %v8683_v0 = vld [vmem:[%s15709_s0 + $0x2a8] sm:$0xff]  ;;  %v8686_v35 = vld [vmem:[%s15709_s0 + $0x2d0] sm:$0xff] }
 0x3e0   :  { %2294 = vmatmul.mubr.f32.gmra.mrb[60].mxu0 %v10922_v29  ;;  %v8667_v29 = vld [vmem:[%s15709_s0 + $0x1e8] sm:$0xff] }
 0x3e1   :  { %2298 = vmatprep.mubr.f32.mxu0 %v756_v18  ;;  %v16563_v18 = vld [vmem:[#allocation101_spill] sm:$0xff] }
 0x3e4   :  { %2299 = vmatmul.mubr.f32.gmra.mrb[62].mxu0 %v10927_v61  ;;  %v11272_v61 = vpop.f32.mrb[14].mxu1 }
 0x3e5   :  { %2303 = vmatprep.mubr.f32.mxu0 %v16490_v49  ;;  %v8668_v49 = vld [vmem:[%s15709_s0 + $0x1f8] sm:$0xff] }
 0x3e8   :  { %2304 = vmatmul.mubr.f32.gmra.mrb[64].mxu0 %v8666_v57  ;;  %v16564_v57 = vld [vmem:[#allocation104_spill] sm:$0xff] }
 0x3e9   :  { %2308 = vmatprep.mubr.f32.mxu0 %v16491_v19  ;;  %v11274_v19 = vpop.f32.mrb[15].mxu1 }
 0x3ea   :  { %v11284_v31 = vpop.f32.mrb[16].mxu1 }
 0x3ec   :  { %2309 = vmatmul.mubr.f32.gmra.mrb[66].mxu0 %v8667_v29 }
 0x3ed   :  { %2313 = vmatprep.mubr.f32.mxu0 %v16492_v10  ;;  %v8670_v10 = vld [vmem:[%s15709_s0 + $0x210] sm:$0xff] }
 0x3f0   :  { %2314 = vmatmul.mubr.f32.gmra.mrb[68].mxu0 %v8668_v49 }
 0x3f1   :  { %2318 = vmatprep.mubr.f32.mxu0 %v16493_v20  ;;  %v11286_v20 = vpop.f32.mrb[17].mxu1 }
 0x3f2   :  { %v11296_v33 = vpop.f32.mrb[18].mxu1 }
 0x3f4   :  { %2319 = vmatmul.mubr.f32.gmra.mrb[70].mxu0 %v8669_v63 }
 0x3f5   :  { %2323 = vmatprep.mubr.f32.mxu0 %v16494_v39  ;;  %v8672_v39 = vld [vmem:[%s15709_s0 + $0x228] sm:$0xff] }
 0x3f8   :  { %2324 = vmatmul.mubr.f32.gmra.mrb[72].mxu0 %v8670_v10 }
 0x3f9   :  { %2328 = vmatprep.mubr.f32.mxu0 %v16495_v21  ;;  %v11298_v21 = vpop.f32.mrb[19].mxu1 }
 0x3fa   :  { %v11308_v22 = vpop.f32.mrb[20].mxu1 }
 0x3fc   :  { %2329 = vmatmul.mubr.f32.gmra.mrb[74].mxu0 %v8671_v59 }
 0x3fd   :  { %2333 = vmatprep.mubr.f32.mxu0 %v16496_v54  ;;  %v8674_v54 = vld [vmem:[%s15709_s0 + $0x240] sm:$0xff] }
 0x400   :  { %2334 = vmatmul.mubr.f32.gmra.mrb[76].mxu0 %v8672_v39  ;;  %v8687_v39 = vld [vmem:[%s15709_s0 + $0x2d8] sm:$0xff] }
 0x401   :  { %2338 = vmatprep.mubr.f32.mxu0 %v16497_v36  ;;  %v11310_v36 = vpop.f32.mrb[21].mxu1 }
 0x402   :  { %v11320_v16 = vpop.f32.mrb[22].mxu1 }
 0x404   :  { %2339 = vmatmul.mubr.f32.gmra.mrb[78].mxu0 %v8673_v15  ;;  %v16566_v15 = vld [vmem:[#allocation106_spill] sm:$0xff] }
 0x405   :  { %2343 = vmatprep.mubr.f32.mxu0 %v16498_v1  ;;  %v8676_v1 = vld [vmem:[%s15709_s0 + $0x258] sm:$0xff] }
 0x408   :  { %2344 = vmatmul.mubr.f32.gmra.mrb[80].mxu0 %v8674_v54 }
 0x409   :  { %2348 = vmatprep.mubr.f32.mxu0 %v16499_v5  ;;  %v11322_v5 = vpop.f32.mrb[23].mxu1 }
 0x40a   :  { %v11332_v48 = vpop.f32.mrb[24].mxu1 }
 0x40c   :  { %2349 = vmatmul.mubr.f32.gmra.mrb[82].mxu0 %v8675_v34 }
 0x40d   :  { %2353 = vmatprep.mubr.f32.mxu0 %v16500_v40  ;;  %v8678_v40 = vld [vmem:[%s15709_s0 + $0x270] sm:$0xff] }
 0x410   :  { %2354 = vmatmul.mubr.f32.gmra.mrb[84].mxu0 %v8676_v1 }
 0x411   :  { %2358 = vmatprep.mubr.f32.mxu0 %v16501_v27  ;;  %v11334_v27 = vpop.f32.mrb[25].mxu1 }
 0x412   :  { %v11344_v11 = vpop.f32.mrb[26].mxu1 }
 0x414   :  { %2359 = vmatmul.mubr.f32.gmra.mrb[86].mxu0 %v8677_v8  ;;  %v8688_v8 = vld [vmem:[%s15709_s0 + $0x2e8] sm:$0xff] }
 0x415   :  { %2363 = vmatprep.mubr.f32.mxu0 %v16502_v52  ;;  %v8680_v52 = vld [vmem:[%s15709_s0 + $0x288] sm:$0xff] }
 0x418   :  { %2364 = vmatmul.mubr.f32.gmra.mrb[88].mxu0 %v8678_v40 }
 0x419   :  { %2368 = vmatprep.mubr.f32.mxu0 %v16503_v45  ;;  %v11346_v45 = vpop.f32.mrb[27].mxu1 }
 0x41a   :  { %v11356_v53 = vpop.f32.mrb[28].mxu1 }
 0x41b   :  { %v11358_v7 = vpop.f32.mrb[29].mxu1 }
 0x41c   :  { %2369 = vmatmul.mubr.f32.gmra.mrb[90].mxu0 %v8679_v51 }
 0x41d   :  { %2373 = vmatprep.mubr.f32.mxu0 %v16505_v60  ;;  %v8682_v60 = vld [vmem:[%s15709_s0 + $0x2a0] sm:$0xff] }
 0x420   :  { %2374 = vmatmul.mubr.f32.gmra.mrb[92].mxu0 %v8680_v52 }
 0x421   :  { %2378 = vmatprep.mubr.f32.mxu0 %v16558_v26 }
 0x424   :  { %2379 = vmatmul.mubr.f32.gmra.mrb[94].mxu0 %v8681_v4 }
 0x425   :  { %2383 = vmatprep.mubr.f32.mxu0 %v16559_v42  ;;  %v16570_v42 = vld [vmem:[#allocation109_spill] sm:$0xff] }
 0x428   :  { %2384 = vmatmul.mubr.f32.gmra.mrb[96].mxu0 %v8682_v60 }
 0x429   :  { %2388 = vmatprep.mubr.f32.mxu0 %v16560_v32 }
 0x42c   :  { %2389 = vmatmul.mubr.f32.gmra.mrb[98].mxu0 %v8683_v0 }
 0x42d   :  { %2393 = vmatprep.mubr.f32.mxu0 %v16561_v30  ;;  %v8690_v30 = vld [vmem:[%s15709_s0 + $0x300] sm:$0xff] }
 0x42f   :  { %v11368_v28 = vpop.f32.mrb[30].mxu1 }
 0x430   :  { %2394 = vmatmul.mubr.f32.gmra.mrb[100].mxu0 %v8684_v58  ;;  %v11370_v50 = vpop.f32.mrb[31].mxu1 }
 0x431   :  { %2398 = vmatprep.mubr.f32.mxu0 %v16562_v14 }
 0x433   :  { %v11380_v29 = vpop.f32.mrb[32].mxu1 }
 0x434   :  { %2399 = vmatmul.mubr.f32.gmra.mrb[102].mxu0 %v8685_v25  ;;  %v11382_v63 = vpop.f32.mrb[33].mxu1 }
 0x435   :  { %2403 = vmatprep.mubr.f32.mxu0 %v16563_v18 }
 0x437   :  { %v11398_v40 = vpop.f32.mrb[34].mxu1 }
 0x438   :  { %2404 = vmatmul.mubr.f32.gmra.mrb[104].mxu0 %v8686_v35  ;;  %v11400_v52 = vpop.f32.mrb[35].mxu1 }
 0x439   :  { %2408 = vmatprep.mubr.f32.mxu0 %v16564_v57  ;;  %v16572_v57 = vld [vmem:[#allocation113_spill] sm:$0xff] }
 0x43b   :  { %v2145_v49 = vpop.f32.mrb[0].mxu0  ;;  %v11416_v58 = vpop.f32.mrb[36].mxu1 }
 0x43c   :  { %v11385_v10 = vadd.f32 %v11073_v46, %v2145_v49  ;;  %v2147_v59 = vpop.f32.mrb[1].mxu0  ;;  %2409 = vmatmul.mubr.f32.gmra.mrb[106].mxu0 %v8687_v39  ;;  %v16568_v46 = vld [vmem:[#allocation107_spill] sm:$0xff]  ;;  %v11418_v25 = vpop.f32.mrb[37].mxu1 }
 0x43d   :  { %2413 = vmatprep.mubr.f32.mxu0 %v16566_v15  ;;  %v8692_v15 = vld [vmem:[%s15709_s0 + $0x318] sm:$0xff] }
 0x43e   :  { %16565 = vst [vmem:[#allocation60_spill] sm:$0xff] %v11385_v10 }
 0x43f   :  { %v2150_v54 = vpop.f32.mrb[2].mxu0 }
 0x440   :  { %v11392_v34 = vadd.f32 %v11068_v47, %v2150_v54  ;;  %v2152_v1 = vpop.f32.mrb[3].mxu0  ;;  %2414 = vmatmul.mubr.f32.gmra.mrb[108].mxu0 %v8688_v8  ;;  %v8689_v47 = vld [vmem:[%s15709_s0 + $0x2f0] sm:$0xff]  ;;  %v11434_v54 = vpop.f32.mrb[38].mxu1 }
 0x441   :  { %2418 = vmatprep.mubr.f32.mxu0 %v16568_v46  ;;  %v11436_v8 = vpop.f32.mrb[39].mxu1 }
 0x442   :  { %16567 = vst [vmem:[#allocation63_spill] sm:$0xff] %v11392_v34 }
 0x443   :  { %v2155_v51 = vpop.f32.mrb[4].mxu0 }
 0x444   :  { %v11403_v26 = vadd.f32 %v11183_v6, %v2155_v51  ;;  %v2157_v4 = vpop.f32.mrb[5].mxu0  ;;  %2419 = vmatmul.mubr.f32.gmra.mrb[110].mxu0 %v8689_v47  ;;  %v16571_v6 = vld [vmem:[#allocation111_spill] sm:$0xff]  ;;  %v758_v47 = vrot.slane %v11231_v56, 1 }
 0x445   :  { %2423 = vmatprep.mubr.f32.mxu0 %v16570_v42  ;;  %v757_v4 = vrot.slane %v11226_v23, 1 }
 0x446   :  { %16569 = vst [vmem:[#allocation67_spill] sm:$0xff] %v11403_v26 }
 0x447   :  { %v2160_v60 = vpop.f32.mrb[6].mxu0 }
 0x448   :  { %v11410_v32 = vadd.f32 %v11181_v41, %v2160_v60  ;;  %v2162_v0 = vpop.f32.mrb[7].mxu0  ;;  %2424 = vmatmul.mubr.f32.gmra.mrb[112].mxu0 %v8690_v30  ;;  %v8691_v41 = vld [vmem:[%s15709_s0 + $0x308] sm:$0xff]  ;;  %v759_v30 = vsel %vm262_vm0, %v757_v4, %v758_v47 }
 0x449   :  { %2428 = vmatprep.mubr.f32.mxu0 %v16571_v6  ;;  %v11456_v6 = vpop.f32.mrb[40].mxu1 }
 0x44b   :  { %v2165_v14 = vpop.f32.mrb[8].mxu0 }
 0x44c   :  { %v11421_v18 = vadd.f32 %v11195_v12, %v2165_v14  ;;  %v2167_v35 = vpop.f32.mrb[9].mxu0  ;;  %2429 = vmatmul.mubr.f32.gmra.mrb[114].mxu0 %v8691_v41  ;;  %v16573_v12 = vld [vmem:[#allocation114_spill] sm:$0xff] }
 0x44d   :  { %2433 = vmatprep.mubr.f32.mxu0 %v16572_v57  ;;  %v11458_v35 = vpop.f32.mrb[41].mxu1  ;;  %v8695_v57 = vld [vmem:[%s15709_s0 + $0x338] sm:$0xff] }
 0x44f   :  { %v2170_v49 = vpop.f32.mrb[10].mxu0 }
 0x450   :  { %v11428_v59 = vadd.f32 %v11193_v17, %v2170_v49  ;;  %v2172_v39 = vpop.f32.mrb[11].mxu0  ;;  %2434 = vmatmul.mubr.f32.gmra.mrb[116].mxu0 %v8692_v15  ;;  %v8693_v17 = vld [vmem:[%s15709_s0 + $0x320] sm:$0xff]  ;;  %v11471_v15 = vpop.f32.mrb[42].mxu1 }
 0x451   :  { %2438 = vmatprep.mubr.f32.mxu0 %v16573_v12  ;;  %v11473_v12 = vpop.f32.mrb[43].mxu1 }
 0x453   :  { %v2175_v1 = vpop.f32.mrb[12].mxu0 }
 0x454   :  { %v11439_v46 = vadd.f32 %v11207_v2, %v2175_v1  ;;  %v2177_v51 = vpop.f32.mrb[13].mxu0  ;;  %2439 = vmatmul.mubr.f32.gmra.mrb[118].mxu0 %v8693_v17  ;;  %v8694_v2 = vld [vmem:[%s15709_s0 + $0x330] sm:$0xff] }
 0x455   :  { %2443 = vmatprep.mubr.f32.mxu0 %v10940_v44  ;;  %v760_v44 = vrot.slane %v11240_v13, 1 }
 0x457   :  { %v2180_v42 = vpop.f32.mrb[14].mxu0 }
 0x458   :  { %v11448_v60 = vadd.f32 %v11205_v43, %v2180_v42  ;;  %v2182_v0 = vpop.f32.mrb[15].mxu0  ;;  %2444 = vmatmul.mubr.f32.gmra.mrb[120].mxu0 %v8694_v2 }
 0x459   :  { %2448 = vmatprep.mubr.f32.mxu0 %v10951_v3  ;;  %v761_v3 = vsel %vm262_vm0, %v758_v47, %v760_v44  ;;  %v11482_v47 = vpop.f32.mrb[44].mxu1 }
 0x45a   :  { %v11484_v42 = vpop.f32.mrb[45].mxu1 }
 0x45b   :  { %v2185_v14 = vpop.f32.mrb[16].mxu0 }
 0x45c   :  { %v11461_v43 = vadd.f32 %v11233_v37, %v2185_v14  ;;  %v2187_v41 = vpop.f32.mrb[17].mxu0  ;;  %2449 = vmatmul.mubr.f32.gmra.mrb[122].mxu0 %v8695_v57 }
 0x45d   :  { %2453 = vmatprep.mubr.f32.mxu0 %v759_v30 }
 0x45f   :  { %v2190_v49 = vpop.f32.mrb[18].mxu0 }
 0x460   :  { %v11468_v13 = vadd.f32 %v11221_v55, %v2190_v49  ;;  %v2192_v39 = vpop.f32.mrb[19].mxu0  ;;  %2454 = vmatmul.mubr.f32.gmra.mrb[124].mxu0 %v11226_v23 }
 0x461   :  { %2458 = vmatprep.mubr.f32.mxu0 %v761_v3 }
 0x463   :  { %v2195_v37 = vpop.f32.mrb[20].mxu0 }
 0x464   :  { %v11476_v1 = vadd.f32 %v11252_v24, %v2195_v37  ;;  %v2197_v51 = vpop.f32.mrb[21].mxu0  ;;  %2459 = vmatmul.mubr.f32.gmra.mrb[126].mxu0 %v11231_v56  ;;  %v11492_v56 = vpop.f32.mrb[46].mxu1 }
 0x467   :  { %v2200_v17 = vpop.f32.mrb[22].mxu0 }
 0x468   :  { %v11480_v4 = vadd.f32 %v11250_v9, %v2200_v17  ;;  %v2202_v55 = vpop.f32.mrb[23].mxu0  ;;  %v11494_v9 = vpop.f32.mrb[47].mxu1 }
 0x469   :  { %v11502_v39 = vpop.f32.mrb[48].mxu1 }
 0x46b   :  { %v2205_v23 = vpop.f32.mrb[24].mxu0 }
 0x46c   :  { %v11487_v0 = vadd.f32 %v11262_v38, %v2205_v23  ;;  %v2207_v2 = vpop.f32.mrb[25].mxu0 }
 0x46f   :  { %v2210_v30 = vpop.f32.mrb[26].mxu0 }
 0x470   :  { %v11490_v24 = vadd.f32 %v11260_v62, %v2210_v30  ;;  %v2212_v44 = vpop.f32.mrb[27].mxu0  ;;  %v11504_v62 = vpop.f32.mrb[49].mxu1 }
 0x471   :  { %v11512_v2 = vpop.f32.mrb[50].mxu1 }
 0x472   :  { %16574 = vst [vmem:[#allocation65_spill] sm:$0xff] %v11512_v2 }
 0x473   :  { %v2215_v14 = vpop.f32.mrb[28].mxu0 }
 0x474   :  { %v11497_v41 = vadd.f32 %v11274_v19, %v2215_v14  ;;  %v2217_v57 = vpop.f32.mrb[29].mxu0 }
 0x477   :  { %v2220_v3 = vpop.f32.mrb[30].mxu0 }
 0x478   :  { %v11500_v49 = vadd.f32 %v11272_v61, %v2220_v3  ;;  %v2222_v38 = vpop.f32.mrb[31].mxu0  ;;  %v11514_v61 = vpop.f32.mrb[51].mxu1 }
 0x479   :  { %v11522_v38 = vpop.f32.mrb[52].mxu1 }
 0x47a   :  { %16575 = vst [vmem:[#allocation68_spill] sm:$0xff] %v11522_v38 }
 0x47b   :  { %v2225_v37 = vpop.f32.mrb[32].mxu0 }
 0x47c   :  { %v11507_v51 = vadd.f32 %v11286_v20, %v2225_v37  ;;  %v2227_v17 = vpop.f32.mrb[33].mxu0 }
 0x47f   :  { %v2230_v55 = vpop.f32.mrb[34].mxu0 }
 0x480   :  { %v11510_v23 = vadd.f32 %v11284_v31, %v2230_v55  ;;  %v2232_v19 = vpop.f32.mrb[35].mxu0  ;;  %v11524_v31 = vpop.f32.mrb[53].mxu1 }
 0x481   :  { %16576 = vst [vmem:[#allocation72_spill] sm:$0xff] %v11524_v31 }
 0x483   :  { %v2235_v30 = vpop.f32.mrb[36].mxu0 }
 0x484   :  { %v11517_v44 = vadd.f32 %v11298_v21, %v2235_v30  ;;  %v2237_v14 = vpop.f32.mrb[37].mxu0  ;;  %v11532_v30 = vpop.f32.mrb[54].mxu1 }
 0x485   :  { %16577 = vst [vmem:[#allocation70_spill] sm:$0xff] %v11532_v30 }
 0x487   :  { %v2240_v57 = vpop.f32.mrb[38].mxu0 }
 0x488   :  { %v11520_v3 = vadd.f32 %v11296_v33, %v2240_v57  ;;  %v2242_v20 = vpop.f32.mrb[39].mxu0  ;;  %v11534_v33 = vpop.f32.mrb[55].mxu1 }
 0x489   :  { %16578 = vst [vmem:[#allocation73_spill] sm:$0xff] %v11534_v33 }
 0x48b   :  { %v2245_v37 = vpop.f32.mrb[40].mxu0 }
 0x48c   :  { %v11527_v17 = vadd.f32 %v11310_v36, %v2245_v37  ;;  %v2247_v55 = vpop.f32.mrb[41].mxu0  ;;  %v11542_v37 = vpop.f32.mrb[56].mxu1 }
 0x48d   :  { %16579 = vst [vmem:[#allocation77_spill] sm:$0xff] %v11542_v37 }
 0x48f   :  { %v2250_v19 = vpop.f32.mrb[42].mxu0 }
 0x490   :  { %v11530_v2 = vadd.f32 %v11308_v22, %v2250_v19  ;;  %v2252_v21 = vpop.f32.mrb[43].mxu0  ;;  %v11544_v22 = vpop.f32.mrb[57].mxu1 }
 0x491   :  { %16580 = vst [vmem:[#allocation75_spill] sm:$0xff] %v11544_v22 }
 0x493   :  { %v2255_v14 = vpop.f32.mrb[44].mxu0 }
 0x494   :  { %v11537_v57 = vadd.f32 %v11322_v5, %v2255_v14  ;;  %v2257_v20 = vpop.f32.mrb[45].mxu0  ;;  %v11552_v14 = vpop.f32.mrb[58].mxu1 }
 0x495   :  { %16581 = vst [vmem:[#allocation78_spill] sm:$0xff] %v11552_v14 }
 0x497   :  { %v2260_v38 = vpop.f32.mrb[46].mxu0 }
 0x498   :  { %v11540_v31 = vadd.f32 %v11320_v16, %v2260_v38  ;;  %v2262_v36 = vpop.f32.mrb[47].mxu0  ;;  %v11554_v16 = vpop.f32.mrb[59].mxu1 }
 0x49b   :  { %v2265_v55 = vpop.f32.mrb[48].mxu0 }
 0x49c   :  { %v11547_v19 = vadd.f32 %v11334_v27, %v2265_v55  ;;  %v2267_v21 = vpop.f32.mrb[49].mxu0  ;;  %v11562_v55 = vpop.f32.mrb[60].mxu1 }
 0x49d   :  { %16582 = vst [vmem:[#allocation82_spill] sm:$0xff] %v11562_v55 }
 0x49f   :  { %v2270_v30 = vpop.f32.mrb[50].mxu0 }
 0x4a0   :  { %v11550_v33 = vadd.f32 %v11332_v48, %v2270_v30  ;;  %v2272_v5 = vpop.f32.mrb[51].mxu0  ;;  %v11564_v48 = vpop.f32.mrb[61].mxu1 }
 0x4a1   :  { %16583 = vst [vmem:[#allocation80_spill] sm:$0xff] %v11564_v48 }
 0x4a3   :  { %v2275_v20 = vpop.f32.mrb[52].mxu0 }
 0x4a4   :  { %v11557_v38 = vadd.f32 %v11346_v45, %v2275_v20  ;;  %v2277_v36 = vpop.f32.mrb[53].mxu0  ;;  %v2851_v45 = vadd.f32 %v11392_v34, %v11385_v10 }
 0x4a7   :  { %v2280_v37 = vpop.f32.mrb[54].mxu0 }
 0x4a8   :  { %v11560_v22 = vadd.f32 %v11344_v11, %v2280_v37  ;;  %v2282_v27 = vpop.f32.mrb[55].mxu0  ;;  %v2852_v11 = vadd.f32 %v2851_v45, %v11403_v26 }
 0x4aa   :  { %v2853_v48 = vadd.f32 %v2852_v11, %v11410_v32 }
 0x4ab   :  { %v2285_v21 = vpop.f32.mrb[56].mxu0 }
 0x4ac   :  { %v11567_v30 = vadd.f32 %v11358_v7, %v2285_v21  ;;  %v2287_v5 = vpop.f32.mrb[57].mxu0 }
 0x4ad   :  { %v2854_v5 = vadd.f32 %v2853_v48, %v11421_v18 }
 0x4af   :  { %v2290_v14 = vpop.f32.mrb[58].mxu0 }
 0x4b0   :  { %v11572_v20 = vadd.f32 %v11356_v53, %v2290_v14  ;;  %v2292_v36 = vpop.f32.mrb[59].mxu0  ;;  %v11575_v37 = vpop.f32.mrb[62].mxu1  ;;  %v2855_v53 = vadd.f32 %v2854_v5, %v11428_v59 }
 0x4b1   :  { %v11577_v55 = vpop.f32.mrb[63].mxu1 }
 0x4b2   :  { %v2856_v36 = vadd.f32 %v2855_v53, %v11439_v46 }
 0x4b3   :  { %v2295_v27 = vpop.f32.mrb[60].mxu0 }
 0x4b4   :  { %v11581_v7 = vadd.f32 %v11370_v50, %v2295_v27  ;;  %v2297_v21 = vpop.f32.mrb[61].mxu0  ;;  %v2857_v10 = vadd.f32 %v2856_v36, %v11448_v60 }
 0x4b6   :  { %v2858_v27 = vadd.f32 %v2857_v10, %v11461_v43 }
 0x4b7   :  { %v2300_v34 = vpop.f32.mrb[62].mxu0 }
 0x4b8   :  { %v11586_v14 = vadd.f32 %v11368_v28, %v2300_v34  ;;  %v2302_v45 = vpop.f32.mrb[63].mxu0  ;;  %v2859_v48 = vadd.f32 %v2858_v27, %v11468_v13 }
 0x4ba   :  { %v2860_v34 = vadd.f32 %v2859_v48, %v11476_v1 }
 0x4bb   :  { %v2305_v26 = vpop.f32.mrb[64].mxu0 }
 0x4bc   :  { %v11591_v11 = vadd.f32 %v11382_v63, %v2305_v26  ;;  %v2307_v50 = vpop.f32.mrb[65].mxu0  ;;  %v2861_v53 = vadd.f32 %v2860_v34, %v11480_v4 }
 0x4be   :  { %v2862_v26 = vadd.f32 %v2861_v53, %v11487_v0 }
 0x4bf   :  { %v2310_v21 = vpop.f32.mrb[66].mxu0 }
 0x4c0   :  { %v11596_v5 = vadd.f32 %v11380_v29, %v2310_v21  ;;  %v2312_v28 = vpop.f32.mrb[67].mxu0  ;;  %v2863_v10 = vadd.f32 %v2862_v26, %v11490_v24 }
 0x4c2   :  { %v2864_v21 = vadd.f32 %v2863_v10, %v11497_v41 }
 0x4c3   :  { %v2315_v45 = vpop.f32.mrb[68].mxu0 }
 0x4c4   :  { %v11601_v36 = vadd.f32 %v11400_v52, %v2315_v45  ;;  %v2317_v63 = vpop.f32.mrb[69].mxu0  ;;  %v2865_v48 = vadd.f32 %v2864_v21, %v11500_v49 }
 0x4c6   :  { %v2866_v45 = vadd.f32 %v2865_v48, %v11507_v51 }
 0x4c7   :  { %v2320_v50 = vpop.f32.mrb[70].mxu0 }
 0x4c8   :  { %v11606_v27 = vadd.f32 %v11398_v40, %v2320_v50  ;;  %v2322_v29 = vpop.f32.mrb[71].mxu0  ;;  %v2867_v53 = vadd.f32 %v2866_v45, %v11510_v23 }
 0x4ca   :  { %v2868_v50 = vadd.f32 %v2867_v53, %v11517_v44 }
 0x4cb   :  { %v2325_v28 = vpop.f32.mrb[72].mxu0 }
 0x4cc   :  { %v11611_v34 = vadd.f32 %v11418_v25, %v2325_v28  ;;  %v2327_v52 = vpop.f32.mrb[73].mxu0  ;;  %v2869_v10 = vadd.f32 %v2868_v50, %v11520_v3 }
 0x4ce   :  { %v2870_v28 = vadd.f32 %v2869_v10, %v11527_v17 }
 0x4cf   :  { %v2330_v63 = vpop.f32.mrb[74].mxu0 }
 0x4d0   :  { %v11616_v26 = vadd.f32 %v11416_v58, %v2330_v63  ;;  %v2332_v40 = vpop.f32.mrb[75].mxu0  ;;  %v2871_v48 = vadd.f32 %v2870_v28, %v11530_v2 }
 0x4d2   :  { %v2872_v63 = vadd.f32 %v2871_v48, %v11537_v57 }
 0x4d3   :  { %v2335_v29 = vpop.f32.mrb[76].mxu0 }
 0x4d4   :  { %v11621_v21 = vadd.f32 %v11436_v8, %v2335_v29  ;;  %v2337_v25 = vpop.f32.mrb[77].mxu0  ;;  %v2873_v53 = vadd.f32 %v2872_v63, %v11540_v31 }
 0x4d6   :  { %16584 = vst [vmem:[#allocation83_spill] sm:$0xff] %v11621_v21  ;;  %v2874_v29 = vadd.f32 %v2873_v53, %v11547_v19 }
 0x4d7   :  { %v2340_v52 = vpop.f32.mrb[78].mxu0 }
 0x4d8   :  { %v11626_v45 = vadd.f32 %v11434_v54, %v2340_v52  ;;  %v2342_v58 = vpop.f32.mrb[79].mxu0  ;;  %v2875_v10 = vadd.f32 %v2874_v29, %v11550_v33 }
 0x4da   :  { %16585 = vst [vmem:[#allocation87_spill] sm:$0xff] %v11626_v45  ;;  %v2876_v52 = vadd.f32 %v2875_v10, %v11557_v38 }
 0x4db   :  { %v2345_v40 = vpop.f32.mrb[80].mxu0 }
 0x4dc   :  { %v11631_v50 = vadd.f32 %v11458_v35, %v2345_v40  ;;  %v2347_v8 = vpop.f32.mrb[81].mxu0  ;;  %v2877_v48 = vadd.f32 %v2876_v52, %v11560_v22 }
 0x4de   :  { %16586 = vst [vmem:[#allocation85_spill] sm:$0xff] %v11631_v50  ;;  %v2878_v40 = vadd.f32 %v2877_v48, %v11567_v30 }
 0x4df   :  { %v2350_v25 = vpop.f32.mrb[82].mxu0 }
 0x4e0   :  { %v11636_v28 = vadd.f32 %v11456_v6, %v2350_v25  ;;  %v2352_v54 = vpop.f32.mrb[83].mxu0  ;;  %v2879_v53 = vadd.f32 %v2878_v40, %v11572_v20 }
 0x4e2   :  { %16587 = vst [vmem:[#allocation88_spill] sm:$0xff] %v11636_v28  ;;  %v2880_v25 = vadd.f32 %v2879_v53, %v11581_v7 }
 0x4e3   :  { %v2355_v58 = vpop.f32.mrb[84].mxu0 }
 0x4e4   :  { %v11641_v63 = vadd.f32 %v11473_v12, %v2355_v58  ;;  %v2357_v35 = vpop.f32.mrb[85].mxu0  ;;  %v2881_v10 = vadd.f32 %v2880_v25, %v11586_v14 }
 0x4e6   :  { %16588 = vst [vmem:[#allocation92_spill] sm:$0xff] %v11641_v63  ;;  %v2882_v58 = vadd.f32 %v2881_v10, %v11591_v11 }
 0x4e7   :  { %v2360_v8 = vpop.f32.mrb[86].mxu0 }
 0x4e8   :  { %v11646_v29 = vadd.f32 %v11471_v15, %v2360_v8  ;;  %v2362_v6 = vpop.f32.mrb[87].mxu0  ;;  %v2883_v48 = vadd.f32 %v2882_v58, %v11596_v5 }
 0x4ea   :  { %16589 = vst [vmem:[#allocation90_spill] sm:$0xff] %v11646_v29  ;;  %v2884_v8 = vadd.f32 %v2883_v48, %v11601_v36 }
 0x4eb   :  { %v2365_v54 = vpop.f32.mrb[88].mxu0 }
 0x4ec   :  { %v11651_v52 = vadd.f32 %v11484_v42, %v2365_v54  ;;  %v2367_v12 = vpop.f32.mrb[89].mxu0  ;;  %v2885_v53 = vadd.f32 %v2884_v8, %v11606_v27 }
 0x4ee   :  { %16590 = vst [vmem:[#allocation93_spill] sm:$0xff] %v11651_v52  ;;  %v2886_v54 = vadd.f32 %v2885_v53, %v11611_v34 }
 0x4ef   :  { %v2370_v35 = vpop.f32.mrb[90].mxu0 }
 0x4f0   :  { %v11656_v40 = vadd.f32 %v11482_v47, %v2370_v35  ;;  %v2372_v15 = vpop.f32.mrb[91].mxu0  ;;  %v2887_v10 = vadd.f32 %v2886_v54, %v11616_v26 }
 0x4f2   :  { %16591 = vst [vmem:[#allocation97_spill] sm:$0xff] %v11656_v40  ;;  %v2888_v35 = vadd.f32 %v2887_v10, %v11621_v21 }
 0x4f3   :  { %v2375_v6 = vpop.f32.mrb[92].mxu0 }
 0x4f4   :  { %v11661_v25 = vadd.f32 %v11494_v9, %v2375_v6  ;;  %v2377_v42 = vpop.f32.mrb[93].mxu0  ;;  %v2889_v48 = vadd.f32 %v2888_v35, %v11626_v45 }
 0x4f6   :  { %16592 = vst [vmem:[#allocation95_spill] sm:$0xff] %v11661_v25  ;;  %v2890_v6 = vadd.f32 %v2889_v48, %v11631_v50  ;;  %v16597_v50 = vld [vmem:[#allocation65_spill] sm:$0xff] }
 0x4f7   :  { %v2380_v12 = vpop.f32.mrb[94].mxu0 }
 0x4f8   :  { %v11666_v58 = vadd.f32 %v11492_v56, %v2380_v12  ;;  %v2382_v47 = vpop.f32.mrb[95].mxu0  ;;  %v2891_v53 = vadd.f32 %v2890_v6, %v11636_v28  ;;  %v16610_v28 = vld [vmem:[#allocation82_spill] sm:$0xff] }
 0x4fa   :  { %16593 = vst [vmem:[#allocation98_spill] sm:$0xff] %v11666_v58  ;;  %v2892_v12 = vadd.f32 %v2891_v53, %v11641_v63  ;;  %v16599_v63 = vld [vmem:[#allocation72_spill] sm:$0xff] }
 0x4fb   :  { %v2385_v15 = vpop.f32.mrb[96].mxu0 }
 0x4fc   :  { %v11671_v8 = vadd.f32 %v11504_v62, %v2385_v15  ;;  %v2387_v9 = vpop.f32.mrb[97].mxu0  ;;  %v2893_v10 = vadd.f32 %v2892_v12, %v11646_v29  ;;  %v16609_v29 = vld [vmem:[#allocation80_spill] sm:$0xff] }
 0x4fe   :  { %16594 = vst [vmem:[#allocation102_spill] sm:$0xff] %v11671_v8  ;;  %v2894_v15 = vadd.f32 %v2893_v10, %v11651_v52  ;;  %v16601_v52 = vld [vmem:[#allocation68_spill] sm:$0xff] }
 0x4ff   :  { %v2390_v42 = vpop.f32.mrb[98].mxu0 }
 0x500   :  { %v11676_v54 = vadd.f32 %v11502_v39, %v2390_v42  ;;  %v2392_v56 = vpop.f32.mrb[99].mxu0  ;;  %v2895_v48 = vadd.f32 %v2894_v15, %v11656_v40 }
 0x502   :  { %16595 = vst [vmem:[#allocation100_spill] sm:$0xff] %v11676_v54  ;;  %v2896_v42 = vadd.f32 %v2895_v48, %v11661_v25  ;;  %v16603_v25 = vld [vmem:[#allocation73_spill] sm:$0xff] }
 0x503   :  { %v2395_v47 = vpop.f32.mrb[100].mxu0 }
 0x504   :  { %v11681_v35 = vadd.f32 %v11514_v61, %v2395_v47  ;;  %v2397_v62 = vpop.f32.mrb[101].mxu0  ;;  %v2897_v53 = vadd.f32 %v2896_v42, %v11666_v58 }
 0x506   :  { %16596 = vst [vmem:[#allocation103_spill] sm:$0xff] %v11681_v35  ;;  %v2898_v47 = vadd.f32 %v2897_v53, %v11671_v8  ;;  %v16605_v8 = vld [vmem:[#allocation70_spill] sm:$0xff] }
 0x507   :  { %v2400_v9 = vpop.f32.mrb[102].mxu0 }
 0x508   :  { %v11686_v6 = vadd.f32 %v16597_v50, %v2400_v9  ;;  %v2402_v39 = vpop.f32.mrb[103].mxu0  ;;  %v2899_v10 = vadd.f32 %v2898_v47, %v11676_v54 }
 0x50a   :  { %16598 = vst [vmem:[#allocation105_spill] sm:$0xff] %v11686_v6  ;;  %v2900_v9 = vadd.f32 %v2899_v10, %v11681_v35  ;;  %v16606_v10 = vld [vmem:[#allocation75_spill] sm:$0xff] }
 0x50b   :  { %v2405_v56 = vpop.f32.mrb[104].mxu0 }
 0x50c   :  { %v11691_v12 = vadd.f32 %v16599_v63, %v2405_v56  ;;  %v2407_v61 = vpop.f32.mrb[105].mxu0  ;;  %v2901_v48 = vadd.f32 %v2900_v9, %v11686_v6 }
 0x50e   :  { %16600 = vst [vmem:[#allocation108_spill] sm:$0xff] %v11691_v12  ;;  %v2902_v56 = vadd.f32 %v2901_v48, %v11691_v12 }
 0x50f   :  { %v2410_v62 = vpop.f32.mrb[106].mxu0 }
 0x510   :  { %v11696_v15 = vadd.f32 %v16601_v52, %v2410_v62  ;;  %v2412_v50 = vpop.f32.mrb[107].mxu0 }
 0x512   :  { %16602 = vst [vmem:[#allocation110_spill] sm:$0xff] %v11696_v15  ;;  %v2903_v53 = vadd.f32 %v2902_v56, %v11696_v15 }
 0x513   :  { %v2415_v39 = vpop.f32.mrb[108].mxu0 }
 0x514   :  { %v11701_v42 = vadd.f32 %v16603_v25, %v2415_v39  ;;  %v2417_v63 = vpop.f32.mrb[109].mxu0  ;;  %v16607_v25 = vld [vmem:[#allocation77_spill] sm:$0xff] }
 0x516   :  { %16604 = vst [vmem:[#allocation112_spill] sm:$0xff] %v11701_v42  ;;  %v2904_v52 = vadd.f32 %v2903_v53, %v11701_v42 }
 0x517   :  { %v2420_v61 = vpop.f32.mrb[110].mxu0 }
 0x518   :  { %v2806_v47 = vadd.f32 %v16605_v8, %v2420_v61  ;;  %v2422_v54 = vpop.f32.mrb[111].mxu0 }
 0x519   :  { %v16608_v54 = vld [vmem:[#allocation78_spill] sm:$0xff] }
 0x51a   :  { %v2905_v50 = vadd.f32 %v2904_v52, %v2806_v47 }
 0x51b   :  { %v2425_v62 = vpop.f32.mrb[112].mxu0 }
 0x51c   :  { %v2811_v35 = vadd.f32 %v16606_v10, %v2425_v62  ;;  %v2427_v58 = vpop.f32.mrb[113].mxu0 }
 0x51e   :  { %v2906_v9 = vadd.f32 %v2905_v50, %v2811_v35 }
 0x51f   :  { %v2430_v6 = vpop.f32.mrb[114].mxu0 }
 0x520   :  { %v2816_v39 = vadd.f32 %v16607_v25, %v2430_v6  ;;  %v2432_v63 = vpop.f32.mrb[115].mxu0 }
 0x522   :  { %v2907_v40 = vadd.f32 %v2906_v9, %v2816_v39 }
 0x523   :  { %v2435_v48 = vpop.f32.mrb[116].mxu0 }
 0x524   :  { %v2821_v12 = vadd.f32 %v11554_v16, %v2435_v48  ;;  %v2437_v56 = vpop.f32.mrb[117].mxu0 }
 0x526   :  { %v2908_v15 = vadd.f32 %v2907_v40, %v2821_v12 }
 0x527   :  { %v2440_v8 = vpop.f32.mrb[118].mxu0 }
 0x528   :  { %v2826_v61 = vadd.f32 %v16608_v54, %v2440_v8  ;;  %v2442_v53 = vpop.f32.mrb[119].mxu0 }
 0x52a   :  { %v2909_v42 = vadd.f32 %v2908_v15, %v2826_v61 }
 0x52b   :  { %v2445_v52 = vpop.f32.mrb[120].mxu0 }
 0x52c   :  { %v2831_v62 = vadd.f32 %v16609_v29, %v2445_v52  ;;  %v2447_v58 = vpop.f32.mrb[121].mxu0 }
 0x52e   :  { %v2910_v50 = vadd.f32 %v2909_v42, %v2831_v62 }
 0x52f   :  { %v2450_v10 = vpop.f32.mrb[122].mxu0 }
 0x530   :  { %v2836_v6 = vadd.f32 %v16610_v28, %v2450_v10  ;;  %v2452_v25 = vpop.f32.mrb[123].mxu0 }
 0x532   :  { %v2911_v9 = vadd.f32 %v2910_v50, %v2836_v6 }
 0x533   :  { %v2455_v63 = vpop.f32.mrb[124].mxu0 }
 0x534   :  { %v2841_v16 = vadd.f32 %v11577_v55, %v2455_v63  ;;  %v2457_v48 = vpop.f32.mrb[125].mxu0 }
 0x536   :  { %v2912_v40 = vadd.f32 %v2911_v9, %v2841_v16 }
 0x537   :  { %v2460_v56 = vpop.f32.mrb[126].mxu0 }
 0x538   :  { %v2846_v8 = vadd.f32 %v11575_v37, %v2460_v56  ;;  %v2462_v54 = vpop.f32.mrb[127].mxu0 }
 0x53a   :  { %v2913_v15 = vadd.f32 %v2912_v40, %v2846_v8 }
 0x53c   :  { %v2914_v53 = vrot.slane %v2913_v15, 4 }
 0x53e   :  { %v2915_v45 = vadd.f32 %v2914_v53, %v2913_v15 }
 0x540   :  { %v2916_v29 = vrot.slane %v2915_v45, 2 }
 0x542   :  { %v2917_v52 = vadd.f32 %v2916_v29, %v2915_v45 }
 0x544   :  { %v2918_v42 = vrot.slane %v2917_v52, 1 }
 0x546   :  { %v2919_v58 = vadd.f32 %v2918_v42, %v2917_v52 }
 0x548   :  { %v11715_v21 = vmul.f32 0.001953125, %v2919_v58 }
 0x54a   :  { %v11718_v28 = vsub.f32 %v2806_v47, %v11715_v21  ;;  %v11721_v55 = vsub.f32 %v2811_v35, %v11715_v21  ;;  %v11724_v50 = vsub.f32 %v2816_v39, %v11715_v21  ;;  %v11727_v37 = vsub.f32 %v2821_v12, %v11715_v21  ;;  %v16615_v39 = vld [vmem:[#allocation60_spill] sm:$0xff]  ;;  %v16616_v12 = vld [vmem:[#allocation63_spill] sm:$0xff] }
 0x54b   :  { %v11730_v10 = vsub.f32 %v2826_v61, %v11715_v21  ;;  %v11733_v45 = vsub.f32 %v2831_v62, %v11715_v21  ;;  %v11736_v25 = vsub.f32 %v2836_v6, %v11715_v21  ;;  %v11739_v47 = vsub.f32 %v2841_v16, %v11715_v21  ;;  %v16617_v62 = vld [vmem:[#allocation67_spill] sm:$0xff] }
 0x54c   :  { %v11742_v35 = vsub.f32 %v2846_v8, %v11715_v21  ;;  %v11746_v9 = vsub.f32 %v16615_v39, %v11715_v21  ;;  %v11750_v61 = vsub.f32 %v16616_v12, %v11715_v21  ;;  %v11754_v63 = vsub.f32 %v16617_v62, %v11715_v21 }
 0x54d   :  { %16611 = vst [vmem:[#allocation12_spill] sm:$0xff] %v11730_v10  ;;  %16612 = vst [vmem:[#allocation13_spill] sm:$0xff] %v11733_v45  ;;  %v11762_v48 = vsub.f32 %v11410_v32, %v11715_v21  ;;  %v11766_v40 = vsub.f32 %v11421_v18, %v11715_v21  ;;  %v11772_v54 = vsub.f32 %v11428_v59, %v11715_v21 }
 0x54e   :  { %16613 = vst [vmem:[#allocation42_spill] sm:$0xff] %v11736_v25  ;;  %16614 = vst [vmem:[#allocation47_spill] sm:$0xff] %v11739_v47  ;;  %v2985_v6 = vmul.f32 %v11746_v9, %v11746_v9  ;;  %v2986_v16 = vmul.f32 %v11750_v61, %v11750_v61  ;;  %v2987_v56 = vmul.f32 %v11754_v63, %v11754_v63 }
 0x54f   :  { %v2988_v15 = vmul.f32 %v11762_v48, %v11762_v48  ;;  %v11778_v32 = vsub.f32 %v11439_v46, %v11715_v21  ;;  %v2989_v18 = vmul.f32 %v11766_v40, %v11766_v40  ;;  %v11784_v52 = vsub.f32 %v11448_v60, %v11715_v21 }
 0x550   :  { %v3049_v8 = vadd.f32 %v2986_v16, %v2985_v6  ;;  %v2990_v59 = vmul.f32 %v11772_v54, %v11772_v54  ;;  %v11790_v58 = vsub.f32 %v11461_v43, %v11715_v21  ;;  %v11796_v12 = vsub.f32 %v11468_v13, %v11715_v21 }
 0x551   :  { %v2991_v46 = vmul.f32 %v11778_v32, %v11778_v32  ;;  %v2992_v60 = vmul.f32 %v11784_v52, %v11784_v52  ;;  %v11802_v6 = vsub.f32 %v11476_v1, %v11715_v21 }
 0x552   :  { %v3050_v53 = vadd.f32 %v3049_v8, %v2987_v56  ;;  %v2993_v43 = vmul.f32 %v11790_v58, %v11790_v58  ;;  %v11808_v56 = vsub.f32 %v11480_v4, %v11715_v21  ;;  %v2994_v13 = vmul.f32 %v11796_v12, %v11796_v12 }
 0x553   :  { %v2995_v1 = vmul.f32 %v11802_v6, %v11802_v6 }
 0x554   :  { %v3051_v29 = vadd.f32 %v3050_v53, %v2988_v15  ;;  %v11814_v15 = vsub.f32 %v11487_v0, %v11715_v21  ;;  %v2996_v4 = vmul.f32 %v11808_v56, %v11808_v56  ;;  %v11826_v0 = vsub.f32 %v11497_v41, %v11715_v21 }
 0x555   :  { %v11839_v41 = vsub.f32 %v11507_v51, %v11715_v21  ;;  %v11852_v51 = vsub.f32 %v11517_v44, %v11715_v21  ;;  %v11865_v44 = vsub.f32 %v11527_v17, %v11715_v21  ;;  %v11878_v17 = vsub.f32 %v11537_v57, %v11715_v21 }
 0x556   :  { %v3052_v42 = vadd.f32 %v3051_v29, %v2989_v18  ;;  %v4219_v18 = vld [vmem:[#allocation3] sm:$0xff]  ;;  %v4220_v29 = vld [vmem:[#allocation3 + $0x8] sm:$0xff]  ;;  %v11891_v57 = vsub.f32 %v11547_v19, %v11715_v21  ;;  %v11904_v19 = vsub.f32 %v11557_v38, %v11715_v21  ;;  %v11917_v38 = vsub.f32 %v11567_v30, %v11715_v21 }
 0x557   :  { %v11930_v30 = vsub.f32 %v11581_v7, %v11715_v21  ;;  %v4347_v7 = vld [vmem:[#allocation3 + $0x400] sm:$0xff] }
 0x558   :  { %v3053_v39 = vadd.f32 %v3052_v42, %v2990_v59  ;;  %v7618_v59 = vpack.c.bf16 %v4220_v29, %v4219_v18  ;;  %v11820_v42 = vsub.f32 %v11490_v24, %v11715_v21  ;;  %v11833_v24 = vsub.f32 %v11500_v49, %v11715_v21  ;;  %v4223_v29 = vld [vmem:[#allocation3 + $0x20] sm:$0xff] }
 0x559   :  { %v11846_v49 = vsub.f32 %v11510_v23, %v11715_v21  ;;  %v11859_v23 = vsub.f32 %v11520_v3, %v11715_v21  ;;  %v11872_v3 = vsub.f32 %v11530_v2, %v11715_v21  ;;  %v11885_v2 = vsub.f32 %v11540_v31, %v11715_v21 }
 0x55a   :  { %v3054_v62 = vadd.f32 %v3053_v39, %v2991_v46  ;;  %7619 = vmatpush1.bf16.msra.mxu1 %v7618_v59  ;;  %v2997_v39 = vmul.f32 %v11814_v15, %v11814_v15  ;;  %v4224_v59 = vld [vmem:[#allocation3 + $0x28] sm:$0xff]  ;;  %v11898_v31 = vsub.f32 %v11550_v33, %v11715_v21  ;;  %v11911_v33 = vsub.f32 %v11560_v22, %v11715_v21 }
 0x55b   :  { %v11924_v22 = vsub.f32 %v11572_v20, %v11715_v21  ;;  %v11937_v20 = vsub.f32 %v11586_v14, %v11715_v21  ;;  %v4240_v14 = vld [vmem:[#allocation3 + $0xa8] sm:$0xff] }
 0x55c   :  { %v3055_v16 = vadd.f32 %v3054_v62, %v2992_v60  ;;  %v16618_v62 = vmov 0.0|0.0  }
 0x55d   :  { %7620 = vmatprep.subr.bf16.mxu1 %v16618_v62  ;;  %16619 = vst [vmem:[#allocation49_spill] sm:$0xff] %v11937_v20 }
 0x55e   :  { %v3056_v8 = vadd.f32 %v3055_v16, %v2993_v43  ;;  %v4221_v43 = vld [vmem:[#allocation3 + $0x10] sm:$0xff]  ;;  %v4222_v16 = vld [vmem:[#allocation3 + $0x18] sm:$0xff] }
 0x560   :  { %v3057_v53 = vadd.f32 %v3056_v8, %v2994_v13  ;;  %v7621_v13 = vpack.c.bf16 %v4222_v16, %v4221_v43  ;;  %v2998_v8 = vmul.f32 %v11820_v42, %v11820_v42  ;;  %v4225_v16 = vld [vmem:[#allocation3 + $0x30] sm:$0xff] }
 0x562   :  { %v3058_v46 = vadd.f32 %v3057_v53, %v2995_v1  ;;  %7622 = vmatpush1.bf16.msra.mxu1 %v7621_v13  ;;  %v2999_v53 = vmul.f32 %v11826_v0, %v11826_v0  ;;  %v4226_v13 = vld [vmem:[#allocation3 + $0x38] sm:$0xff] }
 0x563   :  { %7623 = vmatprep.subr.bf16.mxu1 %v16618_v62 }
 0x564   :  { %v3059_v60 = vadd.f32 %v3058_v46, %v2996_v4  ;;  %v7624_v4 = vpack.c.bf16 %v4224_v59, %v4223_v29  ;;  %v3000_v46 = vmul.f32 %v11833_v24, %v11833_v24  ;;  %v4227_v59 = vld [vmem:[#allocation3 + $0x40] sm:$0xff] }
 0x566   :  { %v3060_v1 = vadd.f32 %v3059_v60, %v2997_v39  ;;  %7625 = vmatpush1.bf16.msra.mxu1 %v7624_v4  ;;  %v3001_v60 = vmul.f32 %v11839_v41, %v11839_v41  ;;  %v4228_v4 = vld [vmem:[#allocation3 + $0x48] sm:$0xff] }
 0x567   :  { %7626 = vmatprep.subr.bf16.mxu1 %v16618_v62 }
 0x568   :  { %v3061_v18 = vadd.f32 %v3060_v1, %v2998_v8  ;;  %v7627_v8 = vpack.c.bf16 %v4226_v13, %v4225_v16  ;;  %v3002_v1 = vmul.f32 %v11846_v49, %v11846_v49  ;;  %v4229_v13 = vld [vmem:[#allocation3 + $0x50] sm:$0xff] }
 0x56a   :  { %v3062_v39 = vadd.f32 %v3061_v18, %v2999_v53  ;;  %7628 = vmatpush1.bf16.msra.mxu1 %v7627_v8  ;;  %v3003_v18 = vmul.f32 %v11852_v51, %v11852_v51  ;;  %v4230_v8 = vld [vmem:[#allocation3 + $0x58] sm:$0xff] }
 0x56b   :  { %7629 = vmatprep.subr.bf16.mxu1 %v16618_v62 }
 0x56c   :  { %v3063_v43 = vadd.f32 %v3062_v39, %v3000_v46  ;;  %v7630_v46 = vpack.c.bf16 %v4228_v4, %v4227_v59  ;;  %v3004_v39 = vmul.f32 %v11859_v23, %v11859_v23  ;;  %v4231_v4 = vld [vmem:[#allocation3 + $0x60] sm:$0xff] }
 0x56e   :  { %v3064_v53 = vadd.f32 %v3063_v43, %v3001_v60  ;;  %7631 = vmatpush1.bf16.msra.mxu1 %v7630_v46  ;;  %v3005_v43 = vmul.f32 %v11865_v44, %v11865_v44  ;;  %v4232_v46 = vld [vmem:[#allocation3 + $0x68] sm:$0xff] }
 0x56f   :  { %7632 = vmatprep.subr.bf16.mxu1 %v16618_v62 }
 0x570   :  { %v3065_v29 = vadd.f32 %v3064_v53, %v3002_v1  ;;  %v7633_v1 = vpack.c.bf16 %v4230_v8, %v4229_v13  ;;  %v3006_v53 = vmul.f32 %v11872_v3, %v11872_v3  ;;  %v4233_v8 = vld [vmem:[#allocation3 + $0x70] sm:$0xff] }
 0x572   :  { %v3066_v60 = vadd.f32 %v3065_v29, %v3003_v18  ;;  %7634 = vmatpush1.bf16.msra.mxu1 %v7633_v1  ;;  %v3007_v29 = vmul.f32 %v11878_v17, %v11878_v17  ;;  %v4234_v1 = vld [vmem:[#allocation3 + $0x78] sm:$0xff] }
 0x573   :  { %7635 = vmatprep.subr.bf16.mxu1 %v16618_v62 }
 0x574   :  { %v3067_v16 = vadd.f32 %v3066_v60, %v3004_v39  ;;  %v7636_v39 = vpack.c.bf16 %v4232_v46, %v4231_v4  ;;  %v3008_v60 = vmul.f32 %v11885_v2, %v11885_v2  ;;  %v4235_v46 = vld [vmem:[#allocation3 + $0x80] sm:$0xff] }
 0x576   :  { %v3068_v18 = vadd.f32 %v3067_v16, %v3005_v43  ;;  %7637 = vmatpush1.bf16.msra.mxu1 %v7636_v39  ;;  %v3009_v16 = vmul.f32 %v11891_v57, %v11891_v57  ;;  %v4236_v39 = vld [vmem:[#allocation3 + $0x88] sm:$0xff] }
 0x577   :  { %7638 = vmatprep.subr.bf16.mxu1 %v16618_v62 }
 0x578   :  { %v3069_v59 = vadd.f32 %v3068_v18, %v3006_v53  ;;  %v7639_v53 = vpack.c.bf16 %v4234_v1, %v4233_v8  ;;  %v3010_v18 = vmul.f32 %v11898_v31, %v11898_v31  ;;  %v4237_v1 = vld [vmem:[#allocation3 + $0x90] sm:$0xff] }
 0x57a   :  { %v3070_v43 = vadd.f32 %v3069_v59, %v3007_v29  ;;  %7640 = vmatpush1.bf16.msra.mxu1 %v7639_v53  ;;  %v3011_v59 = vmul.f32 %v11904_v19, %v11904_v19  ;;  %v4238_v53 = vld [vmem:[#allocation3 + $0x98] sm:$0xff] }
 0x57b   :  { %7641 = vmatprep.subr.bf16.mxu1 %v16618_v62 }
 0x57c   :  { %v3071_v13 = vadd.f32 %v3070_v43, %v3008_v60  ;;  %v7642_v60 = vpack.c.bf16 %v4236_v39, %v4235_v46  ;;  %v3012_v43 = vmul.f32 %v11911_v33, %v11911_v33  ;;  %v11943_v46 = vsub.f32 %v11591_v11, %v11715_v21 }
 0x57d   :  { %v3015_v39 = vmul.f32 %v11930_v30, %v11930_v30 }
 0x57e   :  { %v3072_v29 = vadd.f32 %v3071_v13, %v3009_v16  ;;  %7643 = vmatpush1.bf16.msra.mxu1 %v7642_v60  ;;  %v3013_v13 = vmul.f32 %v11917_v38, %v11917_v38  ;;  %16620 = vst [vmem:[#allocation51_spill] sm:$0xff] %v11943_v46 }
 0x57f   :  { %7644 = vmatprep.subr.bf16.mxu1 %v16618_v62 }
 0x580   :  { %v3073_v4 = vadd.f32 %v3072_v29, %v3010_v18  ;;  %v7645_v18 = vpack.c.bf16 %v4238_v53, %v4237_v1  ;;  %v3014_v29 = vmul.f32 %v11924_v22, %v11924_v22  ;;  %v4349_v53 = vld [vmem:[#allocation3 + $0x410] sm:$0xff] }
 0x582   :  { %v3074_v16 = vadd.f32 %v3073_v4, %v3011_v59  ;;  %7646 = vmatpush1.bf16.msra.mxu1 %v7645_v18  ;;  %v4348_v4 = vld [vmem:[#allocation3 + $0x408] sm:$0xff]  ;;  %v4350_v18 = vld [vmem:[#allocation3 + $0x418] sm:$0xff] }
 0x583   :  { %7647 = vmatprep.subr.bf16.mxu1 %v16618_v62 }
 0x584   :  { %v3075_v8 = vadd.f32 %v3074_v16, %v3012_v43  ;;  %v4239_v43 = vld [vmem:[#allocation3 + $0xa0] sm:$0xff]  ;;  %v11948_v16 = vpack.c.bf16 %v4348_v4, %v4347_v7  ;;  %v4241_v7 = vld [vmem:[#allocation3 + $0xb0] sm:$0xff]  ;;  %v4242_v4 = vld [vmem:[#allocation3 + $0xb8] sm:$0xff] }
 0x585   :  { %v7648_v1 = vpack.c.bf16 %v4240_v14, %v4239_v43  ;;  %v11969_v43 = vsub.f32 %v11606_v27, %v11715_v21 }
 0x586   :  { %v3076_v59 = vadd.f32 %v3075_v8, %v3013_v13  ;;  %16621 = vst [vmem:[#allocation54_spill] sm:$0xff] %v11948_v16  ;;  %v11952_v13 = vsub.f32 %v11596_v5, %v11715_v21  ;;  %v3016_v8 = vmul.f32 %v11937_v20, %v11937_v20  ;;  %7810 = vmatprep.subr.bf16.mxu0 %v11948_v16  ;;  %v4362_v20 = vld [vmem:[#allocation3 + $0x478] sm:$0xff] }
 0x587   :  { %7649 = vmatpush1.bf16.msra.mxu1 %v7648_v1  ;;  %7812 = vmatpush3.bf16.msra.mxu0 %v11948_v16  ;;  %16625 = vst [vmem:[#allocation64_spill] sm:$0xff] %v11969_v43  ;;  %v4351_v1 = vld [vmem:[#allocation3 + $0x420] sm:$0xff] }
 0x588   :  { %v3077_v60 = vadd.f32 %v3076_v59, %v3014_v29  ;;  %16622 = vst [vmem:[#allocation56_spill] sm:$0xff] %v11952_v13  ;;  %v11960_v29 = vsub.f32 %v11601_v36, %v11715_v21  ;;  %v3017_v59 = vmul.f32 %v11943_v46, %v11943_v46  ;;  %7650 = vmatprep.subr.bf16.mxu1 %v16618_v62 }
 0x589   :  { %v3018_v14 = vmul.f32 %v11952_v13, %v11952_v13 }
 0x58a   :  { %v3078_v11 = vadd.f32 %v3077_v60, %v3015_v39  ;;  %16623 = vst [vmem:[#allocation59_spill] sm:$0xff] %v11960_v29  ;;  %v11965_v39 = vpack.c.bf16 %v4350_v18, %v4349_v53  ;;  %v7651_v60 = vpack.c.bf16 %v4242_v4, %v4241_v7  ;;  %v3019_v53 = vmul.f32 %v11960_v29, %v11960_v29  ;;  %v4243_v18 = vld [vmem:[#allocation3 + $0xc0] sm:$0xff]  ;;  %v4244_v7 = vld [vmem:[#allocation3 + $0xc8] sm:$0xff] }
 0x58b   :  { %v11986_v4 = vsub.f32 %v11616_v26, %v11715_v21  ;;  %v4251_v29 = vld [vmem:[#allocation3 + $0x100] sm:$0xff] }
 0x58c   :  { %v3079_v5 = vadd.f32 %v3078_v11, %v3016_v8  ;;  %16624 = vst [vmem:[#allocation61_spill] sm:$0xff] %v11965_v39  ;;  %7814 = vmatprep.subr.bf16.mxu0 %v11965_v39  ;;  %7652 = vmatpush1.bf16.msra.mxu1 %v7651_v60  ;;  %v4352_v8 = vld [vmem:[#allocation3 + $0x428] sm:$0xff]  ;;  %v11977_v11 = vsub.f32 %v11611_v34, %v11715_v21 }
 0x58d   :  { %7816 = vmatpush3.bf16.msra.mxu0 %v11965_v39  ;;  %7653 = vmatprep.subr.bf16.mxu1 %v16618_v62  ;;  %16628 = vst [vmem:[#allocation71_spill] sm:$0xff] %v11986_v4  ;;  %v3020_v60 = vmul.f32 %v11969_v43, %v11969_v43  ;;  %v16629_v39 = vld [vmem:[#allocation83_spill] sm:$0xff]  ;;  %v3022_v16 = vmul.f32 %v11986_v4, %v11986_v4 }
 0x58e   :  { %v3080_v36 = vadd.f32 %v3079_v5, %v3017_v59  ;;  %16626 = vst [vmem:[#allocation66_spill] sm:$0xff] %v11977_v11  ;;  %v11982_v59 = vpack.c.bf16 %v4352_v8, %v4351_v1  ;;  %v7654_v5 = vpack.c.bf16 %v4244_v7, %v4243_v18  ;;  %v11994_v1 = vsub.f32 %v16629_v39, %v11715_v21  ;;  %v4245_v18 = vld [vmem:[#allocation3 + $0xd0] sm:$0xff]  ;;  %v4246_v7 = vld [vmem:[#allocation3 + $0xd8] sm:$0xff] }
 0x58f   :  { %v3021_v8 = vmul.f32 %v11977_v11, %v11977_v11  ;;  %v16634_v11 = vld [vmem:[#allocation85_spill] sm:$0xff]  ;;  %v8696_v43 = vld [vmem:[#allocation2 + $0x18] sm:$0xff] }
 0x590   :  { %v3081_v27 = vadd.f32 %v3080_v36, %v3018_v14  ;;  %16627 = vst [vmem:[#allocation69_spill] sm:$0xff] %v11982_v59  ;;  %7818 = vmatprep.subr.bf16.mxu0 %v11982_v59  ;;  %7655 = vmatpush1.bf16.msra.mxu1 %v7654_v5  ;;  %v4353_v14 = vld [vmem:[#allocation3 + $0x430] sm:$0xff]  ;;  %v4354_v36 = vld [vmem:[#allocation3 + $0x438] sm:$0xff]  ;;  %16630 = vst [vmem:[#allocation74_spill] sm:$0xff] %v11994_v1 }
 0x591   :  { %7820 = vmatpush3.bf16.msra.mxu0 %v11982_v59  ;;  %7656 = vmatprep.subr.bf16.mxu1 %v16618_v62  ;;  %v16632_v5 = vld [vmem:[#allocation87_spill] sm:$0xff] }
 0x592   :  { %v3082_v34 = vadd.f32 %v3081_v27, %v3019_v53  ;;  %v11999_v53 = vpack.c.bf16 %v4354_v36, %v4353_v14  ;;  %v7657_v27 = vpack.c.bf16 %v4246_v7, %v4245_v18  ;;  %v12003_v59 = vsub.f32 %v16632_v5, %v11715_v21  ;;  %v4247_v7 = vld [vmem:[#allocation3 + $0xe0] sm:$0xff]  ;;  %v4248_v5 = vld [vmem:[#allocation3 + $0xe8] sm:$0xff] }
 0x593   :  { %v12011_v14 = vsub.f32 %v16634_v11, %v11715_v21  ;;  %v3023_v36 = vmul.f32 %v11994_v1, %v11994_v1  ;;  %v16639_v1 = vld [vmem:[#allocation92_spill] sm:$0xff] }
 0x594   :  { %v3083_v26 = vadd.f32 %v3082_v34, %v3020_v60  ;;  %16631 = vst [vmem:[#allocation76_spill] sm:$0xff] %v11999_v53  ;;  %16633 = vst [vmem:[#allocation79_spill] sm:$0xff] %v12003_v59  ;;  %7822 = vmatprep.subr.bf16.mxu0 %v11999_v53  ;;  %7658 = vmatpush1.bf16.msra.mxu1 %v7657_v27  ;;  %v4355_v60 = vld [vmem:[#allocation3 + $0x440] sm:$0xff]  ;;  %v4356_v34 = vld [vmem:[#allocation3 + $0x448] sm:$0xff]  ;;  %v3024_v4 = vmul.f32 %v12003_v59, %v12003_v59 }
 0x595   :  { %7824 = vmatpush3.bf16.msra.mxu0 %v11999_v53  ;;  %16635 = vst [vmem:[#allocation81_spill] sm:$0xff] %v12011_v14  ;;  %7659 = vmatprep.subr.bf16.mxu1 %v16618_v62  ;;  %v16637_v27 = vld [vmem:[#allocation88_spill] sm:$0xff]  ;;  %v16641_v59 = vld [vmem:[#allocation90_spill] sm:$0xff] }
 0x596   :  { %v3084_v39 = vadd.f32 %v3083_v26, %v3021_v8  ;;  %v12016_v8 = vpack.c.bf16 %v4356_v34, %v4355_v60  ;;  %v7660_v26 = vpack.c.bf16 %v4248_v5, %v4247_v7  ;;  %v12020_v53 = vsub.f32 %v16637_v27, %v11715_v21  ;;  %v4358_v60 = vld [vmem:[#allocation3 + $0x458] sm:$0xff]  ;;  %v4249_v5 = vld [vmem:[#allocation3 + $0xf0] sm:$0xff] }
 0x597   :  { %v3025_v34 = vmul.f32 %v12011_v14, %v12011_v14  ;;  %v4250_v27 = vld [vmem:[#allocation3 + $0xf8] sm:$0xff]  ;;  %v12042_v14 = vrot.slane %v8696_v43, 1 }
 0x598   :  { %v3085_v18 = vadd.f32 %v3084_v39, %v3022_v16  ;;  %16636 = vst [vmem:[#allocation84_spill] sm:$0xff] %v12016_v8  ;;  %16638 = vst [vmem:[#allocation41_spill] sm:$0xff] %v12020_v53  ;;  %7826 = vmatprep.subr.bf16.mxu0 %v12016_v8  ;;  %v12027_v16 = vsub.f32 %v16639_v1, %v11715_v21  ;;  %7661 = vmatpush1.bf16.msra.mxu1 %v7660_v26  ;;  %v4357_v39 = vld [vmem:[#allocation3 + $0x450] sm:$0xff] }
 0x599   :  { %7828 = vmatpush3.bf16.msra.mxu0 %v12016_v8  ;;  %7662 = vmatprep.subr.bf16.mxu1 %v16618_v62  ;;  %v12037_v1 = vsub.f32 %v16641_v59, %v11715_v21  ;;  %v3026_v26 = vmul.f32 %v12020_v53, %v12020_v53  ;;  %16642 = vst [vmem:[#allocation44_spill] sm:$0xff] %v12042_v14 }
 0x59a   :  { %v3086_v11 = vadd.f32 %v3085_v18, %v3023_v36  ;;  %v12033_v36 = vpack.c.bf16 %v4358_v60, %v4357_v39  ;;  %v7663_v18 = vpack.c.bf16 %v4250_v27, %v4249_v5  ;;  %v16643_v39 = vld [vmem:[#allocation93_spill] sm:$0xff]  ;;  %v3027_v59 = vmul.f32 %v12027_v16, %v12027_v16  ;;  %v4361_v27 = vld [vmem:[#allocation3 + $0x470] sm:$0xff]  ;;  %4427 = vmatprep.mubr.f32.mxu1 %v12042_v14 }
 0x59b   :  { %v12046_v60 = vsub.f32 %v16643_v39, %v11715_v21  ;;  %v12056_v39 = vpack.c.bf16 %v4362_v20, %v4361_v27 }
 0x59c   :  { %v3087_v7 = vadd.f32 %v3086_v11, %v3024_v4  ;;  %16640 = vst [vmem:[#allocation86_spill] sm:$0xff] %v12033_v36  ;;  %7830 = vmatprep.subr.bf16.mxu0 %v12033_v36  ;;  %v4359_v4 = vld [vmem:[#allocation3 + $0x460] sm:$0xff]  ;;  %v4360_v11 = vld [vmem:[#allocation3 + $0x468] sm:$0xff]  ;;  %7664 = vmatpush1.bf16.msra.mxu1 %v7663_v18 }
 0x59d   :  { %7832 = vmatpush3.bf16.msra.mxu0 %v12033_v36  ;;  %v12051_v5 = vpack.c.bf16 %v4360_v11, %v4359_v4  ;;  %7665 = vmatprep.subr.bf16.mxu1 %v16618_v62  ;;  %16645 = vst [vmem:[#allocation45_spill] sm:$0xff] %v12056_v39  ;;  %v16646_v18 = vld [vmem:[#allocation97_spill] sm:$0xff]  ;;  %v3028_v4 = vmul.f32 %v12037_v1, %v12037_v1 }
 0x59e   :  { %v3088_v8 = vadd.f32 %v3087_v7, %v3025_v34  ;;  %v4252_v34 = vld [vmem:[#allocation3 + $0x108] sm:$0xff]  ;;  %v3501_v7 = vld [vmem:[#allocation2 + $0x10] sm:$0x3]  ;;  %v12060_v36 = vsub.f32 %v16646_v18, %v11715_v21  ;;  %v3029_v20 = vmul.f32 %v12046_v60, %v12046_v60 }
 0x59f   :  { %16644 = vst [vmem:[#allocation43_spill] sm:$0xff] %v12051_v5  ;;  %v7666_v13 = vpack.c.bf16 %v4252_v34, %v4251_v29  ;;  %v3706_v46 = vrot.slane %v3501_v7, 1  ;;  %7834 = vmatprep.subr.bf16.mxu0 %v12051_v5  ;;  %4428 = vmatmul.mubr.f32.vlgmr.msra.gmra.mrb[64].mxu1 %v8696_v43  ;;  %v16649_v7 = vld [vmem:[#allocation102_spill] sm:$0xff] }
 0x5a0   :  { %v3089_v53 = vadd.f32 %v3088_v8, %v3026_v26  ;;  %v16647_v8 = vld [vmem:[#allocation95_spill] sm:$0xff]  ;;  %v12084_v27 = vsub.f32 %v16649_v7, %v11715_v21 }
 0x5a1   :  { %v3707_v29 = vsel %vm262_vm0, %v12042_v14, %v3706_v46  ;;  %7667 = vmatpush1.bf16.msra.mxu1 %v7666_v13  ;;  %7836 = vmatpush3.bf16.msra.mxu0 %v12051_v5  ;;  %v12069_v26 = vsub.f32 %v16647_v8, %v11715_v21  ;;  %v3030_v46 = vmul.f32 %v12060_v36, %v12060_v36 }
 0x5a2   :  { %v3090_v11 = vadd.f32 %v3089_v53, %v3027_v59  ;;  %4432 = vmatprep.mubr.f32.mxu1 %v3707_v29  ;;  %7838 = vmatprep.subr.bf16.mxu0 %v12056_v39  ;;  %v16648_v53 = vld [vmem:[#allocation98_spill] sm:$0xff]  ;;  %16650 = vst [vmem:[#allocation46_spill] sm:$0xff] %v12084_v27  ;;  %v3033_v7 = vmul.f32 %v12084_v27, %v12084_v27  ;;  %v4256_v27 = vld [vmem:[#allocation3 + $0x128] sm:$0xff] }
 0x5a3   :  { %7668 = vmatprep.subr.bf16.mxu1 %v16618_v62  ;;  %v12077_v59 = vsub.f32 %v16648_v53, %v11715_v21  ;;  %4433 = vmatmul.mubr.f32.gmra.mrb[66].mxu1 %v8696_v43  ;;  %v3031_v18 = vmul.f32 %v12069_v26, %v12069_v26  ;;  %v4254_v43 = vld [vmem:[#allocation3 + $0x118] sm:$0xff] }
 0x5a4   :  { %v3091_v34 = vadd.f32 %v3090_v11, %v3028_v4  ;;  %v16651_v11 = vld [vmem:[#allocation100_spill] sm:$0xff] }
 0x5a5   :  { %7840 = vmatpush3.bf16.msra.mxu0 %v12056_v39  ;;  %v12090_v29 = vsub.f32 %v16651_v11, %v11715_v21  ;;  %v3032_v8 = vmul.f32 %v12077_v59, %v12077_v59  ;;  %v16653_v39 = vld [vmem:[#allocation103_spill] sm:$0xff] }
 0x5a6   :  { %v3092_v13 = vadd.f32 %v3091_v34, %v3029_v20  ;;  %v4253_v20 = vld [vmem:[#allocation3 + $0x110] sm:$0xff]  ;;  %v12096_v5 = vsub.f32 %v16653_v39, %v11715_v21 }
 0x5a7   :  { %16652 = vst [vmem:[#allocation48_spill] sm:$0xff] %v12090_v29  ;;  %v7669_v34 = vpack.c.bf16 %v4254_v43, %v4253_v20  ;;  %v3034_v11 = vmul.f32 %v12090_v29, %v12090_v29 }
 0x5a8   :  { %v3093_v4 = vadd.f32 %v3092_v13, %v3030_v46  ;;  %16654 = vst [vmem:[#allocation52_spill] sm:$0xff] %v12096_v5  ;;  %v16655_v46 = vld [vmem:[#allocation105_spill] sm:$0xff]  ;;  %v3035_v39 = vmul.f32 %v12096_v5, %v12096_v5 }
 0x5a9   :  { %7670 = vmatpush1.bf16.msra.mxu1 %v7669_v34  ;;  %v12102_v13 = vsub.f32 %v16655_v46, %v11715_v21 }
 0x5aa   :  { %v3094_v53 = vadd.f32 %v3093_v4, %v3031_v18  ;;  %7671 = vmatprep.subr.bf16.mxu1 %v16618_v62  ;;  %v16657_v4 = vld [vmem:[#allocation108_spill] sm:$0xff] }
 0x5ab   :  { %16656 = vst [vmem:[#allocation50_spill] sm:$0xff] %v12102_v13  ;;  %v12109_v20 = vsub.f32 %v16657_v4, %v11715_v21  ;;  %v3036_v34 = vmul.f32 %v12102_v13, %v12102_v13  ;;  %v3040_v13 = vmul.f32 %v11718_v28, %v11718_v28 }
 0x5ac   :  { %v3095_v14 = vadd.f32 %v3094_v53, %v3032_v8  ;;  %v16659_v8 = vld [vmem:[#allocation110_spill] sm:$0xff] }
 0x5ad   :  { %16658 = vst [vmem:[#allocation53_spill] sm:$0xff] %v12109_v20  ;;  %v12115_v53 = vsub.f32 %v16659_v8, %v11715_v21  ;;  %v3037_v4 = vmul.f32 %v12109_v20, %v12109_v20 }
 0x5ae   :  { %v3096_v18 = vadd.f32 %v3095_v14, %v3033_v7  ;;  %v16660_v14 = vld [vmem:[#allocation112_spill] sm:$0xff] }
 0x5af   :  { %v12121_v7 = vsub.f32 %v16660_v14, %v11715_v21  ;;  %v3038_v5 = vmul.f32 %v12115_v53, %v12115_v53  ;;  %v3041_v14 = vmul.f32 %v11721_v55, %v11721_v55 }
 0x5b0   :  { %v3097_v43 = vadd.f32 %v3096_v18, %v3034_v11 }
 0x5b1   :  { %v3039_v18 = vmul.f32 %v12121_v7, %v12121_v7 }
 0x5b2   :  { %v3098_v46 = vadd.f32 %v3097_v43, %v3035_v39  ;;  %v4255_v43 = vld [vmem:[#allocation3 + $0x120] sm:$0xff] }
 0x5b3   :  { %v7672_v21 = vpack.c.bf16 %v4256_v27, %v4255_v43  ;;  %v3045_v27 = vmul.f32 %v11733_v45, %v11733_v45  ;;  %v3048_v43 = vmul.f32 %v11742_v35, %v11742_v35 }
 0x5b4   :  { %v3099_v29 = vadd.f32 %v3098_v46, %v3036_v34  ;;  %v3042_v34 = vmul.f32 %v11724_v50, %v11724_v50 }
 0x5b5   :  { %7673 = vmatpush1.bf16.msra.mxu1 %v7672_v21 }
 0x5b6   :  { %v3100_v11 = vadd.f32 %v3099_v29, %v3037_v4  ;;  %7674 = vmatprep.subr.bf16.mxu1 %v16618_v62  ;;  %v3044_v4 = vmul.f32 %v11730_v10, %v11730_v10 }
 0x5b8   :  { %v3101_v8 = vadd.f32 %v3100_v11, %v3038_v5  ;;  %v3043_v5 = vmul.f32 %v11727_v37, %v11727_v37 }
 0x5ba   :  { %v3102_v39 = vadd.f32 %v3101_v8, %v3039_v18 }
 0x5bc   :  { %v3103_v20 = vadd.f32 %v3102_v39, %v3040_v13  ;;  %v3046_v13 = vmul.f32 %v11736_v25, %v11736_v25 }
 0x5be   :  { %v3104_v29 = vadd.f32 %v3103_v20, %v3041_v14  ;;  %v3047_v20 = vmul.f32 %v11739_v47, %v11739_v47  ;;  %v4257_v14 = vld [vmem:[#allocation3 + $0x130] sm:$0xff]  ;;  %v4259_v47 = vld [vmem:[#allocation3 + $0x140] sm:$0xff] }
 0x5c0   :  { %v3105_v46 = vadd.f32 %v3104_v29, %v3042_v34  ;;  %v4258_v34 = vld [vmem:[#allocation3 + $0x138] sm:$0xff] }
 0x5c1   :  { %v7675_v29 = vpack.c.bf16 %v4258_v34, %v4257_v14  ;;  %v4261_v34 = vld [vmem:[#allocation3 + $0x150] sm:$0xff] }
 0x5c2   :  { %v3106_v11 = vadd.f32 %v3105_v46, %v3043_v5 }
 0x5c3   :  { %7676 = vmatpush1.bf16.msra.mxu1 %v7675_v29  ;;  %v4262_v29 = vld [vmem:[#allocation3 + $0x158] sm:$0xff] }
 0x5c4   :  { %v3107_v18 = vadd.f32 %v3106_v11, %v3044_v4  ;;  %7677 = vmatprep.subr.bf16.mxu1 %v16618_v62 }
 0x5c6   :  { %v3108_v8 = vadd.f32 %v3107_v18, %v3045_v27 }
 0x5c8   :  { %v3109_v39 = vadd.f32 %v3108_v8, %v3046_v13  ;;  %v4260_v13 = vld [vmem:[#allocation3 + $0x148] sm:$0xff] }
 0x5c9   :  { %v7678_v8 = vpack.c.bf16 %v4260_v13, %v4259_v47  ;;  %v12163_v47 = vld [vmem:[%s15712_s3] ss:$0 sm:$0xff] }
 0x5ca   :  { %v3110_v21 = vadd.f32 %v3109_v39, %v3047_v20  ;;  %v3123_v20 = vlaneseq }
 0x5cb   :  { %7679 = vmatpush1.bf16.msra.mxu1 %v7678_v8  ;;  %v16662_v8 = vld [vmem:[#allocation49_spill] sm:$0xff] }
 0x5cc   :  { %v3111_v5 = vadd.f32 %v3110_v21, %v3048_v43  ;;  %7680 = vmatprep.subr.bf16.mxu1 %v16618_v62  ;;  %v12150_v39 = vshrl.u32 %v3123_v20, 7  ;;  %v2849_v43 = vld [vmem:[%s15711_s2] sm:$0x1]  ;;  %v16663_v20 = vld [vmem:[#allocation51_spill] sm:$0xff] }
 0x5ce   :  { %v3112_v46 = vrot.slane %v3111_v5, 4  ;;  %16661 = vst [vmem:[#allocation55_spill] sm:$0xff] %v12150_v39  ;;  %v15991_v21 = vsub.s32 0, %v12150_v39  ;;  %v16676_v39 = vld [vmem:[#allocation48_spill] sm:$0xff] }
 0x5d0   :  { %v3113_v4 = vadd.f32 %v3112_v46, %v3111_v5 }
 0x5d2   :  { %v3114_v11 = vrot.slane %v3113_v4, 2 }
 0x5d4   :  { %v3115_v25 = vadd.f32 %v3114_v11, %v3113_v4 }
 0x5d6   :  { %v3116_v27 = vrot.slane %v3115_v25, 1 }
 0x5d8   :  { %v3117_v18 = vadd.f32 %v3116_v27, %v3115_v25 }
 0x5da   :  { %v3118_v45 = vmul.f32 0.001953125, %v3117_v18 }
 0x5dc   :  { %v3119_v10 = vadd.f32 1e-05, %v3118_v45 }
 0x5de   :  { %8632 = vrsqrt.f32 %v3119_v10  ;;  %v7681_v10 = vpack.c.bf16 %v4262_v29, %v4261_v34  ;;  %v16667_v34 = vld [vmem:[#allocation66_spill] sm:$0xff] }
 0x5e0   :  { %7682 = vmatpush1.bf16.msra.mxu1 %v7681_v10  ;;  %v16668_v10 = vld [vmem:[#allocation71_spill] sm:$0xff] }
 0x5e1   :  { %7683 = vmatprep.subr.bf16.mxu1 %v16618_v62  ;;  %v16677_v62 = vld [vmem:[#allocation52_spill] sm:$0xff] }
 0x5e8   :  { %v8633_v14 = vpop.eup %8632 }
 0x5e9   :  { %v3121_v25 = vmul.f32 %v8633_v14, %v2849_v43  ;;  %v16664_v43 = vld [vmem:[#allocation56_spill] sm:$0xff]  ;;  %v16665_v14 = vld [vmem:[#allocation59_spill] sm:$0xff] }
 0x5eb   :  { %v12158_v45 = vrot.slane %v3121_v25, %v15991_v21  ;;  %v16666_v25 = vld [vmem:[#allocation64_spill] sm:$0xff]  ;;  %v16675_v21 = vld [vmem:[#allocation46_spill] sm:$0xff] }
 0x5ed   :  { %v3191_v5 = vmul.f32 %v12158_v45, %v11742_v35  ;;  %v12169_v46 = vmul.f32 %v12158_v45, %v11746_v9  ;;  %v12173_v4 = vmul.f32 %v12158_v45, %v11750_v61  ;;  %v12177_v11 = vmul.f32 %v12158_v45, %v11754_v63 }
 0x5ee   :  { %v12181_v27 = vmul.f32 %v12158_v45, %v11762_v48  ;;  %v12185_v35 = vmul.f32 %v12158_v45, %v11766_v40  ;;  %v12189_v9 = vmul.f32 %v12158_v45, %v11772_v54  ;;  %v12193_v61 = vmul.f32 %v12158_v45, %v11778_v32 }
 0x5ef   :  { %v3261_v63 = vadd.f32 %v12163_v47, %v3191_v5  ;;  %v12199_v48 = vmul.f32 %v12158_v45, %v11784_v52  ;;  %v12203_v40 = vmul.f32 %v12158_v45, %v11790_v58  ;;  %v12207_v54 = vmul.f32 %v12158_v45, %v11796_v12 }
 0x5f0   :  { %v12211_v32 = vmul.f32 %v12158_v45, %v11802_v6  ;;  %v12215_v18 = vmul.f32 %v12158_v45, %v11808_v56  ;;  %v12219_v52 = vmul.f32 %v12158_v45, %v11814_v15  ;;  %v12223_v58 = vmul.f32 %v12158_v45, %v11820_v42 }
 0x5f1   :  { %v3325_v13 = vmax.f32 %v3261_v63, 0.0  ;;  %v12227_v12 = vmul.f32 %v12158_v45, %v11826_v0  ;;  %v12231_v6 = vmul.f32 %v12158_v45, %v11833_v24  ;;  %v12235_v56 = vmul.f32 %v12158_v45, %v11839_v41  ;;  %v16669_v63 = vld [vmem:[#allocation74_spill] sm:$0xff] }
 0x5f2   :  { %v12239_v15 = vmul.f32 %v12158_v45, %v11846_v49  ;;  %v12243_v42 = vmul.f32 %v12158_v45, %v11852_v51  ;;  %v12247_v0 = vmul.f32 %v12158_v45, %v11859_v23  ;;  %v12251_v24 = vmul.f32 %v12158_v45, %v11865_v44 }
 0x5f3   :  { %3498 = vst [vmem:[#allocation2 + $0x339] sm:$0xff] %v3325_v13  ;;  %v12255_v41 = vmul.f32 %v12158_v45, %v11872_v3  ;;  %v12259_v49 = vmul.f32 %v12158_v45, %v11878_v17  ;;  %v12263_v51 = vmul.f32 %v12158_v45, %v11885_v2  ;;  %v12267_v23 = vmul.f32 %v12158_v45, %v11891_v57 }
 0x5f4   :  { %v12271_v44 = vmul.f32 %v12158_v45, %v11898_v31  ;;  %v12275_v3 = vmul.f32 %v12158_v45, %v11904_v19  ;;  %v12279_v17 = vmul.f32 %v12158_v45, %v11911_v33  ;;  %v12283_v2 = vmul.f32 %v12158_v45, %v11917_v38 }
 0x5f5   :  { %v12287_v57 = vmul.f32 %v12158_v45, %v11924_v22  ;;  %v12291_v31 = vmul.f32 %v12158_v45, %v11930_v30  ;;  %v12295_v19 = vmul.f32 %v12158_v45, %v16662_v8  ;;  %v12299_v33 = vmul.f32 %v12158_v45, %v16663_v20  ;;  %v16670_v8 = vld [vmem:[#allocation79_spill] sm:$0xff] }
 0x5f6   :  { %v12303_v38 = vmul.f32 %v12158_v45, %v16664_v43  ;;  %v12307_v22 = vmul.f32 %v12158_v45, %v16665_v14  ;;  %v12311_v30 = vmul.f32 %v12158_v45, %v16666_v25  ;;  %v12315_v29 = vmul.f32 %v12158_v45, %v16667_v34  ;;  %v16671_v43 = vld [vmem:[#allocation81_spill] sm:$0xff] }
 0x5f7   :  { %v12319_v5 = vmul.f32 %v12158_v45, %v16668_v10  ;;  %v12323_v13 = vmul.f32 %v12158_v45, %v16669_v63  ;;  %v12327_v20 = vmul.f32 %v12158_v45, %v16670_v8  ;;  %v12331_v14 = vmul.f32 %v12158_v45, %v16671_v43  ;;  %v16672_v25 = vld [vmem:[#allocation41_spill] sm:$0xff] }
 0x5f8   :  { %v12335_v34 = vmul.f32 %v12158_v45, %v16672_v25  ;;  %v12339_v10 = vmul.f32 %v12158_v45, %v12027_v16  ;;  %v12343_v63 = vmul.f32 %v12158_v45, %v12037_v1  ;;  %v12347_v8 = vmul.f32 %v12158_v45, %v12046_v60 }
 0x5f9   :  { %v12351_v43 = vmul.f32 %v12158_v45, %v12060_v36  ;;  %v12355_v25 = vmul.f32 %v12158_v45, %v12069_v26  ;;  %v12359_v16 = vmul.f32 %v12158_v45, %v12077_v59  ;;  %v12363_v1 = vmul.f32 %v12158_v45, %v16675_v21 }
 0x5fa   :  { %v12367_v60 = vmul.f32 %v12158_v45, %v16676_v39  ;;  %v12371_v36 = vmul.f32 %v12158_v45, %v16677_v62  ;;  %v12383_v21 = vmul.f32 %v12158_v45, %v12115_v53  ;;  %v12387_v39 = vmul.f32 %v12158_v45, %v12121_v7 }
 0x5fb   :  { %16673 = vst [vmem:[#allocation57_spill] sm:$0xff] %v12351_v43  ;;  %16674 = vst [vmem:[#allocation58_spill] sm:$0xff] %v12355_v25  ;;  %v16678_v43 = vld [vmem:[#allocation50_spill] sm:$0xff]  ;;  %v16679_v25 = vld [vmem:[#allocation53_spill] sm:$0xff]  ;;  %v12391_v62 = vmul.f32 %v12158_v45, %v11718_v28  ;;  %v12403_v53 = vmul.f32 %v12158_v45, %v11727_v37  ;;  %v12423_v37 = vadd.f32 %v12163_v47, %v12169_v46 }
 0x5fc   :  { %v12375_v26 = vmul.f32 %v12158_v45, %v16678_v43  ;;  %v12379_v59 = vmul.f32 %v12158_v45, %v16679_v25  ;;  %16680 = vst [vmem:[#allocation62_spill] sm:$0xff] %v12383_v21  ;;  %16681 = vst [vmem:[#allocation14_spill] sm:$0xff] %v12387_v39  ;;  %v12395_v43 = vmul.f32 %v12158_v45, %v11721_v55  ;;  %v16684_v21 = vld [vmem:[#allocation12_spill] sm:$0xff]  ;;  %v16685_v39 = vld [vmem:[#allocation13_spill] sm:$0xff] }
 0x5fd   :  { %16682 = vst [vmem:[#allocation15_spill] sm:$0xff] %v12391_v62  ;;  %v12399_v25 = vmul.f32 %v12158_v45, %v11724_v50  ;;  %v12407_v7 = vmul.f32 %v12158_v45, %v16684_v21  ;;  %v12411_v28 = vmul.f32 %v12158_v45, %v16685_v39  ;;  %v16686_v62 = vld [vmem:[#allocation42_spill] sm:$0xff]  ;;  %v12427_v21 = vadd.f32 %v12163_v47, %v12173_v4 }
 0x5fe   :  { %16683 = vst [vmem:[#allocation16_spill] sm:$0xff] %v12395_v43  ;;  %v12415_v55 = vmul.f32 %v12158_v45, %v16686_v62  ;;  %v16687_v43 = vld [vmem:[#allocation47_spill] sm:$0xff]  ;;  %v12431_v39 = vadd.f32 %v12163_v47, %v12177_v11  ;;  %v12435_v62 = vadd.f32 %v12163_v47, %v12181_v27  ;;  %v12443_v46 = vadd.f32 %v12163_v47, %v12189_v9 }
 0x5ff   :  { %v12419_v50 = vmul.f32 %v12158_v45, %v16687_v43  ;;  %v12439_v45 = vadd.f32 %v12163_v47, %v12185_v35  ;;  %v12447_v4 = vadd.f32 %v12163_v47, %v12193_v61  ;;  %v12451_v11 = vadd.f32 %v12163_v47, %v12199_v48 }
 0x600   :  { %v12455_v27 = vadd.f32 %v12163_v47, %v12203_v40  ;;  %v12459_v35 = vadd.f32 %v12163_v47, %v12207_v54  ;;  %v12463_v9 = vadd.f32 %v12163_v47, %v12211_v32  ;;  %v12467_v61 = vadd.f32 %v12163_v47, %v12215_v18 }
 0x601   :  { %v12471_v48 = vadd.f32 %v12163_v47, %v12219_v52  ;;  %v12475_v40 = vadd.f32 %v12163_v47, %v12223_v58  ;;  %v12479_v54 = vadd.f32 %v12163_v47, %v12227_v12  ;;  %v12483_v32 = vadd.f32 %v12163_v47, %v12231_v6 }
 0x602   :  { %v12487_v18 = vadd.f32 %v12163_v47, %v12235_v56  ;;  %v12491_v52 = vadd.f32 %v12163_v47, %v12239_v15  ;;  %v12495_v58 = vadd.f32 %v12163_v47, %v12243_v42  ;;  %v12499_v12 = vadd.f32 %v12163_v47, %v12247_v0  ;;  %v16689_v43 = vld [vmem:[#allocation57_spill] sm:$0xff] }
 0x603   :  { %v12503_v6 = vadd.f32 %v12163_v47, %v12251_v24  ;;  %v12507_v56 = vadd.f32 %v12163_v47, %v12255_v41  ;;  %v12511_v15 = vadd.f32 %v12163_v47, %v12259_v49  ;;  %v12515_v42 = vadd.f32 %v12163_v47, %v12263_v51 }
 0x604   :  { %v12519_v0 = vadd.f32 %v12163_v47, %v12267_v23  ;;  %v12523_v24 = vadd.f32 %v12163_v47, %v12271_v44  ;;  %v12527_v41 = vadd.f32 %v12163_v47, %v12275_v3  ;;  %v12531_v49 = vadd.f32 %v12163_v47, %v12279_v17 }
 0x605   :  { %v12535_v51 = vadd.f32 %v12163_v47, %v12283_v2  ;;  %v12539_v23 = vadd.f32 %v12163_v47, %v12287_v57  ;;  %v12543_v44 = vadd.f32 %v12163_v47, %v12291_v31  ;;  %v12547_v3 = vadd.f32 %v12163_v47, %v12295_v19 }
 0x606   :  { %v12551_v17 = vadd.f32 %v12163_v47, %v12299_v33  ;;  %v12555_v2 = vadd.f32 %v12163_v47, %v12303_v38  ;;  %v12559_v57 = vadd.f32 %v12163_v47, %v12307_v22  ;;  %v12563_v31 = vadd.f32 %v12163_v47, %v12311_v30 }
 0x607   :  { %v12567_v19 = vadd.f32 %v12163_v47, %v12315_v29  ;;  %v12571_v33 = vadd.f32 %v12163_v47, %v12319_v5  ;;  %v12575_v38 = vadd.f32 %v12163_v47, %v12323_v13  ;;  %v12579_v22 = vadd.f32 %v12163_v47, %v12327_v20 }
 0x608   :  { %v12583_v30 = vadd.f32 %v12163_v47, %v12331_v14  ;;  %v12587_v29 = vadd.f32 %v12163_v47, %v12335_v34  ;;  %v12591_v5 = vadd.f32 %v12163_v47, %v12339_v10  ;;  %v12595_v13 = vadd.f32 %v12163_v47, %v12343_v63 }
 0x609   :  { %v12599_v20 = vadd.f32 %v12163_v47, %v12347_v8  ;;  %v12603_v14 = vadd.f32 %v12163_v47, %v16689_v43  ;;  %v12611_v10 = vadd.f32 %v12163_v47, %v12359_v16  ;;  %v12615_v63 = vadd.f32 %v12163_v47, %v12363_v1 }
 0x60a   :  { %16688 = vst [vmem:[#allocation17_spill] sm:$0xff] %v12583_v30  ;;  %v16690_v30 = vld [vmem:[#allocation58_spill] sm:$0xff]  ;;  %v12619_v8 = vadd.f32 %v12163_v47, %v12367_v60  ;;  %v12623_v43 = vadd.f32 %v12163_v47, %v12371_v36  ;;  %v12631_v16 = vadd.f32 %v12163_v47, %v12379_v59  ;;  %v12651_v59 = vadd.f32 %v12163_v47, %v12399_v25 }
 0x60b   :  { %v12607_v34 = vadd.f32 %v12163_v47, %v16690_v30  ;;  %16691 = vst [vmem:[#allocation18_spill] sm:$0xff] %v12611_v10  ;;  %16692 = vst [vmem:[#allocation19_spill] sm:$0xff] %v12615_v63  ;;  %v12627_v30 = vadd.f32 %v12163_v47, %v12375_v26  ;;  %v16695_v10 = vld [vmem:[#allocation62_spill] sm:$0xff]  ;;  %v12671_v25 = vadd.f32 %v12163_v47, %v12419_v50  ;;  %v3272_v50 = vmax.f32 %v12463_v9, 0.0 }
 0x60c   :  { %16693 = vst [vmem:[#allocation20_spill] sm:$0xff] %v12619_v8  ;;  %16694 = vst [vmem:[#allocation21_spill] sm:$0xff] %v12623_v43  ;;  %v12635_v1 = vadd.f32 %v12163_v47, %v16695_v10  ;;  %v16696_v63 = vld [vmem:[#allocation14_spill] sm:$0xff]  ;;  %v16697_v8 = vld [vmem:[#allocation15_spill] sm:$0xff]  ;;  %v12655_v10 = vadd.f32 %v12163_v47, %v12403_v53  ;;  %v3263_v53 = vmax.f32 %v12427_v21, 0.0  ;;  %v3274_v21 = vmax.f32 %v12471_v48, 0.0 }
 0x60d   :  { %v12639_v60 = vadd.f32 %v12163_v47, %v16696_v63  ;;  %v12643_v36 = vadd.f32 %v12163_v47, %v16697_v8  ;;  %v16698_v43 = vld [vmem:[#allocation16_spill] sm:$0xff]  ;;  %16699 = vst [vmem:[#allocation22_spill] sm:$0xff] %v12651_v59  ;;  %v12659_v63 = vadd.f32 %v12163_v47, %v12407_v7  ;;  %v12663_v8 = vadd.f32 %v12163_v47, %v12411_v28 }
 0x60e   :  { %v12647_v26 = vadd.f32 %v12163_v47, %v16698_v43  ;;  %16700 = vst [vmem:[#allocation23_spill] sm:$0xff] %v12655_v10  ;;  %v12667_v43 = vadd.f32 %v12163_v47, %v12415_v55  ;;  %v3262_v59 = vmax.f32 %v12423_v37, 0.0  ;;  %v3264_v10 = vmax.f32 %v12431_v39, 0.0  ;;  %3436 = vst [vmem:[#allocation2 + $0x21] sm:$0xff] %v3263_v53 }
 0x60f   :  { %16701 = vst [vmem:[#allocation24_spill] sm:$0xff] %v12659_v63  ;;  %16702 = vst [vmem:[#allocation25_spill] sm:$0xff] %v12663_v8  ;;  %v3265_v7 = vmax.f32 %v12435_v62, 0.0  ;;  %v3266_v63 = vmax.f32 %v12439_v45, 0.0  ;;  %v3267_v28 = vmax.f32 %v12443_v46, 0.0  ;;  %v3268_v8 = vmax.f32 %v12447_v4, 0.0 }
 0x610   :  { %16703 = vst [vmem:[#allocation26_spill] sm:$0xff] %v12667_v43  ;;  %v3269_v55 = vmax.f32 %v12451_v11, 0.0  ;;  %v3270_v43 = vmax.f32 %v12455_v27, 0.0  ;;  %v3271_v47 = vmax.f32 %v12459_v35, 0.0  ;;  %3435 = vst [vmem:[#allocation2 + $0x19] sm:$0xff] %v3262_v59  ;;  %v3273_v37 = vmax.f32 %v12467_v61, 0.0 }
 0x611   :  { %3437 = vst [vmem:[#allocation2 + $0x31] sm:$0xff] %v3264_v10  ;;  %v3275_v39 = vmax.f32 %v12475_v40, 0.0  ;;  %v3276_v62 = vmax.f32 %v12479_v54, 0.0  ;;  %3438 = vst [vmem:[#allocation2 + $0x39] sm:$0xff] %v3265_v7  ;;  %v3277_v45 = vmax.f32 %v12483_v32, 0.0  ;;  %v3278_v46 = vmax.f32 %v12487_v18, 0.0 }
 0x612   :  { %3439 = vst [vmem:[#allocation2 + $0x49] sm:$0xff] %v3266_v63  ;;  %3440 = vst [vmem:[#allocation2 + $0x51] sm:$0xff] %v3267_v28  ;;  %v3279_v4 = vmax.f32 %v12491_v52, 0.0  ;;  %v3280_v11 = vmax.f32 %v12495_v58, 0.0  ;;  %v3281_v27 = vmax.f32 %v12499_v12, 0.0  ;;  %v3282_v35 = vmax.f32 %v12503_v6, 0.0 }
 0x613   :  { %3441 = vst [vmem:[#allocation2 + $0x61] sm:$0xff] %v3268_v8  ;;  %3442 = vst [vmem:[#allocation2 + $0x69] sm:$0xff] %v3269_v55  ;;  %v3283_v9 = vmax.f32 %v12507_v56, 0.0  ;;  %v3284_v61 = vmax.f32 %v12511_v15, 0.0  ;;  %v3285_v48 = vmax.f32 %v12515_v42, 0.0  ;;  %v3286_v40 = vmax.f32 %v12519_v0, 0.0 }
 0x614   :  { %3443 = vst [vmem:[#allocation2 + $0x79] sm:$0xff] %v3270_v43  ;;  %3444 = vst [vmem:[#allocation2 + $0x81] sm:$0xff] %v3271_v47  ;;  %v3287_v54 = vmax.f32 %v12523_v24, 0.0  ;;  %v3288_v32 = vmax.f32 %v12527_v41, 0.0  ;;  %v3289_v18 = vmax.f32 %v12531_v49, 0.0  ;;  %v3290_v52 = vmax.f32 %v12535_v51, 0.0 }
 0x615   :  { %3445 = vst [vmem:[#allocation2 + $0x91] sm:$0xff] %v3272_v50  ;;  %3446 = vst [vmem:[#allocation2 + $0x99] sm:$0xff] %v3273_v37  ;;  %v3291_v58 = vmax.f32 %v12539_v23, 0.0  ;;  %v3292_v12 = vmax.f32 %v12543_v44, 0.0  ;;  %v3293_v6 = vmax.f32 %v12547_v3, 0.0  ;;  %v3294_v56 = vmax.f32 %v12551_v17, 0.0 }
 0x616   :  { %3447 = vst [vmem:[#allocation2 + $0xa9] sm:$0xff] %v3274_v21  ;;  %3448 = vst [vmem:[#allocation2 + $0xb1] sm:$0xff] %v3275_v39  ;;  %v3295_v15 = vmax.f32 %v12555_v2, 0.0  ;;  %v3296_v42 = vmax.f32 %v12559_v57, 0.0  ;;  %v3297_v0 = vmax.f32 %v12563_v31, 0.0  ;;  %v3298_v24 = vmax.f32 %v12567_v19, 0.0 }
 0x617   :  { %3449 = vst [vmem:[#allocation2 + $0xc1] sm:$0xff] %v3276_v62  ;;  %3450 = vst [vmem:[#allocation2 + $0xc9] sm:$0xff] %v3277_v45  ;;  %v3299_v41 = vmax.f32 %v12571_v33, 0.0  ;;  %v3300_v49 = vmax.f32 %v12575_v38, 0.0  ;;  %v3301_v51 = vmax.f32 %v12579_v22, 0.0  ;;  %v16704_v23 = vld [vmem:[#allocation17_spill] sm:$0xff] }
 0x618   :  { %3451 = vst [vmem:[#allocation2 + $0xd9] sm:$0xff] %v3278_v46  ;;  %3452 = vst [vmem:[#allocation2 + $0xe1] sm:$0xff] %v3279_v4  ;;  %v3302_v44 = vmax.f32 %v16704_v23, 0.0  ;;  %v3303_v3 = vmax.f32 %v12587_v29, 0.0  ;;  %v3304_v17 = vmax.f32 %v12591_v5, 0.0  ;;  %v3305_v2 = vmax.f32 %v12595_v13, 0.0 }
 0x619   :  { %3453 = vst [vmem:[#allocation2 + $0xf1] sm:$0xff] %v3280_v11  ;;  %3454 = vst [vmem:[#allocation2 + $0xf9] sm:$0xff] %v3281_v27  ;;  %v3306_v57 = vmax.f32 %v12599_v20, 0.0  ;;  %v3307_v31 = vmax.f32 %v12603_v14, 0.0  ;;  %v3308_v19 = vmax.f32 %v12607_v34, 0.0  ;;  %v12720_v33 = vld [vmem:[#allocation2 + $0x18] sm:$0xff] }
 0x61a   :  { %3455 = vst [vmem:[#allocation2 + $0x109] sm:$0xff] %v3282_v35  ;;  %3456 = vst [vmem:[#allocation2 + $0x111] sm:$0xff] %v3283_v9  ;;  %v12722_v38 = vld [vmem:[#allocation2 + $0x20] sm:$0xff]  ;;  %v12724_v22 = vld [vmem:[#allocation2 + $0x30] sm:$0xff]  ;;  %v3313_v43 = vmax.f32 %v12627_v30, 0.0  ;;  %v3314_v53 = vmax.f32 %v12631_v16, 0.0 }
 0x61b   :  { %3457 = vst [vmem:[#allocation2 + $0x121] sm:$0xff] %v3284_v61  ;;  %3458 = vst [vmem:[#allocation2 + $0x129] sm:$0xff] %v3285_v48  ;;  %v12726_v29 = vld [vmem:[#allocation2 + $0x38] sm:$0xff]  ;;  %v16705_v5 = vld [vmem:[#allocation18_spill] sm:$0xff]  ;;  %v3315_v7 = vmax.f32 %v12635_v1, 0.0  ;;  %v3316_v28 = vmax.f32 %v12639_v60, 0.0 }
 0x61c   :  { %3459 = vst [vmem:[#allocation2 + $0x139] sm:$0xff] %v3286_v40  ;;  %3460 = vst [vmem:[#allocation2 + $0x141] sm:$0xff] %v3287_v54  ;;  %v3309_v13 = vmax.f32 %v16705_v5, 0.0  ;;  %v16706_v59 = vld [vmem:[#allocation19_spill] sm:$0xff]  ;;  %v16707_v10 = vld [vmem:[#allocation20_spill] sm:$0xff]  ;;  %v3317_v47 = vmax.f32 %v12643_v36, 0.0 }
 0x61d   :  { %3461 = vst [vmem:[#allocation2 + $0x151] sm:$0xff] %v3288_v32  ;;  %3462 = vst [vmem:[#allocation2 + $0x159] sm:$0xff] %v3289_v18  ;;  %v3310_v20 = vmax.f32 %v16706_v59, 0.0  ;;  %v3311_v14 = vmax.f32 %v16707_v10, 0.0  ;;  %v16708_v63 = vld [vmem:[#allocation21_spill] sm:$0xff]  ;;  %v3318_v50 = vmax.f32 %v12647_v26, 0.0 }
 0x61e   :  { %3463 = vst [vmem:[#allocation2 + $0x169] sm:$0xff] %v3290_v52  ;;  %3464 = vst [vmem:[#allocation2 + $0x171] sm:$0xff] %v3291_v58  ;;  %v3312_v34 = vmax.f32 %v16708_v63, 0.0  ;;  %v12732_v8 = vld [vmem:[#allocation2 + $0x40] sm:$0x3]  ;;  %v16709_v37 = vld [vmem:[#allocation22_spill] sm:$0xff] }
 0x61f   :  { %3465 = vst [vmem:[#allocation2 + $0x181] sm:$0xff] %v3292_v12  ;;  %3466 = vst [vmem:[#allocation2 + $0x189] sm:$0xff] %v3293_v6  ;;  %v3504_v55 = vld [vmem:[#allocation2 + $0x28] sm:$0x3]  ;;  %v3319_v21 = vmax.f32 %v16709_v37, 0.0  ;;  %v16710_v39 = vld [vmem:[#allocation23_spill] sm:$0xff] }
 0x620   :  { %3467 = vst [vmem:[#allocation2 + $0x1c9] sm:$0xff] %v3294_v56  ;;  %3468 = vst [vmem:[#allocation2 + $0x1d1] sm:$0xff] %v3295_v15  ;;  %v3320_v62 = vmax.f32 %v16710_v39, 0.0  ;;  %v12742_v30 = vld [vmem:[#allocation2 + $0x48] sm:$0xff]  ;;  %v12744_v16 = vld [vmem:[#allocation2 + $0x50] sm:$0xff]  ;;  %v3324_v26 = vmax.f32 %v12671_v25, 0.0 }
 0x621   :  { %3469 = vst [vmem:[#allocation2 + $0x1e1] sm:$0xff] %v3296_v42  ;;  %3470 = vst [vmem:[#allocation2 + $0x1e9] sm:$0xff] %v3297_v0  ;;  %v16711_v1 = vld [vmem:[#allocation24_spill] sm:$0xff]  ;;  %v16712_v45 = vld [vmem:[#allocation25_spill] sm:$0xff]  ;;  %v3708_v11 = vrot.slane %v12720_v33, 1  ;;  %v3709_v27 = vrot.slane %v12722_v38, 1 }
 0x622   :  { %3471 = vst [vmem:[#allocation2 + $0x1f9] sm:$0xff] %v3298_v24  ;;  %3472 = vst [vmem:[#allocation2 + $0x201] sm:$0xff] %v3299_v41  ;;  %v3321_v60 = vmax.f32 %v16711_v1, 0.0  ;;  %v3322_v46 = vmax.f32 %v16712_v45, 0.0  ;;  %v16713_v4 = vld [vmem:[#allocation26_spill] sm:$0xff]  ;;  %v3937_v35 = vrot.slane %v12724_v22, 2 }
 0x623   :  { %3473 = vst [vmem:[#allocation2 + $0x211] sm:$0xff] %v3300_v49  ;;  %3474 = vst [vmem:[#allocation2 + $0x219] sm:$0xff] %v3301_v51  ;;  %v3323_v36 = vmax.f32 %v16713_v4, 0.0  ;;  %v3938_v9 = vrot.slane %v12726_v29, 2  ;;  %v12754_v61 = vld [vmem:[#allocation2 + $0x58] sm:$0x3]  ;;  %v12764_v52 = vsel %vm262_vm0, %v3708_v11, %v3709_v27 }
 0x624   :  { %3475 = vst [vmem:[#allocation2 + $0x229] sm:$0xff] %v3302_v44  ;;  %3476 = vst [vmem:[#allocation2 + $0x231] sm:$0xff] %v3303_v3  ;;  %v3940_v25 = vrot.slane %v12732_v8, 2  ;;  %v3711_v48 = vrot.slane %v3504_v55, 1  ;;  %v3942_v40 = vrot.slane %v12742_v30, 2  ;;  %v3943_v54 = vrot.slane %v12744_v16, 2  ;;  %4437 = vmatprep.mubr.f32.mxu1 %v12764_v52 }
 0x625   :  { %3477 = vst [vmem:[#allocation2 + $0x241] sm:$0xff] %v3304_v17  ;;  %3478 = vst [vmem:[#allocation2 + $0x249] sm:$0xff] %v3305_v2  ;;  %v12759_v32 = vld [vmem:[#allocation2 + $0x60] sm:$0xff]  ;;  %v12761_v18 = vld [vmem:[#allocation2 + $0x68] sm:$0xff]  ;;  %v12767_v58 = vsel %vm487_vm1, %v3937_v35, %v3938_v9  ;;  %v3945_v56 = vrot.slane %v12754_v61, 2  ;;  %v3713_v15 = vrot.slane %v12724_v22, 1  ;;  %4438 = vmatmul.mubr.f32.gmra.mrb[68].mxu1 %v12720_v33 }
 0x626   :  { %3479 = vst [vmem:[#allocation2 + $0x259] sm:$0xff] %v3306_v57  ;;  %3480 = vst [vmem:[#allocation2 + $0x261] sm:$0xff] %v3307_v31  ;;  %7297 = vmatprep.mubr.f32.mxu0 %v12767_v58  ;;  %v12772_v12 = vsel %vm487_vm1, %v3938_v9, %v3940_v25  ;;  %v12775_v6 = vsel %vm262_vm0, %v3709_v27, %v3711_v48  ;;  %v12782_v42 = vsel %vm487_vm1, %v3942_v40, %v3943_v54  ;;  %v12787_v49 = vld [vmem:[#allocation2 + $0x70] sm:$0x3]  ;;  %v12791_v51 = vld [vmem:[#allocation2 + $0x78] sm:$0xff] }
 0x627   :  { %3481 = vst [vmem:[#allocation2 + $0x271] sm:$0xff] %v3308_v19  ;;  %3482 = vst [vmem:[#allocation2 + $0x279] sm:$0xff] %v3309_v13  ;;  %7298 = vmatmul.mubr.f32.vlgmr.msra.gmra.mrb[128].mxu0 %v12772_v12  ;;  %v3714_v0 = vrot.slane %v12726_v29, 1  ;;  %v3947_v24 = vrot.slane %v12759_v32, 2  ;;  %v3948_v41 = vrot.slane %v12761_v18, 2  ;;  %4442 = vmatprep.mubr.f32.mxu1 %v12775_v6  ;;  %v12793_v23 = vld [vmem:[#allocation2 + $0x80] sm:$0xff]  ;;  %v12796_v44 = vsel %vm487_vm1, %v3943_v54, %v3945_v56 }
 0x628   :  { %3483 = vst [vmem:[#allocation2 + $0x289] sm:$0xff] %v3310_v20  ;;  %3484 = vst [vmem:[#allocation2 + $0x291] sm:$0xff] %v3311_v14  ;;  %7300 = vmatprep.mubr.f32.mxu0 %v12782_v42  ;;  %v3950_v3 = vrot.slane %v12787_v49, 2  ;;  %v3716_v17 = vrot.slane %v12732_v8, 1  ;;  %v3952_v31 = vrot.slane %v12791_v51, 2  ;;  %v3953_v19 = vrot.slane %v12793_v23, 2 }
 0x629   :  { %3485 = vst [vmem:[#allocation2 + $0x2a1] sm:$0xff] %v3312_v34  ;;  %3486 = vst [vmem:[#allocation2 + $0x2a9] sm:$0xff] %v3313_v43  ;;  %4443 = vmatmul.mubr.f32.gmra.mrb[70].mxu1 %v12722_v38  ;;  %v12803_v2 = vsel %vm262_vm0, %v3713_v15, %v3714_v0  ;;  %v12806_v57 = vsel %vm487_vm1, %v3947_v24, %v3948_v41  ;;  %v12810_v33 = vld [vmem:[#allocation2 + $0x88] sm:$0x3]  ;;  %v12814_v5 = vld [vmem:[#allocation2 + $0x90] sm:$0xff]  ;;  %v3718_v10 = vrot.slane %v12742_v30, 1 }
 0x62a   :  { %3487 = vst [vmem:[#allocation2 + $0x2b9] sm:$0xff] %v3314_v53  ;;  %3488 = vst [vmem:[#allocation2 + $0x2c1] sm:$0xff] %v3315_v7  ;;  %4447 = vmatprep.mubr.f32.mxu1 %v12803_v2  ;;  %v12816_v38 = vld [vmem:[#allocation2 + $0x98] sm:$0xff]  ;;  %v12819_v13 = vsel %vm487_vm1, %v3948_v41, %v3950_v3  ;;  %v12822_v59 = vsel %vm262_vm0, %v3714_v0, %v3716_v17  ;;  %v3955_v20 = vrot.slane %v12810_v33, 2  ;;  %v3719_v63 = vrot.slane %v12744_v16, 1  ;;  %v12838_v53 = vld [vmem:[#allocation2 + $0xa8] sm:$0xff] }
 0x62b   :  { %3489 = vst [vmem:[#allocation2 + $0x2d1] sm:$0xff] %v3316_v28  ;;  %3490 = vst [vmem:[#allocation2 + $0x2d9] sm:$0xff] %v3317_v47  ;;  %7301 = vmatmul.mubr.f32.gmra.mrb[130].mxu0 %v12796_v44  ;;  %v12829_v14 = vsel %vm487_vm1, %v3952_v31, %v3953_v19  ;;  %v3957_v34 = vrot.slane %v12814_v5, 2  ;;  %v3958_v8 = vrot.slane %v12816_v38, 2  ;;  %v12834_v43 = vld [vmem:[#allocation2 + $0xa0] sm:$0x3] }
 0x62c   :  { %3491 = vst [vmem:[#allocation2 + $0x2e9] sm:$0xff] %v3318_v50  ;;  %3492 = vst [vmem:[#allocation2 + $0x2f1] sm:$0xff] %v3319_v21  ;;  %7303 = vmatprep.mubr.f32.mxu0 %v12806_v57  ;;  %v12843_v7 = vsel %vm487_vm1, %v3953_v19, %v3955_v20  ;;  %v3960_v28 = vrot.slane %v12834_v43, 2  ;;  %v3721_v55 = vrot.slane %v12754_v61, 1  ;;  %v12850_v47 = vsel %vm262_vm0, %v3718_v10, %v3719_v63  ;;  %v12857_v39 = vld [vmem:[#allocation2 + $0xb8] sm:$0x3] }
 0x62d   :  { %3493 = vst [vmem:[#allocation2 + $0x301] sm:$0xff] %v3320_v62  ;;  %3494 = vst [vmem:[#allocation2 + $0x309] sm:$0xff] %v3321_v60  ;;  %4448 = vmatmul.mubr.f32.gmra.mrb[72].mxu1 %v12724_v22  ;;  %v12840_v22 = vld [vmem:[#allocation2 + $0xb0] sm:$0xff]  ;;  %v12853_v50 = vsel %vm487_vm1, %v3957_v34, %v3958_v8  ;;  %v3962_v37 = vrot.slane %v12838_v53, 2  ;;  %v12861_v62 = vld [vmem:[#allocation2 + $0xc0] sm:$0xff]  ;;  %v3965_v45 = vrot.slane %v12857_v39, 2 }
 0x62e   :  { %3495 = vst [vmem:[#allocation2 + $0x319] sm:$0xff] %v3322_v46  ;;  %3496 = vst [vmem:[#allocation2 + $0x321] sm:$0xff] %v3323_v36  ;;  %4452 = vmatprep.mubr.f32.mxu1 %v12822_v59  ;;  %v3963_v21 = vrot.slane %v12840_v22, 2  ;;  %v12866_v1 = vsel %vm487_vm1, %v3958_v8, %v3960_v28  ;;  %v12869_v60 = vsel %vm262_vm0, %v3719_v63, %v3721_v55  ;;  %v3723_v46 = vrot.slane %v12759_v32, 1  ;;  %v12881_v27 = vld [vmem:[#allocation2 + $0xd0] sm:$0x3] }
 0x62f   :  { %3497 = vst [vmem:[#allocation2 + $0x331] sm:$0xff] %v3324_v26  ;;  %16714 = vst [vmem:[#allocation27_spill] sm:$0xff] %v12764_v52  ;;  %7304 = vmatmul.mubr.f32.gmra.mrb[132].mxu0 %v12819_v13  ;;  %v3724_v36 = vrot.slane %v12761_v18, 1  ;;  %v3967_v26 = vrot.slane %v12861_v62, 2  ;;  %v12885_v35 = vld [vmem:[#allocation2 + $0xd8] sm:$0xff]  ;;  %v3970_v61 = vrot.slane %v12881_v27, 2 }
 0x630   :  { %16715 = vst [vmem:[#allocation28_spill] sm:$0xff] %v12775_v6  ;;  %16716 = vst [vmem:[#allocation29_spill] sm:$0xff] %v12803_v2  ;;  %7306 = vmatprep.mubr.f32.mxu0 %v12829_v14  ;;  %v12876_v4 = vsel %vm487_vm1, %v3962_v37, %v3963_v21  ;;  %v12890_v9 = vsel %vm487_vm1, %v3963_v21, %v3965_v45  ;;  %v3726_v25 = vrot.slane %v12787_v49, 1  ;;  %v3972_v54 = vrot.slane %v12885_v35, 2  ;;  %v12904_v15 = vld [vmem:[#allocation2 + $0xe8] sm:$0x3] }
 0x631   :  { %16717 = vst [vmem:[#allocation30_spill] sm:$0xff] %v12822_v59  ;;  %16718 = vst [vmem:[#allocation31_spill] sm:$0xff] %v12829_v14  ;;  %4453 = vmatmul.mubr.f32.gmra.mrb[74].mxu1 %v12726_v29  ;;  %v12863_v29 = vld [vmem:[#allocation2 + $0xc8] sm:$0xff]  ;;  %v12897_v48 = vsel %vm262_vm0, %v3723_v46, %v3724_v36  ;;  %v12908_v0 = vld [vmem:[#allocation2 + $0xf0] sm:$0xff]  ;;  %v3975_v49 = vrot.slane %v12904_v15, 2  ;;  %v3728_v3 = vrot.slane %v12791_v51, 1 }
 0x632   :  { %16719 = vst [vmem:[#allocation32_spill] sm:$0xff] %v12843_v7  ;;  %16720 = vst [vmem:[#allocation33_spill] sm:$0xff] %v12850_v47  ;;  %4457 = vmatprep.mubr.f32.mxu1 %v12850_v47  ;;  %v3968_v11 = vrot.slane %v12863_v29, 2  ;;  %v12916_v41 = vsel %vm262_vm0, %v3724_v36, %v3726_v25  ;;  %v3729_v31 = vrot.slane %v12793_v23, 1  ;;  %v3977_v19 = vrot.slane %v12908_v0, 2  ;;  %v12932_v63 = vld [vmem:[#allocation2 + $0x108] sm:$0xff] }
 0x633   :  { %7307 = vmatmul.mubr.f32.gmra.mrb[134].mxu0 %v12843_v7  ;;  %16721 = vst [vmem:[#allocation34_spill] sm:$0xff] %v12853_v50  ;;  %16722 = vst [vmem:[#allocation35_spill] sm:$0xff] %v12866_v1  ;;  %v12928_v10 = vld [vmem:[#allocation2 + $0x100] sm:$0x3]  ;;  %v3731_v28 = vrot.slane %v12810_v33, 1  ;;  %v3982_v21 = vrot.slane %v12932_v63, 2 }
 0x634   :  { %7309 = vmatprep.mubr.f32.mxu0 %v12853_v50  ;;  %16723 = vst [vmem:[#allocation36_spill] sm:$0xff] %v12869_v60  ;;  %16724 = vst [vmem:[#allocation37_spill] sm:$0xff] %v12876_v4  ;;  %v12900_v40 = vsel %vm487_vm1, %v3967_v26, %v3968_v11  ;;  %v12913_v24 = vsel %vm487_vm1, %v3968_v11, %v3970_v61  ;;  %v3980_v8 = vrot.slane %v12928_v10, 2  ;;  %v12951_v46 = vld [vmem:[#allocation2 + $0x118] sm:$0x3]  ;;  %v12955_v33 = vld [vmem:[#allocation2 + $0x120] sm:$0xff] }
 0x635   :  { %4458 = vmatmul.mubr.f32.gmra.mrb[76].mxu1 %v12742_v30  ;;  %v12887_v30 = vld [vmem:[#allocation2 + $0xe0] sm:$0xff]  ;;  %16725 = vst [vmem:[#allocation38_spill] sm:$0xff] %v12890_v9  ;;  %16726 = vst [vmem:[#allocation39_spill] sm:$0xff] %v12897_v48  ;;  %v12944_v55 = vsel %vm262_vm0, %v3728_v3, %v3729_v31  ;;  %v12963_v26 = vsel %vm262_vm0, %v3729_v31, %v3731_v28  ;;  %v3985_v11 = vrot.slane %v12951_v46, 2  ;;  %v3733_v61 = vrot.slane %v12814_v5, 1  ;;  %v12979_v31 = vld [vmem:[#allocation2 + $0x138] sm:$0xff] }
 0x636   :  { %4462 = vmatprep.mubr.f32.mxu1 %v12869_v60  ;;  %16727 = vst [vmem:[#allocation40_spill] sm:$0xff] %v12900_v40  ;;  %v3973_v56 = vrot.slane %v12887_v30, 2  ;;  %16728 = vst [vmem:[#allocation89_spill] sm:$0xff] %v12913_v24  ;;  %v12975_v3 = vld [vmem:[#allocation2 + $0x130] sm:$0x3]  ;;  %v3738_v47 = vrot.slane %v12838_v53, 1 }
 0x637   :  { %7310 = vmatmul.mubr.f32.gmra.mrb[136].mxu0 %v12866_v1  ;;  %16729 = vst [vmem:[#allocation91_spill] sm:$0xff] %v12916_v41  ;;  %16732 = vst [vmem:[#allocation99_spill] sm:$0xff] %v12944_v55  ;;  %v3990_v28 = vrot.slane %v12975_v3, 2  ;;  %v13014_v59 = vld [vmem:[#allocation2 + $0x160] sm:$0x3]  ;;  %v3741_v6 = vrot.slane %v12857_v39, 1 }
 0x638   :  { %7312 = vmatprep.mubr.f32.mxu0 %v12876_v4  ;;  %v12923_v17 = vsel %vm487_vm1, %v3972_v54, %v3973_v56  ;;  %v12937_v34 = vsel %vm487_vm1, %v3973_v56, %v3975_v49  ;;  %16735 = vst [vmem:[#allocation106_spill] sm:$0xff] %v12963_v26  ;;  %v3734_v54 = vrot.slane %v12816_v38, 1  ;;  %v3987_v56 = vrot.slane %v12955_v33, 2  ;;  %v3548_v39 = vld [vmem:[#allocation2 + $0x188] sm:$0xff]  ;;  %v13296_v4 = vld [vmem:[#allocation2 + $0x2b8] sm:$0xff] }
 0x639   :  { %4463 = vmatmul.mubr.f32.gmra.mrb[78].mxu1 %v12744_v16  ;;  %v12910_v16 = vld [vmem:[#allocation2 + $0xf8] sm:$0xff]  ;;  %16730 = vst [vmem:[#allocation94_spill] sm:$0xff] %v12923_v17  ;;  %16731 = vst [vmem:[#allocation96_spill] sm:$0xff] %v12937_v34  ;;  %v4000_v2 = vrot.slane %v13014_v59, 2  ;;  %v4062_v7 = vrot.slane %v13296_v4, 2 }
 0x63a   :  { %4467 = vmatprep.mubr.f32.mxu1 %v12897_v48  ;;  %v3978_v20 = vrot.slane %v12910_v16, 2  ;;  %v3992_v48 = vrot.slane %v12979_v31, 2 }
 0x63b   :  { %7313 = vmatmul.mubr.f32.gmra.mrb[138].mxu0 %v12890_v9 }
 0x63c   :  { %7315 = vmatprep.mubr.f32.mxu0 %v12900_v40  ;;  %v12947_v37 = vsel %vm487_vm1, %v3977_v19, %v3978_v20  ;;  %v12960_v36 = vsel %vm487_vm1, %v3978_v20, %v3980_v8  ;;  %v4263_v19 = vld [vmem:[#allocation3 + $0x160] sm:$0xff]  ;;  %v4264_v20 = vld [vmem:[#allocation3 + $0x168] sm:$0xff] }
 0x63d   :  { %4468 = vmatmul.mubr.f32.gmra.mrb[80].mxu1 %v12759_v32  ;;  %v12934_v32 = vld [vmem:[#allocation2 + $0x110] sm:$0xff]  ;;  %16733 = vst [vmem:[#allocation101_spill] sm:$0xff] %v12947_v37  ;;  %16734 = vst [vmem:[#allocation104_spill] sm:$0xff] %v12960_v36 }
 0x63e   :  { %4472 = vmatprep.mubr.f32.mxu1 %v12916_v41  ;;  %v3983_v45 = vrot.slane %v12934_v32, 2 }
 0x63f   :  { %7316 = vmatmul.mubr.f32.gmra.mrb[140].mxu0 %v12913_v24 }
 0x640   :  { %7318 = vmatprep.mubr.f32.mxu0 %v12923_v17  ;;  %v12970_v25 = vsel %vm487_vm1, %v3982_v21, %v3983_v45  ;;  %v12984_v8 = vsel %vm487_vm1, %v3983_v45, %v3985_v11  ;;  %v3736_v21 = vrot.slane %v12834_v43, 1  ;;  %v13002_v43 = vld [vmem:[#allocation2 + $0x150] sm:$0xff]  ;;  %v13004_v11 = vld [vmem:[#allocation2 + $0x158] sm:$0xff]  ;;  %v3761_v17 = vrot.slane %v12951_v46, 1 }
 0x641   :  { %4473 = vmatmul.mubr.f32.gmra.mrb[82].mxu1 %v12761_v18  ;;  %v12957_v18 = vld [vmem:[#allocation2 + $0x128] sm:$0xff]  ;;  %16736 = vst [vmem:[#allocation107_spill] sm:$0xff] %v12970_v25  ;;  %16737 = vst [vmem:[#allocation109_spill] sm:$0xff] %v12984_v8  ;;  %v13226_v46 = vld [vmem:[#allocation2 + $0x270] sm:$0xff] }
 0x642   :  { %4477 = vmatprep.mubr.f32.mxu1 %v12944_v55  ;;  %v3988_v49 = vrot.slane %v12957_v18, 2  ;;  %v12988_v55 = vld [vmem:[#allocation2 + $0x148] sm:$0x3] }
 0x643   :  { %7319 = vmatmul.mubr.f32.gmra.mrb[142].mxu0 %v12937_v34  ;;  %v3995_v60 = vrot.slane %v12988_v55, 2 }
 0x644   :  { %7321 = vmatprep.mubr.f32.mxu0 %v12947_v37  ;;  %v12996_v41 = vsel %vm487_vm1, %v3987_v56, %v3988_v49  ;;  %v13011_v56 = vsel %vm262_vm0, %v3734_v54, %v3736_v21  ;;  %v16744_v21 = vmov 0.0|0.0   ;;  %v4270_v37 = vld [vmem:[#allocation3 + $0x198] sm:$0xff] }
 0x645   :  { %4478 = vmatmul.mubr.f32.gmra.mrb[84].mxu1 %v12791_v51  ;;  %v12981_v51 = vld [vmem:[#allocation2 + $0x140] sm:$0xff]  ;;  %16739 = vst [vmem:[#allocation113_spill] sm:$0xff] %v12996_v41  ;;  %16741 = vst [vmem:[#allocation65_spill] sm:$0xff] %v13011_v56 }
 0x646   :  { %4482 = vmatprep.mubr.f32.mxu1 %v12963_v26  ;;  %v12993_v26 = vsel %vm262_vm0, %v3733_v61, %v3734_v54  ;;  %v3993_v45 = vrot.slane %v12981_v51, 2  ;;  %v13008_v61 = vsel %vm487_vm1, %v3988_v49, %v3990_v28  ;;  %v3997_v49 = vrot.slane %v13002_v43, 2  ;;  %v13024_v54 = vld [vmem:[#allocation2 + $0x168] sm:$0xff]  ;;  %v13026_v28 = vld [vmem:[#allocation2 + $0x170] sm:$0xff] }
 0x647   :  { %7322 = vmatmul.mubr.f32.gmra.mrb[144].mxu0 %v12960_v36  ;;  %16738 = vst [vmem:[#allocation111_spill] sm:$0xff] %v12993_v26  ;;  %16740 = vst [vmem:[#allocation114_spill] sm:$0xff] %v13008_v61  ;;  %v4002_v52 = vrot.slane %v13024_v54, 2 }
 0x648   :  { %7324 = vmatprep.mubr.f32.mxu0 %v12970_v25  ;;  %v4268_v25 = vld [vmem:[#allocation3 + $0x188] sm:$0xff] }
 0x649   :  { %4483 = vmatmul.mubr.f32.gmra.mrb[86].mxu1 %v12793_v23  ;;  %v7684_v23 = vpack.c.bf16 %v4264_v20, %v4263_v19  ;;  %v3739_v19 = vrot.slane %v12840_v22, 1  ;;  %v3998_v20 = vrot.slane %v13004_v11, 2 }
 0x64a   :  { %4487 = vmatprep.mubr.f32.mxu1 %v12993_v26  ;;  %v13019_v26 = vsel %vm487_vm1, %v3992_v48, %v3993_v45  ;;  %v4265_v48 = vld [vmem:[#allocation3 + $0x170] sm:$0xff] }
 0x64b   :  { %7325 = vmatmul.mubr.f32.gmra.mrb[146].mxu0 %v12984_v8  ;;  %7685 = vmatpush1.bf16.msra.mxu1 %v7684_v23  ;;  %16742 = vst [vmem:[#allocation72_spill] sm:$0xff] %v13019_v26  ;;  %v4266_v23 = vld [vmem:[#allocation3 + $0x178] sm:$0xff]  ;;  %v4267_v8 = vld [vmem:[#allocation3 + $0x180] sm:$0xff] }
 0x64c   :  { %7327 = vmatprep.mubr.f32.mxu0 %v12996_v41  ;;  %7686 = vmatprep.subr.bf16.mxu1 %v16744_v21  ;;  %v13038_v41 = vld [vmem:[#allocation2 + $0x178] sm:$0x3] }
 0x64d   :  { %4488 = vmatmul.mubr.f32.gmra.mrb[88].mxu1 %v12814_v5  ;;  %v13031_v5 = vsel %vm487_vm1, %v3993_v45, %v3995_v60  ;;  %v13043_v60 = vsel %vm262_vm0, %v3738_v47, %v3739_v19  ;;  %v13046_v45 = vsel %vm487_vm1, %v3997_v49, %v3998_v20  ;;  %v4005_v36 = vrot.slane %v13038_v41, 2 }
 0x64e   :  { %4492 = vmatprep.mubr.f32.mxu1 %v13011_v56  ;;  %16743 = vst [vmem:[#allocation68_spill] sm:$0xff] %v13031_v5  ;;  %16745 = vst [vmem:[#allocation73_spill] sm:$0xff] %v13043_v60  ;;  %v3547_v56 = vld [vmem:[#allocation2 + $0x180] sm:$0xff]  ;;  %v13055_v47 = vsel %vm262_vm0, %v3739_v19, %v3741_v6 }
 0x64f   :  { %7328 = vmatmul.mubr.f32.gmra.mrb[148].mxu0 %v13008_v61  ;;  %v4003_v61 = vrot.slane %v13026_v28, 2  ;;  %16746 = vst [vmem:[#allocation70_spill] sm:$0xff] %v13046_v45  ;;  %16748 = vst [vmem:[#allocation77_spill] sm:$0xff] %v13055_v47 }
 0x650   :  { %7330 = vmatprep.mubr.f32.mxu0 %v13019_v26  ;;  %v7687_v26 = vpack.c.bf16 %v4266_v23, %v4265_v48  ;;  %v3744_v48 = vrot.slane %v12863_v29, 1  ;;  %v4171_v23 = vrot.slane %v3547_v56, 2 }
 0x651   :  { %4493 = vmatmul.mubr.f32.gmra.mrb[90].mxu1 %v12816_v38  ;;  %v13052_v38 = vsel %vm487_vm1, %v3998_v20, %v4000_v2  ;;  %v13058_v49 = vsel %vm487_vm1, %v4002_v52, %v4003_v61  ;;  %v7690_v2 = vpack.c.bf16 %v4268_v25, %v4267_v8  ;;  %v4269_v20 = vld [vmem:[#allocation3 + $0x190] sm:$0xff]  ;;  %v13066_v52 = vld [vmem:[#allocation2] sm:$0xff] }
 0x652   :  { %4497 = vmatprep.mubr.f32.mxu1 %v13043_v60  ;;  %16747 = vst [vmem:[#allocation75_spill] sm:$0xff] %v13052_v38  ;;  %16749 = vst [vmem:[#allocation78_spill] sm:$0xff] %v13058_v49  ;;  %v3549_v60 = vld [vmem:[#allocation2 + $0x190] sm:$0x3]  ;;  %7688 = vmatpush1.bf16.msra.mxu1 %v7687_v26  ;;  %v13069_v6 = vrot.slane %v13066_v52, 2  ;;  %v7693_v25 = vpack.c.bf16 %v4270_v37, %v4269_v20  ;;  %v13086_v37 = vld [vmem:[#allocation2 + $0x1e0] sm:$0xff] }
 0x653   :  { %7331 = vmatmul.mubr.f32.gmra.mrb[150].mxu0 %v13031_v5  ;;  %v3743_v5 = vrot.slane %v12861_v62, 1  ;;  %v3552_v26 = vld [vmem:[#allocation2 + $0x1a8] sm:$0x3]  ;;  %7689 = vmatprep.subr.bf16.mxu1 %v16744_v21  ;;  %v4174_v56 = vrot.slane %v3549_v60, 2  ;;  %v13095_v60 = vld [vmem:[#allocation2 + $0x1f0] sm:$0x3] }
 0x654   :  { %7333 = vmatprep.mubr.f32.mxu0 %v13046_v45  ;;  %v4172_v45 = vrot.slane %v3548_v39, 2  ;;  %v3746_v39 = vrot.slane %v12881_v27, 1  ;;  %v4017_v20 = vrot.slane %v13086_v37, 2 }
 0x655   :  { %4498 = vmatmul.mubr.f32.gmra.mrb[92].mxu1 %v12838_v53  ;;  %v13073_v53 = vsel %vm487_vm1, %v4003_v61, %v4005_v36  ;;  %v13078_v8 = vsel %vm262_vm0, %v3743_v5, %v3744_v48  ;;  %v4208_v36 = vrot.slane %v3552_v26, 2  ;;  %v3748_v5 = vrot.slane %v12885_v35, 1  ;;  %v4273_v26 = vld [vmem:[#allocation3 + $0x1b0] sm:$0xff] }
 0x656   :  { %4502 = vmatprep.mubr.f32.mxu1 %v13055_v47  ;;  %16750 = vst [vmem:[#allocation80_spill] sm:$0xff] %v13073_v53  ;;  %7691 = vmatpush1.bf16.msra.mxu1 %v7690_v2  ;;  %16751 = vst [vmem:[#allocation82_spill] sm:$0xff] %v13078_v8  ;;  %v13081_v19 = vsel %vm487_vm1, %v4171_v23, %v4172_v45  ;;  %v4271_v47 = vld [vmem:[#allocation3 + $0x1a0] sm:$0xff]  ;;  %v13092_v61 = vsel %vm487_vm1, %v4172_v45, %v4174_v56  ;;  %v3749_v2 = vrot.slane %v12887_v30, 1  ;;  %v4274_v56 = vld [vmem:[#allocation3 + $0x1b8] sm:$0xff] }
 0x657   :  { %7334 = vmatmul.mubr.f32.gmra.mrb[152].mxu0 %v13052_v38  ;;  %16752 = vst [vmem:[#allocation60_spill] sm:$0xff] %v13081_v19  ;;  %7692 = vmatprep.subr.bf16.mxu1 %v16744_v21  ;;  %16753 = vst [vmem:[#allocation63_spill] sm:$0xff] %v13092_v61  ;;  %v13100_v23 = vsel %vm262_vm0, %v3744_v48, %v3746_v39  ;;  %v4020_v48 = vrot.slane %v13095_v60, 2  ;;  %v7699_v39 = vpack.c.bf16 %v4274_v56, %v4273_v26  ;;  %v4276_v38 = vld [vmem:[#allocation3 + $0x1c8] sm:$0xff] }
 0x658   :  { %7336 = vmatprep.mubr.f32.mxu0 %v13058_v49  ;;  %v4272_v49 = vld [vmem:[#allocation3 + $0x1a8] sm:$0xff]  ;;  %16754 = vst [vmem:[#allocation67_spill] sm:$0xff] %v13100_v23  ;;  %v3753_v26 = vrot.slane %v12908_v0, 1 }
 0x659   :  { %4503 = vmatmul.mubr.f32.gmra.mrb[94].mxu1 %v12840_v22  ;;  %v13088_v22 = vld [vmem:[#allocation2 + $0x1e8] sm:$0xff]  ;;  %v7696_v27 = vpack.c.bf16 %v4272_v49, %v4271_v47  ;;  %v13109_v47 = vld [vmem:[#allocation2 + $0x1f8] sm:$0xff]  ;;  %v13111_v49 = vld [vmem:[#allocation2 + $0x200] sm:$0xff] }
 0x65a   :  { %4507 = vmatprep.mubr.f32.mxu1 %v13078_v8  ;;  %7694 = vmatpush1.bf16.msra.mxu1 %v7693_v25  ;;  %v4018_v45 = vrot.slane %v13088_v22, 2  ;;  %v3751_v25 = vrot.slane %v12904_v15, 1  ;;  %v13125_v8 = vld [vmem:[#allocation2 + $0x208] sm:$0x3]  ;;  %v13131_v15 = vld [vmem:[#allocation2 + $0x218] sm:$0xff] }
 0x65b   :  { %7337 = vmatmul.mubr.f32.gmra.mrb[154].mxu0 %v13073_v53  ;;  %7695 = vmatprep.subr.bf16.mxu1 %v16744_v21  ;;  %v4275_v53 = vld [vmem:[#allocation3 + $0x1c0] sm:$0xff] }
 0x65c   :  { %7339 = vmatprep.mubr.f32.mxu0 %v13081_v19  ;;  %v4022_v19 = vrot.slane %v13109_v47, 2  ;;  %v7702_v56 = vpack.c.bf16 %v4276_v38, %v4275_v53  ;;  %v13154_v38 = vld [vmem:[#allocation2 + $0x228] sm:$0xff] }
 0x65d   :  { %4508 = vmatmul.mubr.f32.gmra.mrb[96].mxu1 %v12861_v62  ;;  %v4209_v62 = vsel %vm487_vm1, %v13069_v6, %v4208_v36  ;;  %v13121_v36 = vsel %vm487_vm1, %v4017_v20, %v4018_v45  ;;  %v4025_v20 = vrot.slane %v13125_v8, 2 }
 0x65e   :  { %4512 = vmatprep.mubr.f32.mxu1 %v13100_v23  ;;  %7697 = vmatpush1.bf16.msra.mxu1 %v7696_v27  ;;  %16756 = vst [vmem:[#allocation87_spill] sm:$0xff] %v13121_v36  ;;  %v4023_v23 = vrot.slane %v13111_v49, 2  ;;  %v13138_v27 = vsel %vm262_vm0, %v3749_v2, %v3751_v25  ;;  %v13150_v25 = vld [vmem:[#allocation2 + $0x220] sm:$0x3] }
 0x65f   :  { %7340 = vmatmul.mubr.f32.gmra.mrb[156].mxu0 %v13092_v61  ;;  %v13118_v61 = vsel %vm262_vm0, %v3748_v5, %v3749_v2  ;;  %v13134_v5 = vsel %vm487_vm1, %v4018_v45, %v4020_v48  ;;  %7698 = vmatprep.subr.bf16.mxu1 %v16744_v21  ;;  %16758 = vst [vmem:[#allocation88_spill] sm:$0xff] %v13138_v27  ;;  %v3754_v45 = vrot.slane %v12910_v16, 1  ;;  %v4028_v2 = vrot.slane %v13131_v15, 2 }
 0x660   :  { %7342 = vmatprep.mubr.f32.mxu0 %v13069_v6  ;;  %16755 = vst [vmem:[#allocation83_spill] sm:$0xff] %v13118_v61  ;;  %16757 = vst [vmem:[#allocation85_spill] sm:$0xff] %v13134_v5  ;;  %v13160_v53 = vsel %vm487_vm1, %v4023_v23, %v4025_v20  ;;  %v13174_v20 = vld [vmem:[#allocation2 + $0x238] sm:$0x3] }
 0x661   :  { %4513 = vmatmul.mubr.f32.gmra.mrb[98].mxu1 %v12863_v29  ;;  %v13129_v29 = vld [vmem:[#allocation2 + $0x210] sm:$0xff]  ;;  %16760 = vst [vmem:[#allocation90_spill] sm:$0xff] %v13160_v53 }
 0x662   :  { %4517 = vmatprep.mubr.f32.mxu1 %v13118_v61  ;;  %7700 = vmatpush1.bf16.msra.mxu1 %v7699_v39  ;;  %v4027_v48 = vrot.slane %v13129_v29, 2  ;;  %v3756_v39 = vrot.slane %v12928_v10, 1  ;;  %v13178_v10 = vld [vmem:[#allocation2 + $0x240] sm:$0xff] }
 0x663   :  { %7343 = vmatmul.mubr.f32.gmra.mrb[158].mxu0 %v4209_v62  ;;  %v13145_v62 = vsel %vm487_vm1, %v4022_v19, %v4023_v23  ;;  %7701 = vmatprep.subr.bf16.mxu1 %v16744_v21  ;;  %v4030_v19 = vrot.slane %v13150_v25, 2 }
 0x664   :  { %7345 = vmatprep.mubr.f32.mxu0 %v13121_v36  ;;  %16759 = vst [vmem:[#allocation92_spill] sm:$0xff] %v13145_v62  ;;  %v13170_v61 = vsel %vm487_vm1, %v4027_v48, %v4028_v2  ;;  %v4035_v48 = vrot.slane %v13174_v20, 2 }
 0x665   :  { %4518 = vmatmul.mubr.f32.gmra.mrb[100].mxu1 %v12885_v35  ;;  %v13156_v35 = vld [vmem:[#allocation2 + $0x230] sm:$0xff]  ;;  %16762 = vst [vmem:[#allocation97_spill] sm:$0xff] %v13170_v61 }
 0x666   :  { %4522 = vmatprep.mubr.f32.mxu1 %v13138_v27  ;;  %7703 = vmatpush1.bf16.msra.mxu1 %v7702_v56  ;;  %v13167_v27 = vsel %vm262_vm0, %v3753_v26, %v3754_v45  ;;  %v4033_v23 = vrot.slane %v13156_v35, 2  ;;  %v13184_v26 = vsel %vm487_vm1, %v4028_v2, %v4030_v19  ;;  %v13187_v56 = vsel %vm262_vm0, %v3754_v45, %v3756_v39  ;;  %v13199_v19 = vld [vmem:[#allocation2 + $0x250] sm:$0x3]  ;;  %v13201_v45 = vld [vmem:[#allocation2 + $0x258] sm:$0xff] }
 0x667   :  { %7346 = vmatmul.mubr.f32.gmra.mrb[160].mxu0 %v13134_v5  ;;  %16761 = vst [vmem:[#allocation93_spill] sm:$0xff] %v13167_v27  ;;  %7704 = vmatprep.subr.bf16.mxu1 %v16744_v21  ;;  %16763 = vst [vmem:[#allocation95_spill] sm:$0xff] %v13184_v26  ;;  %v4037_v5 = vrot.slane %v13178_v10, 2  ;;  %v4277_v39 = vld [vmem:[#allocation3 + $0x1d0] sm:$0xff]  ;;  %v4040_v34 = vrot.slane %v13199_v19, 2  ;;  %v4042_v24 = vrot.slane %v13201_v45, 2 }
 0x668   :  { %7348 = vmatprep.mubr.f32.mxu0 %v13145_v62  ;;  %v4032_v62 = vrot.slane %v13154_v38, 2  ;;  %16764 = vst [vmem:[#allocation98_spill] sm:$0xff] %v13187_v56  ;;  %v13208_v36 = vsel %vm487_vm1, %v4033_v23, %v4035_v48  ;;  %v3763_v48 = vrot.slane %v12955_v33, 1 }
 0x669   :  { %4523 = vmatmul.mubr.f32.gmra.mrb[102].mxu1 %v12887_v30  ;;  %v13180_v30 = vld [vmem:[#allocation2 + $0x248] sm:$0xff]  ;;  %16766 = vst [vmem:[#allocation100_spill] sm:$0xff] %v13208_v36 }
 0x66a   :  { %4527 = vmatprep.mubr.f32.mxu1 %v13167_v27  ;;  %v13194_v27 = vsel %vm487_vm1, %v4032_v62, %v4033_v23  ;;  %v4038_v2 = vrot.slane %v13180_v30, 2  ;;  %v13222_v23 = vld [vmem:[#allocation2 + $0x268] sm:$0x3] }
 0x66b   :  { %7349 = vmatmul.mubr.f32.gmra.mrb[162].mxu0 %v13160_v53  ;;  %v3758_v53 = vrot.slane %v12932_v63, 1  ;;  %16765 = vst [vmem:[#allocation102_spill] sm:$0xff] %v13194_v27 }
 0x66c   :  { %7351 = vmatprep.mubr.f32.mxu0 %v13170_v61  ;;  %v3759_v61 = vrot.slane %v12934_v32, 1 }
 0x66d   :  { %4528 = vmatmul.mubr.f32.gmra.mrb[104].mxu1 %v12908_v0  ;;  %v13205_v0 = vld [vmem:[#allocation2 + $0x260] sm:$0xff] }
 0x66e   :  { %4532 = vmatprep.mubr.f32.mxu1 %v13187_v56  ;;  %v13215_v56 = vsel %vm262_vm0, %v3758_v53, %v3759_v61  ;;  %v13231_v53 = vsel %vm487_vm1, %v4038_v2, %v4040_v34  ;;  %v4047_v34 = vrot.slane %v13226_v46, 2 }
 0x66f   :  { %7352 = vmatmul.mubr.f32.gmra.mrb[164].mxu0 %v13184_v26  ;;  %v4278_v26 = vld [vmem:[#allocation3 + $0x1d8] sm:$0xff]  ;;  %16767 = vst [vmem:[#allocation103_spill] sm:$0xff] %v13215_v56  ;;  %16769 = vst [vmem:[#allocation108_spill] sm:$0xff] %v13231_v53 }
 0x670   :  { %7354 = vmatprep.mubr.f32.mxu0 %v13194_v27  ;;  %v7705_v62 = vpack.c.bf16 %v4278_v26, %v4277_v39  ;;  %v13218_v27 = vsel %vm487_vm1, %v4037_v5, %v4038_v2  ;;  %v4043_v26 = vrot.slane %v13205_v0, 2  ;;  %v4045_v5 = vrot.slane %v13222_v23, 2 }
 0x671   :  { %4533 = vmatmul.mubr.f32.gmra.mrb[106].mxu1 %v12910_v16  ;;  %16768 = vst [vmem:[#allocation105_spill] sm:$0xff] %v13218_v27  ;;  %v13228_v16 = vld [vmem:[#allocation2 + $0x278] sm:$0xff]  ;;  %v3764_v39 = vrot.slane %v12957_v18, 1 }
 0x672   :  { %4537 = vmatprep.mubr.f32.mxu1 %v13215_v56  ;;  %7706 = vmatpush1.bf16.msra.mxu1 %v7705_v62  ;;  %v13240_v56 = vsel %vm262_vm0, %v3759_v61, %v3761_v17  ;;  %v13243_v62 = vsel %vm487_vm1, %v4042_v24, %v4043_v26  ;;  %v4048_v2 = vrot.slane %v13228_v16, 2  ;;  %v13256_v17 = vsel %vm487_vm1, %v4043_v26, %v4045_v5  ;;  %v13270_v26 = vld [vmem:[#allocation2 + $0x298] sm:$0x3]  ;;  %v13274_v5 = vld [vmem:[#allocation2 + $0x2a0] sm:$0xff] }
 0x673   :  { %7355 = vmatmul.mubr.f32.gmra.mrb[166].mxu0 %v13208_v36  ;;  %7707 = vmatprep.subr.bf16.mxu1 %v16744_v21  ;;  %16770 = vst [vmem:[#allocation110_spill] sm:$0xff] %v13240_v56  ;;  %16771 = vst [vmem:[#allocation112_spill] sm:$0xff] %v13243_v62  ;;  %v13251_v36 = vld [vmem:[#allocation2 + $0x288] sm:$0xff]  ;;  %v13259_v24 = vsel %vm262_vm0, %v3763_v48, %v3764_v39  ;;  %v4057_v9 = vrot.slane %v13274_v5, 2 }
 0x674   :  { %7357 = vmatprep.mubr.f32.mxu0 %v13218_v27  ;;  %v13247_v27 = vld [vmem:[#allocation2 + $0x280] sm:$0x3]  ;;  %16772 = vst [vmem:[#allocation49_spill] sm:$0xff] %v13256_v17  ;;  %16773 = vst [vmem:[#allocation51_spill] sm:$0xff] %v13259_v24 }
 0x675   :  { %4538 = vmatmul.mubr.f32.gmra.mrb[108].mxu1 %v12932_v63  ;;  %v13253_v63 = vld [vmem:[#allocation2 + $0x290] sm:$0xff]  ;;  %v4050_v61 = vrot.slane %v13247_v27, 2 }
 0x676   :  { %4542 = vmatprep.mubr.f32.mxu1 %v13240_v56  ;;  %v13265_v56 = vsel %vm487_vm1, %v4047_v34, %v4048_v2  ;;  %v4053_v40 = vrot.slane %v13253_v63, 2  ;;  %v4055_v34 = vrot.slane %v13270_v26, 2 }
 0x677   :  { %7358 = vmatmul.mubr.f32.gmra.mrb[168].mxu0 %v13231_v53  ;;  %16774 = vst [vmem:[#allocation56_spill] sm:$0xff] %v13265_v56  ;;  %v4052_v53 = vrot.slane %v13251_v36, 2  ;;  %v13279_v48 = vsel %vm487_vm1, %v4048_v2, %v4050_v61  ;;  %v13294_v61 = vld [vmem:[#allocation2 + $0x2b0] sm:$0x3] }
 0x678   :  { %7360 = vmatprep.mubr.f32.mxu0 %v13243_v62  ;;  %v3766_v62 = vrot.slane %v12975_v3, 1  ;;  %16775 = vst [vmem:[#allocation59_spill] sm:$0xff] %v13279_v48  ;;  %v3768_v3 = vrot.slane %v12979_v31, 1  ;;  %v4060_v50 = vrot.slane %v13294_v61, 2 }
 0x679   :  { %4543 = vmatmul.mubr.f32.gmra.mrb[110].mxu1 %v12934_v32  ;;  %v13276_v32 = vld [vmem:[#allocation2 + $0x2a8] sm:$0xff] }
 0x67a   :  { %4547 = vmatprep.mubr.f32.mxu1 %v13259_v24  ;;  %v13287_v24 = vsel %vm262_vm0, %v3764_v39, %v3766_v62  ;;  %v4058_v2 = vrot.slane %v13276_v32, 2  ;;  %v4280_v39 = vld [vmem:[#allocation3 + $0x1e8] sm:$0xff] }
 0x67b   :  { %7361 = vmatmul.mubr.f32.gmra.mrb[170].mxu0 %v13256_v17  ;;  %v3769_v17 = vrot.slane %v12981_v51, 1  ;;  %16776 = vst [vmem:[#allocation64_spill] sm:$0xff] %v13287_v24 }
 0x67c   :  { %7363 = vmatprep.mubr.f32.mxu0 %v13265_v56  ;;  %v13290_v56 = vsel %vm487_vm1, %v4052_v53, %v4053_v40  ;;  %v13303_v53 = vsel %vm487_vm1, %v4053_v40, %v4055_v34  ;;  %v13317_v40 = vld [vmem:[#allocation2 + $0x2c8] sm:$0x3]  ;;  %v13321_v34 = vld [vmem:[#allocation2 + $0x2d0] sm:$0xff] }
 0x67d   :  { %4548 = vmatmul.mubr.f32.gmra.mrb[112].mxu1 %v12955_v33  ;;  %16777 = vst [vmem:[#allocation66_spill] sm:$0xff] %v13290_v56  ;;  %v13300_v33 = vld [vmem:[#allocation2 + $0x2c0] sm:$0xff]  ;;  %16778 = vst [vmem:[#allocation71_spill] sm:$0xff] %v13303_v53  ;;  %v13306_v1 = vsel %vm262_vm0, %v3768_v3, %v3769_v17  ;;  %v3773_v3 = vrot.slane %v13002_v43, 1 }
 0x67e   :  { %4552 = vmatprep.mubr.f32.mxu1 %v13287_v24  ;;  %16779 = vst [vmem:[#allocation74_spill] sm:$0xff] %v13306_v1  ;;  %v13312_v24 = vsel %vm487_vm1, %v4057_v9, %v4058_v2  ;;  %v13326_v9 = vsel %vm487_vm1, %v4058_v2, %v4060_v50  ;;  %v4067_v50 = vrot.slane %v13321_v34, 2 }
 0x67f   :  { %7364 = vmatmul.mubr.f32.gmra.mrb[172].mxu0 %v13279_v48  ;;  %v4279_v48 = vld [vmem:[#allocation3 + $0x1e0] sm:$0xff]  ;;  %16780 = vst [vmem:[#allocation79_spill] sm:$0xff] %v13312_v24  ;;  %16781 = vst [vmem:[#allocation81_spill] sm:$0xff] %v13326_v9 }
 0x680   :  { %7366 = vmatprep.mubr.f32.mxu0 %v13290_v56  ;;  %v7708_v62 = vpack.c.bf16 %v4280_v39, %v4279_v48  ;;  %v3771_v56 = vrot.slane %v12988_v55, 1  ;;  %v4063_v48 = vrot.slane %v13300_v33, 2  ;;  %v4065_v55 = vrot.slane %v13317_v40, 2 }
 0x681   :  { %4553 = vmatmul.mubr.f32.gmra.mrb[114].mxu1 %v12957_v18  ;;  %v13323_v18 = vld [vmem:[#allocation2 + $0x2d8] sm:$0xff]  ;;  %v3774_v39 = vrot.slane %v13004_v11, 1 }
 0x682   :  { %4557 = vmatprep.mubr.f32.mxu1 %v13306_v1  ;;  %7709 = vmatpush1.bf16.msra.mxu1 %v7708_v62  ;;  %v13335_v1 = vsel %vm262_vm0, %v3769_v17, %v3771_v56  ;;  %v13338_v62 = vsel %vm487_vm1, %v4062_v7, %v4063_v48  ;;  %v4068_v2 = vrot.slane %v13323_v18, 2  ;;  %v13351_v56 = vsel %vm487_vm1, %v4063_v48, %v4065_v55  ;;  %v13365_v48 = vld [vmem:[#allocation2 + $0x2f8] sm:$0x3] }
 0x683   :  { %7367 = vmatmul.mubr.f32.gmra.mrb[174].mxu0 %v13303_v53  ;;  %7710 = vmatprep.subr.bf16.mxu1 %v16744_v21  ;;  %16782 = vst [vmem:[#allocation41_spill] sm:$0xff] %v13335_v1  ;;  %16783 = vst [vmem:[#allocation46_spill] sm:$0xff] %v13338_v62  ;;  %v13346_v53 = vld [vmem:[#allocation2 + $0x2e8] sm:$0xff]  ;;  %v13354_v7 = vsel %vm262_vm0, %v3773_v3, %v3774_v39 }
 0x684   :  { %7369 = vmatprep.mubr.f32.mxu0 %v13312_v24  ;;  %v13342_v24 = vld [vmem:[#allocation2 + $0x2e0] sm:$0x3]  ;;  %16784 = vst [vmem:[#allocation48_spill] sm:$0xff] %v13354_v7 }
 0x685   :  { %4558 = vmatmul.mubr.f32.gmra.mrb[116].mxu1 %v12979_v31  ;;  %v13348_v31 = vld [vmem:[#allocation2 + $0x2f0] sm:$0xff]  ;;  %v4070_v17 = vrot.slane %v13342_v24, 2 }
 0x686   :  { %4562 = vmatprep.mubr.f32.mxu1 %v13335_v1  ;;  %v13360_v1 = vsel %vm487_vm1, %v4067_v50, %v4068_v2  ;;  %v4073_v14 = vrot.slane %v13348_v31, 2  ;;  %v3778_v50 = vrot.slane %v13024_v54, 1 }
 0x687   :  { %7370 = vmatmul.mubr.f32.gmra.mrb[176].mxu0 %v13326_v9  ;;  %16785 = vst [vmem:[#allocation52_spill] sm:$0xff] %v13360_v1  ;;  %v4072_v9 = vrot.slane %v13346_v53, 2  ;;  %v13370_v55 = vsel %vm487_vm1, %v4068_v2, %v4070_v17  ;;  %v4281_v2 = vld [vmem:[#allocation3 + $0x1f0] sm:$0xff]  ;;  %v4282_v17 = vld [vmem:[#allocation3 + $0x1f8] sm:$0xff] }
 0x688   :  { %7372 = vmatprep.mubr.f32.mxu0 %v13338_v62  ;;  %v3776_v62 = vrot.slane %v13014_v59, 1 }
 0x689   :  { %4563 = vmatmul.mubr.f32.gmra.mrb[118].mxu1 %v12981_v51  ;;  %v4075_v51 = vrot.slane %v13365_v48, 2  ;;  %v13379_v3 = vsel %vm487_vm1, %v4072_v9, %v4073_v14 }
 0x68a   :  { %4567 = vmatprep.mubr.f32.mxu1 %v13354_v7  ;;  %v13376_v59 = vsel %vm262_vm0, %v3774_v39, %v3776_v62  ;;  %v3779_v7 = vrot.slane %v13026_v28, 1  ;;  %v3781_v39 = vrot.slane %v13038_v41, 1  ;;  %v13396_v62 = vld [vmem:[#allocation2 + $0x1c0] sm:$0x3]  ;;  %v13406_v41 = vld [vmem:[#allocation2 + $0x1c8] sm:$0xff] }
 0x68b   :  { %7373 = vmatmul.mubr.f32.gmra.mrb[178].mxu0 %v13351_v56 }
 0x68c   :  { %7375 = vmatprep.mubr.f32.mxu0 %v13360_v1  ;;  %v7711_v1 = vpack.c.bf16 %v4282_v17, %v4281_v2  ;;  %v13391_v9 = vsel %vm262_vm0, %v3778_v50, %v3779_v7  ;;  %v13415_v2 = vld [vmem:[#allocation2 + $0x1d8] sm:$0x3] }
 0x68d   :  { %4568 = vmatmul.mubr.f32.gmra.mrb[120].mxu1 %v13002_v43  ;;  %v13386_v43 = vsel %vm487_vm1, %v4073_v14, %v4075_v51  ;;  %v13400_v14 = vsel %vm262_vm0, %v3779_v7, %v3781_v39  ;;  %v16787_v51 = vld [vmem:[#allocation44_spill] sm:$0xff]  ;;  %v3791_v17 = vrot.slane %v13415_v2, 1 }
 0x68e   :  { %4572 = vmatprep.mubr.f32.mxu1 %v13376_v59  ;;  %7712 = vmatpush1.bf16.msra.mxu1 %v7711_v1  ;;  %16786 = vst [vmem:[#allocation50_spill] sm:$0xff] %v13400_v14  ;;  %v13408_v1 = vld [vmem:[#allocation2 + $0x1d0] sm:$0xff] }
 0x68f   :  { %7376 = vmatmul.mubr.f32.gmra.mrb[180].mxu0 %v13370_v55  ;;  %7713 = vmatprep.subr.bf16.mxu1 %v16744_v21  ;;  %v3789_v7 = vrot.slane %v13408_v1, 1 }
 0x690   :  { %7378 = vmatprep.mubr.f32.mxu0 %v13379_v3 }
 0x691   :  { %4573 = vmatmul.mubr.f32.gmra.mrb[122].mxu1 %v13004_v11  ;;  %v3786_v11 = vrot.slane %v13396_v62, 1  ;;  %v13425_v39 = vsel %vm262_vm0, %v3789_v7, %v3791_v17  ;;  %v3799_v17 = vrot.slane %v13111_v49, 1 }
 0x692   :  { %4577 = vmatprep.mubr.f32.mxu1 %v13391_v9  ;;  %16789 = vst [vmem:[#allocation12_spill] sm:$0xff] %v13425_v39 }
 0x693   :  { %7379 = vmatmul.mubr.f32.gmra.mrb[182].mxu0 %v13386_v43  ;;  %v3787_v50 = vsel %vm262_vm0, %v16787_v51, %v3786_v11  ;;  %v3793_v11 = vrot.slane %v13086_v37, 1 }
 0x695   :  { %4578 = vmatmul.mubr.f32.gmra.mrb[124].mxu1 %v13024_v54  ;;  %v3788_v54 = vrot.slane %v13406_v41, 1 }
 0x696   :  { %4582 = vmatprep.mubr.f32.mxu1 %v13400_v14  ;;  %v4012_v14 = vrot.slane %v13406_v41, 2 }
 0x699   :  { %4583 = vmatmul.mubr.f32.gmra.mrb[126].mxu1 %v13026_v28  ;;  %v13419_v28 = vsel %vm262_vm0, %v3788_v54, %v3789_v7  ;;  %v3798_v7 = vrot.slane %v13109_v47, 1 }
 0x69a   :  { %4587 = vmatprep.mubr.f32.mxu1 %v16787_v51  ;;  %16788 = vst [vmem:[#allocation53_spill] sm:$0xff] %v13419_v28  ;;  %v3794_v51 = vrot.slane %v13088_v22, 1 }
 0x69d   :  { %4588 = vmatmul.mubr.f32.gmra.mrb[128].mxu1 %v13066_v52 }
 0x69e   :  { %4592 = vmatprep.mubr.f32.mxu1 %v3787_v50  ;;  %v3796_v50 = vrot.slane %v13095_v60, 1  ;;  %v3801_v60 = vrot.slane %v13125_v8, 1  ;;  %v3806_v8 = vrot.slane %v13150_v25, 1  ;;  %v3811_v25 = vrot.slane %v13174_v20, 1 }
 0x69f   :  { %v3816_v20 = vrot.slane %v13199_v19, 1  ;;  %v3821_v19 = vrot.slane %v13222_v23, 1  ;;  %v3826_v23 = vrot.slane %v13247_v27, 1  ;;  %v3831_v27 = vrot.slane %v13270_v26, 1 }
 0x6a0   :  { %v13438_v54 = vsel %vm262_vm0, %v3794_v51, %v3796_v50  ;;  %v3804_v50 = vrot.slane %v13131_v15, 1  ;;  %v3836_v26 = vrot.slane %v13294_v61, 1  ;;  %v3841_v61 = vrot.slane %v13317_v40, 1 }
 0x6a1   :  { %4593 = vmatmul.mubr.f32.gmra.mrb[130].mxu1 %v13066_v52  ;;  %v13432_v52 = vsel %vm262_vm0, %v3793_v11, %v3794_v51  ;;  %16791 = vst [vmem:[#allocation42_spill] sm:$0xff] %v13438_v54  ;;  %v13445_v11 = vsel %vm262_vm0, %v3798_v7, %v3799_v17  ;;  %v3803_v51 = vrot.slane %v13129_v29, 1  ;;  %v3808_v7 = vrot.slane %v13154_v38, 1 }
 0x6a2   :  { %4597 = vmatprep.mubr.f32.mxu1 %v13419_v28  ;;  %16790 = vst [vmem:[#allocation13_spill] sm:$0xff] %v13432_v52  ;;  %16792 = vst [vmem:[#allocation47_spill] sm:$0xff] %v13445_v11  ;;  %v13879_v28 = vld [vmem:[#allocation2] sm:$0xff] }
 0x6a3   :  { %16925 = vst [vmem:[#allocation188_spill] sm:$0xff] %v13879_v28 }
 0x6a5   :  { %4598 = vmatmul.mubr.f32.gmra.mrb[132].mxu1 %v13406_v41 }
 0x6a6   :  { %4602 = vmatprep.mubr.f32.mxu1 %v13425_v39  ;;  %v13871_v39 = vld [vmem:[#allocation2 + $0x180] sm:$0xff] }
 0x6a9   :  { %4603 = vmatmul.mubr.f32.gmra.mrb[134].mxu1 %v13408_v1 }
 0x6aa   :  { %4607 = vmatprep.mubr.f32.mxu1 %v13432_v52  ;;  %v16921_v52 = vld [vmem:[#allocation75_spill] sm:$0xff] }
 0x6ab   :  { %16922 = vst [vmem:[#allocation75_spill] sm:$0xff] %v13871_v39 }
 0x6ad   :  { %4608 = vmatmul.mubr.f32.gmra.mrb[136].mxu1 %v13086_v37  ;;  %v13451_v37 = vsel %vm262_vm0, %v3799_v17, %v3801_v60  ;;  %v3809_v17 = vrot.slane %v13156_v35, 1  ;;  %v3813_v60 = vrot.slane %v13178_v10, 1 }
 0x6ae   :  { %4612 = vmatprep.mubr.f32.mxu1 %v13438_v54  ;;  %16793 = vst [vmem:[#allocation57_spill] sm:$0xff] %v13451_v37 }
 0x6b1   :  { %4613 = vmatmul.mubr.f32.gmra.mrb[138].mxu1 %v13088_v22  ;;  %v13458_v22 = vsel %vm262_vm0, %v3803_v51, %v3804_v50  ;;  %v3814_v51 = vrot.slane %v13180_v30, 1 }
 0x6b2   :  { %4617 = vmatprep.mubr.f32.mxu1 %v13445_v11  ;;  %16794 = vst [vmem:[#allocation58_spill] sm:$0xff] %v13458_v22  ;;  %v16917_v11 = vld [vmem:[#allocation68_spill] sm:$0xff] }
 0x6b5   :  { %4618 = vmatmul.mubr.f32.gmra.mrb[140].mxu1 %v13109_v47  ;;  %v13464_v47 = vsel %vm262_vm0, %v3804_v50, %v3806_v8  ;;  %v3818_v50 = vrot.slane %v13201_v45, 1  ;;  %v3819_v8 = vrot.slane %v13205_v0, 1 }
 0x6b6   :  { %4622 = vmatprep.mubr.f32.mxu1 %v13451_v37  ;;  %16795 = vst [vmem:[#allocation62_spill] sm:$0xff] %v13464_v47  ;;  %v13854_v37 = vld [vmem:[#allocation2 + $0x150] sm:$0xff] }
 0x6b9   :  { %4623 = vmatmul.mubr.f32.gmra.mrb[142].mxu1 %v13111_v49  ;;  %v13471_v49 = vsel %vm262_vm0, %v3808_v7, %v3809_v17  ;;  %v3823_v7 = vrot.slane %v13226_v46, 1 }
 0x6ba   :  { %4627 = vmatprep.mubr.f32.mxu1 %v13458_v22  ;;  %16796 = vst [vmem:[#allocation14_spill] sm:$0xff] %v13471_v49  ;;  %v16913_v22 = vld [vmem:[#allocation114_spill] sm:$0xff] }
 0x6bb   :  { %16914 = vst [vmem:[#allocation114_spill] sm:$0xff] %v13854_v37 }
 0x6bd   :  { %4628 = vmatmul.mubr.f32.gmra.mrb[144].mxu1 %v13129_v29  ;;  %v13477_v29 = vsel %vm262_vm0, %v3809_v17, %v3811_v25  ;;  %v3824_v17 = vrot.slane %v13228_v16, 1  ;;  %v3828_v25 = vrot.slane %v13251_v36, 1 }
 0x6be   :  { %4632 = vmatprep.mubr.f32.mxu1 %v13464_v47  ;;  %16797 = vst [vmem:[#allocation15_spill] sm:$0xff] %v13477_v29 }
 0x6c1   :  { %4633 = vmatmul.mubr.f32.gmra.mrb[146].mxu1 %v13131_v15  ;;  %v13484_v15 = vsel %vm262_vm0, %v3813_v60, %v3814_v51  ;;  %v3829_v60 = vrot.slane %v13253_v63, 1 }
 0x6c2   :  { %4637 = vmatprep.mubr.f32.mxu1 %v13471_v49  ;;  %16798 = vst [vmem:[#allocation16_spill] sm:$0xff] %v13484_v15  ;;  %v16909_v49 = vld [vmem:[#allocation109_spill] sm:$0xff] }
 0x6c5   :  { %4638 = vmatmul.mubr.f32.gmra.mrb[148].mxu1 %v13154_v38  ;;  %v13490_v38 = vsel %vm262_vm0, %v3814_v51, %v3816_v20  ;;  %v3833_v51 = vrot.slane %v13274_v5, 1  ;;  %v3834_v20 = vrot.slane %v13276_v32, 1 }
 0x6c6   :  { %4642 = vmatprep.mubr.f32.mxu1 %v13477_v29  ;;  %16799 = vst [vmem:[#allocation17_spill] sm:$0xff] %v13490_v38  ;;  %v13837_v29 = vld [vmem:[#allocation2 + $0x120] sm:$0xff] }
 0x6c9   :  { %4643 = vmatmul.mubr.f32.gmra.mrb[150].mxu1 %v13156_v35  ;;  %v13497_v35 = vsel %vm262_vm0, %v3818_v50, %v3819_v8  ;;  %v13542_v50 = vsel %vm262_vm0, %v3834_v20, %v3836_v26 }
 0x6ca   :  { %4647 = vmatprep.mubr.f32.mxu1 %v13484_v15  ;;  %16800 = vst [vmem:[#allocation18_spill] sm:$0xff] %v13497_v35  ;;  %16807 = vst [vmem:[#allocation25_spill] sm:$0xff] %v13542_v50 }
 0x6cd   :  { %4648 = vmatmul.mubr.f32.gmra.mrb[152].mxu1 %v13178_v10  ;;  %v13503_v10 = vsel %vm262_vm0, %v3819_v8, %v3821_v19  ;;  %v3838_v8 = vrot.slane %v13296_v4, 1  ;;  %v3839_v19 = vrot.slane %v13300_v33, 1 }
 0x6ce   :  { %4652 = vmatprep.mubr.f32.mxu1 %v13490_v38  ;;  %16801 = vst [vmem:[#allocation19_spill] sm:$0xff] %v13503_v10 }
 0x6d1   :  { %4653 = vmatmul.mubr.f32.gmra.mrb[154].mxu1 %v13180_v30  ;;  %v13510_v30 = vsel %vm262_vm0, %v3823_v7, %v3824_v17  ;;  %v13549_v7 = vsel %vm262_vm0, %v3838_v8, %v3839_v19 }
 0x6d2   :  { %4657 = vmatprep.mubr.f32.mxu1 %v13497_v35  ;;  %16802 = vst [vmem:[#allocation20_spill] sm:$0xff] %v13510_v30  ;;  %16808 = vst [vmem:[#allocation26_spill] sm:$0xff] %v13549_v7 }
 0x6d5   :  { %4658 = vmatmul.mubr.f32.gmra.mrb[156].mxu1 %v13201_v45  ;;  %v13516_v45 = vsel %vm262_vm0, %v3824_v17, %v3826_v23  ;;  %v13555_v17 = vsel %vm262_vm0, %v3839_v19, %v3841_v61  ;;  %v3843_v23 = vrot.slane %v13321_v34, 1  ;;  %v3848_v19 = vrot.slane %v13346_v53, 1 }
 0x6d6   :  { %4662 = vmatprep.mubr.f32.mxu1 %v13503_v10  ;;  %16803 = vst [vmem:[#allocation21_spill] sm:$0xff] %v13516_v45  ;;  %16809 = vst [vmem:[#allocation44_spill] sm:$0xff] %v13555_v17  ;;  %v3849_v61 = vrot.slane %v13348_v31, 1  ;;  %v13671_v10 = vld [vmem:[#allocation2 + $0x30] sm:$0xff] }
 0x6d7   :  { %16840 = vst [vmem:[#allocation145_spill] sm:$0xff] %v13671_v10 }
 0x6d9   :  { %4663 = vmatmul.mubr.f32.gmra.mrb[158].mxu1 %v13205_v0  ;;  %v13523_v0 = vsel %vm262_vm0, %v3828_v25, %v3829_v60  ;;  %v3844_v25 = vrot.slane %v13323_v18, 1 }
 0x6da   :  { %4667 = vmatprep.mubr.f32.mxu1 %v13510_v30  ;;  %16804 = vst [vmem:[#allocation22_spill] sm:$0xff] %v13523_v0 }
 0x6db   :  { %v13566_v40 = vsel %vm262_vm0, %v3843_v23, %v3844_v25 }
 0x6dc   :  { %16812 = vst [vmem:[#allocation117_spill] sm:$0xff] %v13566_v40 }
 0x6dd   :  { %4668 = vmatmul.mubr.f32.gmra.mrb[160].mxu1 %v13226_v46  ;;  %v13529_v46 = vsel %vm262_vm0, %v3829_v60, %v3831_v27 }
 0x6de   :  { %4672 = vmatprep.mubr.f32.mxu1 %v13516_v45  ;;  %16805 = vst [vmem:[#allocation23_spill] sm:$0xff] %v13529_v46 }
 0x6e1   :  { %4673 = vmatmul.mubr.f32.gmra.mrb[162].mxu1 %v13228_v16  ;;  %v13536_v16 = vsel %vm262_vm0, %v3833_v51, %v3834_v20  ;;  %v3846_v51 = vrot.slane %v13342_v24, 1 }
 0x6e2   :  { %4677 = vmatprep.mubr.f32.mxu1 %v13523_v0  ;;  %16806 = vst [vmem:[#allocation24_spill] sm:$0xff] %v13536_v16  ;;  %v4285_v0 = vld [vmem:[#allocation3 + $0x210] sm:$0xff] }
 0x6e3   :  { %v13576_v8 = vsel %vm262_vm0, %v3844_v25, %v3846_v51  ;;  %v13591_v25 = vld [vmem:[#allocation2 + $0x300] sm:$0xff]  ;;  %v13593_v51 = vld [vmem:[#allocation2 + $0x308] sm:$0xff] }
 0x6e4   :  { %16815 = vst [vmem:[#allocation120_spill] sm:$0xff] %v13576_v8 }
 0x6e5   :  { %4678 = vmatmul.mubr.f32.gmra.mrb[164].mxu1 %v13251_v36 }
 0x6e6   :  { %4682 = vmatprep.mubr.f32.mxu1 %v13529_v46 }
 0x6e9   :  { %4683 = vmatmul.mubr.f32.gmra.mrb[166].mxu1 %v13253_v63 }
 0x6ea   :  { %4687 = vmatprep.mubr.f32.mxu1 %v13536_v16  ;;  %v8699_v16 = vld [vmem:[#allocation2 + $0x10] sm:$0x3] }
 0x6eb   :  { %v3930_v46 = vrot.slane %v8699_v16, 2 }
 0x6ed   :  { %4688 = vmatmul.mubr.f32.gmra.mrb[168].mxu1 %v13274_v5 }
 0x6ee   :  { %4692 = vmatprep.mubr.f32.mxu1 %v13542_v50 }
 0x6f1   :  { %4693 = vmatmul.mubr.f32.gmra.mrb[170].mxu1 %v13276_v32 }
 0x6f2   :  { %4697 = vmatprep.mubr.f32.mxu1 %v13549_v7 }
 0x6f5   :  { %4698 = vmatmul.mubr.f32.gmra.mrb[172].mxu1 %v13296_v4 }
 0x6f6   :  { %4702 = vmatprep.mubr.f32.mxu1 %v13555_v17 }
 0x6f9   :  { %4703 = vmatmul.mubr.f32.gmra.mrb[174].mxu1 %v13300_v33 }
 0x6fa   :  { %v13560_v60 = vpop.f32.mrb[128].mxu0  ;;  %4707 = vmatprep.mubr.f32.mxu1 %v13566_v40 }
 0x6fb   :  { %16810 = vst [vmem:[#allocation115_spill] sm:$0xff] %v13560_v60  ;;  %v13563_v27 = vpop.f32.mrb[129].mxu0 }
 0x6fc   :  { %16811 = vst [vmem:[#allocation116_spill] sm:$0xff] %v13563_v27 }
 0x6fd   :  { %4708 = vmatmul.mubr.f32.gmra.mrb[176].mxu1 %v13321_v34 }
 0x6fe   :  { %v13570_v20 = vpop.f32.mrb[130].mxu0  ;;  %4712 = vmatprep.mubr.f32.mxu1 %v13576_v8 }
 0x6ff   :  { %16813 = vst [vmem:[#allocation118_spill] sm:$0xff] %v13570_v20  ;;  %v13573_v26 = vpop.f32.mrb[131].mxu0  ;;  %v13587_v20 = vsel %vm262_vm0, %v3848_v19, %v3849_v61  ;;  %v3853_v19 = vrot.slane %v13591_v25, 1 }
 0x700   :  { %16814 = vst [vmem:[#allocation119_spill] sm:$0xff] %v13573_v26  ;;  %16818 = vst [vmem:[#allocation123_spill] sm:$0xff] %v13587_v20  ;;  %v3851_v26 = vrot.slane %v13365_v48, 1  ;;  %v13606_v48 = vld [vmem:[#allocation2 + $0x310] sm:$0x3] }
 0x701   :  { %4713 = vmatmul.mubr.f32.gmra.mrb[178].mxu1 %v13323_v18 }
 0x702   :  { %v13581_v23 = vpop.f32.mrb[132].mxu0  ;;  %4717 = vmatprep.mubr.f32.mxu1 %v13587_v20  ;;  %v13601_v27 = vsel %vm262_vm0, %v3849_v61, %v3851_v26  ;;  %v3856_v26 = vrot.slane %v13606_v48, 1  ;;  %v13618_v61 = vld [vmem:[#allocation2 + $0x318] sm:$0xff] }
 0x703   :  { %16816 = vst [vmem:[#allocation121_spill] sm:$0xff] %v13581_v23  ;;  %v13584_v24 = vpop.f32.mrb[133].mxu0  ;;  %16821 = vst [vmem:[#allocation126_spill] sm:$0xff] %v13601_v27 }
 0x704   :  { %16817 = vst [vmem:[#allocation122_spill] sm:$0xff] %v13584_v24  ;;  %v3854_v24 = vrot.slane %v13593_v51, 1 }
 0x705   :  { %4718 = vmatmul.mubr.f32.gmra.mrb[180].mxu1 %v13346_v53 }
 0x706   :  { %v13595_v60 = vpop.f32.mrb[134].mxu0  ;;  %4722 = vmatprep.mubr.f32.mxu1 %v13601_v27  ;;  %v13614_v8 = vsel %vm262_vm0, %v3853_v19, %v3854_v24  ;;  %v13628_v40 = vsel %vm262_vm0, %v3854_v24, %v3856_v26  ;;  %v3858_v19 = vrot.slane %v13618_v61, 1 }
 0x707   :  { %16819 = vst [vmem:[#allocation124_spill] sm:$0xff] %v13595_v60  ;;  %v13598_v23 = vpop.f32.mrb[135].mxu0  ;;  %16824 = vst [vmem:[#allocation129_spill] sm:$0xff] %v13614_v8 }
 0x708   :  { %16820 = vst [vmem:[#allocation125_spill] sm:$0xff] %v13598_v23  ;;  %v13620_v23 = vld [vmem:[#allocation2 + $0x320] sm:$0xff]  ;;  %16827 = vst [vmem:[#allocation132_spill] sm:$0xff] %v13628_v40 }
 0x709   :  { %4723 = vmatmul.mubr.f32.gmra.mrb[182].mxu1 %v13348_v31 }
 0x70a   :  { %v13608_v20 = vpop.f32.mrb[136].mxu0  ;;  %4727 = vmatprep.mubr.f32.mxu1 %v13614_v8  ;;  %v13633_v8 = vld [vmem:[#allocation2 + $0x328] sm:$0x3] }
 0x70b   :  { %16822 = vst [vmem:[#allocation127_spill] sm:$0xff] %v13608_v20  ;;  %v13611_v60 = vpop.f32.mrb[137].mxu0  ;;  %v3861_v24 = vrot.slane %v13633_v8, 1 }
 0x70c   :  { %16823 = vst [vmem:[#allocation128_spill] sm:$0xff] %v13611_v60  ;;  %v3859_v60 = vrot.slane %v13620_v23, 1 }
 0x70d   :  { %4728 = vmatmul.mubr.f32.gmra.mrb[184].mxu1 %v13591_v25 }
 0x70e   :  { %v13622_v27 = vpop.f32.mrb[138].mxu0  ;;  %4732 = vmatprep.mubr.f32.mxu1 %v13628_v40  ;;  %v13641_v7 = vsel %vm262_vm0, %v3858_v19, %v3859_v60  ;;  %v13651_v40 = vsel %vm262_vm0, %v3859_v60, %v3861_v24  ;;  %v8700_v24 = vld [vmem:[#allocation2 + $0x20] sm:$0xff] }
 0x70f   :  { %16825 = vst [vmem:[#allocation130_spill] sm:$0xff] %v13622_v27  ;;  %v13625_v20 = vpop.f32.mrb[139].mxu0  ;;  %16830 = vst [vmem:[#allocation135_spill] sm:$0xff] %v13641_v7  ;;  %v3933_v30 = vrot.slane %v8700_v24, 2 }
 0x710   :  { %16826 = vst [vmem:[#allocation131_spill] sm:$0xff] %v13625_v20  ;;  %16833 = vst [vmem:[#allocation138_spill] sm:$0xff] %v13651_v40 }
 0x711   :  { %4733 = vmatmul.mubr.f32.gmra.mrb[186].mxu1 %v13593_v51 }
 0x712   :  { %v13635_v17 = vpop.f32.mrb[140].mxu0  ;;  %4737 = vmatprep.mubr.f32.mxu1 %v13641_v7  ;;  %v8698_v7 = vld [vmem:[#allocation2 + $0x18] sm:$0xff] }
 0x713   :  { %16828 = vst [vmem:[#allocation133_spill] sm:$0xff] %v13635_v17  ;;  %v13638_v27 = vpop.f32.mrb[141].mxu0  ;;  %v4283_v17 = vld [vmem:[#allocation3 + $0x200] sm:$0xff] }
 0x714   :  { %16829 = vst [vmem:[#allocation134_spill] sm:$0xff] %v13638_v27  ;;  %v4284_v27 = vld [vmem:[#allocation3 + $0x208] sm:$0xff] }
 0x715   :  { %4738 = vmatmul.mubr.f32.gmra.mrb[188].mxu1 %v13618_v61 }
 0x716   :  { %v13645_v26 = vpop.f32.mrb[142].mxu0  ;;  %4742 = vmatprep.mubr.f32.mxu1 %v13651_v40  ;;  %v3932_v40 = vrot.slane %v8698_v7, 2 }
 0x717   :  { %16831 = vst [vmem:[#allocation136_spill] sm:$0xff] %v13645_v26  ;;  %v13648_v20 = vpop.f32.mrb[143].mxu0  ;;  %v7714_v26 = vpack.c.bf16 %v4284_v27, %v4283_v17  ;;  %v4287_v17 = vld [vmem:[#allocation3 + $0x220] sm:$0xff]  ;;  %v4288_v27 = vld [vmem:[#allocation3 + $0x228] sm:$0xff] }
 0x718   :  { %16832 = vst [vmem:[#allocation137_spill] sm:$0xff] %v13648_v20  ;;  %v4286_v20 = vld [vmem:[#allocation3 + $0x218] sm:$0xff] }
 0x719   :  { %4743 = vmatmul.mubr.f32.gmra.mrb[190].mxu1 %v13620_v23 }
 0x71a   :  { %v13654_v50 = vpop.f32.mrb[144].mxu0  ;;  %4812 = vmatprep.mubr.f32.mxu1 %v8698_v7  ;;  %v8702_v7 = vld [vmem:[#allocation2 + $0x28] sm:$0x3] }
 0x71b   :  { %16834 = vst [vmem:[#allocation139_spill] sm:$0xff] %v13654_v50  ;;  %v13657_v19 = vpop.f32.mrb[145].mxu0  ;;  %v3931_v50 = vsel %vm487_vm1, %v13069_v6, %v3930_v46 }
 0x71c   :  { %16835 = vst [vmem:[#allocation140_spill] sm:$0xff] %v13657_v19  ;;  %v7717_v19 = vpack.c.bf16 %v4286_v20, %v4285_v0  ;;  %v4290_v0 = vld [vmem:[#allocation3 + $0x238] sm:$0xff]  ;;  %v13678_v20 = vsel %vm487_vm1, %v3932_v40, %v3933_v30 }
 0x71d   :  { %4813 = vmatmul.mubr.f32.vlgmr.msra.gmra.mrb[64].mxu1 %v13069_v6  ;;  %v4289_v6 = vld [vmem:[#allocation3 + $0x230] sm:$0xff] }
 0x71e   :  { %v13659_v45 = vpop.f32.mrb[146].mxu0  ;;  %4817 = vmatprep.mubr.f32.mxu1 %v8700_v24  ;;  %7715 = vmatpush1.bf16.msra.mxu1 %v7714_v26  ;;  %v7720_v26 = vpack.c.bf16 %v4288_v27, %v4287_v17  ;;  %v3935_v24 = vrot.slane %v8702_v7, 2  ;;  %v4291_v17 = vld [vmem:[#allocation3 + $0x240] sm:$0xff]  ;;  %v4292_v27 = vld [vmem:[#allocation3 + $0x248] sm:$0xff] }
 0x71f   :  { %16836 = vst [vmem:[#allocation141_spill] sm:$0xff] %v13659_v45  ;;  %v13662_v60 = vpop.f32.mrb[147].mxu0  ;;  %7716 = vmatprep.subr.bf16.mxu1 %v16744_v21 }
 0x720   :  { %16837 = vst [vmem:[#allocation142_spill] sm:$0xff] %v13662_v60  ;;  %v13690_v40 = vsel %vm487_vm1, %v3933_v30, %v3935_v24  ;;  %v13704_v24 = vld [vmem:[#allocation2 + $0x50] sm:$0xff] }
 0x721   :  { %4818 = vmatmul.mubr.f32.gmra.mrb[66].mxu1 %v3931_v50  ;;  %16849 = vst [vmem:[#allocation154_spill] sm:$0xff] %v13704_v24 }
 0x722   :  { %v13667_v16 = vpop.f32.mrb[148].mxu0  ;;  %4822 = vmatprep.mubr.f32.mxu1 %v13671_v10  ;;  %7718 = vmatpush1.bf16.msra.mxu1 %v7717_v19  ;;  %v7723_v19 = vpack.c.bf16 %v4290_v0, %v4289_v6  ;;  %v4293_v6 = vld [vmem:[#allocation3 + $0x250] sm:$0xff]  ;;  %v4294_v0 = vld [vmem:[#allocation3 + $0x258] sm:$0xff] }
 0x723   :  { %16838 = vst [vmem:[#allocation143_spill] sm:$0xff] %v13667_v16  ;;  %v13669_v45 = vpop.f32.mrb[149].mxu0  ;;  %7719 = vmatprep.subr.bf16.mxu1 %v16744_v21  ;;  %v13683_v16 = vld [vmem:[#allocation2 + $0x38] sm:$0xff] }
 0x724   :  { %16839 = vst [vmem:[#allocation144_spill] sm:$0xff] %v13669_v45  ;;  %16843 = vst [vmem:[#allocation148_spill] sm:$0xff] %v13683_v16 }
 0x725   :  { %4823 = vmatmul.mubr.f32.gmra.mrb[68].mxu1 %v13678_v20 }
 0x726   :  { %v13675_v46 = vpop.f32.mrb[150].mxu0  ;;  %4827 = vmatprep.mubr.f32.mxu1 %v13683_v16  ;;  %7721 = vmatpush1.bf16.msra.mxu1 %v7720_v26  ;;  %v7726_v26 = vpack.c.bf16 %v4292_v27, %v4291_v17  ;;  %v4296_v17 = vld [vmem:[#allocation3 + $0x268] sm:$0xff] }
 0x727   :  { %16841 = vst [vmem:[#allocation146_spill] sm:$0xff] %v13675_v46  ;;  %v13681_v50 = vpop.f32.mrb[151].mxu0  ;;  %7722 = vmatprep.subr.bf16.mxu1 %v16744_v21 }
 0x728   :  { %16842 = vst [vmem:[#allocation147_spill] sm:$0xff] %v13681_v50  ;;  %v13695_v50 = vld [vmem:[#allocation2 + $0x48] sm:$0xff] }
 0x729   :  { %4828 = vmatmul.mubr.f32.gmra.mrb[70].mxu1 %v13690_v40  ;;  %16846 = vst [vmem:[#allocation151_spill] sm:$0xff] %v13695_v50 }
 0x72a   :  { %v13687_v46 = vpop.f32.mrb[152].mxu0  ;;  %4832 = vmatprep.mubr.f32.mxu1 %v13695_v50  ;;  %7724 = vmatpush1.bf16.msra.mxu1 %v7723_v19  ;;  %v4295_v19 = vld [vmem:[#allocation3 + $0x260] sm:$0xff] }
 0x72b   :  { %16844 = vst [vmem:[#allocation149_spill] sm:$0xff] %v13687_v46  ;;  %v13693_v7 = vpop.f32.mrb[153].mxu0  ;;  %7725 = vmatprep.subr.bf16.mxu1 %v16744_v21  ;;  %v7729_v46 = vpack.c.bf16 %v4294_v0, %v4293_v6  ;;  %v4298_v6 = vld [vmem:[#allocation3 + $0x278] sm:$0xff] }
 0x72c   :  { %16845 = vst [vmem:[#allocation150_spill] sm:$0xff] %v13693_v7 }
 0x72d   :  { %4833 = vmatmul.mubr.f32.gmra.mrb[72].mxu1 %v12767_v58 }
 0x72e   :  { %v13699_v45 = vpop.f32.mrb[154].mxu0  ;;  %4837 = vmatprep.mubr.f32.mxu1 %v13704_v24  ;;  %7727 = vmatpush1.bf16.msra.mxu1 %v7726_v26  ;;  %v4297_v26 = vld [vmem:[#allocation3 + $0x270] sm:$0xff] }
 0x72f   :  { %16847 = vst [vmem:[#allocation152_spill] sm:$0xff] %v13699_v45  ;;  %v13702_v30 = vpop.f32.mrb[155].mxu0  ;;  %7728 = vmatprep.subr.bf16.mxu1 %v16744_v21  ;;  %v13713_v45 = vld [vmem:[#allocation2 + $0x60] sm:$0xff] }
 0x730   :  { %16848 = vst [vmem:[#allocation153_spill] sm:$0xff] %v13702_v30  ;;  %16852 = vst [vmem:[#allocation157_spill] sm:$0xff] %v13713_v45  ;;  %v7732_v30 = vpack.c.bf16 %v4296_v17, %v4295_v19  ;;  %v4300_v19 = vld [vmem:[#allocation3 + $0x288] sm:$0xff] }
 0x731   :  { %4838 = vmatmul.mubr.f32.gmra.mrb[74].mxu1 %v12772_v12 }
 0x732   :  { %v13708_v27 = vpop.f32.mrb[156].mxu0  ;;  %4842 = vmatprep.mubr.f32.mxu1 %v13713_v45  ;;  %7730 = vmatpush1.bf16.msra.mxu1 %v7729_v46  ;;  %v4299_v46 = vld [vmem:[#allocation3 + $0x280] sm:$0xff] }
 0x733   :  { %16850 = vst [vmem:[#allocation155_spill] sm:$0xff] %v13708_v27  ;;  %v13711_v7 = vpop.f32.mrb[157].mxu0  ;;  %7731 = vmatprep.subr.bf16.mxu1 %v16744_v21  ;;  %v13722_v27 = vld [vmem:[#allocation2 + $0x68] sm:$0xff] }
 0x734   :  { %16851 = vst [vmem:[#allocation156_spill] sm:$0xff] %v13711_v7  ;;  %16855 = vst [vmem:[#allocation160_spill] sm:$0xff] %v13722_v27  ;;  %v7735_v7 = vpack.c.bf16 %v4298_v6, %v4297_v26  ;;  %v4302_v26 = vld [vmem:[#allocation3 + $0x298] sm:$0xff] }
 0x735   :  { %4843 = vmatmul.mubr.f32.gmra.mrb[76].mxu1 %v12782_v42 }
 0x736   :  { %v13717_v0 = vpop.f32.mrb[158].mxu0  ;;  %4847 = vmatprep.mubr.f32.mxu1 %v13722_v27  ;;  %7733 = vmatpush1.bf16.msra.mxu1 %v7732_v30  ;;  %v4301_v30 = vld [vmem:[#allocation3 + $0x290] sm:$0xff] }
 0x737   :  { %16853 = vst [vmem:[#allocation158_spill] sm:$0xff] %v13717_v0  ;;  %v13720_v60 = vpop.f32.mrb[159].mxu0  ;;  %7734 = vmatprep.subr.bf16.mxu1 %v16744_v21  ;;  %v13731_v0 = vld [vmem:[#allocation2 + $0x78] sm:$0xff] }
 0x738   :  { %16854 = vst [vmem:[#allocation159_spill] sm:$0xff] %v13720_v60  ;;  %16858 = vst [vmem:[#allocation163_spill] sm:$0xff] %v13731_v0  ;;  %v7738_v60 = vpack.c.bf16 %v4300_v19, %v4299_v46  ;;  %v4304_v46 = vld [vmem:[#allocation3 + $0x2a8] sm:$0xff] }
 0x739   :  { %4848 = vmatmul.mubr.f32.gmra.mrb[78].mxu1 %v12796_v44 }
 0x73a   :  { %v13726_v17 = vpop.f32.mrb[160].mxu0  ;;  %4852 = vmatprep.mubr.f32.mxu1 %v13731_v0  ;;  %7736 = vmatpush1.bf16.msra.mxu1 %v7735_v7  ;;  %v4303_v7 = vld [vmem:[#allocation3 + $0x2a0] sm:$0xff] }
 0x73b   :  { %16856 = vst [vmem:[#allocation161_spill] sm:$0xff] %v13726_v17  ;;  %v13729_v45 = vpop.f32.mrb[161].mxu0  ;;  %7737 = vmatprep.subr.bf16.mxu1 %v16744_v21  ;;  %v13740_v17 = vld [vmem:[#allocation2 + $0x80] sm:$0xff] }
 0x73c   :  { %16857 = vst [vmem:[#allocation162_spill] sm:$0xff] %v13729_v45  ;;  %16861 = vst [vmem:[#allocation166_spill] sm:$0xff] %v13740_v17  ;;  %v7741_v45 = vpack.c.bf16 %v4302_v26, %v4301_v30  ;;  %v16866_v30 = vld [vmem:[#allocation31_spill] sm:$0xff] }
 0x73d   :  { %4853 = vmatmul.mubr.f32.gmra.mrb[80].mxu1 %v12806_v57 }
 0x73e   :  { %v13735_v6 = vpop.f32.mrb[162].mxu0  ;;  %4857 = vmatprep.mubr.f32.mxu1 %v13740_v17  ;;  %7739 = vmatpush1.bf16.msra.mxu1 %v7738_v60  ;;  %v13758_v17 = vld [vmem:[#allocation2 + $0x98] sm:$0xff] }
 0x73f   :  { %16859 = vst [vmem:[#allocation164_spill] sm:$0xff] %v13735_v6  ;;  %v13738_v27 = vpop.f32.mrb[163].mxu0  ;;  %7740 = vmatprep.subr.bf16.mxu1 %v16744_v21  ;;  %v13749_v6 = vld [vmem:[#allocation2 + $0x90] sm:$0xff]  ;;  %16868 = vst [vmem:[#allocation171_spill] sm:$0xff] %v13758_v17 }
 0x740   :  { %16860 = vst [vmem:[#allocation165_spill] sm:$0xff] %v13738_v27  ;;  %16864 = vst [vmem:[#allocation169_spill] sm:$0xff] %v13749_v6  ;;  %v7744_v27 = vpack.c.bf16 %v4304_v46, %v4303_v7  ;;  %v13767_v7 = vld [vmem:[#allocation2 + $0xa8] sm:$0xff] }
 0x741   :  { %4858 = vmatmul.mubr.f32.gmra.mrb[82].mxu1 %v12819_v13  ;;  %16872 = vst [vmem:[#allocation173_spill] sm:$0xff] %v13767_v7 }
 0x742   :  { %v13744_v19 = vpop.f32.mrb[164].mxu0  ;;  %4862 = vmatprep.mubr.f32.mxu1 %v13749_v6  ;;  %7742 = vmatpush1.bf16.msra.mxu1 %v7741_v45 }
 0x743   :  { %16862 = vst [vmem:[#allocation167_spill] sm:$0xff] %v13744_v19  ;;  %v13747_v0 = vpop.f32.mrb[165].mxu0  ;;  %7743 = vmatprep.subr.bf16.mxu1 %v16744_v21 }
 0x744   :  { %16863 = vst [vmem:[#allocation168_spill] sm:$0xff] %v13747_v0  ;;  %v16870_v0 = vld [vmem:[#allocation32_spill] sm:$0xff] }
 0x745   :  { %4863 = vmatmul.mubr.f32.gmra.mrb[84].mxu1 %v16866_v30 }
 0x746   :  { %v13753_v60 = vpop.f32.mrb[166].mxu0  ;;  %4867 = vmatprep.mubr.f32.mxu1 %v13758_v17  ;;  %7745 = vmatpush1.bf16.msra.mxu1 %v7744_v27  ;;  %v13775_v17 = vld [vmem:[#allocation2 + $0xb0] sm:$0xff] }
 0x747   :  { %16865 = vst [vmem:[#allocation170_spill] sm:$0xff] %v13753_v60  ;;  %v13756_v26 = vpop.f32.mrb[167].mxu0  ;;  %7746 = vmatprep.subr.bf16.mxu1 %v16744_v21  ;;  %v16874_v60 = vld [vmem:[#allocation34_spill] sm:$0xff]  ;;  %16876 = vst [vmem:[#allocation175_spill] sm:$0xff] %v13775_v17 }
 0x748   :  { %16867 = vst [vmem:[#allocation31_spill] sm:$0xff] %v13756_v26  ;;  %v4305_v27 = vld [vmem:[#allocation3 + $0x2b0] sm:$0xff] }
 0x749   :  { %4868 = vmatmul.mubr.f32.gmra.mrb[86].mxu1 %v16870_v0 }
 0x74a   :  { %v13762_v19 = vpop.f32.mrb[168].mxu0  ;;  %4872 = vmatprep.mubr.f32.mxu1 %v13767_v7  ;;  %v13783_v7 = vld [vmem:[#allocation2 + $0xc0] sm:$0xff] }
 0x74b   :  { %16869 = vst [vmem:[#allocation172_spill] sm:$0xff] %v13762_v19  ;;  %v13765_v45 = vpop.f32.mrb[169].mxu0  ;;  %v4306_v19 = vld [vmem:[#allocation3 + $0x2b8] sm:$0xff]  ;;  %16880 = vst [vmem:[#allocation177_spill] sm:$0xff] %v13783_v7 }
 0x74c   :  { %16871 = vst [vmem:[#allocation32_spill] sm:$0xff] %v13765_v45  ;;  %v7747_v6 = vpack.c.bf16 %v4306_v19, %v4305_v27  ;;  %v16878_v45 = vld [vmem:[#allocation35_spill] sm:$0xff]  ;;  %v13792_v19 = vld [vmem:[#allocation2 + $0xc8] sm:$0xff] }
 0x74d   :  { %4873 = vmatmul.mubr.f32.gmra.mrb[88].mxu1 %v16874_v60  ;;  %16884 = vst [vmem:[#allocation179_spill] sm:$0xff] %v13792_v19 }
 0x74e   :  { %v13770_v46 = vpop.f32.mrb[170].mxu0  ;;  %4877 = vmatprep.mubr.f32.mxu1 %v13775_v17  ;;  %7748 = vmatpush1.bf16.msra.mxu1 %v7747_v6 }
 0x74f   :  { %16873 = vst [vmem:[#allocation174_spill] sm:$0xff] %v13770_v46  ;;  %v13773_v26 = vpop.f32.mrb[171].mxu0  ;;  %7749 = vmatprep.subr.bf16.mxu1 %v16744_v21 }
 0x750   :  { %16875 = vst [vmem:[#allocation34_spill] sm:$0xff] %v13773_v26  ;;  %v16882_v26 = vld [vmem:[#allocation37_spill] sm:$0xff] }
 0x751   :  { %4878 = vmatmul.mubr.f32.gmra.mrb[90].mxu1 %v16878_v45 }
 0x752   :  { %v13778_v24 = vpop.f32.mrb[172].mxu0  ;;  %4882 = vmatprep.mubr.f32.mxu1 %v13783_v7  ;;  %v13800_v7 = vld [vmem:[#allocation2 + $0xd8] sm:$0xff] }
 0x753   :  { %16877 = vst [vmem:[#allocation176_spill] sm:$0xff] %v13778_v24  ;;  %v13781_v50 = vpop.f32.mrb[173].mxu0  ;;  %v16886_v24 = vld [vmem:[#allocation38_spill] sm:$0xff]  ;;  %16888 = vst [vmem:[#allocation181_spill] sm:$0xff] %v13800_v7 }
 0x754   :  { %16879 = vst [vmem:[#allocation35_spill] sm:$0xff] %v13781_v50 }
 0x755   :  { %4883 = vmatmul.mubr.f32.gmra.mrb[92].mxu1 %v16882_v26 }
 0x756   :  { %v13787_v46 = vpop.f32.mrb[174].mxu0  ;;  %4887 = vmatprep.mubr.f32.mxu1 %v13792_v19  ;;  %v4307_v19 = vld [vmem:[#allocation3 + $0x2c0] sm:$0xff] }
 0x757   :  { %16881 = vst [vmem:[#allocation178_spill] sm:$0xff] %v13787_v46  ;;  %v13790_v17 = vpop.f32.mrb[175].mxu0  ;;  %v16890_v46 = vld [vmem:[#allocation40_spill] sm:$0xff] }
 0x758   :  { %16883 = vst [vmem:[#allocation37_spill] sm:$0xff] %v13790_v17  ;;  %v13808_v17 = vld [vmem:[#allocation2 + $0xe0] sm:$0xff] }
 0x759   :  { %4888 = vmatmul.mubr.f32.gmra.mrb[94].mxu1 %v16886_v24  ;;  %16892 = vst [vmem:[#allocation183_spill] sm:$0xff] %v13808_v17 }
 0x75a   :  { %v13795_v27 = vpop.f32.mrb[176].mxu0  ;;  %4892 = vmatprep.mubr.f32.mxu1 %v13800_v7  ;;  %v13816_v7 = vld [vmem:[#allocation2 + $0xf0] sm:$0xff] }
 0x75b   :  { %16885 = vst [vmem:[#allocation180_spill] sm:$0xff] %v13795_v27  ;;  %v13798_v50 = vpop.f32.mrb[177].mxu0  ;;  %v4308_v27 = vld [vmem:[#allocation3 + $0x2c8] sm:$0xff]  ;;  %16896 = vst [vmem:[#allocation185_spill] sm:$0xff] %v13816_v7 }
 0x75c   :  { %16887 = vst [vmem:[#allocation38_spill] sm:$0xff] %v13798_v50  ;;  %v7750_v10 = vpack.c.bf16 %v4308_v27, %v4307_v19  ;;  %v16894_v50 = vld [vmem:[#allocation89_spill] sm:$0xff]  ;;  %v13825_v19 = vld [vmem:[#allocation2 + $0xf8] sm:$0xff]  ;;  %v16901_v27 = vld [vmem:[#allocation96_spill] sm:$0xff] }
 0x75d   :  { %4893 = vmatmul.mubr.f32.gmra.mrb[96].mxu1 %v16890_v46  ;;  %16900 = vst [vmem:[#allocation187_spill] sm:$0xff] %v13825_v19 }
 0x75e   :  { %v13803_v6 = vpop.f32.mrb[178].mxu0  ;;  %4897 = vmatprep.mubr.f32.mxu1 %v13808_v17  ;;  %7751 = vmatpush1.bf16.msra.mxu1 %v7750_v10  ;;  %v13833_v10 = vld [vmem:[#allocation2 + $0x110] sm:$0xff] }
 0x75f   :  { %16889 = vst [vmem:[#allocation182_spill] sm:$0xff] %v13803_v6  ;;  %v13806_v16 = vpop.f32.mrb[179].mxu0  ;;  %7752 = vmatprep.subr.bf16.mxu1 %v16744_v21 }
 0x760   :  { %16891 = vst [vmem:[#allocation40_spill] sm:$0xff] %v13806_v16  ;;  %v16898_v16 = vld [vmem:[#allocation94_spill] sm:$0xff] }
 0x761   :  { %4898 = vmatmul.mubr.f32.gmra.mrb[98].mxu1 %v16894_v50 }
 0x762   :  { %v13811_v35 = vpop.f32.mrb[180].mxu0  ;;  %4902 = vmatprep.mubr.f32.mxu1 %v13816_v7  ;;  %v4310_v7 = vld [vmem:[#allocation3 + $0x2d8] sm:$0xff] }
 0x763   :  { %16893 = vst [vmem:[#allocation184_spill] sm:$0xff] %v13811_v35  ;;  %v13814_v38 = vpop.f32.mrb[181].mxu0  ;;  %v13829_v35 = vld [vmem:[#allocation2 + $0x108] sm:$0xff] }
 0x764   :  { %16895 = vst [vmem:[#allocation89_spill] sm:$0xff] %v13814_v38  ;;  %16902 = vst [vmem:[#allocation96_spill] sm:$0xff] %v13829_v35  ;;  %v16903_v38 = vld [vmem:[#allocation101_spill] sm:$0xff] }
 0x765   :  { %4903 = vmatmul.mubr.f32.gmra.mrb[100].mxu1 %v16898_v16  ;;  %16904 = vst [vmem:[#allocation101_spill] sm:$0xff] %v13833_v10 }
 0x766   :  { %v13820_v6 = vpop.f32.mrb[182].mxu0  ;;  %4907 = vmatprep.mubr.f32.mxu1 %v13825_v19  ;;  %v16907_v19 = vld [vmem:[#allocation107_spill] sm:$0xff] }
 0x767   :  { %16897 = vst [vmem:[#allocation186_spill] sm:$0xff] %v13820_v6  ;;  %v13823_v17 = vpop.f32.mrb[183].mxu0  ;;  %v4309_v6 = vld [vmem:[#allocation3 + $0x2d0] sm:$0xff] }
 0x768   :  { %16899 = vst [vmem:[#allocation94_spill] sm:$0xff] %v13823_v17  ;;  %v7753_v15 = vpack.c.bf16 %v4310_v7, %v4309_v6  ;;  %v16905_v17 = vld [vmem:[#allocation104_spill] sm:$0xff]  ;;  %v16911_v7 = vld [vmem:[#allocation113_spill] sm:$0xff] }
 0x769   :  { %4908 = vmatmul.mubr.f32.gmra.mrb[102].mxu1 %v16901_v27  ;;  %16906 = vst [vmem:[#allocation104_spill] sm:$0xff] %v13837_v29  ;;  %v13850_v6 = vld [vmem:[#allocation2 + $0x140] sm:$0xff] }
 0x76a   :  { %4912 = vmatprep.mubr.f32.mxu1 %v13829_v35  ;;  %7754 = vmatpush1.bf16.msra.mxu1 %v7753_v15  ;;  %v13842_v35 = vld [vmem:[#allocation2 + $0x128] sm:$0xff]  ;;  %16912 = vst [vmem:[#allocation113_spill] sm:$0xff] %v13850_v6  ;;  %v4311_v15 = vld [vmem:[#allocation3 + $0x2e0] sm:$0xff] }
 0x76b   :  { %7755 = vmatprep.subr.bf16.mxu1 %v16744_v21  ;;  %16908 = vst [vmem:[#allocation107_spill] sm:$0xff] %v13842_v35 }
 0x76d   :  { %4913 = vmatmul.mubr.f32.gmra.mrb[104].mxu1 %v16903_v38 }
 0x76e   :  { %4917 = vmatprep.mubr.f32.mxu1 %v13833_v10  ;;  %v13846_v10 = vld [vmem:[#allocation2 + $0x138] sm:$0xff] }
 0x76f   :  { %16910 = vst [vmem:[#allocation109_spill] sm:$0xff] %v13846_v10 }
 0x771   :  { %4918 = vmatmul.mubr.f32.gmra.mrb[106].mxu1 %v16905_v17 }
 0x772   :  { %4922 = vmatprep.mubr.f32.mxu1 %v13837_v29  ;;  %v4312_v29 = vld [vmem:[#allocation3 + $0x2e8] sm:$0xff] }
 0x773   :  { %v7756_v47 = vpack.c.bf16 %v4312_v29, %v4311_v15  ;;  %v16919_v29 = vld [vmem:[#allocation70_spill] sm:$0xff] }
 0x774   :  { %v13867_v15 = vld [vmem:[#allocation2 + $0x170] sm:$0xff] }
 0x775   :  { %4923 = vmatmul.mubr.f32.gmra.mrb[108].mxu1 %v16907_v19  ;;  %16920 = vst [vmem:[#allocation70_spill] sm:$0xff] %v13867_v15 }
 0x776   :  { %4927 = vmatprep.mubr.f32.mxu1 %v13842_v35  ;;  %7757 = vmatpush1.bf16.msra.mxu1 %v7756_v47  ;;  %v16915_v35 = vld [vmem:[#allocation72_spill] sm:$0xff]  ;;  %v4313_v47 = vld [vmem:[#allocation3 + $0x2f0] sm:$0xff] }
 0x777   :  { %7758 = vmatprep.subr.bf16.mxu1 %v16744_v21 }
 0x779   :  { %4928 = vmatmul.mubr.f32.gmra.mrb[110].mxu1 %v16909_v49 }
 0x77a   :  { %4932 = vmatprep.mubr.f32.mxu1 %v13846_v10  ;;  %v13859_v10 = vld [vmem:[#allocation2 + $0x158] sm:$0xff] }
 0x77b   :  { %16916 = vst [vmem:[#allocation72_spill] sm:$0xff] %v13859_v10 }
 0x77d   :  { %4933 = vmatmul.mubr.f32.gmra.mrb[112].mxu1 %v16911_v7 }
 0x77e   :  { %4937 = vmatprep.mubr.f32.mxu1 %v13850_v6  ;;  %v13863_v6 = vld [vmem:[#allocation2 + $0x168] sm:$0xff] }
 0x77f   :  { %16918 = vst [vmem:[#allocation68_spill] sm:$0xff] %v13863_v6 }
 0x781   :  { %4938 = vmatmul.mubr.f32.gmra.mrb[114].mxu1 %v16913_v22 }
 0x782   :  { %4942 = vmatprep.mubr.f32.mxu1 %v13854_v37  ;;  %v4314_v37 = vld [vmem:[#allocation3 + $0x2f8] sm:$0xff] }
 0x783   :  { %v7759_v54 = vpack.c.bf16 %v4314_v37, %v4313_v47  ;;  %v16927_v37 = vld [vmem:[#allocation80_spill] sm:$0xff]  ;;  %v4010_v47 = vrot.slane %v13396_v62, 2  ;;  %v4015_v62 = vrot.slane %v13415_v2, 2  ;;  %v16933_v2 = vld [vmem:[#allocation85_spill] sm:$0xff] }
 0x785   :  { %4943 = vmatmul.mubr.f32.gmra.mrb[116].mxu1 %v16915_v35 }
 0x786   :  { %4947 = vmatprep.mubr.f32.mxu1 %v13859_v10  ;;  %7760 = vmatpush1.bf16.msra.mxu1 %v7759_v54  ;;  %v16923_v10 = vld [vmem:[#allocation78_spill] sm:$0xff] }
 0x787   :  { %7761 = vmatprep.subr.bf16.mxu1 %v16744_v21 }
 0x789   :  { %4948 = vmatmul.mubr.f32.gmra.mrb[118].mxu1 %v16917_v11 }
 0x78a   :  { %4952 = vmatprep.mubr.f32.mxu1 %v13863_v6  ;;  %v13876_v6 = vld [vmem:[#allocation2 + $0x188] sm:$0xff] }
 0x78b   :  { %16924 = vst [vmem:[#allocation78_spill] sm:$0xff] %v13876_v6 }
 0x78d   :  { %4953 = vmatmul.mubr.f32.gmra.mrb[120].mxu1 %v16919_v29 }
 0x78e   :  { %4957 = vmatprep.mubr.f32.mxu1 %v13867_v15  ;;  %v13882_v15 = vrot.slane %v13879_v28, 2  ;;  %v13893_v28 = vld [vmem:[#allocation2 + $0x1e0] sm:$0xff] }
 0x78f   :  { %16928 = vst [vmem:[#allocation190_spill] sm:$0xff] %v13893_v28 }
 0x790   :  { %16926 = vst [vmem:[#allocation189_spill] sm:$0xff] %v13882_v15  ;;  %v4011_v54 = vsel %vm487_vm1, %v13882_v15, %v4010_v47  ;;  %v16931_v47 = vld [vmem:[#allocation87_spill] sm:$0xff] }
 0x791   :  { %4958 = vmatmul.mubr.f32.gmra.mrb[122].mxu1 %v16921_v52 }
 0x792   :  { %4962 = vmatprep.mubr.f32.mxu1 %v13871_v39 }
 0x795   :  { %4963 = vmatmul.mubr.f32.gmra.mrb[124].mxu1 %v16923_v10 }
 0x796   :  { %4967 = vmatprep.mubr.f32.mxu1 %v13876_v6  ;;  %v4013_v6 = vrot.slane %v13408_v1, 2 }
 0x798   :  { %v13897_v39 = vsel %vm487_vm1, %v4012_v14, %v4013_v6  ;;  %v13912_v14 = vld [vmem:[#allocation2 + $0x200] sm:$0xff] }
 0x799   :  { %4968 = vmatmul.mubr.f32.gmra.mrb[126].mxu1 %v16927_v37  ;;  %v13901_v37 = vld [vmem:[#allocation2 + $0x1e8] sm:$0xff]  ;;  %16932 = vst [vmem:[#allocation87_spill] sm:$0xff] %v13912_v14 }
 0x79a   :  { %4972 = vmatprep.mubr.f32.mxu1 %v13406_v41  ;;  %16929 = vst [vmem:[#allocation191_spill] sm:$0xff] %v13901_v37  ;;  %v13905_v41 = vsel %vm487_vm1, %v4013_v6, %v4015_v62  ;;  %v16935_v6 = vld [vmem:[#allocation92_spill] sm:$0xff]  ;;  %v13920_v62 = vld [vmem:[#allocation2 + $0x218] sm:$0xff] }
 0x79b   :  { %16936 = vst [vmem:[#allocation193_spill] sm:$0xff] %v13920_v62 }
 0x79d   :  { %4973 = vmatmul.mubr.f32.gmra.mrb[128].mxu1 %v13882_v15  ;;  %v16937_v15 = vld [vmem:[#allocation90_spill] sm:$0xff] }
 0x79e   :  { %4977 = vmatprep.mubr.f32.mxu1 %v13408_v1  ;;  %v13908_v1 = vld [vmem:[#allocation2 + $0x1f8] sm:$0xff] }
 0x79f   :  { %16930 = vst [vmem:[#allocation192_spill] sm:$0xff] %v13908_v1 }
 0x7a1   :  { %4978 = vmatmul.mubr.f32.gmra.mrb[130].mxu1 %v4011_v54  ;;  %v13916_v54 = vld [vmem:[#allocation2 + $0x210] sm:$0xff] }
 0x7a2   :  { %4982 = vmatprep.mubr.f32.mxu1 %v13893_v28  ;;  %16934 = vst [vmem:[#allocation85_spill] sm:$0xff] %v13916_v54  ;;  %v16941_v28 = vld [vmem:[#allocation95_spill] sm:$0xff] }
 0x7a5   :  { %4983 = vmatmul.mubr.f32.gmra.mrb[132].mxu1 %v13897_v39 }
 0x7a6   :  { %4987 = vmatprep.mubr.f32.mxu1 %v13901_v37  ;;  %v16939_v37 = vld [vmem:[#allocation97_spill] sm:$0xff] }
 0x7a9   :  { %4988 = vmatmul.mubr.f32.gmra.mrb[134].mxu1 %v13905_v41 }
 0x7aa   :  { %4992 = vmatprep.mubr.f32.mxu1 %v13908_v1  ;;  %v13924_v1 = vld [vmem:[#allocation2 + $0x228] sm:$0xff] }
 0x7ab   :  { %16938 = vst [vmem:[#allocation194_spill] sm:$0xff] %v13924_v1 }
 0x7ad   :  { %4993 = vmatmul.mubr.f32.gmra.mrb[136].mxu1 %v16931_v47 }
 0x7ae   :  { %4997 = vmatprep.mubr.f32.mxu1 %v13912_v14  ;;  %v13928_v14 = vld [vmem:[#allocation2 + $0x230] sm:$0xff] }
 0x7af   :  { %16940 = vst [vmem:[#allocation195_spill] sm:$0xff] %v13928_v14 }
 0x7b1   :  { %4998 = vmatmul.mubr.f32.gmra.mrb[138].mxu1 %v16933_v2 }
 0x7b2   :  { %5002 = vmatprep.mubr.f32.mxu1 %v13916_v54  ;;  %v13932_v54 = vld [vmem:[#allocation2 + $0x240] sm:$0xff] }
 0x7b3   :  { %16942 = vst [vmem:[#allocation196_spill] sm:$0xff] %v13932_v54 }
 0x7b5   :  { %5003 = vmatmul.mubr.f32.gmra.mrb[140].mxu1 %v16935_v6  ;;  %v16943_v6 = vld [vmem:[#allocation102_spill] sm:$0xff] }
 0x7b6   :  { %5007 = vmatprep.mubr.f32.mxu1 %v13920_v62  ;;  %v13936_v62 = vld [vmem:[#allocation2 + $0x248] sm:$0xff] }
 0x7b7   :  { %16944 = vst [vmem:[#allocation197_spill] sm:$0xff] %v13936_v62 }
 0x7b9   :  { %5008 = vmatmul.mubr.f32.gmra.mrb[142].mxu1 %v16937_v15  ;;  %v16945_v15 = vld [vmem:[#allocation100_spill] sm:$0xff] }
 0x7ba   :  { %5012 = vmatprep.mubr.f32.mxu1 %v13924_v1  ;;  %v13940_v1 = vld [vmem:[#allocation2 + $0x258] sm:$0xff] }
 0x7bb   :  { %16946 = vst [vmem:[#allocation198_spill] sm:$0xff] %v13940_v1 }
 0x7bd   :  { %5013 = vmatmul.mubr.f32.gmra.mrb[144].mxu1 %v16939_v37  ;;  %v16947_v37 = vld [vmem:[#allocation105_spill] sm:$0xff] }
 0x7be   :  { %5017 = vmatprep.mubr.f32.mxu1 %v13928_v14  ;;  %v13944_v14 = vld [vmem:[#allocation2 + $0x260] sm:$0xff] }
 0x7bf   :  { %16948 = vst [vmem:[#allocation105_spill] sm:$0xff] %v13944_v14 }
 0x7c1   :  { %5018 = vmatmul.mubr.f32.gmra.mrb[146].mxu1 %v16941_v28  ;;  %v16949_v28 = vld [vmem:[#allocation108_spill] sm:$0xff] }
 0x7c2   :  { %5022 = vmatprep.mubr.f32.mxu1 %v13932_v54  ;;  %v13948_v54 = vld [vmem:[#allocation2 + $0x270] sm:$0xff] }
 0x7c3   :  { %16950 = vst [vmem:[#allocation199_spill] sm:$0xff] %v13948_v54 }
 0x7c5   :  { %5023 = vmatmul.mubr.f32.gmra.mrb[148].mxu1 %v16943_v6  ;;  %v16951_v6 = vld [vmem:[#allocation112_spill] sm:$0xff] }
 0x7c6   :  { %5027 = vmatprep.mubr.f32.mxu1 %v13936_v62  ;;  %v13952_v62 = vld [vmem:[#allocation2 + $0x278] sm:$0xff] }
 0x7c7   :  { %16952 = vst [vmem:[#allocation112_spill] sm:$0xff] %v13952_v62 }
 0x7c9   :  { %5028 = vmatmul.mubr.f32.gmra.mrb[150].mxu1 %v16945_v15  ;;  %v16953_v15 = vld [vmem:[#allocation49_spill] sm:$0xff] }
 0x7ca   :  { %5032 = vmatprep.mubr.f32.mxu1 %v13940_v1  ;;  %v16954_v1 = vld [vmem:[#allocation56_spill] sm:$0xff] }
 0x7cd   :  { %5033 = vmatmul.mubr.f32.gmra.mrb[152].mxu1 %v16947_v37 }
 0x7ce   :  { %5037 = vmatprep.mubr.f32.mxu1 %v13944_v14  ;;  %v16955_v14 = vld [vmem:[#allocation59_spill] sm:$0xff] }
 0x7d1   :  { %5038 = vmatmul.mubr.f32.gmra.mrb[154].mxu1 %v16949_v28  ;;  %v16956_v28 = vld [vmem:[#allocation66_spill] sm:$0xff] }
 0x7d2   :  { %5042 = vmatprep.mubr.f32.mxu1 %v13948_v54  ;;  %v16957_v54 = vld [vmem:[#allocation71_spill] sm:$0xff] }
 0x7d5   :  { %5043 = vmatmul.mubr.f32.gmra.mrb[156].mxu1 %v16951_v6 }
 0x7d6   :  { %5047 = vmatprep.mubr.f32.mxu1 %v13952_v62  ;;  %v16958_v62 = vld [vmem:[#allocation79_spill] sm:$0xff] }
 0x7d9   :  { %5048 = vmatmul.mubr.f32.gmra.mrb[158].mxu1 %v16953_v15 }
 0x7da   :  { %5052 = vmatprep.mubr.f32.mxu1 %v13251_v36  ;;  %v16959_v36 = vld [vmem:[#allocation81_spill] sm:$0xff] }
 0x7dd   :  { %5053 = vmatmul.mubr.f32.gmra.mrb[160].mxu1 %v16954_v1 }
 0x7de   :  { %5057 = vmatprep.mubr.f32.mxu1 %v13253_v63  ;;  %v16960_v63 = vld [vmem:[#allocation46_spill] sm:$0xff] }
 0x7e1   :  { %5058 = vmatmul.mubr.f32.gmra.mrb[162].mxu1 %v16955_v14 }
 0x7e2   :  { %5062 = vmatprep.mubr.f32.mxu1 %v13274_v5  ;;  %v16961_v5 = vld [vmem:[#allocation52_spill] sm:$0xff] }
 0x7e5   :  { %5063 = vmatmul.mubr.f32.gmra.mrb[164].mxu1 %v16956_v28 }
 0x7e6   :  { %5067 = vmatprep.mubr.f32.mxu1 %v13276_v32  ;;  %v4078_v32 = vrot.slane %v13593_v51, 2 }
 0x7e9   :  { %5068 = vmatmul.mubr.f32.gmra.mrb[166].mxu1 %v16957_v54 }
 0x7ea   :  { %5072 = vmatprep.mubr.f32.mxu1 %v13296_v4  ;;  %v4077_v4 = vrot.slane %v13591_v25, 2 }
 0x7ed   :  { %5073 = vmatmul.mubr.f32.gmra.mrb[168].mxu1 %v16958_v62 }
 0x7ee   :  { %5077 = vmatprep.mubr.f32.mxu1 %v13300_v33  ;;  %v13984_v33 = vsel %vm487_vm1, %v4077_v4, %v4078_v32  ;;  %v14003_v4 = vld [vmem:[#allocation2 + $0x338] sm:$0xff] }
 0x7ef   :  { %16962 = vst [vmem:[#allocation49_spill] sm:$0xff] %v13984_v33  ;;  %16966 = vst [vmem:[#allocation71_spill] sm:$0xff] %v14003_v4 }
 0x7f1   :  { %5078 = vmatmul.mubr.f32.gmra.mrb[170].mxu1 %v16959_v36 }
 0x7f2   :  { %5082 = vmatprep.mubr.f32.mxu1 %v13321_v34 }
 0x7f5   :  { %5083 = vmatmul.mubr.f32.gmra.mrb[172].mxu1 %v16960_v63 }
 0x7f6   :  { %5087 = vmatprep.mubr.f32.mxu1 %v13323_v18  ;;  %v4082_v18 = vrot.slane %v13618_v61, 2 }
 0x7f9   :  { %5088 = vmatmul.mubr.f32.gmra.mrb[174].mxu1 %v13351_v56 }
 0x7fa   :  { %5092 = vmatprep.mubr.f32.mxu1 %v13346_v53  ;;  %v4080_v53 = vrot.slane %v13606_v48, 2  ;;  %v4085_v48 = vrot.slane %v13633_v8, 2 }
 0x7fc   :  { %v13990_v34 = vsel %vm487_vm1, %v4078_v32, %v4080_v53  ;;  %v4316_v32 = vld [vmem:[#allocation3 + $0x308] sm:$0xff] }
 0x7fd   :  { %5093 = vmatmul.mubr.f32.gmra.mrb[176].mxu1 %v16961_v5  ;;  %16963 = vst [vmem:[#allocation56_spill] sm:$0xff] %v13990_v34 }
 0x7fe   :  { %5097 = vmatprep.mubr.f32.mxu1 %v13348_v31  ;;  %v4083_v31 = vrot.slane %v13620_v23, 2 }
 0x801   :  { %5098 = vmatmul.mubr.f32.gmra.mrb[178].mxu1 %v13370_v55 }
 0x802   :  { %5102 = vmatprep.mubr.f32.mxu1 %v13591_v25  ;;  %v13995_v25 = vld [vmem:[#allocation2 + $0x330] sm:$0xff] }
 0x803   :  { %16964 = vst [vmem:[#allocation59_spill] sm:$0xff] %v13995_v25 }
 0x805   :  { %5103 = vmatmul.mubr.f32.gmra.mrb[180].mxu1 %v13379_v3 }
 0x806   :  { %5107 = vmatprep.mubr.f32.mxu1 %v13593_v51  ;;  %v13999_v51 = vsel %vm487_vm1, %v4082_v18, %v4083_v31  ;;  %v4317_v18 = vld [vmem:[#allocation3 + $0x310] sm:$0xff] }
 0x807   :  { %16965 = vst [vmem:[#allocation66_spill] sm:$0xff] %v13999_v51 }
 0x809   :  { %5108 = vmatmul.mubr.f32.gmra.mrb[182].mxu1 %v13386_v43 }
 0x80a   :  { %5112 = vmatprep.mubr.f32.mxu1 %v13618_v61  ;;  %v4315_v61 = vld [vmem:[#allocation3 + $0x300] sm:$0xff] }
 0x80b   :  { %v7762_v53 = vpack.c.bf16 %v4316_v32, %v4315_v61  ;;  %v16970_v61 = vld [vmem:[#allocation29_spill] sm:$0xff]  ;;  %v16971_v32 = vld [vmem:[#allocation30_spill] sm:$0xff] }
 0x80d   :  { %5113 = vmatmul.mubr.f32.gmra.mrb[184].mxu1 %v13984_v33  ;;  %v16969_v33 = vld [vmem:[#allocation28_spill] sm:$0xff] }
 0x80e   :  { %5117 = vmatprep.mubr.f32.mxu1 %v13620_v23  ;;  %v14007_v23 = vsel %vm487_vm1, %v4083_v31, %v4085_v48  ;;  %v4322_v48 = vld [vmem:[#allocation3 + $0x338] sm:$0xff] }
 0x80f   :  { %16967 = vst [vmem:[#allocation79_spill] sm:$0xff] %v14007_v23 }
 0x811   :  { %5118 = vmatmul.mubr.f32.gmra.mrb[186].mxu1 %v13990_v34  ;;  %v16968_v34 = vld [vmem:[#allocation27_spill] sm:$0xff] }
 0x812   :  { %5122 = vmatprep.mubr.f32.mxu1 %v13995_v25  ;;  %v4318_v25 = vld [vmem:[#allocation3 + $0x318] sm:$0xff] }
 0x813   :  { %v7765_v8 = vpack.c.bf16 %v4318_v25, %v4317_v18  ;;  %v4324_v25 = vld [vmem:[#allocation3 + $0x348] sm:$0xff] }
 0x814   :  { %v4328_v18 = vld [vmem:[#allocation3 + $0x368] sm:$0xff] }
 0x815   :  { %5123 = vmatmul.mubr.f32.gmra.mrb[188].mxu1 %v13999_v51  ;;  %v4320_v51 = vld [vmem:[#allocation3 + $0x328] sm:$0xff] }
 0x816   :  { %5127 = vmatprep.mubr.f32.mxu1 %v14003_v4  ;;  %v4319_v4 = vld [vmem:[#allocation3 + $0x320] sm:$0xff] }
 0x817   :  { %v7768_v31 = vpack.c.bf16 %v4320_v51, %v4319_v4  ;;  %v4326_v51 = vld [vmem:[#allocation3 + $0x358] sm:$0xff]  ;;  %v16972_v4 = vld [vmem:[#allocation33_spill] sm:$0xff] }
 0x819   :  { %5128 = vmatmul.mubr.f32.gmra.mrb[190].mxu1 %v14007_v23 }
 0x81a   :  { %5197 = vmatprep.mubr.f32.mxu1 %v13678_v20  ;;  %v4321_v20 = vld [vmem:[#allocation3 + $0x330] sm:$0xff] }
 0x81d   :  { %5198 = vmatmul.mubr.f32.vlgmr.msra.gmra.mrb[64].mxu1 %v16968_v34  ;;  %v4323_v34 = vld [vmem:[#allocation3 + $0x340] sm:$0xff] }
 0x81e   :  { %5202 = vmatprep.mubr.f32.mxu1 %v13690_v40  ;;  %7763 = vmatpush1.bf16.msra.mxu1 %v7762_v53  ;;  %v7771_v40 = vpack.c.bf16 %v4322_v48, %v4321_v20  ;;  %v4327_v53 = vld [vmem:[#allocation3 + $0x360] sm:$0xff]  ;;  %v4330_v20 = vld [vmem:[#allocation3 + $0x378] sm:$0xff] }
 0x81f   :  { %7764 = vmatprep.subr.bf16.mxu1 %v16744_v21  ;;  %v16974_v48 = vld [vmem:[#allocation39_spill] sm:$0xff] }
 0x821   :  { %5203 = vmatmul.mubr.f32.gmra.mrb[66].mxu1 %v16969_v33  ;;  %v4325_v33 = vld [vmem:[#allocation3 + $0x350] sm:$0xff] }
 0x822   :  { %5207 = vmatprep.mubr.f32.mxu1 %v12767_v58  ;;  %7766 = vmatpush1.bf16.msra.mxu1 %v7765_v8  ;;  %v7774_v58 = vpack.c.bf16 %v4324_v25, %v4323_v34  ;;  %v16973_v8 = vld [vmem:[#allocation36_spill] sm:$0xff]  ;;  %v4332_v34 = vld [vmem:[#allocation3 + $0x388] sm:$0xff]  ;;  %v16975_v25 = vld [vmem:[#allocation91_spill] sm:$0xff] }
 0x823   :  { %7767 = vmatprep.subr.bf16.mxu1 %v16744_v21 }
 0x825   :  { %5208 = vmatmul.mubr.f32.gmra.mrb[68].mxu1 %v16970_v61 }
 0x826   :  { %5212 = vmatprep.mubr.f32.mxu1 %v12772_v12  ;;  %7769 = vmatpush1.bf16.msra.mxu1 %v7768_v31  ;;  %v7777_v12 = vpack.c.bf16 %v4326_v51, %v4325_v33  ;;  %v4329_v31 = vld [vmem:[#allocation3 + $0x370] sm:$0xff]  ;;  %v4334_v33 = vld [vmem:[#allocation3 + $0x398] sm:$0xff] }
 0x827   :  { %7770 = vmatprep.subr.bf16.mxu1 %v16744_v21  ;;  %v16976_v51 = vld [vmem:[#allocation99_spill] sm:$0xff] }
 0x829   :  { %5213 = vmatmul.mubr.f32.gmra.mrb[70].mxu1 %v16971_v32 }
 0x82a   :  { %5217 = vmatprep.mubr.f32.mxu1 %v12782_v42  ;;  %7772 = vmatpush1.bf16.msra.mxu1 %v7771_v40  ;;  %v7780_v42 = vpack.c.bf16 %v4328_v18, %v4327_v53  ;;  %v4331_v40 = vld [vmem:[#allocation3 + $0x380] sm:$0xff]  ;;  %v4336_v53 = vld [vmem:[#allocation3 + $0x3a8] sm:$0xff]  ;;  %v16977_v18 = vld [vmem:[#allocation106_spill] sm:$0xff] }
 0x82b   :  { %7773 = vmatprep.subr.bf16.mxu1 %v16744_v21 }
 0x82d   :  { %5218 = vmatmul.mubr.f32.gmra.mrb[72].mxu1 %v16972_v4 }
 0x82e   :  { %5222 = vmatprep.mubr.f32.mxu1 %v12796_v44  ;;  %7775 = vmatpush1.bf16.msra.mxu1 %v7774_v58  ;;  %v7783_v44 = vpack.c.bf16 %v4330_v20, %v4329_v31  ;;  %v4333_v58 = vld [vmem:[#allocation3 + $0x390] sm:$0xff]  ;;  %v16980_v31 = vld [vmem:[#allocation73_spill] sm:$0xff]  ;;  %v4338_v20 = vld [vmem:[#allocation3 + $0x3b8] sm:$0xff] }
 0x82f   :  { %7776 = vmatprep.subr.bf16.mxu1 %v16744_v21 }
 0x831   :  { %5223 = vmatmul.mubr.f32.gmra.mrb[74].mxu1 %v16973_v8 }
 0x832   :  { %5227 = vmatprep.mubr.f32.mxu1 %v12806_v57  ;;  %7778 = vmatpush1.bf16.msra.mxu1 %v7777_v12  ;;  %v7786_v57 = vpack.c.bf16 %v4332_v34, %v4331_v40  ;;  %v4335_v12 = vld [vmem:[#allocation3 + $0x3a0] sm:$0xff]  ;;  %v16981_v40 = vld [vmem:[#allocation77_spill] sm:$0xff]  ;;  %v16983_v34 = vld [vmem:[#allocation67_spill] sm:$0xff] }
 0x833   :  { %7779 = vmatprep.subr.bf16.mxu1 %v16744_v21 }
 0x835   :  { %5228 = vmatmul.mubr.f32.gmra.mrb[76].mxu1 %v16974_v48 }
 0x836   :  { %5232 = vmatprep.mubr.f32.mxu1 %v12819_v13  ;;  %7781 = vmatpush1.bf16.msra.mxu1 %v7780_v42  ;;  %v7789_v13 = vpack.c.bf16 %v4334_v33, %v4333_v58  ;;  %v16978_v42 = vld [vmem:[#allocation111_spill] sm:$0xff]  ;;  %v16985_v33 = vld [vmem:[#allocation88_spill] sm:$0xff] }
 0x837   :  { %7782 = vmatprep.subr.bf16.mxu1 %v16744_v21 }
 0x839   :  { %5233 = vmatmul.mubr.f32.gmra.mrb[78].mxu1 %v16975_v25 }
 0x83a   :  { %5237 = vmatprep.mubr.f32.mxu1 %v16866_v30  ;;  %7784 = vmatpush1.bf16.msra.mxu1 %v7783_v44  ;;  %v7792_v30 = vpack.c.bf16 %v4336_v53, %v4335_v12  ;;  %v16989_v53 = vld [vmem:[#allocation110_spill] sm:$0xff] }
 0x83b   :  { %7785 = vmatprep.subr.bf16.mxu1 %v16744_v21 }
 0x83d   :  { %5238 = vmatmul.mubr.f32.gmra.mrb[80].mxu1 %v16976_v51 }
 0x83e   :  { %5242 = vmatprep.mubr.f32.mxu1 %v16870_v0  ;;  %7787 = vmatpush1.bf16.msra.mxu1 %v7786_v57  ;;  %v16979_v0 = vld [vmem:[#allocation65_spill] sm:$0xff] }
 0x83f   :  { %7788 = vmatprep.subr.bf16.mxu1 %v16744_v21  ;;  %v4340_v57 = vld [vmem:[#allocation3 + $0x3c8] sm:$0xff] }
 0x841   :  { %5243 = vmatmul.mubr.f32.gmra.mrb[82].mxu1 %v16977_v18 }
 0x842   :  { %5247 = vmatprep.mubr.f32.mxu1 %v16874_v60  ;;  %7790 = vmatpush1.bf16.msra.mxu1 %v7789_v13  ;;  %v4337_v60 = vld [vmem:[#allocation3 + $0x3b0] sm:$0xff]  ;;  %v4342_v13 = vld [vmem:[#allocation3 + $0x3d8] sm:$0xff] }
 0x843   :  { %7791 = vmatprep.subr.bf16.mxu1 %v16744_v21  ;;  %v7795_v44 = vpack.c.bf16 %v4338_v20, %v4337_v60  ;;  %v16993_v20 = vld [vmem:[#allocation41_spill] sm:$0xff] }
 0x845   :  { %5248 = vmatmul.mubr.f32.gmra.mrb[84].mxu1 %v16978_v42 }
 0x846   :  { %5252 = vmatprep.mubr.f32.mxu1 %v16878_v45  ;;  %7793 = vmatpush1.bf16.msra.mxu1 %v7792_v30  ;;  %v16982_v45 = vld [vmem:[#allocation82_spill] sm:$0xff]  ;;  %v4344_v30 = vld [vmem:[#allocation3 + $0x3e8] sm:$0xff] }
 0x847   :  { %7794 = vmatprep.subr.bf16.mxu1 %v16744_v21 }
 0x849   :  { %5253 = vmatmul.mubr.f32.gmra.mrb[86].mxu1 %v16979_v0 }
 0x84a   :  { %5257 = vmatprep.mubr.f32.mxu1 %v16882_v26  ;;  %7796 = vmatpush1.bf16.msra.mxu1 %v7795_v44  ;;  %v16984_v26 = vld [vmem:[#allocation83_spill] sm:$0xff] }
 0x84b   :  { %7797 = vmatprep.subr.bf16.mxu1 %v16744_v21 }
 0x84d   :  { %5258 = vmatmul.mubr.f32.gmra.mrb[88].mxu1 %v16980_v31 }
 0x84e   :  { %5262 = vmatprep.mubr.f32.mxu1 %v16886_v24  ;;  %v4339_v24 = vld [vmem:[#allocation3 + $0x3c0] sm:$0xff] }
 0x84f   :  { %v7798_v58 = vpack.c.bf16 %v4340_v57, %v4339_v24  ;;  %v16996_v24 = vld [vmem:[#allocation75_spill] sm:$0xff]  ;;  %v16997_v57 = vld [vmem:[#allocation78_spill] sm:$0xff] }
 0x851   :  { %5263 = vmatmul.mubr.f32.gmra.mrb[90].mxu1 %v16981_v40 }
 0x852   :  { %5267 = vmatprep.mubr.f32.mxu1 %v16890_v46  ;;  %7799 = vmatpush1.bf16.msra.mxu1 %v7798_v58  ;;  %v16986_v46 = vld [vmem:[#allocation93_spill] sm:$0xff]  ;;  %v4158_v58 = vrot.slane %v16997_v57, 1 }
 0x853   :  { %7800 = vmatprep.subr.bf16.mxu1 %v16744_v21 }
 0x855   :  { %5268 = vmatmul.mubr.f32.gmra.mrb[92].mxu1 %v16982_v45 }
 0x856   :  { %5272 = vmatprep.mubr.f32.mxu1 %v16894_v50  ;;  %v16987_v50 = vld [vmem:[#allocation98_spill] sm:$0xff] }
 0x859   :  { %5273 = vmatmul.mubr.f32.gmra.mrb[94].mxu1 %v16983_v34 }
 0x85a   :  { %5277 = vmatprep.mubr.f32.mxu1 %v16898_v16  ;;  %v16988_v16 = vld [vmem:[#allocation103_spill] sm:$0xff] }
 0x85d   :  { %5278 = vmatmul.mubr.f32.gmra.mrb[96].mxu1 %v16984_v26 }
 0x85e   :  { %5282 = vmatprep.mubr.f32.mxu1 %v16901_v27  ;;  %v4341_v27 = vld [vmem:[#allocation3 + $0x3d0] sm:$0xff] }
 0x85f   :  { %v7801_v12 = vpack.c.bf16 %v4342_v13, %v4341_v27  ;;  %v16999_v27 = vld [vmem:[#allocation60_spill] sm:$0xff]  ;;  %v8747_v13 = vld [vmem:[#allocation2 + $0x190] sm:$0x3] }
 0x861   :  { %5283 = vmatmul.mubr.f32.gmra.mrb[98].mxu1 %v16985_v33 }
 0x862   :  { %5287 = vmatprep.mubr.f32.mxu1 %v16903_v38  ;;  %7802 = vmatpush1.bf16.msra.mxu1 %v7801_v12  ;;  %v16990_v38 = vld [vmem:[#allocation51_spill] sm:$0xff]  ;;  %v4160_v12 = vrot.slane %v8747_v13, 1 }
 0x863   :  { %7803 = vmatprep.subr.bf16.mxu1 %v16744_v21  ;;  %v17012_v13 = vld [vmem:[#allocation95_spill] sm:$0xff] }
 0x865   :  { %5288 = vmatmul.mubr.f32.gmra.mrb[100].mxu1 %v16986_v46 }
 0x866   :  { %5292 = vmatprep.mubr.f32.mxu1 %v16905_v17  ;;  %v16991_v17 = vld [vmem:[#allocation64_spill] sm:$0xff] }
 0x869   :  { %5293 = vmatmul.mubr.f32.gmra.mrb[102].mxu1 %v16987_v50 }
 0x86a   :  { %5297 = vmatprep.mubr.f32.mxu1 %v16907_v19  ;;  %v16992_v19 = vld [vmem:[#allocation74_spill] sm:$0xff] }
 0x86d   :  { %5298 = vmatmul.mubr.f32.gmra.mrb[104].mxu1 %v16988_v16 }
 0x86e   :  { %5302 = vmatprep.mubr.f32.mxu1 %v16909_v49  ;;  %v4343_v49 = vld [vmem:[#allocation3 + $0x3e0] sm:$0xff] }
 0x86f   :  { %v7804_v60 = vpack.c.bf16 %v4344_v30, %v4343_v49  ;;  %v17001_v49 = vld [vmem:[#allocation63_spill] sm:$0xff]  ;;  %v14095_v30 = vsel %vm262_vm0, %v4158_v58, %v4160_v12  ;;  %v17014_v12 = vld [vmem:[#allocation102_spill] sm:$0xff] }
 0x871   :  { %5303 = vmatmul.mubr.f32.gmra.mrb[106].mxu1 %v16989_v53 }
 0x872   :  { %5307 = vmatprep.mubr.f32.mxu1 %v16911_v7  ;;  %7805 = vmatpush1.bf16.msra.mxu1 %v7804_v60  ;;  %v16994_v7 = vld [vmem:[#allocation48_spill] sm:$0xff]  ;;  %v17002_v60 = vld [vmem:[#allocation53_spill] sm:$0xff] }
 0x873   :  { %7806 = vmatprep.subr.bf16.mxu1 %v16744_v21  ;;  %v16998_v21 = vld [vmem:[#allocation50_spill] sm:$0xff] }
 0x875   :  { %5308 = vmatmul.mubr.f32.gmra.mrb[108].mxu1 %v16990_v38 }
 0x876   :  { %5312 = vmatprep.mubr.f32.mxu1 %v16913_v22  ;;  %v4345_v22 = vld [vmem:[#allocation3 + $0x3f0] sm:$0xff] }
 0x879   :  { %5313 = vmatmul.mubr.f32.gmra.mrb[110].mxu1 %v16991_v17 }
 0x87a   :  { %5317 = vmatprep.mubr.f32.mxu1 %v16915_v35  ;;  %v4346_v35 = vld [vmem:[#allocation3 + $0x3f8] sm:$0xff] }
 0x87b   :  { %v7807_v44 = vpack.c.bf16 %v4346_v35, %v4345_v22  ;;  %v17004_v22 = vld [vmem:[#allocation13_spill] sm:$0xff]  ;;  %v17005_v35 = vld [vmem:[#allocation42_spill] sm:$0xff] }
 0x87d   :  { %5318 = vmatmul.mubr.f32.gmra.mrb[112].mxu1 %v16992_v19 }
 0x87e   :  { %5322 = vmatprep.mubr.f32.mxu1 %v16917_v11  ;;  %v16995_v11 = vld [vmem:[#allocation80_spill] sm:$0xff]  ;;  %7808 = vmatpush1.bf16.msra.mxu1 %v7807_v44 }
 0x87f   :  { %v17006_v44 = vld [vmem:[#allocation92_spill] sm:$0xff] }
 0x881   :  { %5323 = vmatmul.mubr.f32.gmra.mrb[114].mxu1 %v16993_v20 }
 0x882   :  { %5327 = vmatprep.mubr.f32.mxu1 %v16919_v29  ;;  %v4157_v29 = vrot.slane %v16996_v24, 1 }
 0x885   :  { %5328 = vmatmul.mubr.f32.gmra.mrb[116].mxu1 %v16994_v7 }
 0x886   :  { %5332 = vmatprep.mubr.f32.mxu1 %v16921_v52  ;;  %v17000_v52 = vld [vmem:[#allocation54_spill] sm:$0xff] }
 0x887   :  { %7841 = vmatprep.subr.bf16.mxu1 %v17000_v52 }
 0x889   :  { %5333 = vmatmul.mubr.f32.gmra.mrb[118].mxu1 %v13376_v59 }
 0x88a   :  { %5337 = vmatprep.mubr.f32.mxu1 %v16923_v10  ;;  %v14090_v10 = vsel %vm262_vm0, %v4157_v29, %v4158_v58  ;;  %v17007_v29 = vld [vmem:[#allocation47_spill] sm:$0xff]  ;;  %v17008_v58 = vld [vmem:[#allocation90_spill] sm:$0xff] }
 0x88d   :  { %5338 = vmatmul.mubr.f32.gmra.mrb[120].mxu1 %v13391_v9 }
 0x88e   :  { %5342 = vmatprep.mubr.f32.mxu1 %v16995_v11  ;;  %v17003_v11 = vld [vmem:[#allocation12_spill] sm:$0xff] }
 0x891   :  { %5343 = vmatmul.mubr.f32.gmra.mrb[122].mxu1 %v16998_v21 }
 0x892   :  { %5347 = vmatprep.mubr.f32.mxu1 %v16999_v27  ;;  %v17010_v27 = vld [vmem:[#allocation97_spill] sm:$0xff] }
 0x895   :  { %5348 = vmatmul.mubr.f32.gmra.mrb[124].mxu1 %v14090_v10 }
 0x896   :  { %5352 = vmatprep.mubr.f32.mxu1 %v17001_v49  ;;  %v17016_v49 = vld [vmem:[#allocation100_spill] sm:$0xff] }
 0x899   :  { %5353 = vmatmul.mubr.f32.gmra.mrb[126].mxu1 %v14095_v30 }
 0x89a   :  { %5357 = vmatprep.mubr.f32.mxu1 %v13897_v39  ;;  %v17009_v39 = vld [vmem:[#allocation57_spill] sm:$0xff] }
 0x89d   :  { %5358 = vmatmul.mubr.f32.gmra.mrb[128].mxu1 %v17002_v60  ;;  %v17017_v60 = vld [vmem:[#allocation15_spill] sm:$0xff] }
 0x89e   :  { %5362 = vmatprep.mubr.f32.mxu1 %v13905_v41  ;;  %v17011_v41 = vld [vmem:[#allocation58_spill] sm:$0xff] }
 0x8a1   :  { %5363 = vmatmul.mubr.f32.gmra.mrb[130].mxu1 %v17003_v11  ;;  %v17018_v11 = vld [vmem:[#allocation16_spill] sm:$0xff] }
 0x8a2   :  { %5367 = vmatprep.mubr.f32.mxu1 %v16931_v47  ;;  %v17013_v47 = vld [vmem:[#allocation62_spill] sm:$0xff] }
 0x8a5   :  { %5368 = vmatmul.mubr.f32.gmra.mrb[132].mxu1 %v17004_v22 }
 0x8a6   :  { %5372 = vmatprep.mubr.f32.mxu1 %v16933_v2  ;;  %v17015_v2 = vld [vmem:[#allocation14_spill] sm:$0xff] }
 0x8a9   :  { %5373 = vmatmul.mubr.f32.gmra.mrb[134].mxu1 %v17005_v35 }
 0x8aa   :  { %5377 = vmatprep.mubr.f32.mxu1 %v17006_v44  ;;  %v17019_v44 = vld [vmem:[#allocation108_spill] sm:$0xff] }
 0x8ad   :  { %5378 = vmatmul.mubr.f32.gmra.mrb[136].mxu1 %v17007_v29 }
 0x8ae   :  { %5382 = vmatprep.mubr.f32.mxu1 %v17008_v58  ;;  %v17020_v58 = vld [vmem:[#allocation17_spill] sm:$0xff] }
 0x8b1   :  { %5383 = vmatmul.mubr.f32.gmra.mrb[138].mxu1 %v17009_v39 }
 0x8b2   :  { %5387 = vmatprep.mubr.f32.mxu1 %v17010_v27  ;;  %v17021_v27 = vld [vmem:[#allocation18_spill] sm:$0xff] }
 0x8b5   :  { %5388 = vmatmul.mubr.f32.gmra.mrb[140].mxu1 %v17011_v41 }
 0x8b6   :  { %5392 = vmatprep.mubr.f32.mxu1 %v17012_v13  ;;  %v17022_v13 = vld [vmem:[#allocation19_spill] sm:$0xff] }
 0x8b9   :  { %5393 = vmatmul.mubr.f32.gmra.mrb[142].mxu1 %v17013_v47 }
 0x8ba   :  { %5397 = vmatprep.mubr.f32.mxu1 %v17014_v12  ;;  %v17023_v12 = vld [vmem:[#allocation20_spill] sm:$0xff] }
 0x8bd   :  { %5398 = vmatmul.mubr.f32.gmra.mrb[144].mxu1 %v17015_v2 }
 0x8be   :  { %5402 = vmatprep.mubr.f32.mxu1 %v17016_v49  ;;  %v17025_v49 = vld [vmem:[#allocation22_spill] sm:$0xff] }
 0x8c1   :  { %5403 = vmatmul.mubr.f32.gmra.mrb[146].mxu1 %v17017_v60 }
 0x8c2   :  { %5407 = vmatprep.mubr.f32.mxu1 %v16947_v37  ;;  %v17024_v37 = vld [vmem:[#allocation21_spill] sm:$0xff] }
 0x8c5   :  { %5408 = vmatmul.mubr.f32.gmra.mrb[148].mxu1 %v17018_v11 }
 0x8c6   :  { %5412 = vmatprep.mubr.f32.mxu1 %v17019_v44  ;;  %v17035_v44 = vld [vmem:[#allocation49_spill] sm:$0xff] }
 0x8c9   :  { %5413 = vmatmul.mubr.f32.gmra.mrb[150].mxu1 %v17020_v58 }
 0x8ca   :  { %5417 = vmatprep.mubr.f32.mxu1 %v16951_v6  ;;  %v17026_v6 = vld [vmem:[#allocation23_spill] sm:$0xff] }
 0x8cd   :  { %5418 = vmatmul.mubr.f32.gmra.mrb[152].mxu1 %v17021_v27 }
 0x8ce   :  { %5422 = vmatprep.mubr.f32.mxu1 %v16953_v15  ;;  %v17027_v15 = vld [vmem:[#allocation24_spill] sm:$0xff] }
 0x8d1   :  { %5423 = vmatmul.mubr.f32.gmra.mrb[154].mxu1 %v17022_v13 }
 0x8d2   :  { %5427 = vmatprep.mubr.f32.mxu1 %v16954_v1  ;;  %v17028_v1 = vld [vmem:[#allocation25_spill] sm:$0xff] }
 0x8d5   :  { %5428 = vmatmul.mubr.f32.gmra.mrb[156].mxu1 %v17023_v12 }
 0x8d6   :  { %5432 = vmatprep.mubr.f32.mxu1 %v16955_v14  ;;  %v17029_v14 = vld [vmem:[#allocation26_spill] sm:$0xff] }
 0x8d9   :  { %5433 = vmatmul.mubr.f32.gmra.mrb[158].mxu1 %v17024_v37 }
 0x8da   :  { %5437 = vmatprep.mubr.f32.mxu1 %v16956_v28  ;;  %v17030_v28 = vld [vmem:[#allocation44_spill] sm:$0xff] }
 0x8dd   :  { %5438 = vmatmul.mubr.f32.gmra.mrb[160].mxu1 %v17025_v49 }
 0x8de   :  { %5442 = vmatprep.mubr.f32.mxu1 %v16957_v54  ;;  %v17031_v54 = vld [vmem:[#allocation117_spill] sm:$0xff] }
 0x8e1   :  { %5443 = vmatmul.mubr.f32.gmra.mrb[162].mxu1 %v17026_v6 }
 0x8e2   :  { %5447 = vmatprep.mubr.f32.mxu1 %v16958_v62  ;;  %v17032_v62 = vld [vmem:[#allocation120_spill] sm:$0xff] }
 0x8e5   :  { %5448 = vmatmul.mubr.f32.gmra.mrb[164].mxu1 %v17027_v15 }
 0x8e6   :  { %5452 = vmatprep.mubr.f32.mxu1 %v16959_v36  ;;  %v17033_v36 = vld [vmem:[#allocation123_spill] sm:$0xff] }
 0x8e9   :  { %5453 = vmatmul.mubr.f32.gmra.mrb[166].mxu1 %v17028_v1 }
 0x8ea   :  { %5457 = vmatprep.mubr.f32.mxu1 %v16960_v63  ;;  %v17034_v63 = vld [vmem:[#allocation126_spill] sm:$0xff] }
 0x8ed   :  { %5458 = vmatmul.mubr.f32.gmra.mrb[168].mxu1 %v17029_v14  ;;  %v17042_v14 = vld [vmem:[#allocation71_spill] sm:$0xff] }
 0x8ee   :  { %5462 = vmatprep.mubr.f32.mxu1 %v13351_v56  ;;  %v17036_v56 = vld [vmem:[#allocation129_spill] sm:$0xff] }
 0x8f1   :  { %5463 = vmatmul.mubr.f32.gmra.mrb[170].mxu1 %v17030_v28  ;;  %v17037_v28 = vld [vmem:[#allocation56_spill] sm:$0xff] }
 0x8f2   :  { %5467 = vmatprep.mubr.f32.mxu1 %v16961_v5  ;;  %v17038_v5 = vld [vmem:[#allocation132_spill] sm:$0xff] }
 0x8f5   :  { %5468 = vmatmul.mubr.f32.gmra.mrb[172].mxu1 %v17031_v54  ;;  %v17039_v54 = vld [vmem:[#allocation66_spill] sm:$0xff] }
 0x8f6   :  { %5472 = vmatprep.mubr.f32.mxu1 %v13370_v55  ;;  %v17040_v55 = vld [vmem:[#allocation135_spill] sm:$0xff] }
 0x8f9   :  { %5473 = vmatmul.mubr.f32.gmra.mrb[174].mxu1 %v17032_v62  ;;  %v17041_v62 = vld [vmem:[#allocation59_spill] sm:$0xff] }
 0x8fa   :  { %5477 = vmatprep.mubr.f32.mxu1 %v13379_v3  ;;  %v4176_v3 = vrot.slane %v17041_v62, 2 }
 0x8fd   :  { %5478 = vmatmul.mubr.f32.gmra.mrb[176].mxu1 %v17033_v36  ;;  %v4177_v36 = vrot.slane %v17042_v14, 2 }
 0x8fe   :  { %5482 = vmatprep.mubr.f32.mxu1 %v13386_v43  ;;  %v3603_v43 = vld [vmem:[#allocation2 + $0x340] sm:$0x3] }
 0x901   :  { %5483 = vmatmul.mubr.f32.gmra.mrb[178].mxu1 %v17034_v63  ;;  %v4162_v63 = vrot.slane %v17041_v62, 1 }
 0x902   :  { %5487 = vmatprep.mubr.f32.mxu1 %v17035_v44  ;;  %v4163_v44 = vrot.slane %v17042_v14, 1 }
 0x905   :  { %5488 = vmatmul.mubr.f32.gmra.mrb[180].mxu1 %v17036_v56  ;;  %v17043_v56 = vld [vmem:[#allocation138_spill] sm:$0xff] }
 0x906   :  { %5492 = vmatprep.mubr.f32.mxu1 %v17037_v28  ;;  %v14163_v28 = vsel %vm487_vm1, %v4176_v3, %v4177_v36  ;;  %v17044_v3 = vld [vmem:[#allocation145_spill] sm:$0xff] }
 0x909   :  { %5493 = vmatmul.mubr.f32.gmra.mrb[182].mxu1 %v17038_v5  ;;  %v4179_v5 = vrot.slane %v3603_v43, 2 }
 0x90a   :  { %5497 = vmatprep.mubr.f32.mxu1 %v17039_v54  ;;  %v14167_v54 = vsel %vm262_vm0, %v4162_v63, %v4163_v44  ;;  %v17045_v63 = vld [vmem:[#allocation61_spill] sm:$0xff] }
 0x90d   :  { %5498 = vmatmul.mubr.f32.gmra.mrb[184].mxu1 %v17040_v55  ;;  %v4165_v55 = vrot.slane %v3603_v43, 1  ;;  %v17046_v43 = vld [vmem:[#allocation148_spill] sm:$0xff] }
 0x90e   :  { %5502 = vmatprep.mubr.f32.mxu1 %v14007_v23  ;;  %v14171_v23 = vsel %vm487_vm1, %v4177_v36, %v4179_v5  ;;  %v17047_v36 = vld [vmem:[#allocation69_spill] sm:$0xff]  ;;  %v17053_v5 = vld [vmem:[#allocation86_spill] sm:$0xff] }
 0x90f   :  { %v14175_v14 = vsel %vm262_vm0, %v4163_v44, %v4165_v55  ;;  %v17048_v44 = vld [vmem:[#allocation151_spill] sm:$0xff] }
 0x910   :  { %v17055_v55 = vld [vmem:[#allocation43_spill] sm:$0xff] }
 0x911   :  { %5503 = vmatmul.mubr.f32.gmra.mrb[186].mxu1 %v17043_v56 }
 0x912   :  { %5507 = vmatprep.mubr.f32.mxu1 %v14163_v28 }
 0x915   :  { %5508 = vmatmul.mubr.f32.gmra.mrb[188].mxu1 %v14167_v54 }
 0x916   :  { %5512 = vmatprep.mubr.f32.mxu1 %v14171_v23 }
 0x919   :  { %5513 = vmatmul.mubr.f32.gmra.mrb[190].mxu1 %v14175_v14 }
 0x91a   :  { %5582 = vmatprep.mubr.f32.mxu1 %v16970_v61  ;;  %v17049_v61 = vld [vmem:[#allocation76_spill] sm:$0xff] }
 0x91d   :  { %5583 = vmatmul.mubr.f32.vlgmr.msra.gmra.mrb[64].mxu1 %v17044_v3  ;;  %v17057_v3 = vld [vmem:[#allocation45_spill] sm:$0xff] }
 0x91e   :  { %5587 = vmatprep.mubr.f32.mxu1 %v16971_v32  ;;  %7849 = vmatpush3.bf16.msra.mxu1 %v17000_v52  ;;  %v17050_v32 = vld [vmem:[#allocation154_spill] sm:$0xff]  ;;  %v17051_v52 = vld [vmem:[#allocation84_spill] sm:$0xff] }
 0x91f   :  { %7842 = vmatprep.subr.bf16.mxu1 %v17045_v63 }
 0x921   :  { %5588 = vmatmul.mubr.f32.gmra.mrb[66].mxu1 %v17046_v43  ;;  %v17061_v43 = vld [vmem:[#allocation173_spill] sm:$0xff] }
 0x922   :  { %5592 = vmatprep.mubr.f32.mxu1 %v16972_v4  ;;  %7850 = vmatpush3.bf16.msra.mxu1 %v17045_v63  ;;  %v17052_v4 = vld [vmem:[#allocation157_spill] sm:$0xff] }
 0x923   :  { %7843 = vmatprep.subr.bf16.mxu1 %v17047_v36  ;;  %v17059_v63 = vld [vmem:[#allocation169_spill] sm:$0xff] }
 0x925   :  { %5593 = vmatmul.mubr.f32.gmra.mrb[68].mxu1 %v17048_v44 }
 0x926   :  { %5597 = vmatprep.mubr.f32.mxu1 %v16973_v8  ;;  %7851 = vmatpush3.bf16.msra.mxu1 %v17047_v36  ;;  %v17054_v8 = vld [vmem:[#allocation160_spill] sm:$0xff]  ;;  %v17063_v36 = vld [vmem:[#allocation177_spill] sm:$0xff] }
 0x927   :  { %7844 = vmatprep.subr.bf16.mxu1 %v17049_v61 }
 0x929   :  { %5598 = vmatmul.mubr.f32.gmra.mrb[70].mxu1 %v17050_v32  ;;  %v17095_v32 = vld [vmem:[#allocation44_spill] sm:$0xff] }
 0x92a   :  { %5602 = vmatprep.mubr.f32.mxu1 %v16974_v48  ;;  %7852 = vmatpush3.bf16.msra.mxu1 %v17049_v61  ;;  %v17056_v48 = vld [vmem:[#allocation163_spill] sm:$0xff]  ;;  %v17094_v61 = vld [vmem:[#allocation26_spill] sm:$0xff] }
 0x92b   :  { %7845 = vmatprep.subr.bf16.mxu1 %v17051_v52 }
 0x92d   :  { %5603 = vmatmul.mubr.f32.gmra.mrb[72].mxu1 %v17052_v4  ;;  %v17097_v4 = vld [vmem:[#allocation120_spill] sm:$0xff] }
 0x92e   :  { %5607 = vmatprep.mubr.f32.mxu1 %v16975_v25  ;;  %7853 = vmatpush3.bf16.msra.mxu1 %v17051_v52  ;;  %v17058_v25 = vld [vmem:[#allocation166_spill] sm:$0xff]  ;;  %v17096_v52 = vld [vmem:[#allocation117_spill] sm:$0xff] }
 0x92f   :  { %7846 = vmatprep.subr.bf16.mxu1 %v17053_v5 }
 0x931   :  { %5608 = vmatmul.mubr.f32.gmra.mrb[74].mxu1 %v17054_v8 }
 0x932   :  { %5612 = vmatprep.mubr.f32.mxu1 %v16976_v51  ;;  %7854 = vmatpush3.bf16.msra.mxu1 %v17053_v5  ;;  %v17060_v51 = vld [vmem:[#allocation171_spill] sm:$0xff]  ;;  %v17098_v5 = vld [vmem:[#allocation116_spill] sm:$0xff] }
 0x933   :  { %7847 = vmatprep.subr.bf16.mxu1 %v17055_v55 }
 0x935   :  { %5613 = vmatmul.mubr.f32.gmra.mrb[76].mxu1 %v17056_v48  ;;  %v17099_v48 = vld [vmem:[#allocation123_spill] sm:$0xff] }
 0x936   :  { %5617 = vmatprep.mubr.f32.mxu1 %v16977_v18  ;;  %7855 = vmatpush3.bf16.msra.mxu1 %v17055_v55  ;;  %v17062_v18 = vld [vmem:[#allocation175_spill] sm:$0xff] }
 0x937   :  { %7848 = vmatprep.subr.bf16.mxu1 %v17057_v3  ;;  %v8756_v55 = vld [vmem:[#allocation2 + $0x2d8] sm:$0xff] }
 0x939   :  { %5618 = vmatmul.mubr.f32.gmra.mrb[78].mxu1 %v17058_v25  ;;  %v17100_v25 = vld [vmem:[#allocation115_spill] sm:$0xff] }
 0x93a   :  { %5622 = vmatprep.mubr.f32.mxu1 %v16978_v42  ;;  %7856 = vmatpush3.bf16.msra.mxu1 %v17057_v3  ;;  %v17064_v42 = vld [vmem:[#allocation179_spill] sm:$0xff] }
 0x93d   :  { %5623 = vmatmul.mubr.f32.gmra.mrb[80].mxu1 %v17059_v63 }
 0x93e   :  { %5627 = vmatprep.mubr.f32.mxu1 %v16979_v0  ;;  %v17065_v0 = vld [vmem:[#allocation181_spill] sm:$0xff] }
 0x941   :  { %5628 = vmatmul.mubr.f32.gmra.mrb[82].mxu1 %v17060_v51 }
 0x942   :  { %5632 = vmatprep.mubr.f32.mxu1 %v16980_v31  ;;  %v17066_v31 = vld [vmem:[#allocation183_spill] sm:$0xff] }
 0x945   :  { %5633 = vmatmul.mubr.f32.gmra.mrb[84].mxu1 %v17061_v43  ;;  %v8757_v43 = vld [vmem:[#allocation2 + $0x2e8] sm:$0xff] }
 0x946   :  { %5637 = vmatprep.mubr.f32.mxu1 %v16981_v40  ;;  %v17067_v40 = vld [vmem:[#allocation185_spill] sm:$0xff] }
 0x949   :  { %5638 = vmatmul.mubr.f32.gmra.mrb[86].mxu1 %v17062_v18  ;;  %v17101_v18 = vld [vmem:[#allocation126_spill] sm:$0xff] }
 0x94a   :  { %5642 = vmatprep.mubr.f32.mxu1 %v16982_v45  ;;  %v17068_v45 = vld [vmem:[#allocation187_spill] sm:$0xff] }
 0x94d   :  { %5643 = vmatmul.mubr.f32.gmra.mrb[88].mxu1 %v17063_v36 }
 0x94e   :  { %5647 = vmatprep.mubr.f32.mxu1 %v16983_v34  ;;  %v17069_v34 = vld [vmem:[#allocation96_spill] sm:$0xff] }
 0x951   :  { %5648 = vmatmul.mubr.f32.gmra.mrb[90].mxu1 %v17064_v42  ;;  %v17102_v42 = vld [vmem:[#allocation119_spill] sm:$0xff] }
 0x952   :  { %5652 = vmatprep.mubr.f32.mxu1 %v16984_v26  ;;  %v17070_v26 = vld [vmem:[#allocation101_spill] sm:$0xff] }
 0x955   :  { %5653 = vmatmul.mubr.f32.gmra.mrb[92].mxu1 %v17065_v0 }
 0x956   :  { %5657 = vmatprep.mubr.f32.mxu1 %v16985_v33  ;;  %v17071_v33 = vld [vmem:[#allocation104_spill] sm:$0xff] }
 0x959   :  { %5658 = vmatmul.mubr.f32.gmra.mrb[94].mxu1 %v17066_v31 }
 0x95a   :  { %5662 = vmatprep.mubr.f32.mxu1 %v16986_v46  ;;  %v17072_v46 = vld [vmem:[#allocation107_spill] sm:$0xff] }
 0x95d   :  { %5663 = vmatmul.mubr.f32.gmra.mrb[96].mxu1 %v17067_v40  ;;  %v8758_v40 = vld [vmem:[#allocation2 + $0x2f0] sm:$0xff] }
 0x95e   :  { %5667 = vmatprep.mubr.f32.mxu1 %v16987_v50  ;;  %v17073_v50 = vld [vmem:[#allocation109_spill] sm:$0xff] }
 0x961   :  { %5668 = vmatmul.mubr.f32.gmra.mrb[98].mxu1 %v17068_v45  ;;  %v17103_v45 = vld [vmem:[#allocation129_spill] sm:$0xff] }
 0x962   :  { %5672 = vmatprep.mubr.f32.mxu1 %v16988_v16  ;;  %v17074_v16 = vld [vmem:[#allocation113_spill] sm:$0xff] }
 0x965   :  { %5673 = vmatmul.mubr.f32.gmra.mrb[100].mxu1 %v17069_v34 }
 0x966   :  { %5677 = vmatprep.mubr.f32.mxu1 %v16989_v53  ;;  %v17075_v53 = vld [vmem:[#allocation114_spill] sm:$0xff] }
 0x969   :  { %5678 = vmatmul.mubr.f32.gmra.mrb[102].mxu1 %v17070_v26  ;;  %v17104_v26 = vld [vmem:[#allocation118_spill] sm:$0xff] }
 0x96a   :  { %5682 = vmatprep.mubr.f32.mxu1 %v16990_v38  ;;  %v17076_v38 = vld [vmem:[#allocation72_spill] sm:$0xff] }
 0x96d   :  { %5683 = vmatmul.mubr.f32.gmra.mrb[104].mxu1 %v17071_v33 }
 0x96e   :  { %5687 = vmatprep.mubr.f32.mxu1 %v16991_v17  ;;  %v17077_v17 = vld [vmem:[#allocation68_spill] sm:$0xff] }
 0x971   :  { %5688 = vmatmul.mubr.f32.gmra.mrb[106].mxu1 %v17072_v46 }
 0x972   :  { %5692 = vmatprep.mubr.f32.mxu1 %v16992_v19  ;;  %v17078_v19 = vld [vmem:[#allocation70_spill] sm:$0xff] }
 0x975   :  { %5693 = vmatmul.mubr.f32.gmra.mrb[108].mxu1 %v17073_v50  ;;  %v8759_v50 = vld [vmem:[#allocation2 + $0x300] sm:$0xff] }
 0x976   :  { %5697 = vmatprep.mubr.f32.mxu1 %v16993_v20  ;;  %v17079_v20 = vld [vmem:[#allocation188_spill] sm:$0xff] }
 0x977   :  { %v14251_v44 = vrot.slane %v17079_v20, 1 }
 0x979   :  { %5698 = vmatmul.mubr.f32.gmra.mrb[110].mxu1 %v17074_v16  ;;  %v17105_v16 = vld [vmem:[#allocation132_spill] sm:$0xff] }
 0x97a   :  { %5702 = vmatprep.mubr.f32.mxu1 %v16994_v7 }
 0x97d   :  { %5703 = vmatmul.mubr.f32.gmra.mrb[112].mxu1 %v17075_v53 }
 0x97e   :  { %5707 = vmatprep.mubr.f32.mxu1 %v13376_v59  ;;  %v8748_v59 = vld [vmem:[#allocation2 + $0x1a8] sm:$0x3] }
 0x97f   :  { %v4194_v7 = vrot.slane %v8748_v59, 1  ;;  %v8760_v59 = vld [vmem:[#allocation2 + $0x308] sm:$0xff] }
 0x981   :  { %5708 = vmatmul.mubr.f32.gmra.mrb[114].mxu1 %v17076_v38  ;;  %v17106_v38 = vld [vmem:[#allocation122_spill] sm:$0xff] }
 0x982   :  { %5712 = vmatprep.mubr.f32.mxu1 %v13391_v9  ;;  %v4195_v9 = vsel %vm262_vm0, %v14251_v44, %v4194_v7  ;;  %v17107_v7 = vld [vmem:[#allocation135_spill] sm:$0xff] }
 0x985   :  { %5713 = vmatmul.mubr.f32.gmra.mrb[116].mxu1 %v17077_v17 }
 0x986   :  { %5717 = vmatprep.mubr.f32.mxu1 %v16998_v21  ;;  %v17080_v21 = vld [vmem:[#allocation190_spill] sm:$0xff] }
 0x989   :  { %5718 = vmatmul.mubr.f32.gmra.mrb[118].mxu1 %v17078_v19 }
 0x98a   :  { %5722 = vmatprep.mubr.f32.mxu1 %v14090_v10  ;;  %v17083_v10 = vld [vmem:[#allocation87_spill] sm:$0xff] }
 0x98d   :  { %5723 = vmatmul.mubr.f32.gmra.mrb[120].mxu1 %v16996_v24  ;;  %v17081_v24 = vld [vmem:[#allocation191_spill] sm:$0xff] }
 0x98e   :  { %5727 = vmatprep.mubr.f32.mxu1 %v14095_v30  ;;  %v17084_v30 = vld [vmem:[#allocation85_spill] sm:$0xff] }
 0x991   :  { %5728 = vmatmul.mubr.f32.gmra.mrb[122].mxu1 %v16997_v57  ;;  %v17082_v57 = vld [vmem:[#allocation192_spill] sm:$0xff] }
 0x992   :  { %5732 = vmatprep.mubr.f32.mxu1 %v14251_v44 }
 0x995   :  { %5733 = vmatmul.mubr.f32.gmra.mrb[124].mxu1 %v17079_v20 }
 0x996   :  { %5737 = vmatprep.mubr.f32.mxu1 %v4195_v9 }
 0x999   :  { %5738 = vmatmul.mubr.f32.gmra.mrb[126].mxu1 %v17079_v20 }
 0x99a   :  { %5742 = vmatprep.mubr.f32.mxu1 %v17004_v22  ;;  %v17085_v22 = vld [vmem:[#allocation193_spill] sm:$0xff] }
 0x99d   :  { %5743 = vmatmul.mubr.f32.gmra.mrb[128].mxu1 %v17080_v21  ;;  %v17108_v21 = vld [vmem:[#allocation121_spill] sm:$0xff] }
 0x99e   :  { %5747 = vmatprep.mubr.f32.mxu1 %v17005_v35  ;;  %v17086_v35 = vld [vmem:[#allocation194_spill] sm:$0xff] }
 0x9a1   :  { %5748 = vmatmul.mubr.f32.gmra.mrb[130].mxu1 %v17081_v24 }
 0x9a2   :  { %5752 = vmatprep.mubr.f32.mxu1 %v17007_v29  ;;  %v17087_v29 = vld [vmem:[#allocation195_spill] sm:$0xff] }
 0x9a5   :  { %5753 = vmatmul.mubr.f32.gmra.mrb[132].mxu1 %v17082_v57 }
 0x9a6   :  { %5757 = vmatprep.mubr.f32.mxu1 %v17009_v39  ;;  %v17088_v39 = vld [vmem:[#allocation196_spill] sm:$0xff] }
 0x9a9   :  { %5758 = vmatmul.mubr.f32.gmra.mrb[134].mxu1 %v17083_v10  ;;  %v8761_v10 = vld [vmem:[#allocation2 + $0x318] sm:$0xff] }
 0x9aa   :  { %5762 = vmatprep.mubr.f32.mxu1 %v17011_v41  ;;  %v17089_v41 = vld [vmem:[#allocation197_spill] sm:$0xff] }
 0x9ad   :  { %5763 = vmatmul.mubr.f32.gmra.mrb[136].mxu1 %v17084_v30 }
 0x9ae   :  { %5767 = vmatprep.mubr.f32.mxu1 %v17013_v47  ;;  %v17090_v47 = vld [vmem:[#allocation198_spill] sm:$0xff] }
 0x9b1   :  { %5768 = vmatmul.mubr.f32.gmra.mrb[138].mxu1 %v17085_v22  ;;  %v17109_v22 = vld [vmem:[#allocation125_spill] sm:$0xff] }
 0x9b2   :  { %5772 = vmatprep.mubr.f32.mxu1 %v17015_v2  ;;  %v17091_v2 = vld [vmem:[#allocation105_spill] sm:$0xff] }
 0x9b5   :  { %5773 = vmatmul.mubr.f32.gmra.mrb[140].mxu1 %v17086_v35 }
 0x9b6   :  { %5777 = vmatprep.mubr.f32.mxu1 %v17017_v60  ;;  %v17092_v60 = vld [vmem:[#allocation199_spill] sm:$0xff] }
 0x9b9   :  { %5778 = vmatmul.mubr.f32.gmra.mrb[142].mxu1 %v17087_v29 }
 0x9ba   :  { %5782 = vmatprep.mubr.f32.mxu1 %v17018_v11  ;;  %v17093_v11 = vld [vmem:[#allocation112_spill] sm:$0xff] }
 0x9bd   :  { %5783 = vmatmul.mubr.f32.gmra.mrb[144].mxu1 %v17088_v39  ;;  %v8762_v39 = vld [vmem:[#allocation2 + $0x320] sm:$0xff] }
 0x9be   :  { %5787 = vmatprep.mubr.f32.mxu1 %v17020_v58  ;;  %v8749_v58 = vld [vmem:[#allocation2 + $0x288] sm:$0xff] }
 0x9c1   :  { %5788 = vmatmul.mubr.f32.gmra.mrb[146].mxu1 %v17089_v41 }
 0x9c2   :  { %5792 = vmatprep.mubr.f32.mxu1 %v17021_v27  ;;  %v8750_v27 = vld [vmem:[#allocation2 + $0x290] sm:$0xff] }
 0x9c5   :  { %5793 = vmatmul.mubr.f32.gmra.mrb[148].mxu1 %v17090_v47  ;;  %v3606_v47 = vld [vmem:[#allocation2 + $0x358] sm:$0x3] }
 0x9c6   :  { %5797 = vmatprep.mubr.f32.mxu1 %v17022_v13  ;;  %v8751_v13 = vld [vmem:[#allocation2 + $0x2a0] sm:$0xff] }
 0x9c9   :  { %5798 = vmatmul.mubr.f32.gmra.mrb[150].mxu1 %v17091_v2  ;;  %v17110_v2 = vld [vmem:[#allocation124_spill] sm:$0xff] }
 0x9ca   :  { %5802 = vmatprep.mubr.f32.mxu1 %v17023_v12  ;;  %v8752_v12 = vld [vmem:[#allocation2 + $0x2a8] sm:$0xff] }
 0x9cd   :  { %5803 = vmatmul.mubr.f32.gmra.mrb[152].mxu1 %v17092_v60 }
 0x9ce   :  { %5807 = vmatprep.mubr.f32.mxu1 %v17024_v37  ;;  %v8753_v37 = vld [vmem:[#allocation2 + $0x2b8] sm:$0xff] }
 0x9d1   :  { %5808 = vmatmul.mubr.f32.gmra.mrb[154].mxu1 %v17093_v11 }
 0x9d2   :  { %5812 = vmatprep.mubr.f32.mxu1 %v17025_v49  ;;  %v8754_v49 = vld [vmem:[#allocation2 + $0x2c0] sm:$0xff] }
 0x9d5   :  { %5813 = vmatmul.mubr.f32.gmra.mrb[156].mxu1 %v8749_v58 }
 0x9d6   :  { %5817 = vmatprep.mubr.f32.mxu1 %v17026_v6  ;;  %v8755_v6 = vld [vmem:[#allocation2 + $0x2d0] sm:$0xff] }
 0x9d9   :  { %5818 = vmatmul.mubr.f32.gmra.mrb[158].mxu1 %v8750_v27  ;;  %v17111_v27 = vld [vmem:[#allocation128_spill] sm:$0xff] }
 0x9da   :  { %5822 = vmatprep.mubr.f32.mxu1 %v17027_v15 }
 0x9dd   :  { %5823 = vmatmul.mubr.f32.gmra.mrb[160].mxu1 %v8751_v13 }
 0x9de   :  { %5827 = vmatprep.mubr.f32.mxu1 %v17028_v1 }
 0x9e1   :  { %5828 = vmatmul.mubr.f32.gmra.mrb[162].mxu1 %v8752_v12 }
 0x9e2   :  { %5832 = vmatprep.mubr.f32.mxu1 %v17094_v61  ;;  %v17112_v61 = vld [vmem:[#allocation71_spill] sm:$0xff] }
 0x9e5   :  { %5833 = vmatmul.mubr.f32.gmra.mrb[164].mxu1 %v8753_v37 }
 0x9e6   :  { %5837 = vmatprep.mubr.f32.mxu1 %v17095_v32  ;;  %v17113_v32 = vld [vmem:[#allocation127_spill] sm:$0xff] }
 0x9e9   :  { %5838 = vmatmul.mubr.f32.gmra.mrb[166].mxu1 %v8754_v49 }
 0x9ea   :  { %5842 = vmatprep.mubr.f32.mxu1 %v17096_v52  ;;  %v17114_v52 = vld [vmem:[#allocation131_spill] sm:$0xff] }
 0x9ed   :  { %5843 = vmatmul.mubr.f32.gmra.mrb[168].mxu1 %v8755_v6 }
 0x9ee   :  { %5847 = vmatprep.mubr.f32.mxu1 %v17097_v4 }
 0x9f0   :  { %v5584_v15 = vpop.f32.mrb[64].mxu1 }
 0x9f1   :  { %v14298_v8 = vadd.f32 %v17098_v5, %v5584_v15  ;;  %v5586_v1 = vpop.f32.mrb[65].mxu1  ;;  %5848 = vmatmul.mubr.f32.gmra.mrb[170].mxu1 %v8756_v55  ;;  %v17115_v15 = vld [vmem:[#allocation49_spill] sm:$0xff] }
 0x9f2   :  { %5852 = vmatprep.mubr.f32.mxu1 %v17099_v48  ;;  %v17116_v1 = vld [vmem:[#allocation130_spill] sm:$0xff]  ;;  %v17117_v48 = vld [vmem:[#allocation56_spill] sm:$0xff] }
 0x9f4   :  { %v5589_v3 = vpop.f32.mrb[66].mxu1 }
 0x9f5   :  { %v14302_v63 = vadd.f32 %v17100_v25, %v5589_v3  ;;  %v5591_v51 = vpop.f32.mrb[67].mxu1  ;;  %5853 = vmatmul.mubr.f32.gmra.mrb[172].mxu1 %v8757_v43  ;;  %v17118_v3 = vld [vmem:[#allocation66_spill] sm:$0xff] }
 0x9f6   :  { %5857 = vmatprep.mubr.f32.mxu1 %v17101_v18  ;;  %v17119_v51 = vld [vmem:[#allocation134_spill] sm:$0xff] }
 0x9f8   :  { %v5594_v36 = vpop.f32.mrb[68].mxu1 }
 0x9f9   :  { %v14306_v0 = vadd.f32 %v17102_v42, %v5594_v36  ;;  %v5596_v31 = vpop.f32.mrb[69].mxu1  ;;  %5858 = vmatmul.mubr.f32.gmra.mrb[174].mxu1 %v8758_v40  ;;  %v17120_v36 = vld [vmem:[#allocation79_spill] sm:$0xff] }
 0x9fa   :  { %5862 = vmatprep.mubr.f32.mxu1 %v17103_v45  ;;  %v17121_v31 = vld [vmem:[#allocation133_spill] sm:$0xff] }
 0x9fc   :  { %v5599_v34 = vpop.f32.mrb[70].mxu1 }
 0x9fd   :  { %v14310_v33 = vadd.f32 %v17104_v26, %v5599_v34  ;;  %v5601_v46 = vpop.f32.mrb[71].mxu1  ;;  %5863 = vmatmul.mubr.f32.gmra.mrb[176].mxu1 %v8759_v50  ;;  %v17122_v34 = vld [vmem:[#allocation189_spill] sm:$0xff] }
 0x9fe   :  { %5867 = vmatprep.mubr.f32.mxu1 %v17105_v16  ;;  %v17123_v50 = vld [vmem:[#allocation137_spill] sm:$0xff] }
 0xa00   :  { %v5604_v53 = vpop.f32.mrb[72].mxu1 }
 0xa01   :  { %v14314_v17 = vadd.f32 %v17106_v38, %v5604_v53  ;;  %v5606_v19 = vpop.f32.mrb[73].mxu1  ;;  %5868 = vmatmul.mubr.f32.gmra.mrb[178].mxu1 %v8760_v59  ;;  %v17124_v38 = vld [vmem:[#allocation136_spill] sm:$0xff] }
 0xa02   :  { %5872 = vmatprep.mubr.f32.mxu1 %v17107_v7 }
 0xa04   :  { %v5609_v9 = vpop.f32.mrb[74].mxu1 }
 0xa05   :  { %v14318_v24 = vadd.f32 %v17108_v21, %v5609_v9  ;;  %v5611_v57 = vpop.f32.mrb[75].mxu1  ;;  %5873 = vmatmul.mubr.f32.gmra.mrb[180].mxu1 %v8761_v10  ;;  %v17125_v9 = vld [vmem:[#allocation140_spill] sm:$0xff]  ;;  %v17126_v10 = vld [vmem:[#allocation139_spill] sm:$0xff] }
 0xa06   :  { %5877 = vmatprep.mubr.f32.mxu1 %v17043_v56  ;;  %v4199_v56 = vrot.slane %v3606_v47, 1 }
 0xa08   :  { %v5614_v30 = vpop.f32.mrb[76].mxu1 }
 0xa09   :  { %v14322_v35 = vadd.f32 %v17109_v22, %v5614_v30  ;;  %v5616_v29 = vpop.f32.mrb[77].mxu1  ;;  %5878 = vmatmul.mubr.f32.gmra.mrb[182].mxu1 %v8762_v39  ;;  %v17127_v39 = vld [vmem:[#allocation142_spill] sm:$0xff] }
 0xa0a   :  { %5882 = vmatprep.mubr.f32.mxu1 %v14167_v54  ;;  %v4200_v54 = vsel %vm262_vm0, %v14251_v44, %v4199_v56 }
 0xa0c   :  { %v5619_v41 = vpop.f32.mrb[78].mxu1 }
 0xa0d   :  { %v14326_v60 = vadd.f32 %v17110_v2, %v5619_v41  ;;  %v5621_v11 = vpop.f32.mrb[79].mxu1  ;;  %5883 = vmatmul.mubr.f32.gmra.mrb[184].mxu1 %v17041_v62 }
 0xa0e   :  { %5887 = vmatprep.mubr.f32.mxu1 %v14175_v14  ;;  %v17128_v11 = vld [vmem:[#allocation141_spill] sm:$0xff] }
 0xa10   :  { %v5624_v58 = vpop.f32.mrb[80].mxu1 }
 0xa11   :  { %v14331_v13 = vadd.f32 %v17111_v27, %v5624_v58  ;;  %v5626_v12 = vpop.f32.mrb[81].mxu1  ;;  %5888 = vmatmul.mubr.f32.gmra.mrb[186].mxu1 %v17112_v61 }
 0xa12   :  { %5892 = vmatprep.mubr.f32.mxu1 %v14251_v44  ;;  %v17129_v12 = vld [vmem:[#allocation144_spill] sm:$0xff] }
 0xa14   :  { %v5629_v37 = vpop.f32.mrb[82].mxu1 }
 0xa15   :  { %v14338_v49 = vadd.f32 %v17113_v32, %v5629_v37  ;;  %v5631_v62 = vpop.f32.mrb[83].mxu1  ;;  %5893 = vmatmul.mubr.f32.gmra.mrb[188].mxu1 %v17079_v20  ;;  %v17130_v32 = vld [vmem:[#allocation143_spill] sm:$0xff] }
 0xa16   :  { %5897 = vmatprep.mubr.f32.mxu1 %v4200_v54 }
 0xa18   :  { %v5634_v14 = vpop.f32.mrb[84].mxu1 }
 0xa19   :  { %v14342_v6 = vadd.f32 %v17114_v52, %v5634_v14  ;;  %v5636_v4 = vpop.f32.mrb[85].mxu1  ;;  %5898 = vmatmul.mubr.f32.gmra.mrb[190].mxu1 %v17079_v20  ;;  %v4213_v20 = vrot.slane %v3606_v47, 2 }
 0xa1a   :  { %7381 = vmatprep.mubr.f32.mxu1 %v17115_v15  ;;  %v17131_v4 = vld [vmem:[#allocation147_spill] sm:$0xff] }
 0xa1b   :  { %v4214_v26 = vsel %vm487_vm1, %v17122_v34, %v4213_v20 }
 0xa1c   :  { %v5639_v5 = vpop.f32.mrb[86].mxu1 }
 0xa1d   :  { %v14347_v44 = vadd.f32 %v17116_v1, %v5639_v5  ;;  %v5641_v55 = vpop.f32.mrb[87].mxu1  ;;  %7382 = vmatmul.mubr.f32.vlgmr.msra.gmra.mrb[192].mxu1 %v17117_v48 }
 0xa1e   :  { %7384 = vmatprep.mubr.f32.mxu1 %v17118_v3  ;;  %v17132_v55 = vld [vmem:[#allocation146_spill] sm:$0xff] }
 0xa20   :  { %v5644_v25 = vpop.f32.mrb[88].mxu1 }
 0xa21   :  { %v14352_v43 = vadd.f32 %v17119_v51, %v5644_v25  ;;  %v5646_v18 = vpop.f32.mrb[89].mxu1  ;;  %7385 = vmatmul.mubr.f32.gmra.mrb[194].mxu1 %v17120_v36  ;;  %v17133_v51 = vld [vmem:[#allocation150_spill] sm:$0xff] }
 0xa22   :  { %7387 = vmatprep.mubr.f32.mxu1 %v14163_v28 }
 0xa24   :  { %v5649_v42 = vpop.f32.mrb[90].mxu1 }
 0xa25   :  { %v14357_v40 = vadd.f32 %v17121_v31, %v5649_v42  ;;  %v5651_v45 = vpop.f32.mrb[91].mxu1  ;;  %7388 = vmatmul.mubr.f32.gmra.mrb[196].mxu1 %v14171_v23  ;;  %v17135_v42 = vld [vmem:[#allocation149_spill] sm:$0xff] }
 0xa26   :  { %7390 = vmatprep.mubr.f32.mxu1 %v17122_v34 }
 0xa28   :  { %v5654_v46 = vpop.f32.mrb[92].mxu1 }
 0xa29   :  { %v14364_v16 = vadd.f32 %v17123_v50, %v5654_v46  ;;  %v5656_v53 = vpop.f32.mrb[93].mxu1  ;;  %7391 = vmatmul.mubr.f32.gmra.mrb[198].mxu1 %v4214_v26  ;;  %v17136_v26 = vld [vmem:[#allocation153_spill] sm:$0xff] }
 0xa2c   :  { %v5659_v28 = vpop.f32.mrb[94].mxu1 }
 0xa2d   :  { %v14367_v19 = vadd.f32 %v17124_v38, %v5659_v28  ;;  %v5661_v59 = vpop.f32.mrb[95].mxu1  ;;  %v17138_v28 = vld [vmem:[#allocation152_spill] sm:$0xff] }
 0xa30   :  { %v5664_v7 = vpop.f32.mrb[96].mxu1 }
 0xa31   :  { %v14370_v21 = vadd.f32 %v17125_v9, %v5664_v7  ;;  %v5666_v23 = vpop.f32.mrb[97].mxu1  ;;  %v17139_v9 = vld [vmem:[#allocation156_spill] sm:$0xff] }
 0xa34   :  { %v5669_v57 = vpop.f32.mrb[98].mxu1 }
 0xa35   :  { %v14373_v30 = vadd.f32 %v17126_v10, %v5669_v57  ;;  %v5671_v22 = vpop.f32.mrb[99].mxu1 }
 0xa36   :  { %v17141_v22 = vld [vmem:[#allocation155_spill] sm:$0xff] }
 0xa38   :  { %v5674_v29 = vpop.f32.mrb[100].mxu1 }
 0xa39   :  { %v14376_v41 = vadd.f32 %v17127_v39, %v5674_v29  ;;  %v5676_v47 = vpop.f32.mrb[101].mxu1 }
 0xa3c   :  { %v5679_v2 = vpop.f32.mrb[102].mxu1 }
 0xa3d   :  { %v14379_v56 = vadd.f32 %v17128_v11, %v5679_v2  ;;  %v5681_v58 = vpop.f32.mrb[103].mxu1  ;;  %v17142_v2 = vld [vmem:[#allocation159_spill] sm:$0xff] }
 0xa40   :  { %v5684_v27 = vpop.f32.mrb[104].mxu1 }
 0xa41   :  { %v14382_v61 = vadd.f32 %v17129_v12, %v5684_v27  ;;  %v5686_v54 = vpop.f32.mrb[105].mxu1  ;;  %v17144_v12 = vld [vmem:[#allocation158_spill] sm:$0xff] }
 0xa44   :  { %v5689_v37 = vpop.f32.mrb[106].mxu1 }
 0xa45   :  { %v14385_v62 = vadd.f32 %v17130_v32, %v5689_v37  ;;  %v5691_v14 = vpop.f32.mrb[107].mxu1 }
 0xa46   :  { %v17145_v14 = vld [vmem:[#allocation162_spill] sm:$0xff] }
 0xa48   :  { %v5694_v52 = vpop.f32.mrb[108].mxu1 }
 0xa49   :  { %v14388_v15 = vadd.f32 %v17131_v4, %v5694_v52  ;;  %v5696_v5 = vpop.f32.mrb[109].mxu1 }
 0xa4c   :  { %v5699_v1 = vpop.f32.mrb[110].mxu1 }
 0xa4d   :  { %v14391_v48 = vadd.f32 %v17132_v55, %v5699_v1  ;;  %v5701_v3 = vpop.f32.mrb[111].mxu1  ;;  %v17147_v1 = vld [vmem:[#allocation161_spill] sm:$0xff] }
 0xa50   :  { %v5704_v25 = vpop.f32.mrb[112].mxu1 }
 0xa51   :  { %v14394_v18 = vadd.f32 %v17133_v51, %v5704_v25  ;;  %v5706_v36 = vpop.f32.mrb[113].mxu1  ;;  %v17148_v51 = vld [vmem:[#allocation165_spill] sm:$0xff] }
 0xa53   :  { %17134 = vst [vmem:[#allocation81_spill] sm:$0xff] %v14394_v18 }
 0xa54   :  { %v5709_v20 = vpop.f32.mrb[114].mxu1 }
 0xa55   :  { %v14397_v31 = vadd.f32 %v17135_v42, %v5709_v20  ;;  %v5711_v45 = vpop.f32.mrb[115].mxu1 }
 0xa56   :  { %v17150_v45 = vld [vmem:[#allocation164_spill] sm:$0xff] }
 0xa58   :  { %v5714_v34 = vpop.f32.mrb[116].mxu1 }
 0xa59   :  { %v14400_v46 = vadd.f32 %v17136_v26, %v5714_v34  ;;  %v5716_v50 = vpop.f32.mrb[117].mxu1 }
 0xa5b   :  { %17137 = vst [vmem:[#allocation46_spill] sm:$0xff] %v14400_v46 }
 0xa5c   :  { %v5719_v53 = vpop.f32.mrb[118].mxu1 }
 0xa5d   :  { %v14403_v38 = vadd.f32 %v17138_v28, %v5719_v53  ;;  %v5721_v59 = vpop.f32.mrb[119].mxu1  ;;  %v17151_v53 = vld [vmem:[#allocation168_spill] sm:$0xff] }
 0xa60   :  { %v5724_v7 = vpop.f32.mrb[120].mxu1 }
 0xa61   :  { %v14406_v23 = vadd.f32 %v17139_v9, %v5724_v7  ;;  %v5726_v57 = vpop.f32.mrb[121].mxu1  ;;  %v17153_v9 = vld [vmem:[#allocation167_spill] sm:$0xff] }
 0xa63   :  { %17140 = vst [vmem:[#allocation52_spill] sm:$0xff] %v14406_v23 }
 0xa64   :  { %v5729_v10 = vpop.f32.mrb[122].mxu1 }
 0xa65   :  { %v14409_v29 = vadd.f32 %v17141_v22, %v5729_v10  ;;  %v5731_v39 = vpop.f32.mrb[123].mxu1  ;;  %v6290_v22 = vadd.f32 %v14302_v63, %v14298_v8 }
 0xa67   :  { %v6291_v39 = vadd.f32 %v6290_v22, %v14306_v0 }
 0xa68   :  { %v5734_v47 = vpop.f32.mrb[124].mxu1 }
 0xa69   :  { %v14412_v11 = vadd.f32 %v17142_v2, %v5734_v47  ;;  %v5736_v58 = vpop.f32.mrb[125].mxu1  ;;  %v17154_v2 = vld [vmem:[#allocation31_spill] sm:$0xff] }
 0xa6b   :  { %17143 = vst [vmem:[#allocation27_spill] sm:$0xff] %v14412_v11 }
 0xa6c   :  { %v5739_v27 = vpop.f32.mrb[126].mxu1 }
 0xa6d   :  { %v14415_v54 = vadd.f32 %v17144_v12, %v5739_v27  ;;  %v5741_v37 = vpop.f32.mrb[127].mxu1  ;;  %v6292_v12 = vadd.f32 %v6291_v39, %v14310_v33  ;;  %v17160_v39 = vld [vmem:[#allocation34_spill] sm:$0xff] }
 0xa6f   :  { %v6293_v37 = vadd.f32 %v6292_v12, %v14314_v17 }
 0xa70   :  { %v5744_v32 = vpop.f32.mrb[128].mxu1 }
 0xa71   :  { %v14418_v52 = vadd.f32 %v17145_v14, %v5744_v32  ;;  %v5746_v4 = vpop.f32.mrb[129].mxu1  ;;  %v17155_v14 = vld [vmem:[#allocation170_spill] sm:$0xff] }
 0xa73   :  { %17146 = vst [vmem:[#allocation28_spill] sm:$0xff] %v14418_v52 }
 0xa74   :  { %v5749_v5 = vpop.f32.mrb[130].mxu1 }
 0xa75   :  { %v14421_v55 = vadd.f32 %v17147_v1, %v5749_v5  ;;  %v5751_v3 = vpop.f32.mrb[131].mxu1  ;;  %v6294_v1 = vadd.f32 %v6293_v37, %v14318_v24 }
 0xa77   :  { %v6295_v3 = vadd.f32 %v6294_v1, %v14322_v35 }
 0xa78   :  { %v5754_v25 = vpop.f32.mrb[132].mxu1 }
 0xa79   :  { %v14424_v36 = vadd.f32 %v17148_v51, %v5754_v25  ;;  %v5756_v20 = vpop.f32.mrb[133].mxu1  ;;  %v17157_v51 = vld [vmem:[#allocation32_spill] sm:$0xff] }
 0xa7b   :  { %17149 = vst [vmem:[#allocation29_spill] sm:$0xff] %v14424_v36 }
 0xa7c   :  { %v5759_v42 = vpop.f32.mrb[134].mxu1 }
 0xa7d   :  { %v14427_v34 = vadd.f32 %v17150_v45, %v5759_v42  ;;  %v5761_v26 = vpop.f32.mrb[135].mxu1  ;;  %v6296_v45 = vadd.f32 %v6295_v3, %v14326_v60 }
 0xa7f   :  { %v6297_v26 = vadd.f32 %v6296_v45, %v14331_v13 }
 0xa80   :  { %v5764_v50 = vpop.f32.mrb[136].mxu1 }
 0xa81   :  { %v14430_v28 = vadd.f32 %v17151_v53, %v5764_v50  ;;  %v5766_v59 = vpop.f32.mrb[137].mxu1  ;;  %v17158_v53 = vld [vmem:[#allocation172_spill] sm:$0xff] }
 0xa83   :  { %17152 = vst [vmem:[#allocation30_spill] sm:$0xff] %v14430_v28 }
 0xa84   :  { %v5769_v7 = vpop.f32.mrb[138].mxu1 }
 0xa85   :  { %v14433_v57 = vadd.f32 %v17153_v9, %v5769_v7  ;;  %v5771_v10 = vpop.f32.mrb[139].mxu1  ;;  %v6298_v9 = vadd.f32 %v6297_v26, %v14338_v49 }
 0xa87   :  { %v6299_v10 = vadd.f32 %v6298_v9, %v14342_v6 }
 0xa88   :  { %v5774_v47 = vpop.f32.mrb[140].mxu1 }
 0xa89   :  { %v14439_v58 = vadd.f32 %v17154_v2, %v5774_v47  ;;  %v5776_v27 = vpop.f32.mrb[141].mxu1 }
 0xa8a   :  { %v6300_v27 = vadd.f32 %v6299_v10, %v14347_v44 }
 0xa8c   :  { %v5779_v32 = vpop.f32.mrb[142].mxu1  ;;  %v6301_v12 = vadd.f32 %v6300_v27, %v14352_v43  ;;  %v17168_v27 = vld [vmem:[#allocation37_spill] sm:$0xff] }
 0xa8d   :  { %v14444_v4 = vadd.f32 %v17155_v14, %v5779_v32  ;;  %v5781_v5 = vpop.f32.mrb[143].mxu1  ;;  %v17162_v32 = vld [vmem:[#allocation174_spill] sm:$0xff] }
 0xa8e   :  { %v6302_v1 = vadd.f32 %v6301_v12, %v14357_v40 }
 0xa8f   :  { %17156 = vst [vmem:[#allocation33_spill] sm:$0xff] %v14444_v4 }
 0xa90   :  { %v5784_v25 = vpop.f32.mrb[144].mxu1  ;;  %v6303_v3 = vadd.f32 %v6302_v1, %v14364_v16 }
 0xa91   :  { %v14449_v20 = vadd.f32 %v17157_v51, %v5784_v25  ;;  %v5786_v42 = vpop.f32.mrb[145].mxu1  ;;  %v17164_v51 = vld [vmem:[#allocation35_spill] sm:$0xff] }
 0xa92   :  { %v6304_v26 = vadd.f32 %v6303_v3, %v14367_v19  ;;  %v17170_v3 = vld [vmem:[#allocation178_spill] sm:$0xff] }
 0xa94   :  { %v5789_v50 = vpop.f32.mrb[146].mxu1 }
 0xa95   :  { %v14454_v59 = vadd.f32 %v17158_v53, %v5789_v50  ;;  %v5791_v7 = vpop.f32.mrb[147].mxu1  ;;  %v6305_v50 = vadd.f32 %v6304_v26, %v14370_v21 }
 0xa96   :  { %v17166_v7 = vld [vmem:[#allocation176_spill] sm:$0xff] }
 0xa97   :  { %17159 = vst [vmem:[#allocation36_spill] sm:$0xff] %v14454_v59 }
 0xa98   :  { %v5794_v22 = vpop.f32.mrb[148].mxu1 }
 0xa99   :  { %v14459_v47 = vadd.f32 %v17160_v39, %v5794_v22  ;;  %v5796_v2 = vpop.f32.mrb[149].mxu1  ;;  %v6306_v22 = vadd.f32 %v6305_v50, %v14373_v30 }
 0xa9b   :  { %17161 = vst [vmem:[#allocation39_spill] sm:$0xff] %v14459_v47  ;;  %v6307_v39 = vadd.f32 %v6306_v22, %v14376_v41 }
 0xa9c   :  { %v5799_v37 = vpop.f32.mrb[150].mxu1 }
 0xa9d   :  { %v14464_v14 = vadd.f32 %v17162_v32, %v5799_v37  ;;  %v5801_v5 = vpop.f32.mrb[151].mxu1  ;;  %v6308_v32 = vadd.f32 %v6307_v39, %v14379_v56 }
 0xa9f   :  { %17163 = vst [vmem:[#allocation91_spill] sm:$0xff] %v14464_v14  ;;  %v6309_v5 = vadd.f32 %v6308_v32, %v14382_v61 }
 0xaa0   :  { %v5804_v25 = vpop.f32.mrb[152].mxu1 }
 0xaa1   :  { %v14469_v42 = vadd.f32 %v17164_v51, %v5804_v25  ;;  %v5806_v45 = vpop.f32.mrb[153].mxu1 }
 0xaa2   :  { %v6310_v45 = vadd.f32 %v6309_v5, %v14385_v62 }
 0xaa3   :  { %17165 = vst [vmem:[#allocation99_spill] sm:$0xff] %v14469_v42 }
 0xaa4   :  { %v5809_v53 = vpop.f32.mrb[154].mxu1  ;;  %v6311_v26 = vadd.f32 %v6310_v45, %v14388_v15 }
 0xaa5   :  { %v14474_v9 = vadd.f32 %v17166_v7, %v5809_v53  ;;  %v5811_v10 = vpop.f32.mrb[155].mxu1  ;;  %v17172_v53 = vld [vmem:[#allocation38_spill] sm:$0xff] }
 0xaa6   :  { %v6312_v22 = vadd.f32 %v6311_v26, %v14391_v48 }
 0xaa7   :  { %17167 = vst [vmem:[#allocation106_spill] sm:$0xff] %v14474_v9 }
 0xaa8   :  { %v5814_v2 = vpop.f32.mrb[156].mxu1  ;;  %v6313_v39 = vadd.f32 %v6312_v22, %v14394_v18  ;;  %v17178_v22 = vld [vmem:[#allocation182_spill] sm:$0xff] }
 0xaa9   :  { %v14479_v12 = vadd.f32 %v17168_v27, %v5814_v2  ;;  %v5816_v37 = vpop.f32.mrb[157].mxu1  ;;  %v17174_v27 = vld [vmem:[#allocation180_spill] sm:$0xff] }
 0xaab   :  { %17169 = vst [vmem:[#allocation111_spill] sm:$0xff] %v14479_v12 }
 0xaac   :  { %v5819_v1 = vpop.f32.mrb[158].mxu1 }
 0xaad   :  { %v14484_v25 = vadd.f32 %v17170_v3, %v5819_v1  ;;  %v5821_v51 = vpop.f32.mrb[159].mxu1  ;;  %v6314_v1 = vadd.f32 %v6313_v39, %v14397_v31 }
 0xaae   :  { %v17176_v51 = vld [vmem:[#allocation40_spill] sm:$0xff] }
 0xaaf   :  { %17171 = vst [vmem:[#allocation65_spill] sm:$0xff] %v14484_v25  ;;  %v6315_v5 = vadd.f32 %v6314_v1, %v14400_v46  ;;  %v17180_v1 = vld [vmem:[#allocation89_spill] sm:$0xff] }
 0xab0   :  { %v5824_v50 = vpop.f32.mrb[160].mxu1 }
 0xab1   :  { %v14489_v7 = vadd.f32 %v17172_v53, %v5824_v50  ;;  %v5826_v10 = vpop.f32.mrb[161].mxu1  ;;  %v6316_v53 = vadd.f32 %v6315_v5, %v14403_v38 }
 0xab3   :  { %17173 = vst [vmem:[#allocation73_spill] sm:$0xff] %v14489_v7  ;;  %v6317_v26 = vadd.f32 %v6316_v53, %v14406_v23  ;;  %v17182_v53 = vld [vmem:[#allocation184_spill] sm:$0xff] }
 0xab4   :  { %v5829_v2 = vpop.f32.mrb[162].mxu1 }
 0xab5   :  { %v14494_v37 = vadd.f32 %v17174_v27, %v5829_v2  ;;  %v5831_v32 = vpop.f32.mrb[163].mxu1  ;;  %v6318_v27 = vadd.f32 %v6317_v26, %v14409_v29 }
 0xab7   :  { %17175 = vst [vmem:[#allocation77_spill] sm:$0xff] %v14494_v37  ;;  %v6319_v39 = vadd.f32 %v6318_v27, %v14412_v11  ;;  %v17184_v27 = vld [vmem:[#allocation94_spill] sm:$0xff] }
 0xab8   :  { %v5834_v3 = vpop.f32.mrb[164].mxu1 }
 0xab9   :  { %v14499_v45 = vadd.f32 %v17176_v51, %v5834_v3  ;;  %v5836_v50 = vpop.f32.mrb[165].mxu1  ;;  %v6320_v51 = vadd.f32 %v6319_v39, %v14415_v54 }
 0xabb   :  { %17177 = vst [vmem:[#allocation82_spill] sm:$0xff] %v14499_v45  ;;  %v6321_v5 = vadd.f32 %v6320_v51, %v14418_v52  ;;  %v17186_v51 = vld [vmem:[#allocation186_spill] sm:$0xff] }
 0xabc   :  { %v5839_v10 = vpop.f32.mrb[166].mxu1 }
 0xabd   :  { %v14504_v18 = vadd.f32 %v17178_v22, %v5839_v10  ;;  %v5841_v2 = vpop.f32.mrb[167].mxu1  ;;  %v6322_v22 = vadd.f32 %v6321_v5, %v14421_v55 }
 0xabf   :  { %17179 = vst [vmem:[#allocation67_spill] sm:$0xff] %v14504_v18  ;;  %v6323_v26 = vadd.f32 %v6322_v22, %v14424_v36 }
 0xac0   :  { %v5844_v32 = vpop.f32.mrb[168].mxu1 }
 0xac1   :  { %v14509_v46 = vadd.f32 %v17180_v1, %v5844_v32  ;;  %v5846_v3 = vpop.f32.mrb[169].mxu1  ;;  %v6324_v1 = vadd.f32 %v6323_v26, %v14427_v34 }
 0xac3   :  { %17181 = vst [vmem:[#allocation83_spill] sm:$0xff] %v14509_v46  ;;  %v6325_v39 = vadd.f32 %v6324_v1, %v14430_v28 }
 0xac4   :  { %v5849_v50 = vpop.f32.mrb[170].mxu1 }
 0xac5   :  { %v14514_v23 = vadd.f32 %v17182_v53, %v5849_v50  ;;  %v5851_v10 = vpop.f32.mrb[171].mxu1  ;;  %v6326_v53 = vadd.f32 %v6325_v39, %v14433_v57 }
 0xac7   :  { %17183 = vst [vmem:[#allocation88_spill] sm:$0xff] %v14514_v23  ;;  %v6327_v5 = vadd.f32 %v6326_v53, %v14439_v58 }
 0xac8   :  { %v5854_v2 = vpop.f32.mrb[172].mxu1 }
 0xac9   :  { %v14519_v11 = vadd.f32 %v17184_v27, %v5854_v2  ;;  %v5856_v32 = vpop.f32.mrb[173].mxu1  ;;  %v6328_v36 = vadd.f32 %v6327_v5, %v14444_v4 }
 0xacb   :  { %17185 = vst [vmem:[#allocation93_spill] sm:$0xff] %v14519_v11  ;;  %v6329_v2 = vadd.f32 %v6328_v36, %v14449_v20 }
 0xacc   :  { %v5859_v3 = vpop.f32.mrb[174].mxu1 }
 0xacd   :  { %v14524_v52 = vadd.f32 %v17186_v51, %v5859_v3  ;;  %v5861_v50 = vpop.f32.mrb[175].mxu1  ;;  %v6330_v26 = vadd.f32 %v6329_v2, %v14454_v59 }
 0xacf   :  { %v6331_v1 = vadd.f32 %v6330_v26, %v14459_v47 }
 0xad0   :  { %v5864_v10 = vpop.f32.mrb[176].mxu1 }
 0xad1   :  { %v5866_v22 = vpop.f32.mrb[177].mxu1  ;;  %v6332_v51 = vadd.f32 %v6331_v1, %v14464_v14 }
 0xad3   :  { %v6333_v39 = vadd.f32 %v6332_v51, %v14469_v42 }
 0xad4   :  { %v5869_v27 = vpop.f32.mrb[178].mxu1 }
 0xad5   :  { %v5871_v32 = vpop.f32.mrb[179].mxu1  ;;  %v6334_v22 = vadd.f32 %v6333_v39, %v14474_v9 }
 0xad7   :  { %v6335_v5 = vadd.f32 %v6334_v22, %v14479_v12 }
 0xad8   :  { %v5874_v28 = vpop.f32.mrb[180].mxu1 }
 0xad9   :  { %v5876_v3 = vpop.f32.mrb[181].mxu1  ;;  %v6336_v32 = vadd.f32 %v6335_v5, %v14484_v25 }
 0xadb   :  { %v6337_v2 = vadd.f32 %v6336_v32, %v14489_v7 }
 0xadc   :  { %v5879_v50 = vpop.f32.mrb[182].mxu1 }
 0xadd   :  { %v5881_v53 = vpop.f32.mrb[183].mxu1  ;;  %v6338_v3 = vadd.f32 %v6337_v2, %v14494_v37 }
 0xadf   :  { %v6339_v1 = vadd.f32 %v6338_v3, %v14499_v45 }
 0xae0   :  { %v5884_v4 = vpop.f32.mrb[184].mxu1 }
 0xae1   :  { %v5886_v36 = vpop.f32.mrb[185].mxu1  ;;  %v6340_v53 = vadd.f32 %v6339_v1, %v14504_v18 }
 0xae3   :  { %v6341_v39 = vadd.f32 %v6340_v53, %v14509_v46 }
 0xae4   :  { %v5889_v59 = vpop.f32.mrb[186].mxu1 }
 0xae5   :  { %v5891_v26 = vpop.f32.mrb[187].mxu1  ;;  %v6342_v36 = vadd.f32 %v6341_v39, %v14514_v23 }
 0xae7   :  { %v6343_v5 = vadd.f32 %v6342_v36, %v14519_v11 }
 0xae8   :  { %v5894_v14 = vpop.f32.mrb[188].mxu1 }
 0xae9   :  { %v5896_v51 = vpop.f32.mrb[189].mxu1  ;;  %v6344_v26 = vadd.f32 %v6343_v5, %v14524_v52 }
 0xaec   :  { %v5899_v9 = vpop.f32.mrb[190].mxu1 }
 0xaed   :  { %v5901_v22 = vpop.f32.mrb[191].mxu1 }
 0xaf0   :  { %v7383_v25 = vpop.f32.mrb[192].mxu1 }
 0xaf1   :  { %v6255_v32 = vadd.f32 %v7383_v25, %v5869_v27  ;;  %v6249_v7 = vpop.f32.mrb[193].mxu1 }
 0xaf2   :  { %v6250_v2 = vadd.f32 %v6249_v7, %v5864_v10 }
 0xaf4   :  { %v6345_v37 = vadd.f32 %v6344_v26, %v6250_v2  ;;  %v7386_v3 = vpop.f32.mrb[194].mxu1 }
 0xaf5   :  { %v6265_v45 = vadd.f32 %v7386_v3, %v5879_v50  ;;  %v6259_v51 = vpop.f32.mrb[195].mxu1 }
 0xaf6   :  { %v6260_v12 = vadd.f32 %v6259_v51, %v5874_v28  ;;  %v6346_v1 = vadd.f32 %v6345_v37, %v6255_v32 }
 0xaf8   :  { %v6347_v18 = vadd.f32 %v6346_v1, %v6260_v12  ;;  %v7389_v53 = vpop.f32.mrb[196].mxu1 }
 0xaf9   :  { %v6275_v46 = vadd.f32 %v7389_v53, %v5889_v59  ;;  %v6269_v22 = vpop.f32.mrb[197].mxu1 }
 0xafa   :  { %v6270_v42 = vadd.f32 %v6269_v22, %v5884_v4  ;;  %v6348_v39 = vadd.f32 %v6347_v18, %v6265_v45 }
 0xafc   :  { %v6349_v23 = vadd.f32 %v6348_v39, %v6270_v42  ;;  %v7392_v36 = vpop.f32.mrb[198].mxu1 }
 0xafd   :  { %v6285_v11 = vadd.f32 %v7392_v36, %v5899_v9  ;;  %v6279_v25 = vpop.f32.mrb[199].mxu1 }
 0xafe   :  { %v6280_v27 = vadd.f32 %v6279_v25, %v5894_v14  ;;  %v6350_v47 = vadd.f32 %v6349_v23, %v6275_v46 }
 0xb00   :  { %v6351_v5 = vadd.f32 %v6350_v47, %v6280_v27 }
 0xb02   :  { %v6352_v7 = vadd.f32 %v6351_v5, %v6285_v11 }
 0xb04   :  { %v6353_v10 = vrot.slane %v6352_v7, 4 }
 0xb06   :  { %v6354_v26 = vadd.f32 %v6353_v10, %v6352_v7 }
 0xb08   :  { %v6355_v50 = vrot.slane %v6354_v26, 2 }
 0xb0a   :  { %v6356_v3 = vadd.f32 %v6355_v50, %v6354_v26 }
 0xb0c   :  { %v6357_v28 = vrot.slane %v6356_v3, 1 }
 0xb0e   :  { %v6358_v37 = vadd.f32 %v6357_v28, %v6356_v3 }
 0xb10   :  { %v14545_v51 = vmul.f32 0.001953125, %v6358_v37 }
 0xb12   :  { %v14548_v59 = vsub.f32 %v6250_v2, %v14545_v51  ;;  %v14551_v18 = vsub.f32 %v6255_v32, %v14545_v51  ;;  %v14554_v4 = vsub.f32 %v6260_v12, %v14545_v51  ;;  %v14557_v23 = vsub.f32 %v6265_v45, %v14545_v51 }
 0xb13   :  { %v14560_v47 = vsub.f32 %v6270_v42, %v14545_v51  ;;  %v14563_v14 = vsub.f32 %v6275_v46, %v14545_v51  ;;  %v14566_v9 = vsub.f32 %v6280_v27, %v14545_v51  ;;  %v14569_v2 = vsub.f32 %v6285_v11, %v14545_v51 }
 0xb14   :  { %17187 = vst [vmem:[#allocation98_spill] sm:$0xff] %v14551_v18  ;;  %17188 = vst [vmem:[#allocation103_spill] sm:$0xff] %v14554_v4  ;;  %v14573_v32 = vsub.f32 %v14298_v8, %v14545_v51  ;;  %v14577_v12 = vsub.f32 %v14302_v63, %v14545_v51  ;;  %v14581_v42 = vsub.f32 %v14306_v0, %v14545_v51 }
 0xb15   :  { %17189 = vst [vmem:[#allocation110_spill] sm:$0xff] %v14557_v23  ;;  %17190 = vst [vmem:[#allocation51_spill] sm:$0xff] %v14560_v47  ;;  %v14589_v11 = vsub.f32 %v14310_v33, %v14545_v51  ;;  %v14593_v8 = vsub.f32 %v14314_v17, %v14545_v51  ;;  %v14599_v0 = vsub.f32 %v14318_v24, %v14545_v51 }
 0xb16   :  { %17191 = vst [vmem:[#allocation64_spill] sm:$0xff] %v14563_v14  ;;  %17192 = vst [vmem:[#allocation74_spill] sm:$0xff] %v14569_v2  ;;  %v6424_v46 = vmul.f32 %v14573_v32, %v14573_v32  ;;  %v6425_v45 = vmul.f32 %v14577_v12, %v14577_v12  ;;  %v6426_v63 = vmul.f32 %v14581_v42, %v14581_v42 }
 0xb17   :  { %v6427_v53 = vmul.f32 %v14589_v11, %v14589_v11  ;;  %v14605_v33 = vsub.f32 %v14322_v35, %v14545_v51  ;;  %v6428_v17 = vmul.f32 %v14593_v8, %v14593_v8  ;;  %v14611_v36 = vsub.f32 %v14326_v60, %v14545_v51 }
 0xb18   :  { %v6488_v1 = vadd.f32 %v6425_v45, %v6424_v46  ;;  %v6429_v24 = vmul.f32 %v14599_v0, %v14599_v0  ;;  %v14617_v27 = vsub.f32 %v14331_v13, %v14545_v51  ;;  %v14623_v7 = vsub.f32 %v14338_v49, %v14545_v51 }
 0xb19   :  { %v6430_v35 = vmul.f32 %v14605_v33, %v14605_v33  ;;  %v6431_v60 = vmul.f32 %v14611_v36, %v14611_v36  ;;  %v14629_v26 = vsub.f32 %v14342_v6, %v14545_v51  ;;  %v14635_v3 = vsub.f32 %v14347_v44, %v14545_v51 }
 0xb1a   :  { %v6489_v22 = vadd.f32 %v6488_v1, %v6426_v63  ;;  %v6432_v13 = vmul.f32 %v14617_v27, %v14617_v27  ;;  %v6433_v49 = vmul.f32 %v14623_v7, %v14623_v7  ;;  %v14641_v37 = vsub.f32 %v14352_v43, %v14545_v51 }
 0xb1b   :  { %v6434_v6 = vmul.f32 %v14629_v26, %v14629_v26  ;;  %v14647_v45 = vsub.f32 %v14357_v40, %v14545_v51  ;;  %v6435_v44 = vmul.f32 %v14635_v3, %v14635_v3  ;;  %v14653_v1 = vsub.f32 %v14364_v16, %v14545_v51 }
 0xb1c   :  { %v6490_v39 = vadd.f32 %v6489_v22, %v6427_v53  ;;  %v6436_v43 = vmul.f32 %v14641_v37, %v14641_v37  ;;  %v14659_v22 = vsub.f32 %v14367_v19, %v14545_v51 }
 0xb1d   :  { %v6437_v40 = vmul.f32 %v14647_v45, %v14647_v45  ;;  %v6438_v16 = vmul.f32 %v14653_v1, %v14653_v1 }
 0xb1e   :  { %v6491_v25 = vadd.f32 %v6490_v39, %v6428_v17  ;;  %v14665_v39 = vsub.f32 %v14370_v21, %v14545_v51  ;;  %v6439_v19 = vmul.f32 %v14659_v22, %v14659_v22 }
 0xb20   :  { %v6492_v5 = vadd.f32 %v6491_v25, %v6429_v24  ;;  %v14671_v25 = vsub.f32 %v14373_v30, %v14545_v51  ;;  %v6440_v21 = vmul.f32 %v14665_v39, %v14665_v39 }
 0xb22   :  { %v6493_v10 = vadd.f32 %v6492_v5, %v6430_v35  ;;  %v14677_v5 = vsub.f32 %v14376_v41, %v14545_v51  ;;  %v6441_v30 = vmul.f32 %v14671_v25, %v14671_v25 }
 0xb24   :  { %v6494_v50 = vadd.f32 %v6493_v10, %v6431_v60  ;;  %v14683_v10 = vsub.f32 %v14379_v56, %v14545_v51  ;;  %v6442_v41 = vmul.f32 %v14677_v5, %v14677_v5 }
 0xb26   :  { %v6495_v28 = vadd.f32 %v6494_v50, %v6432_v13  ;;  %v14689_v50 = vsub.f32 %v14382_v61, %v14545_v51  ;;  %v6443_v56 = vmul.f32 %v14683_v10, %v14683_v10 }
 0xb28   :  { %v6496_v46 = vadd.f32 %v6495_v28, %v6433_v49  ;;  %v14695_v28 = vsub.f32 %v14385_v62, %v14545_v51  ;;  %v6444_v61 = vmul.f32 %v14689_v50, %v14689_v50 }
 0xb2a   :  { %v6497_v63 = vadd.f32 %v6496_v46, %v6434_v6  ;;  %v14701_v46 = vsub.f32 %v14388_v15, %v14545_v51  ;;  %v6445_v62 = vmul.f32 %v14695_v28, %v14695_v28 }
 0xb2c   :  { %v6498_v53 = vadd.f32 %v6497_v63, %v6435_v44  ;;  %v14707_v63 = vsub.f32 %v14391_v48, %v14545_v51  ;;  %v6446_v15 = vmul.f32 %v14701_v46, %v14701_v46 }
 0xb2e   :  { %v6499_v17 = vadd.f32 %v6498_v53, %v6436_v43  ;;  %v17193_v53 = vld [vmem:[#allocation81_spill] sm:$0xff]  ;;  %v6447_v48 = vmul.f32 %v14707_v63, %v14707_v63 }
 0xb30   :  { %v6500_v24 = vadd.f32 %v6499_v17, %v6437_v40  ;;  %v14713_v40 = vsub.f32 %v17193_v53, %v14545_v51 }
 0xb32   :  { %v6501_v35 = vadd.f32 %v6500_v24, %v6438_v16  ;;  %v14719_v16 = vsub.f32 %v14397_v31, %v14545_v51 }
 0xb34   :  { %v6502_v60 = vadd.f32 %v6501_v35, %v6439_v19  ;;  %v17194_v19 = vld [vmem:[#allocation46_spill] sm:$0xff]  ;;  %v6449_v31 = vmul.f32 %v14719_v16, %v14719_v16 }
 0xb35   :  { %v14725_v35 = vsub.f32 %v17194_v19, %v14545_v51 }
 0xb36   :  { %v6503_v13 = vadd.f32 %v6502_v60, %v6440_v21  ;;  %v6448_v21 = vmul.f32 %v14713_v40, %v14713_v40 }
 0xb38   :  { %v6504_v49 = vadd.f32 %v6503_v13, %v6441_v30  ;;  %v14731_v30 = vsub.f32 %v14403_v38, %v14545_v51 }
 0xb3a   :  { %v6505_v6 = vadd.f32 %v6504_v49, %v6442_v41  ;;  %v17195_v41 = vld [vmem:[#allocation52_spill] sm:$0xff]  ;;  %v6451_v38 = vmul.f32 %v14731_v30, %v14731_v30 }
 0xb3b   :  { %v14737_v49 = vsub.f32 %v17195_v41, %v14545_v51  ;;  %v17198_v41 = vld [vmem:[#allocation29_spill] sm:$0xff] }
 0xb3c   :  { %v6506_v44 = vadd.f32 %v6505_v6, %v6443_v56  ;;  %v6450_v56 = vmul.f32 %v14725_v35, %v14725_v35 }
 0xb3d   :  { %v6452_v53 = vmul.f32 %v14737_v49, %v14737_v49 }
 0xb3e   :  { %v6507_v43 = vadd.f32 %v6506_v44, %v6444_v61  ;;  %v14743_v61 = vsub.f32 %v14409_v29, %v14545_v51 }
 0xb40   :  { %v6508_v17 = vadd.f32 %v6507_v43, %v6445_v62  ;;  %v17196_v62 = vld [vmem:[#allocation27_spill] sm:$0xff]  ;;  %v6453_v29 = vmul.f32 %v14743_v61, %v14743_v61 }
 0xb41   :  { %v14749_v43 = vsub.f32 %v17196_v62, %v14545_v51 }
 0xb42   :  { %v6509_v24 = vadd.f32 %v6508_v17, %v6446_v15  ;;  %v14755_v17 = vsub.f32 %v14415_v54, %v14545_v51 }
 0xb44   :  { %v6510_v60 = vadd.f32 %v6509_v24, %v6447_v48  ;;  %v17197_v24 = vld [vmem:[#allocation28_spill] sm:$0xff]  ;;  %v6455_v54 = vmul.f32 %v14755_v17, %v14755_v17 }
 0xb45   :  { %v14761_v19 = vsub.f32 %v17197_v24, %v14545_v51  ;;  %v14791_v24 = vsub.f32 %v14433_v57, %v14545_v51 }
 0xb46   :  { %v6511_v13 = vadd.f32 %v6510_v60, %v6448_v21  ;;  %v6454_v21 = vmul.f32 %v14749_v43, %v14749_v43 }
 0xb47   :  { %v6461_v57 = vmul.f32 %v14791_v24, %v14791_v24 }
 0xb48   :  { %v6512_v6 = vadd.f32 %v6511_v13, %v6449_v31  ;;  %v14767_v31 = vsub.f32 %v14421_v55, %v14545_v51 }
 0xb4a   :  { %v6513_v44 = vadd.f32 %v6512_v6, %v6450_v56  ;;  %v14773_v56 = vsub.f32 %v17198_v41, %v14545_v51  ;;  %v6456_v6 = vmul.f32 %v14761_v19, %v14761_v19  ;;  %v6457_v55 = vmul.f32 %v14767_v31, %v14767_v31  ;;  %v17201_v41 = vld [vmem:[#allocation33_spill] sm:$0xff] }
 0xb4c   :  { %v6514_v15 = vadd.f32 %v6513_v44, %v6451_v38  ;;  %v14779_v44 = vsub.f32 %v14427_v34, %v14545_v51 }
 0xb4e   :  { %v6515_v48 = vadd.f32 %v6514_v15, %v6452_v53  ;;  %v17199_v53 = vld [vmem:[#allocation30_spill] sm:$0xff]  ;;  %v6459_v34 = vmul.f32 %v14779_v44, %v14779_v44 }
 0xb4f   :  { %v14785_v15 = vsub.f32 %v17199_v53, %v14545_v51  ;;  %v17204_v53 = vld [vmem:[#allocation36_spill] sm:$0xff] }
 0xb50   :  { %v6516_v60 = vadd.f32 %v6515_v48, %v6453_v29  ;;  %v6458_v29 = vmul.f32 %v14773_v56, %v14773_v56 }
 0xb52   :  { %v6517_v13 = vadd.f32 %v6516_v60, %v6454_v21  ;;  %v14797_v60 = vsub.f32 %v14439_v58, %v14545_v51 }
 0xb54   :  { %v6518_v38 = vadd.f32 %v6517_v13, %v6455_v54  ;;  %17200 = vst [vmem:[#allocation41_spill] sm:$0xff] %v14797_v60  ;;  %v6460_v54 = vmul.f32 %v14785_v15, %v14785_v15  ;;  %v6462_v58 = vmul.f32 %v14797_v60, %v14797_v60 }
 0xb56   :  { %v6519_v62 = vadd.f32 %v6518_v38, %v6456_v6  ;;  %v14803_v6 = vsub.f32 %v17201_v41, %v14545_v51 }
 0xb58   :  { %v6520_v48 = vadd.f32 %v6519_v62, %v6457_v55  ;;  %17202 = vst [vmem:[#allocation48_spill] sm:$0xff] %v14803_v6  ;;  %v14809_v55 = vsub.f32 %v14449_v20, %v14545_v51 }
 0xb5a   :  { %v6521_v21 = vadd.f32 %v6520_v48, %v6458_v29  ;;  %17203 = vst [vmem:[#allocation80_spill] sm:$0xff] %v14809_v55  ;;  %v14815_v29 = vsub.f32 %v17204_v53, %v14545_v51  ;;  %v6463_v48 = vmul.f32 %v14803_v6, %v14803_v6  ;;  %v6464_v20 = vmul.f32 %v14809_v55, %v14809_v55  ;;  %v17210_v53 = vld [vmem:[#allocation99_spill] sm:$0xff] }
 0xb5b   :  { %v14833_v6 = vsub.f32 %v17210_v53, %v14545_v51  ;;  %v17216_v53 = vld [vmem:[#allocation65_spill] sm:$0xff] }
 0xb5c   :  { %v6522_v13 = vadd.f32 %v6521_v21, %v6459_v34  ;;  %17205 = vst [vmem:[#allocation75_spill] sm:$0xff] %v14815_v29  ;;  %v17206_v21 = vld [vmem:[#allocation39_spill] sm:$0xff] }
 0xb5d   :  { %v14821_v41 = vsub.f32 %v17206_v21, %v14545_v51  ;;  %17211 = vst [vmem:[#allocation60_spill] sm:$0xff] %v14833_v6  ;;  %v17212_v21 = vld [vmem:[#allocation106_spill] sm:$0xff] }
 0xb5e   :  { %v6523_v38 = vadd.f32 %v6522_v13, %v6460_v54  ;;  %v17208_v13 = vld [vmem:[#allocation91_spill] sm:$0xff]  ;;  %v14839_v55 = vsub.f32 %v17212_v21, %v14545_v51  ;;  %v17218_v21 = vld [vmem:[#allocation73_spill] sm:$0xff] }
 0xb5f   :  { %17207 = vst [vmem:[#allocation78_spill] sm:$0xff] %v14821_v41  ;;  %v14827_v60 = vsub.f32 %v17208_v13, %v14545_v51  ;;  %v17214_v13 = vld [vmem:[#allocation111_spill] sm:$0xff] }
 0xb60   :  { %v6524_v62 = vadd.f32 %v6523_v38, %v6461_v57  ;;  %v6465_v57 = vmul.f32 %v14815_v29, %v14815_v29  ;;  %17213 = vst [vmem:[#allocation54_spill] sm:$0xff] %v14839_v55  ;;  %v14845_v29 = vsub.f32 %v17214_v13, %v14545_v51  ;;  %v17220_v13 = vld [vmem:[#allocation77_spill] sm:$0xff] }
 0xb61   :  { %17209 = vst [vmem:[#allocation50_spill] sm:$0xff] %v14827_v60 }
 0xb62   :  { %v6525_v34 = vadd.f32 %v6524_v62, %v6462_v58  ;;  %v6466_v58 = vmul.f32 %v14821_v41, %v14821_v41  ;;  %17215 = vst [vmem:[#allocation63_spill] sm:$0xff] %v14845_v29  ;;  %v14851_v41 = vsub.f32 %v17216_v53, %v14545_v51  ;;  %v17222_v53 = vld [vmem:[#allocation82_spill] sm:$0xff] }
 0xb64   :  { %v6526_v54 = vadd.f32 %v6525_v34, %v6463_v48  ;;  %v6467_v48 = vmul.f32 %v14827_v60, %v14827_v60  ;;  %17217 = vst [vmem:[#allocation53_spill] sm:$0xff] %v14851_v41  ;;  %v14857_v60 = vsub.f32 %v17218_v21, %v14545_v51  ;;  %v17223_v21 = vld [vmem:[#allocation67_spill] sm:$0xff] }
 0xb66   :  { %v6527_v38 = vadd.f32 %v6526_v54, %v6464_v20  ;;  %v6468_v20 = vmul.f32 %v14833_v6, %v14833_v6  ;;  %17219 = vst [vmem:[#allocation12_spill] sm:$0xff] %v14857_v60  ;;  %v14863_v6 = vsub.f32 %v17220_v13, %v14545_v51  ;;  %v17224_v13 = vld [vmem:[#allocation83_spill] sm:$0xff] }
 0xb68   :  { %v6528_v62 = vadd.f32 %v6527_v38, %v6465_v57  ;;  %v6469_v57 = vmul.f32 %v14839_v55, %v14839_v55  ;;  %17221 = vst [vmem:[#allocation13_spill] sm:$0xff] %v14863_v6  ;;  %v14869_v55 = vsub.f32 %v17222_v53, %v14545_v51  ;;  %v17226_v53 = vld [vmem:[#allocation88_spill] sm:$0xff] }
 0xb6a   :  { %v6529_v34 = vadd.f32 %v6528_v62, %v6466_v58  ;;  %v6470_v58 = vmul.f32 %v14845_v29, %v14845_v29  ;;  %v14875_v29 = vsub.f32 %v17223_v21, %v14545_v51  ;;  %v17227_v21 = vld [vmem:[#allocation93_spill] sm:$0xff] }
 0xb6c   :  { %v6530_v54 = vadd.f32 %v6529_v34, %v6467_v48  ;;  %v6471_v48 = vmul.f32 %v14851_v41, %v14851_v41  ;;  %v14881_v41 = vsub.f32 %v17224_v13, %v14545_v51  ;;  %v14899_v13 = vsub.f32 %v14524_v52, %v14545_v51 }
 0xb6d   :  { %v6481_v52 = vmul.f32 %v14551_v18, %v14551_v18 }
 0xb6e   :  { %v6531_v38 = vadd.f32 %v6530_v54, %v6468_v20  ;;  %v6472_v20 = vmul.f32 %v14857_v60, %v14857_v60  ;;  %17225 = vst [vmem:[#allocation42_spill] sm:$0xff] %v14881_v41  ;;  %v14887_v60 = vsub.f32 %v17226_v53, %v14545_v51 }
 0xb70   :  { %v6532_v62 = vadd.f32 %v6531_v38, %v6469_v57  ;;  %v6473_v57 = vmul.f32 %v14863_v6, %v14863_v6  ;;  %v14893_v6 = vsub.f32 %v17227_v21, %v14545_v51 }
 0xb72   :  { %v6533_v34 = vadd.f32 %v6532_v62, %v6470_v58  ;;  %v6474_v58 = vmul.f32 %v14869_v55, %v14869_v55  ;;  %v6478_v53 = vmul.f32 %v14893_v6, %v14893_v6 }
 0xb74   :  { %v6534_v54 = vadd.f32 %v6533_v34, %v6471_v48  ;;  %v6475_v48 = vmul.f32 %v14875_v29, %v14875_v29 }
 0xb76   :  { %v6535_v38 = vadd.f32 %v6534_v54, %v6472_v20  ;;  %v6476_v20 = vmul.f32 %v14881_v41, %v14881_v41  ;;  %v6480_v41 = vmul.f32 %v14548_v59, %v14548_v59 }
 0xb78   :  { %v6536_v62 = vadd.f32 %v6535_v38, %v6473_v57  ;;  %v6477_v57 = vmul.f32 %v14887_v60, %v14887_v60 }
 0xb7a   :  { %v6537_v34 = vadd.f32 %v6536_v62, %v6474_v58  ;;  %v6479_v62 = vmul.f32 %v14899_v13, %v14899_v13 }
 0xb7c   :  { %v6538_v54 = vadd.f32 %v6537_v34, %v6475_v48  ;;  %v6482_v34 = vmul.f32 %v14554_v4, %v14554_v4 }
 0xb7e   :  { %v6539_v38 = vadd.f32 %v6538_v54, %v6476_v20  ;;  %v6483_v54 = vmul.f32 %v14557_v23, %v14557_v23 }
 0xb80   :  { %v6540_v58 = vadd.f32 %v6539_v38, %v6477_v57  ;;  %v6484_v38 = vmul.f32 %v14560_v47, %v14560_v47 }
 0xb82   :  { %v6541_v21 = vadd.f32 %v6540_v58, %v6478_v53  ;;  %v6485_v58 = vmul.f32 %v14563_v14, %v14563_v14 }
 0xb84   :  { %v6542_v48 = vadd.f32 %v6541_v21, %v6479_v62  ;;  %v6486_v21 = vmul.f32 %v14566_v9, %v14566_v9 }
 0xb86   :  { %v6543_v51 = vadd.f32 %v6542_v48, %v6480_v41  ;;  %v6487_v48 = vmul.f32 %v14569_v2, %v14569_v2 }
 0xb88   :  { %v6544_v20 = vadd.f32 %v6543_v51, %v6481_v52 }
 0xb8a   :  { %v6545_v57 = vadd.f32 %v6544_v20, %v6482_v34 }
 0xb8c   :  { %v6546_v53 = vadd.f32 %v6545_v57, %v6483_v54 }
 0xb8e   :  { %v6547_v62 = vadd.f32 %v6546_v53, %v6484_v38  ;;  %v6288_v38 = vld [vmem:[%s15714_s5] sm:$0x1]  ;;  %s8841_s5 = smov [#allocation8]  }
 0xb90   :  { %v6548_v41 = vadd.f32 %v6547_v62, %v6485_v58  ;;  %v17228_v62 = vld [vmem:[#allocation55_spill] sm:$0xff] }
 0xb91   :  { %v17229_v14 = vsub.s32 0, %v17228_v62  ;;  %v17236_v62 = vld [vmem:[#allocation60_spill] sm:$0xff] }
 0xb92   :  { %v6549_v52 = vadd.f32 %v6548_v41, %v6486_v21  ;;  %v6763_v21 = vld [vmem:[#allocation6 + $0x1f0] sm:$0xff] }
 0xb94   :  { %v6550_v51 = vadd.f32 %v6549_v52, %v6487_v48 }
 0xb96   :  { %v6551_v4 = vrot.slane %v6550_v51, 4 }
 0xb98   :  { %v6552_v23 = vadd.f32 %v6551_v4, %v6550_v51  ;;  %v14933_v4 = vld [vmem:[%s15715_s6] ss:$0 sm:$0xff]  ;;  %s6962_s6 = sshll.u32 %s8841_s5, 4  ;;  %s6963_s6 = int_to_ptr.vmem [resolvable:$true] %s6962_s6 }
 0xb99   :  { %s8807_s7 = scalar_lea.vmem %s6963_s6, 8192  ;;  %p8812_p3 = scmp.lt.s32.totalorder %s6963_s6, %s6963_s6 }
 0xb9a   :  { %v6553_v34 = vrot.slane %v6552_v23, 2  ;;  %p8808_p2 = scmp.ne.s32.totalorder %s6963_s6, %s8807_s7  ;;  %p8813_p4 = scmp.lt.s32.totalorder %s8807_s7, %s8807_s7 }
 0xb9c   :  { %v6554_v20 = vadd.f32 %v6553_v34, %v6552_v23  ;;  %v17230_v34 = vld [vmem:[#allocation41_spill] sm:$0xff]  ;;  %p8814_p5 = por %p8813_p4, %p8812_p3 }
 0xb9e   :  { %v6555_v18 = vrot.slane %v6554_v20, 1  ;;  %p8815_p6 = pnand %p8814_p5, %p8808_p2 }
 0xba0   :  { %v6556_v47 = vadd.f32 %v6555_v18, %v6554_v20  ;;  %v17231_v20 = vld [vmem:[#allocation48_spill] sm:$0xff] }
 0xba2   :  { %v6557_v54 = vmul.f32 0.001953125, %v6556_v47 }
 0xba4   :  { %v6558_v57 = vadd.f32 1e-05, %v6557_v54  ;;  %v17232_v54 = vld [vmem:[#allocation80_spill] sm:$0xff] }
 0xba6   :  { %8634 = vrsqrt.f32 %v6558_v57  ;;  %v17233_v57 = vld [vmem:[#allocation75_spill] sm:$0xff] }
 0xbb0   :  { %v8635_v53 = vpop.eup %8634 }
 0xbb1   :  { %v6560_v58 = vmul.f32 %v8635_v53, %v6288_v38  ;;  %v17234_v38 = vld [vmem:[#allocation78_spill] sm:$0xff] }
 0xbb2   :  { %v17235_v53 = vld [vmem:[#allocation50_spill] sm:$0xff] }
 0xbb3   :  { %v14928_v2 = vrot.slane %v6560_v58, %v17229_v14 }
 0xbb5   :  { %v6629_v18 = vmul.f32 %v14928_v2, %v14566_v9  ;;  %v14939_v23 = vmul.f32 %v14928_v2, %v14573_v32  ;;  %v14943_v47 = vmul.f32 %v14928_v2, %v14577_v12  ;;  %v14947_v14 = vmul.f32 %v14928_v2, %v14581_v42 }
 0xbb6   :  { %v14951_v41 = vmul.f32 %v14928_v2, %v14589_v11  ;;  %v14955_v9 = vmul.f32 %v14928_v2, %v14593_v8  ;;  %v14959_v32 = vmul.f32 %v14928_v2, %v14599_v0  ;;  %v14963_v12 = vmul.f32 %v14928_v2, %v14605_v33 }
 0xbb7   :  { %v6699_v42 = vadd.f32 %v14933_v4, %v6629_v18  ;;  %v14968_v48 = vmul.f32 %v14928_v2, %v14611_v36  ;;  %v14972_v11 = vmul.f32 %v14928_v2, %v14617_v27  ;;  %v14976_v8 = vmul.f32 %v14928_v2, %v14623_v7 }
 0xbb8   :  { %v14980_v0 = vmul.f32 %v14928_v2, %v14629_v26  ;;  %v14984_v33 = vmul.f32 %v14928_v2, %v14635_v3  ;;  %v14988_v36 = vmul.f32 %v14928_v2, %v14641_v37  ;;  %v14992_v27 = vmul.f32 %v14928_v2, %v14647_v45 }
 0xbb9   :  { %v6827_v52 = vadd.f32 %v6763_v21, %v6699_v42  ;;  %v14996_v7 = vmul.f32 %v14928_v2, %v14653_v1  ;;  %v15000_v26 = vmul.f32 %v14928_v2, %v14659_v22  ;;  %v15004_v3 = vmul.f32 %v14928_v2, %v14665_v39  ;;  %v17237_v21 = vld [vmem:[#allocation54_spill] sm:$0xff] }
 0xbba   :  { %v15008_v37 = vmul.f32 %v14928_v2, %v14671_v25  ;;  %v15012_v45 = vmul.f32 %v14928_v2, %v14677_v5  ;;  %v15016_v1 = vmul.f32 %v14928_v2, %v14683_v10  ;;  %v15020_v22 = vmul.f32 %v14928_v2, %v14689_v50 }
 0xbbb   :  { %v6891_v51 = vmax.f32 %v6827_v52, 0.0  ;;  %v15024_v39 = vmul.f32 %v14928_v2, %v14695_v28  ;;  %v15028_v25 = vmul.f32 %v14928_v2, %v14701_v46  ;;  %v15032_v5 = vmul.f32 %v14928_v2, %v14707_v63  ;;  %v17238_v52 = vld [vmem:[#allocation63_spill] sm:$0xff] }
 0xbbc   :  { %v15036_v10 = vmul.f32 %v14928_v2, %v14713_v40  ;;  %v15040_v50 = vmul.f32 %v14928_v2, %v14719_v16  ;;  %v15044_v28 = vmul.f32 %v14928_v2, %v14725_v35  ;;  %v15048_v46 = vmul.f32 %v14928_v2, %v14731_v30 }
 0xbbd   :  { %6955 = vst [vmem:[#allocation8 + $0x1f0] sm:$0xff] %v6891_v51  ;;  %v15052_v63 = vmul.f32 %v14928_v2, %v14737_v49  ;;  %v15056_v40 = vmul.f32 %v14928_v2, %v14743_v61  ;;  %v15060_v16 = vmul.f32 %v14928_v2, %v14749_v43  ;;  %v15064_v35 = vmul.f32 %v14928_v2, %v14755_v17 }
 0xbbe   :  { %v15068_v30 = vmul.f32 %v14928_v2, %v14761_v19  ;;  %v15072_v49 = vmul.f32 %v14928_v2, %v14767_v31  ;;  %v15076_v61 = vmul.f32 %v14928_v2, %v14773_v56  ;;  %v15080_v43 = vmul.f32 %v14928_v2, %v14779_v44 }
 0xbbf   :  { %v15084_v17 = vmul.f32 %v14928_v2, %v14785_v15  ;;  %v15088_v19 = vmul.f32 %v14928_v2, %v14791_v24  ;;  %v15092_v31 = vmul.f32 %v14928_v2, %v17230_v34  ;;  %v15096_v56 = vmul.f32 %v14928_v2, %v17231_v20  ;;  %v17239_v34 = vld [vmem:[#allocation53_spill] sm:$0xff] }
 0xbc0   :  { %v15100_v44 = vmul.f32 %v14928_v2, %v17232_v54  ;;  %v15104_v15 = vmul.f32 %v14928_v2, %v17233_v57  ;;  %v15108_v24 = vmul.f32 %v14928_v2, %v17234_v38  ;;  %v15112_v58 = vmul.f32 %v14928_v2, %v17235_v53  ;;  %v17240_v54 = vld [vmem:[#allocation12_spill] sm:$0xff]  ;;  %v17241_v38 = vld [vmem:[#allocation13_spill] sm:$0xff] }
 0xbc1   :  { %v15116_v18 = vmul.f32 %v14928_v2, %v17236_v62  ;;  %v15120_v42 = vmul.f32 %v14928_v2, %v17237_v21  ;;  %v15124_v51 = vmul.f32 %v14928_v2, %v17238_v52  ;;  %v15128_v20 = vmul.f32 %v14928_v2, %v17239_v34  ;;  %v17243_v52 = vld [vmem:[#allocation42_spill] sm:$0xff] }
 0xbc2   :  { %v15132_v57 = vmul.f32 %v14928_v2, %v17240_v54  ;;  %v15136_v53 = vmul.f32 %v14928_v2, %v17241_v38  ;;  %v15140_v62 = vmul.f32 %v14928_v2, %v14869_v55  ;;  %v15144_v21 = vmul.f32 %v14928_v2, %v14875_v29 }
 0xbc3   :  { %v15148_v34 = vmul.f32 %v14928_v2, %v17243_v52  ;;  %v15152_v54 = vmul.f32 %v14928_v2, %v14887_v60  ;;  %v15156_v38 = vmul.f32 %v14928_v2, %v14893_v6  ;;  %v15160_v55 = vmul.f32 %v14928_v2, %v14899_v13 }
 0xbc4   :  { %17242 = vst [vmem:[#allocation92_spill] sm:$0xff] %v15144_v21  ;;  %v15164_v29 = vmul.f32 %v14928_v2, %v14548_v59  ;;  %v17249_v21 = vld [vmem:[#allocation98_spill] sm:$0xff] }
 0xbc5   :  { %17244 = vst [vmem:[#allocation47_spill] sm:$0xff] %v15148_v34  ;;  %17245 = vst [vmem:[#allocation90_spill] sm:$0xff] %v15152_v54  ;;  %v15168_v52 = vmul.f32 %v14928_v2, %v17249_v21  ;;  %v17250_v34 = vld [vmem:[#allocation103_spill] sm:$0xff]  ;;  %v17251_v54 = vld [vmem:[#allocation110_spill] sm:$0xff] }
 0xbc6   :  { %17246 = vst [vmem:[#allocation57_spill] sm:$0xff] %v15156_v38  ;;  %17247 = vst [vmem:[#allocation97_spill] sm:$0xff] %v15160_v55  ;;  %v15172_v60 = vmul.f32 %v14928_v2, %v17250_v34  ;;  %v15176_v6 = vmul.f32 %v14928_v2, %v17251_v54  ;;  %v17252_v38 = vld [vmem:[#allocation51_spill] sm:$0xff]  ;;  %v17253_v55 = vld [vmem:[#allocation64_spill] sm:$0xff]  ;;  %v15192_v34 = vadd.f32 %v14933_v4, %v14939_v23 }
 0xbc7   :  { %17248 = vst [vmem:[#allocation58_spill] sm:$0xff] %v15164_v29  ;;  %v15180_v13 = vmul.f32 %v14928_v2, %v17252_v38  ;;  %v15184_v59 = vmul.f32 %v14928_v2, %v17253_v55  ;;  %v17254_v29 = vld [vmem:[#allocation74_spill] sm:$0xff]  ;;  %v15196_v54 = vadd.f32 %v14933_v4, %v14943_v47  ;;  %v15200_v38 = vadd.f32 %v14933_v4, %v14947_v14 }
 0xbc8   :  { %v15188_v21 = vmul.f32 %v14928_v2, %v17254_v29  ;;  %v15204_v55 = vadd.f32 %v14933_v4, %v14951_v41  ;;  %v15208_v2 = vadd.f32 %v14933_v4, %v14955_v9  ;;  %v15212_v23 = vadd.f32 %v14933_v4, %v14959_v32  ;;  %v6701_v29 = vld [vmem:[#allocation6] sm:$0xff] }
 0xbc9   :  { %v15216_v47 = vadd.f32 %v14933_v4, %v14963_v12  ;;  %v15220_v14 = vadd.f32 %v14933_v4, %v14968_v48  ;;  %v15224_v41 = vadd.f32 %v14933_v4, %v14972_v11  ;;  %v15228_v9 = vadd.f32 %v14933_v4, %v14976_v8 }
 0xbca   :  { %v15232_v32 = vadd.f32 %v14933_v4, %v14980_v0  ;;  %v15236_v12 = vadd.f32 %v14933_v4, %v14984_v33  ;;  %v15240_v48 = vadd.f32 %v14933_v4, %v14988_v36  ;;  %v15244_v11 = vadd.f32 %v14933_v4, %v14992_v27 }
 0xbcb   :  { %v15248_v8 = vadd.f32 %v14933_v4, %v14996_v7  ;;  %v15252_v0 = vadd.f32 %v14933_v4, %v15000_v26  ;;  %v15256_v33 = vadd.f32 %v14933_v4, %v15004_v3  ;;  %v15260_v36 = vadd.f32 %v14933_v4, %v15008_v37 }
 0xbcc   :  { %v15264_v27 = vadd.f32 %v14933_v4, %v15012_v45  ;;  %v15268_v7 = vadd.f32 %v14933_v4, %v15016_v1  ;;  %v15272_v26 = vadd.f32 %v14933_v4, %v15020_v22  ;;  %v15276_v3 = vadd.f32 %v14933_v4, %v15024_v39 }
 0xbcd   :  { %v15280_v37 = vadd.f32 %v14933_v4, %v15028_v25  ;;  %v15284_v45 = vadd.f32 %v14933_v4, %v15032_v5  ;;  %v15288_v1 = vadd.f32 %v14933_v4, %v15036_v10  ;;  %v15292_v22 = vadd.f32 %v14933_v4, %v15040_v50 }
 0xbce   :  { %v15296_v39 = vadd.f32 %v14933_v4, %v15044_v28  ;;  %v15300_v25 = vadd.f32 %v14933_v4, %v15048_v46  ;;  %v15304_v5 = vadd.f32 %v14933_v4, %v15052_v63  ;;  %v15308_v10 = vadd.f32 %v14933_v4, %v15056_v40 }
 0xbcf   :  { %v15312_v50 = vadd.f32 %v14933_v4, %v15060_v16  ;;  %v15316_v28 = vadd.f32 %v14933_v4, %v15064_v35  ;;  %v15320_v46 = vadd.f32 %v14933_v4, %v15068_v30  ;;  %v15324_v63 = vadd.f32 %v14933_v4, %v15072_v49 }
 0xbd0   :  { %v15328_v40 = vadd.f32 %v14933_v4, %v15076_v61  ;;  %v15332_v16 = vadd.f32 %v14933_v4, %v15080_v43  ;;  %v15336_v35 = vadd.f32 %v14933_v4, %v15084_v17  ;;  %v15340_v30 = vadd.f32 %v14933_v4, %v15088_v19 }
 0xbd1   :  { %17255 = vst [vmem:[#allocation95_spill] sm:$0xff] %v15312_v50  ;;  %17256 = vst [vmem:[#allocation62_spill] sm:$0xff] %v15316_v28  ;;  %v15344_v49 = vadd.f32 %v14933_v4, %v15092_v31  ;;  %v15348_v61 = vadd.f32 %v14933_v4, %v15096_v56  ;;  %v15352_v43 = vadd.f32 %v14933_v4, %v15100_v44  ;;  %v6703_v44 = vld [vmem:[#allocation6 + $0x10] sm:$0xff]  ;;  %v6718_v28 = vld [vmem:[#allocation6 + $0x88] sm:$0xff] }
 0xbd2   :  { %17257 = vst [vmem:[#allocation102_spill] sm:$0xff] %v15320_v46  ;;  %17258 = vst [vmem:[#allocation14_spill] sm:$0xff] %v15324_v63  ;;  %v15356_v17 = vadd.f32 %v14933_v4, %v15104_v15  ;;  %v15360_v19 = vadd.f32 %v14933_v4, %v15108_v24  ;;  %v15364_v31 = vadd.f32 %v14933_v4, %v15112_v58  ;;  %v6716_v63 = vld [vmem:[#allocation6 + $0x78] sm:$0xff]  ;;  %v6717_v46 = vld [vmem:[#allocation6 + $0x80] sm:$0xff] }
 0xbd3   :  { %17259 = vst [vmem:[#allocation100_spill] sm:$0xff] %v15328_v40  ;;  %17260 = vst [vmem:[#allocation15_spill] sm:$0xff] %v15332_v16  ;;  %v6702_v16 = vld [vmem:[#allocation6 + $0x8] sm:$0xff]  ;;  %v15368_v56 = vadd.f32 %v14933_v4, %v15116_v18  ;;  %v15372_v15 = vadd.f32 %v14933_v4, %v15120_v42  ;;  %v15376_v24 = vadd.f32 %v14933_v4, %v15124_v51  ;;  %v17280_v40 = vld [vmem:[#allocation90_spill] sm:$0xff] }
 0xbd4   :  { %17261 = vst [vmem:[#allocation16_spill] sm:$0xff] %v15336_v35  ;;  %17262 = vst [vmem:[#allocation108_spill] sm:$0xff] %v15340_v30  ;;  %v15380_v58 = vadd.f32 %v14933_v4, %v15128_v20  ;;  %v15384_v18 = vadd.f32 %v14933_v4, %v15132_v57  ;;  %v15388_v42 = vadd.f32 %v14933_v4, %v15136_v53  ;;  %v6713_v30 = vld [vmem:[#allocation6 + $0x60] sm:$0xff]  ;;  %v6714_v35 = vld [vmem:[#allocation6 + $0x68] sm:$0xff] }
 0xbd5   :  { %17263 = vst [vmem:[#allocation17_spill] sm:$0xff] %v15344_v49  ;;  %17264 = vst [vmem:[#allocation18_spill] sm:$0xff] %v15348_v61  ;;  %v6705_v61 = vld [vmem:[#allocation6 + $0x20] sm:$0xff]  ;;  %v6706_v49 = vld [vmem:[#allocation6 + $0x28] sm:$0xff]  ;;  %v15392_v51 = vadd.f32 %v14933_v4, %v15140_v62  ;;  %v15404_v53 = vadd.f32 %v14933_v4, %v17280_v40  ;;  %v15420_v40 = vadd.f32 %v14933_v4, %v15168_v52 }
 0xbd6   :  { %17265 = vst [vmem:[#allocation19_spill] sm:$0xff] %v15352_v43  ;;  %17266 = vst [vmem:[#allocation20_spill] sm:$0xff] %v15356_v17  ;;  %v6704_v43 = vld [vmem:[#allocation6 + $0x18] sm:$0xff]  ;;  %v6710_v17 = vld [vmem:[#allocation6 + $0x48] sm:$0xff]  ;;  %v15436_v52 = vadd.f32 %v14933_v4, %v15184_v59  ;;  %v15449_v50 = vadd.f32 %v6703_v44, %v15200_v38 }
 0xbd7   :  { %17267 = vst [vmem:[#allocation21_spill] sm:$0xff] %v15360_v19  ;;  %17268 = vst [vmem:[#allocation22_spill] sm:$0xff] %v15364_v31  ;;  %v6708_v31 = vld [vmem:[#allocation6 + $0x38] sm:$0xff]  ;;  %v6709_v19 = vld [vmem:[#allocation6 + $0x40] sm:$0xff]  ;;  %v15452_v59 = vadd.f32 %v6704_v43, %v15204_v55  ;;  %v15470_v55 = vadd.f32 %v6710_v17, %v15228_v9 }
 0xbd8   :  { %17269 = vst [vmem:[#allocation23_spill] sm:$0xff] %v15368_v56  ;;  %17270 = vst [vmem:[#allocation24_spill] sm:$0xff] %v15372_v15  ;;  %v6707_v56 = vld [vmem:[#allocation6 + $0x30] sm:$0xff]  ;;  %v6712_v15 = vld [vmem:[#allocation6 + $0x58] sm:$0xff]  ;;  %v15467_v38 = vadd.f32 %v6709_v19, %v15224_v41 }
 0xbd9   :  { %17271 = vst [vmem:[#allocation25_spill] sm:$0xff] %v15376_v24  ;;  %17272 = vst [vmem:[#allocation59_spill] sm:$0xff] %v15380_v58  ;;  %v17276_v24 = vld [vmem:[#allocation92_spill] sm:$0xff]  ;;  %v17278_v58 = vld [vmem:[#allocation47_spill] sm:$0xff]  ;;  %v15476_v44 = vadd.f32 %v6712_v15, %v15236_v12  ;;  %v15494_v12 = vadd.f32 %v6718_v28, %v15260_v36 }
 0xbda   :  { %17273 = vst [vmem:[#allocation138_spill] sm:$0xff] %v15384_v18  ;;  %17274 = vst [vmem:[#allocation145_spill] sm:$0xff] %v15388_v42  ;;  %v15396_v20 = vadd.f32 %v14933_v4, %v17276_v24  ;;  %v15400_v57 = vadd.f32 %v14933_v4, %v17278_v58  ;;  %v6711_v18 = vld [vmem:[#allocation6 + $0x50] sm:$0xff]  ;;  %v17282_v42 = vld [vmem:[#allocation57_spill] sm:$0xff] }
 0xbdb   :  { %17275 = vst [vmem:[#allocation61_spill] sm:$0xff] %v15392_v51  ;;  %17281 = vst [vmem:[#allocation151_spill] sm:$0xff] %v15404_v53  ;;  %v15408_v62 = vadd.f32 %v14933_v4, %v17282_v42  ;;  %v17284_v51 = vld [vmem:[#allocation97_spill] sm:$0xff]  ;;  %v15424_v42 = vadd.f32 %v14933_v4, %v15172_v60  ;;  %v15440_v60 = vadd.f32 %v14933_v4, %v15188_v21  ;;  %v6727_v21 = vld [vmem:[#allocation6 + $0xd0] sm:$0xff] }
 0xbdc   :  { %17277 = vst [vmem:[#allocation148_spill] sm:$0xff] %v15396_v20  ;;  %17279 = vst [vmem:[#allocation69_spill] sm:$0xff] %v15400_v57  ;;  %v15412_v24 = vadd.f32 %v14933_v4, %v17284_v51  ;;  %v17286_v20 = vld [vmem:[#allocation58_spill] sm:$0xff]  ;;  %v15428_v51 = vadd.f32 %v14933_v4, %v15176_v6  ;;  %v6722_v53 = vld [vmem:[#allocation6 + $0xa8] sm:$0xff]  ;;  %v15446_v6 = vadd.f32 %v6702_v16, %v15196_v54 }
 0xbdd   :  { %17283 = vst [vmem:[#allocation76_spill] sm:$0xff] %v15408_v62  ;;  %v15416_v58 = vadd.f32 %v14933_v4, %v17286_v20  ;;  %v6715_v57 = vld [vmem:[#allocation6 + $0x70] sm:$0xff]  ;;  %17288 = vst [vmem:[#allocation157_spill] sm:$0xff] %v15420_v40  ;;  %v15432_v20 = vadd.f32 %v14933_v4, %v15180_v13  ;;  %v6721_v62 = vld [vmem:[#allocation6 + $0xa0] sm:$0xff]  ;;  %v15458_v4 = vadd.f32 %v6706_v49, %v15212_v23 }
 0xbde   :  { %17285 = vst [vmem:[#allocation154_spill] sm:$0xff] %v15412_v24  ;;  %17289 = vst [vmem:[#allocation86_spill] sm:$0xff] %v15424_v42  ;;  %v6720_v24 = vld [vmem:[#allocation6 + $0x98] sm:$0xff]  ;;  %v15443_v42 = vadd.f32 %v6701_v29, %v15192_v34  ;;  %v6723_v13 = vld [vmem:[#allocation6 + $0xb0] sm:$0xff]  ;;  %v15461_v29 = vadd.f32 %v6707_v56, %v15216_v47  ;;  %v15473_v43 = vadd.f32 %v6711_v18, %v15232_v32 }
 0xbdf   :  { %17287 = vst [vmem:[#allocation84_spill] sm:$0xff] %v15416_v58  ;;  %17290 = vst [vmem:[#allocation160_spill] sm:$0xff] %v15428_v51  ;;  %v6719_v58 = vld [vmem:[#allocation6 + $0x90] sm:$0xff]  ;;  %v6725_v51 = vld [vmem:[#allocation6 + $0xc0] sm:$0xff]  ;;  %v15479_v47 = vadd.f32 %v6713_v30, %v15240_v48  ;;  %v15488_v56 = vadd.f32 %v6716_v63, %v15252_v0  ;;  %v15491_v32 = vadd.f32 %v6717_v46, %v15256_v33 }
 0xbe0   :  { %17291 = vst [vmem:[#allocation43_spill] sm:$0xff] %v15432_v20  ;;  %17292 = vst [vmem:[#allocation163_spill] sm:$0xff] %v15436_v52  ;;  %v6724_v20 = vld [vmem:[#allocation6 + $0xb8] sm:$0xff]  ;;  %v6726_v40 = vld [vmem:[#allocation6 + $0xc8] sm:$0xff]  ;;  %v15455_v52 = vadd.f32 %v6705_v61, %v15208_v2  ;;  %v15500_v15 = vadd.f32 %v6720_v24, %v15268_v7  ;;  %v15506_v0 = vadd.f32 %v6722_v53, %v15276_v3 }
 0xbe1   :  { %17293 = vst [vmem:[#allocation45_spill] sm:$0xff] %v15446_v6  ;;  %v6728_v34 = vld [vmem:[#allocation6 + $0xd8] sm:$0xff]  ;;  %v6729_v54 = vld [vmem:[#allocation6 + $0xe0] sm:$0xff]  ;;  %v6730_v16 = vld [vmem:[#allocation6 + $0xe8] sm:$0xff]  ;;  %v15464_v6 = vadd.f32 %v6708_v31, %v15220_v14  ;;  %v15482_v14 = vadd.f32 %v6714_v35, %v15244_v11  ;;  %v15485_v31 = vadd.f32 %v6715_v57, %v15248_v8  ;;  %v15497_v35 = vadd.f32 %v6719_v58, %v15264_v27 }
 0xbe2   :  { %v6731_v2 = vld [vmem:[#allocation6 + $0xf0] sm:$0xff]  ;;  %v6732_v61 = vld [vmem:[#allocation6 + $0xf8] sm:$0xff]  ;;  %v6733_v23 = vld [vmem:[#allocation6 + $0x100] sm:$0xff]  ;;  %v15503_v8 = vadd.f32 %v6721_v62, %v15272_v26  ;;  %v15509_v36 = vadd.f32 %v6723_v13, %v15280_v37  ;;  %v15512_v28 = vadd.f32 %v6724_v20, %v15284_v45  ;;  %v15515_v27 = vadd.f32 %v6725_v51, %v15288_v1 }
 0xbe3   :  { %v6734_v49 = vld [vmem:[#allocation6 + $0x108] sm:$0xff]  ;;  %v6735_v41 = vld [vmem:[#allocation6 + $0x110] sm:$0xff]  ;;  %v6736_v19 = vld [vmem:[#allocation6 + $0x118] sm:$0xff]  ;;  %v15518_v7 = vadd.f32 %v6726_v40, %v15292_v22  ;;  %v15521_v3 = vadd.f32 %v6727_v21, %v15296_v39  ;;  %v15524_v53 = vadd.f32 %v6728_v34, %v15300_v25  ;;  %v15527_v37 = vadd.f32 %v6729_v54, %v15304_v5 }
 0xbe4   :  { %v6737_v9 = vld [vmem:[#allocation6 + $0x120] sm:$0xff]  ;;  %v6738_v17 = vld [vmem:[#allocation6 + $0x128] sm:$0xff]  ;;  %v6739_v48 = vld [vmem:[#allocation6 + $0x130] sm:$0xff]  ;;  %v15530_v45 = vadd.f32 %v6730_v16, %v15308_v10 }
 0xbe5   :  { %v6740_v30 = vld [vmem:[#allocation6 + $0x138] sm:$0xff]  ;;  %v6741_v11 = vld [vmem:[#allocation6 + $0x140] sm:$0xff]  ;;  %v6742_v33 = vld [vmem:[#allocation6 + $0x148] sm:$0xff] }
 0xbe6   :  { %v6743_v46 = vld [vmem:[#allocation6 + $0x150] sm:$0xff]  ;;  %v6744_v63 = vld [vmem:[#allocation6 + $0x158] sm:$0xff]  ;;  %v6745_v26 = vld [vmem:[#allocation6 + $0x160] sm:$0xff]  ;;  %17294 = vst [vmem:[#allocation166_spill] sm:$0xff] %v15530_v45 }
 0xbe7   :  { %v6746_v18 = vld [vmem:[#allocation6 + $0x168] sm:$0xff]  ;;  %v6747_v57 = vld [vmem:[#allocation6 + $0x170] sm:$0xff]  ;;  %v6748_v1 = vld [vmem:[#allocation6 + $0x178] sm:$0xff] }
 0xbe8   :  { %v6749_v62 = vld [vmem:[#allocation6 + $0x180] sm:$0xff]  ;;  %v6750_v24 = vld [vmem:[#allocation6 + $0x188] sm:$0xff]  ;;  %v17295_v22 = vld [vmem:[#allocation95_spill] sm:$0xff] }
 0xbe9   :  { %v15533_v58 = vadd.f32 %v6731_v2, %v17295_v22  ;;  %v17296_v40 = vld [vmem:[#allocation62_spill] sm:$0xff]  ;;  %v6752_v21 = vld [vmem:[#allocation6 + $0x198] sm:$0xff]  ;;  %v6753_v34 = vld [vmem:[#allocation6 + $0x1a0] sm:$0xff] }
 0xbea   :  { %v15536_v51 = vadd.f32 %v6732_v61, %v17296_v40  ;;  %v17298_v39 = vld [vmem:[#allocation102_spill] sm:$0xff]  ;;  %v17302_v10 = vld [vmem:[#allocation100_spill] sm:$0xff]  ;;  %v17303_v16 = vld [vmem:[#allocation15_spill] sm:$0xff] }
 0xbeb   :  { %v15539_v20 = vadd.f32 %v6733_v23, %v17298_v39  ;;  %v17300_v25 = vld [vmem:[#allocation14_spill] sm:$0xff]  ;;  %v15545_v54 = vadd.f32 %v6735_v41, %v17302_v10  ;;  %v15548_v45 = vadd.f32 %v6736_v19, %v17303_v16  ;;  %v17305_v2 = vld [vmem:[#allocation16_spill] sm:$0xff]  ;;  %v6754_v23 = vld [vmem:[#allocation6 + $0x1a8] sm:$0xff] }
 0xbec   :  { %17297 = vst [vmem:[#allocation169_spill] sm:$0xff] %v15536_v51  ;;  %v15542_v13 = vadd.f32 %v6734_v49, %v17300_v25  ;;  %v6751_v5 = vld [vmem:[#allocation6 + $0x190] sm:$0xff]  ;;  %v15551_v22 = vadd.f32 %v6737_v9, %v17305_v2  ;;  %v17307_v61 = vld [vmem:[#allocation108_spill] sm:$0xff]  ;;  %v17309_v49 = vld [vmem:[#allocation17_spill] sm:$0xff] }
 0xbed   :  { %17299 = vst [vmem:[#allocation171_spill] sm:$0xff] %v15539_v20  ;;  %17304 = vst [vmem:[#allocation175_spill] sm:$0xff] %v15548_v45  ;;  %v15554_v40 = vadd.f32 %v6738_v17, %v17307_v61  ;;  %v6755_v39 = vld [vmem:[#allocation6 + $0x1b0] sm:$0xff]  ;;  %v6756_v20 = vld [vmem:[#allocation6 + $0x1b8] sm:$0xff]  ;;  %v15557_v25 = vadd.f32 %v6739_v48, %v17309_v49 }
 0xbee   :  { %17301 = vst [vmem:[#allocation173_spill] sm:$0xff] %v15542_v13  ;;  %17306 = vst [vmem:[#allocation177_spill] sm:$0xff] %v15551_v22  ;;  %v17310_v13 = vld [vmem:[#allocation18_spill] sm:$0xff]  ;;  %v17312_v41 = vld [vmem:[#allocation19_spill] sm:$0xff] }
 0xbef   :  { %17308 = vst [vmem:[#allocation179_spill] sm:$0xff] %v15554_v40  ;;  %v15560_v51 = vadd.f32 %v6740_v30, %v17310_v13  ;;  %v15563_v10 = vadd.f32 %v6741_v11, %v17312_v41  ;;  %v17314_v19 = vld [vmem:[#allocation20_spill] sm:$0xff]  ;;  %v6758_v9 = vld [vmem:[#allocation6 + $0x1c8] sm:$0xff]  ;;  %v6760_v22 = vld [vmem:[#allocation6 + $0x1d8] sm:$0xff] }
 0xbf0   :  { %v15566_v16 = vadd.f32 %v6742_v33, %v17314_v19  ;;  %v6757_v2 = vld [vmem:[#allocation6 + $0x1c0] sm:$0xff]  ;;  %v17316_v17 = vld [vmem:[#allocation21_spill] sm:$0xff]  ;;  %v17317_v40 = vld [vmem:[#allocation22_spill] sm:$0xff] }
 0xbf1   :  { %17311 = vst [vmem:[#allocation181_spill] sm:$0xff] %v15560_v51  ;;  %17313 = vst [vmem:[#allocation183_spill] sm:$0xff] %v15563_v10  ;;  %v15569_v61 = vadd.f32 %v6743_v46, %v17316_v17  ;;  %v15572_v45 = vadd.f32 %v6744_v63, %v17317_v40  ;;  %v17319_v48 = vld [vmem:[#allocation23_spill] sm:$0xff]  ;;  %v17321_v30 = vld [vmem:[#allocation24_spill] sm:$0xff] }
 0xbf2   :  { %17315 = vst [vmem:[#allocation185_spill] sm:$0xff] %v15566_v16  ;;  %v15575_v49 = vadd.f32 %v6745_v26, %v17319_v48  ;;  %v15578_v13 = vadd.f32 %v6746_v18, %v17321_v30  ;;  %v6759_v11 = vld [vmem:[#allocation6 + $0x1d0] sm:$0xff]  ;;  %v6762_v41 = vld [vmem:[#allocation6 + $0x1e8] sm:$0xff]  ;;  %v6761_v10 = vld [vmem:[#allocation6 + $0x1e0] sm:$0xff] }
 0xbf3   :  { %17318 = vst [vmem:[#allocation187_spill] sm:$0xff] %v15572_v45  ;;  %v17323_v33 = vld [vmem:[#allocation25_spill] sm:$0xff]  ;;  %v17324_v16 = vld [vmem:[#allocation59_spill] sm:$0xff]  ;;  %v17325_v46 = vld [vmem:[#allocation138_spill] sm:$0xff] }
 0xbf4   :  { %17320 = vst [vmem:[#allocation96_spill] sm:$0xff] %v15575_v49  ;;  %17322 = vst [vmem:[#allocation101_spill] sm:$0xff] %v15578_v13  ;;  %v15581_v19 = vadd.f32 %v6747_v57, %v17323_v33  ;;  %v15584_v51 = vadd.f32 %v6748_v1, %v17324_v16  ;;  %v15587_v17 = vadd.f32 %v6749_v62, %v17325_v46  ;;  %v17326_v63 = vld [vmem:[#allocation145_spill] sm:$0xff]  ;;  %v6764_v26 = vld [vmem:[#allocation6 + $0x1f8] sm:$0xff] }
 0xbf5   :  { %v15590_v40 = vadd.f32 %v6750_v24, %v17326_v63  ;;  %v17327_v48 = vld [vmem:[#allocation61_spill] sm:$0xff]  ;;  %v17328_v18 = vld [vmem:[#allocation148_spill] sm:$0xff]  ;;  %v17330_v57 = vld [vmem:[#allocation151_spill] sm:$0xff] }
 0xbf6   :  { %v15593_v49 = vadd.f32 %v6751_v5, %v17327_v48  ;;  %v15596_v30 = vadd.f32 %v6752_v21, %v17328_v18  ;;  %v17329_v13 = vld [vmem:[#allocation69_spill] sm:$0xff]  ;;  %v15602_v33 = vadd.f32 %v6754_v23, %v17330_v57  ;;  %v17331_v1 = vld [vmem:[#allocation76_spill] sm:$0xff]  ;;  %v17332_v62 = vld [vmem:[#allocation154_spill] sm:$0xff] }
 0xbf7   :  { %v15599_v45 = vadd.f32 %v6753_v34, %v17329_v13  ;;  %v15605_v16 = vadd.f32 %v6755_v39, %v17331_v1  ;;  %v15608_v46 = vadd.f32 %v6756_v20, %v17332_v62  ;;  %v17333_v24 = vld [vmem:[#allocation84_spill] sm:$0xff]  ;;  %v17334_v5 = vld [vmem:[#allocation157_spill] sm:$0xff]  ;;  %v17335_v21 = vld [vmem:[#allocation86_spill] sm:$0xff]  ;;  %v15629_v20 = vadd.f32 %v6764_v26, %v15440_v60 }
 0xbf8   :  { %v15611_v63 = vadd.f32 %v6757_v2, %v17333_v24  ;;  %v15614_v48 = vadd.f32 %v6758_v9, %v17334_v5  ;;  %v15617_v18 = vadd.f32 %v6759_v11, %v17335_v21  ;;  %v17336_v34 = vld [vmem:[#allocation160_spill] sm:$0xff]  ;;  %v17337_v23 = vld [vmem:[#allocation43_spill] sm:$0xff]  ;;  %v6829_v2 = vmax.f32 %v15443_v42, 0.0  ;;  %v17339_v62 = vld [vmem:[#allocation45_spill] sm:$0xff] }
 0xbf9   :  { %v15620_v13 = vadd.f32 %v6760_v22, %v17336_v34  ;;  %v15623_v57 = vadd.f32 %v6761_v10, %v17337_v23  ;;  %v17338_v39 = vld [vmem:[#allocation163_spill] sm:$0xff]  ;;  %v6830_v9 = vmax.f32 %v17339_v62, 0.0  ;;  %v6831_v24 = vmax.f32 %v15449_v50, 0.0  ;;  %v17343_v26 = vld [vmem:[#allocation173_spill] sm:$0xff] }
 0xbfa   :  { %v15626_v1 = vadd.f32 %v6762_v41, %v17338_v39  ;;  %v6832_v11 = vmax.f32 %v15452_v59, 0.0  ;;  %v6833_v22 = vmax.f32 %v15455_v52, 0.0  ;;  %v6834_v5 = vmax.f32 %v15458_v4, 0.0  ;;  %6893 = vst [vmem:[#allocation8] sm:$0xff] %v6829_v2  ;;  %v17345_v39 = vld [vmem:[#allocation177_spill] sm:$0xff]  ;;  %v17346_v2 = vld [vmem:[#allocation179_spill] sm:$0xff] }
 0xbfb   :  { %v6835_v10 = vmax.f32 %v15461_v29, 0.0  ;;  %v6836_v41 = vmax.f32 %v15464_v6, 0.0  ;;  %v6837_v21 = vmax.f32 %v15467_v38, 0.0  ;;  %v6838_v60 = vmax.f32 %v15470_v55, 0.0  ;;  %6894 = vst [vmem:[#allocation8 + $0x8] sm:$0xff] %v6830_v9  ;;  %6895 = vst [vmem:[#allocation8 + $0x10] sm:$0xff] %v6831_v24 }
 0xbfc   :  { %v6839_v42 = vmax.f32 %v15473_v43, 0.0  ;;  %v6840_v50 = vmax.f32 %v15476_v44, 0.0  ;;  %v6841_v59 = vmax.f32 %v15479_v47, 0.0  ;;  %v6842_v52 = vmax.f32 %v15482_v14, 0.0  ;;  %6896 = vst [vmem:[#allocation8 + $0x18] sm:$0xff] %v6832_v11  ;;  %6897 = vst [vmem:[#allocation8 + $0x20] sm:$0xff] %v6833_v22 }
 0xbfd   :  { %v6843_v4 = vmax.f32 %v15485_v31, 0.0  ;;  %6898 = vst [vmem:[#allocation8 + $0x28] sm:$0xff] %v6834_v5  ;;  %6899 = vst [vmem:[#allocation8 + $0x30] sm:$0xff] %v6835_v10  ;;  %v6844_v6 = vmax.f32 %v15488_v56, 0.0  ;;  %v6845_v29 = vmax.f32 %v15491_v32, 0.0  ;;  %v6846_v38 = vmax.f32 %v15494_v12, 0.0 }
 0xbfe   :  { %v6847_v55 = vmax.f32 %v15497_v35, 0.0  ;;  %6900 = vst [vmem:[#allocation8 + $0x38] sm:$0xff] %v6836_v41  ;;  %6901 = vst [vmem:[#allocation8 + $0x40] sm:$0xff] %v6837_v21  ;;  %v6848_v43 = vmax.f32 %v15500_v15, 0.0  ;;  %v6849_v44 = vmax.f32 %v15503_v8, 0.0  ;;  %v6850_v47 = vmax.f32 %v15506_v0, 0.0 }
 0xbff   :  { %6902 = vst [vmem:[#allocation8 + $0x48] sm:$0xff] %v6838_v60  ;;  %6903 = vst [vmem:[#allocation8 + $0x50] sm:$0xff] %v6839_v42  ;;  %v6851_v14 = vmax.f32 %v15509_v36, 0.0  ;;  %v6852_v31 = vmax.f32 %v15512_v28, 0.0  ;;  %v6853_v56 = vmax.f32 %v15515_v27, 0.0  ;;  %v6854_v32 = vmax.f32 %v15518_v7, 0.0 }
 0xc00   :  { %6904 = vst [vmem:[#allocation8 + $0x58] sm:$0xff] %v6840_v50  ;;  %6905 = vst [vmem:[#allocation8 + $0x60] sm:$0xff] %v6841_v59  ;;  %v6855_v12 = vmax.f32 %v15521_v3, 0.0  ;;  %v6856_v35 = vmax.f32 %v15524_v53, 0.0  ;;  %v6857_v15 = vmax.f32 %v15527_v37, 0.0  ;;  %v17340_v8 = vld [vmem:[#allocation166_spill] sm:$0xff] }
 0xc01   :  { %6906 = vst [vmem:[#allocation8 + $0x68] sm:$0xff] %v6842_v52  ;;  %6907 = vst [vmem:[#allocation8 + $0x70] sm:$0xff] %v6843_v4  ;;  %v6858_v0 = vmax.f32 %v17340_v8, 0.0  ;;  %v6859_v36 = vmax.f32 %v15533_v58, 0.0  ;;  %v17341_v28 = vld [vmem:[#allocation169_spill] sm:$0xff]  ;;  %v17342_v7 = vld [vmem:[#allocation171_spill] sm:$0xff] }
 0xc02   :  { %6908 = vst [vmem:[#allocation8 + $0x78] sm:$0xff] %v6844_v6  ;;  %6909 = vst [vmem:[#allocation8 + $0x80] sm:$0xff] %v6845_v29  ;;  %v6860_v27 = vmax.f32 %v17341_v28, 0.0  ;;  %v6861_v3 = vmax.f32 %v17342_v7, 0.0  ;;  %v6862_v34 = vmax.f32 %v17343_v26, 0.0  ;;  %v6863_v23 = vmax.f32 %v15545_v54, 0.0 }
 0xc03   :  { %6910 = vst [vmem:[#allocation8 + $0x88] sm:$0xff] %v6846_v38  ;;  %6911 = vst [vmem:[#allocation8 + $0x90] sm:$0xff] %v6847_v55  ;;  %v17344_v53 = vld [vmem:[#allocation175_spill] sm:$0xff]  ;;  %v6865_v58 = vmax.f32 %v17345_v39, 0.0  ;;  %v6866_v62 = vmax.f32 %v17346_v2, 0.0  ;;  %v6867_v9 = vmax.f32 %v15557_v25, 0.0 }
 0xc04   :  { %6912 = vst [vmem:[#allocation8 + $0x98] sm:$0xff] %v6848_v43  ;;  %6913 = vst [vmem:[#allocation8 + $0xa0] sm:$0xff] %v6849_v44  ;;  %v6864_v37 = vmax.f32 %v17344_v53, 0.0  ;;  %v17347_v24 = vld [vmem:[#allocation181_spill] sm:$0xff]  ;;  %v17348_v22 = vld [vmem:[#allocation183_spill] sm:$0xff]  ;;  %v6871_v41 = vmax.f32 %v15569_v61, 0.0 }
 0xc05   :  { %6914 = vst [vmem:[#allocation8 + $0xa8] sm:$0xff] %v6850_v47  ;;  %6915 = vst [vmem:[#allocation8 + $0xb0] sm:$0xff] %v6851_v14  ;;  %v6868_v11 = vmax.f32 %v17347_v24, 0.0  ;;  %v6869_v54 = vmax.f32 %v17348_v22, 0.0  ;;  %v17349_v5 = vld [vmem:[#allocation185_spill] sm:$0xff]  ;;  %v17350_v21 = vld [vmem:[#allocation187_spill] sm:$0xff] }
 0xc06   :  { %6916 = vst [vmem:[#allocation8 + $0xb8] sm:$0xff] %v6852_v31  ;;  %6917 = vst [vmem:[#allocation8 + $0xc0] sm:$0xff] %v6853_v56  ;;  %v6870_v10 = vmax.f32 %v17349_v5, 0.0  ;;  %v6872_v60 = vmax.f32 %v17350_v21, 0.0  ;;  %v17351_v42 = vld [vmem:[#allocation96_spill] sm:$0xff]  ;;  %v17352_v50 = vld [vmem:[#allocation101_spill] sm:$0xff] }
 0xc07   :  { %6918 = vst [vmem:[#allocation8 + $0xc8] sm:$0xff] %v6854_v32  ;;  %6919 = vst [vmem:[#allocation8 + $0xd0] sm:$0xff] %v6855_v12  ;;  %v6873_v25 = vmax.f32 %v17351_v42, 0.0  ;;  %v6874_v59 = vmax.f32 %v17352_v50, 0.0  ;;  %v6875_v52 = vmax.f32 %v15581_v19, 0.0  ;;  %v6876_v4 = vmax.f32 %v15584_v51, 0.0 }
 0xc08   :  { %6920 = vst [vmem:[#allocation8 + $0xd8] sm:$0xff] %v6856_v35  ;;  %6921 = vst [vmem:[#allocation8 + $0xe0] sm:$0xff] %v6857_v15  ;;  %v6877_v61 = vmax.f32 %v15587_v17, 0.0  ;;  %v6878_v6 = vmax.f32 %v15590_v40, 0.0  ;;  %v6879_v29 = vmax.f32 %v15593_v49, 0.0  ;;  %v6880_v19 = vmax.f32 %v15596_v30, 0.0 }
 0xc09   :  { %6922 = vst [vmem:[#allocation8 + $0xe8] sm:$0xff] %v6858_v0  ;;  %6923 = vst [vmem:[#allocation8 + $0xf0] sm:$0xff] %v6859_v36  ;;  %v6881_v38 = vmax.f32 %v15599_v45, 0.0  ;;  %v6882_v55 = vmax.f32 %v15602_v33, 0.0  ;;  %v6883_v51 = vmax.f32 %v15605_v16, 0.0  ;;  %v6884_v49 = vmax.f32 %v15608_v46, 0.0 }
 0xc0a   :  { %6924 = vst [vmem:[#allocation8 + $0xf8] sm:$0xff] %v6860_v27  ;;  %6925 = vst [vmem:[#allocation8 + $0x100] sm:$0xff] %v6861_v3  ;;  %v6885_v17 = vmax.f32 %v15611_v63, 0.0  ;;  %v6886_v40 = vmax.f32 %v15614_v48, 0.0  ;;  %v6887_v43 = vmax.f32 %v15617_v18, 0.0  ;;  %v6888_v45 = vmax.f32 %v15620_v13, 0.0 }
 0xc0b   :  { %6926 = vst [vmem:[#allocation8 + $0x108] sm:$0xff] %v6862_v34  ;;  %6927 = vst [vmem:[#allocation8 + $0x110] sm:$0xff] %v6863_v23  ;;  %v6889_v30 = vmax.f32 %v15623_v57, 0.0  ;;  %v6890_v33 = vmax.f32 %v15626_v1, 0.0  ;;  %v6892_v16 = vmax.f32 %v15629_v20, 0.0 }
 0xc0c   :  { %6928 = vst [vmem:[#allocation8 + $0x118] sm:$0xff] %v6864_v37  ;;  %6929 = vst [vmem:[#allocation8 + $0x120] sm:$0xff] %v6865_v58 }
 0xc0d   :  { %6930 = vst [vmem:[#allocation8 + $0x128] sm:$0xff] %v6866_v62  ;;  %6931 = vst [vmem:[#allocation8 + $0x130] sm:$0xff] %v6867_v9 }
 0xc0e   :  { %6932 = vst [vmem:[#allocation8 + $0x138] sm:$0xff] %v6868_v11  ;;  %6933 = vst [vmem:[#allocation8 + $0x140] sm:$0xff] %v6869_v54 }
 0xc0f   :  { %6934 = vst [vmem:[#allocation8 + $0x148] sm:$0xff] %v6870_v10  ;;  %6935 = vst [vmem:[#allocation8 + $0x150] sm:$0xff] %v6871_v41 }
 0xc10   :  { %6936 = vst [vmem:[#allocation8 + $0x158] sm:$0xff] %v6872_v60  ;;  %6937 = vst [vmem:[#allocation8 + $0x160] sm:$0xff] %v6873_v25 }
 0xc11   :  { %6938 = vst [vmem:[#allocation8 + $0x168] sm:$0xff] %v6874_v59  ;;  %6939 = vst [vmem:[#allocation8 + $0x170] sm:$0xff] %v6875_v52 }
 0xc12   :  { %6940 = vst [vmem:[#allocation8 + $0x178] sm:$0xff] %v6876_v4  ;;  %6941 = vst [vmem:[#allocation8 + $0x180] sm:$0xff] %v6877_v61 }
 0xc13   :  { %6942 = vst [vmem:[#allocation8 + $0x188] sm:$0xff] %v6878_v6  ;;  %6943 = vst [vmem:[#allocation8 + $0x190] sm:$0xff] %v6879_v29 }
 0xc14   :  { %6944 = vst [vmem:[#allocation8 + $0x198] sm:$0xff] %v6880_v19  ;;  %6945 = vst [vmem:[#allocation8 + $0x1a0] sm:$0xff] %v6881_v38 }
 0xc15   :  { %6946 = vst [vmem:[#allocation8 + $0x1a8] sm:$0xff] %v6882_v55  ;;  %6947 = vst [vmem:[#allocation8 + $0x1b0] sm:$0xff] %v6883_v51 }
 0xc16   :  { %6948 = vst [vmem:[#allocation8 + $0x1b8] sm:$0xff] %v6884_v49  ;;  %6949 = vst [vmem:[#allocation8 + $0x1c0] sm:$0xff] %v6885_v17 }
 0xc17   :  { %6950 = vst [vmem:[#allocation8 + $0x1c8] sm:$0xff] %v6886_v40  ;;  %6951 = vst [vmem:[#allocation8 + $0x1d0] sm:$0xff] %v6887_v43 }
 0xc18   :  { %6952 = vst [vmem:[#allocation8 + $0x1d8] sm:$0xff] %v6888_v45  ;;  %6953 = vst [vmem:[#allocation8 + $0x1e0] sm:$0xff] %v6889_v30 }
 0xc19   :  { %6954 = vst [vmem:[#allocation8 + $0x1e8] sm:$0xff] %v6890_v33  ;;  %6956 = vst [vmem:[#allocation8 + $0x1f8] sm:$0xff] %v6892_v16 }
 0xc1a   :  { %8818 = shalt.err (!%p8815_p6)
}
 0xc1b   :  { %s8819_s18 = scalar_lea.hbm %s15717_s8, 8192 }
 0xc1c   :  { %p8820_p7 = scmp.ne.s32.totalorder %s15717_s8, %s8819_s18  ;;  %p8823_p8 = scmp.lt.u32.totalorder %s8819_s18, %s15717_s8 }
 0xc1e   :  { %p8825_p9 = pnand %p8823_p8, %p8820_p7 }
 0xc20   :  { %8828 = shalt.err (!%p8825_p9)
}
 0xc21   :  { %6968 = dma.vmem_to_hbm [thread:$0]  %s6963_s6, 8192, %s15717_s8, [#allocation5], %s8836_s15, %s8836_s15, %s8837_s16  }
 0xc22   :  { %8833 = dma.done.wait [#allocation5], 8192  }
 0xc23   :  { %8834 = vsyncadd [#allocation5], 4294959104 }
 0xc24   :  { %6972 = vsyncpa [#allocation4], 1 }
 0xc25   :  { %6973 = vsyncpa [#allocation7], 1 }
 0xc26   :  { %6974 = vsyncpa [#allocation5], 1 }

</bundles_post_ra>
